<compile_context>
chip_gen: v5e
topology: v5e:2x2
jax: 0.10.0
libtpu: 0.0.40
codegen_flags: <defaults>
</compile_context>

<pallas_src>
import functools

import jax
import jax.numpy as jnp
from jax.experimental import pallas as pl
from jax.experimental.pallas import tpu as pltpu

EPS_BN = 1e-5      # nn.BatchNorm1d default eps
EPS_NORM = 1e-12   # F.normalize default eps
LANES = 128        # lane width of the packed output slab


# ----------------------------------------------------------------------------
# Single fused kernel.
#   inputs : im2col patches for both views, conv weights/bias, projection and
#            prediction head weights/BN params, current group features.
#   output : lane-dense (B+G, 128) f32 slab
#              rows [0, B)  : lanes [0, G) = logits, lane G = assignment (f32)
#              rows [B, B+G): lanes [0, D) = updated group features
# ----------------------------------------------------------------------------
def smog_fused_kernel(patches_ref, cw_ref, cb_ref,
                      pj_w1_ref, pj_g1_ref, pj_b1_ref, pj_w2_ref,
                      pr_w1_ref, pr_g1_ref, pr_b1_ref, pr_w2_ref, pr_b2_ref,
                      gf_ref, out_ref, *, batch, hw, beta, temperature):
    f32 = jnp.float32
    two_b = 2 * batch

    # ---- encoder: Conv3x3(pad=1) as one im2col matmul + bias + ReLU --------
    y = jnp.dot(patches_ref[...], cw_ref[...], preferred_element_type=f32)
    y = jnp.maximum(y + cb_ref[...], 0.0)                       # (2B*HW, E)

    # ---- global average pool as a second matmul (no in-kernel reshape) -----
    r = jax.lax.broadcasted_iota(jnp.int32, (two_b, two_b * hw), 0)
    c = jax.lax.broadcasted_iota(jnp.int32, (two_b, two_b * hw), 1)
    lo = r * hw
    pool = jnp.where((c >= lo) & (c < lo + hw), 1.0 / hw, 0.0).astype(f32)
    enc = jnp.dot(pool, y, preferred_element_type=f32)          # (2B, E)

    enc1 = enc[:batch, :]     # view1 (online branch)
    enc2 = enc[batch:, :]     # view2 (momentum branch; identical weights @ iter 0)

    # ---- Linear(no bias) -> BatchNorm1d (training-mode batch stats) --------
    def linear_bn(x, w, gamma, shift, relu):
        h = jnp.dot(x, w, preferred_element_type=f32)
        mu = jnp.mean(h, axis=0, keepdims=True)
        var = jnp.mean(jnp.square(h - mu), axis=0, keepdims=True)   # biased
        h = (h - mu) * jax.lax.rsqrt(var + EPS_BN)
        if gamma is not None:
            h = h * gamma + shift
        if relu:
            h = jnp.maximum(h, 0.0)
        return h

    # SMoGProjectionHead: Linear->BN->ReLU->Linear->BN(affine=False).
    # Applied per view so BN batch stats match two independent module calls.
    def project(x):
        h = linear_bn(x, pj_w1_ref[...], pj_g1_ref[...], pj_b1_ref[...], True)
        return linear_bn(h, pj_w2_ref[...], None, None, False)

    v1_enc = project(enc1)                                      # (B, D)
    v2_enc = project(enc2)                                      # (B, D)

    # SMoGPredictionHead: Linear->BN->ReLU->Linear(bias)
    h = linear_bn(v1_enc, pr_w1_ref[...], pr_g1_ref[...], pr_b1_ref[...], True)
    v1_pred = (jnp.dot(h, pr_w2_ref[...], preferred_element_type=f32)
               + pr_b2_ref[...])                                # (B, D)

    # ---- SMoGPrototypes -----------------------------------------------------
    def l2norm(x):
        # F.normalize: x / max(||x||, eps) == x * rsqrt(max(||x||^2, eps^2))
        ss = jnp.sum(x * x, axis=-1, keepdims=True)
        return x * jax.lax.rsqrt(jnp.maximum(ss, EPS_NORM * EPS_NORM))

    gf = gf_ref[...]                                            # (G, D)
    g, d = gf.shape
    gfn = l2norm(gf)

    def cos_sims(xn):                                           # xn @ gfn.T
        return jax.lax.dot_general(xn, gfn, (((1,), (1,)), ((), ())),
                                   preferred_element_type=f32)

    def argmax_last(s):                                         # first-max index
        ids = jax.lax.broadcasted_iota(jnp.int32, s.shape, 1)
        m = jnp.max(s, axis=-1, keepdims=True)
        return jnp.min(jnp.where(s == m, ids, s.shape[-1]),
                       axis=-1, keepdims=True)                  # (rows, 1) int32

    # assignments = smog.assign_groups(view2_encoded)
    # (lightly hard-codes temperature=0.1 here; argmax is scale-invariant)
    assign2 = argmax_last(cos_sims(l2norm(v2_enc)) * (1.0 / 0.1))   # (B, 1)

    # group_features = smog.get_updated_group_features(view1_encoded)
    a1 = argmax_last(cos_sims(l2norm(v1_enc)) * (1.0 / 0.1))        # (B, 1)
    onehot = (jax.lax.broadcasted_iota(jnp.int32, (batch, g), 1)
              == a1).astype(f32)                                    # (B, G)
    # Fuse per-group feature sums and member counts into ONE small matmul by
    # appending a ones column to the raw (unnormalized) features.
    v1_aug = jnp.concatenate([v1_enc, jnp.ones((batch, 1), f32)], axis=1)
    sums_aug = jax.lax.dot_general(onehot, v1_aug, (((0,), (0,)), ((), ())),
                                   preferred_element_type=f32)      # (G, D+1)
    sums = sums_aug[:, :d]
    counts = sums_aug[:, d:d + 1]                                   # (G, 1)
    means = sums / jnp.maximum(counts, 1.0)
    new_gf = jnp.where(counts > 0.0, beta * gf + (1.0 - beta) * means, gf)

    # logits = smog(view1_predicted, new_group_features, temperature)
    logits = jax.lax.dot_general(l2norm(v1_pred), l2norm(new_gf),
                                 (((1,), (1,)), ((), ())),
                                 preferred_element_type=f32) * (1.0 / temperature)

    # ---- pack everything into the lane-dense output slab --------------------
    logit_rows = jnp.concatenate(
        [logits, assign2.astype(f32), jnp.zeros((batch, LANES - g - 1), f32)],
        axis=1)                                                     # (B, 128)
    gf_rows = jnp.concatenate(
        [new_gf, jnp.zeros((g, LANES - d), f32)], axis=1)           # (G, 128)
    out_ref[0:batch, :] = logit_rows
    out_ref[batch:, :] = gf_rows


# ----------------------------------------------------------------------------
# Plain-JAX glue: cheap patch construction (lane-last, no 5-D transpose),
# wrapper, parameter init.
# ----------------------------------------------------------------------------
def _im2col_3x3(x_nchw):
    """(B, C, H, W) -> (2-D) (B*H*W, C*9) patches, lane-last.

    Column order is c*9 + (kh*3 + kw), matching torch conv weight
    (E, C, 3, 3).reshape(E, C*9).
    """
    b, c, h, w = x_nchw.shape
    x = jnp.transpose(x_nchw, (0, 2, 3, 1))                 # NHWC (tiny)
    xp = jnp.pad(x, ((0, 0), (1, 1), (1, 1), (0, 0)))
    slices = [xp[:, kh:kh + h, kw:kw + w, :]                # (B, H, W, C)
              for kh in range(3) for kw in range(3)]
    pat = jnp.stack(slices, axis=-1)                        # (B, H, W, C, 9)
    return pat.reshape(b * h * w, c * 9)


def smog_forward(view1, view2, params, group_features,
                 n_iteration=0, beta=0.99, temperature=0.1):
    if n_iteration % 2:
        view2, view1 = view1, view2

    b, _, h, w = view1.shape
    g, d = group_features.shape

    # Batch both views through the shared (momentum == online at iter 0)
    # encoder conv; BN-sensitive heads split per view inside the kernel.
    patches = _im2col_3x3(jnp.concatenate([view1, view2], axis=0))

    kernel = functools.partial(smog_fused_kernel, batch=b, hw=h * w,
                               beta=beta, temperature=temperature)
    vmem = pl.BlockSpec(memory_space=pltpu.MemorySpace.VMEM)
    slab = pl.pallas_call(
        kernel,
        out_shape=jax.ShapeDtypeStruct((b + g, LANES), jnp.float32),
        in_specs=[vmem] * 13,
        out_specs=vmem,
        compiler_params=pltpu.CompilerParams(vmem_limit_bytes=32 * 1024 * 1024),
    )(patches,
      params["conv_w_mat"], params["conv_b"],
      params["proj"]["w1"], params["proj"]["g1"], params["proj"]["b1"],
      params["proj"]["w2"],
      params["pred"]["w1"], params["pred"]["g1"], params["pred"]["b1"],
      params["pred"]["w2"], params["pred"]["b2"],
      group_features)

    logits = slab[:b, :g]
    assignments = slab[:b, g].astype(jnp.int32)     # small ints, exact in f32
    new_group_features = slab[b:, :d]               # set_group_features (functional)
    return logits, assignments, new_group_features


def init_params(key, c_in=4, enc_dim=32, proj_hidden=64, proj_out=32,
                pred_hidden=64, pred_out=32, n_groups=4):
    ks = jax.random.split(key, 8)
    conv_w = 0.1 * jax.random.normal(ks[0], (enc_dim, c_in, 3, 3), jnp.float32)
    conv_b = 0.01 * jax.random.normal(ks[1], (enc_dim,), jnp.float32)
    params = {
        "conv_w_mat": conv_w.reshape(enc_dim, c_in * 9).T,   # (C*9, E)
        "conv_b": conv_b.reshape(1, enc_dim),
        "proj": {
            "w1": 0.1 * jax.random.normal(ks[2], (enc_dim, proj_hidden), jnp.float32),
            "g1": jnp.ones((1, proj_hidden), jnp.float32),
            "b1": jnp.zeros((1, proj_hidden), jnp.float32),
            "w2": 0.1 * jax.random.normal(ks[3], (proj_hidden, proj_out), jnp.float32),
        },
        "pred": {
            "w1": 0.1 * jax.random.normal(ks[4], (proj_out, pred_hidden), jnp.float32),
            "g1": jnp.ones((1, pred_hidden), jnp.float32),
            "b1": jnp.zeros((1, pred_hidden), jnp.float32),
            "w2": 0.1 * jax.random.normal(ks[5], (pred_hidden, pred_out), jnp.float32),
            "b2": 0.01 * jax.random.normal(ks[6], (1, pred_out), jnp.float32),
        },
    }
    # smog = SMoGPrototypes(group_features=torch.rand(n_groups, n_prototypes))
    # n_prototypes must equal projection/prediction out dim for the matmuls.
    group_features = jax.random.uniform(ks[7], (n_groups, pred_out), jnp.float32)
    return params, group_features


# TODO(synk): reset_group_features/_cluster_features uses sklearn KMeans on a
# memory bank; it is not part of forward() and has no Pallas equivalent here.

if __name__ == "__main__":
    key = jax.random.PRNGKey(0)
    kp, k1, k2 = jax.random.split(key, 3)
    params, group_features = init_params(kp)

    B, C, H, W = 8, 4, 16, 16
    view1 = jax.random.normal(k1, (B, C, H, W), jnp.float32)
    view2 = jax.random.normal(k2, (B, C, H, W), jnp.float32)

    fwd = jax.jit(smog_forward)
    logits, assignments, new_group_features = fwd(view1, view2, params, group_features)
    jax.block_until_ready((logits, assignments, new_group_features))

    assert logits.shape == (B, group_features.shape[0])
    assert assignments.shape == (B,)
    assert new_group_features.shape == group_features.shape
    assert bool(jnp.all(jnp.isfinite(logits)))
    assert bool(jnp.all((assignments >= 0) & (assignments < group_features.shape[0])))
    print("KERNEL_OK")
</pallas_src>

<mosaic_0001>
module attributes {stable_mosaic.version = 11 : i64} {
  func.func @smog_fused_kernel(%arg0: memref<4096x36xf32, #tpu.memory_space<vmem>>, %arg1: memref<36x32xf32, #tpu.memory_space<vmem>>, %arg2: memref<1x32xf32, #tpu.memory_space<vmem>>, %arg3: memref<32x64xf32, #tpu.memory_space<vmem>>, %arg4: memref<1x64xf32, #tpu.memory_space<vmem>>, %arg5: memref<1x64xf32, #tpu.memory_space<vmem>>, %arg6: memref<64x32xf32, #tpu.memory_space<vmem>>, %arg7: memref<32x64xf32, #tpu.memory_space<vmem>>, %arg8: memref<1x64xf32, #tpu.memory_space<vmem>>, %arg9: memref<1x64xf32, #tpu.memory_space<vmem>>, %arg10: memref<64x32xf32, #tpu.memory_space<vmem>>, %arg11: memref<1x32xf32, #tpu.memory_space<vmem>>, %arg12: memref<4x32xf32, #tpu.memory_space<vmem>>, %arg13: memref<12x128xf32, #tpu.memory_space<vmem>>) attributes {dimension_semantics = [], scalar_prefetch = 0 : i64, scratch_operands = 0 : i64, tpu.core_type = #tpu.core_type<tc>} {
    %c0 = arith.constant 0 : index
    %c0_0 = arith.constant 0 : index
    %0 = vector.load %arg0[%c0, %c0_0] : memref<4096x36xf32, #tpu.memory_space<vmem>>, vector<4096x36xf32>
    %c0_1 = arith.constant 0 : index
    %c0_2 = arith.constant 0 : index
    %1 = vector.load %arg1[%c0_1, %c0_2] : memref<36x32xf32, #tpu.memory_space<vmem>>, vector<36x32xf32>
    %cst = arith.constant dense<0.000000e+00> : vector<4096x32xf32>
    %2 = tpu.matmul %0, %1, %cst {dimension_numbers = #tpu.dot_dimension_numbers<[1], [0], [0], [1], [0, 0, 1, 1], [], []>} : vector<4096x36xf32>, vector<36x32xf32>, vector<4096x32xf32> -> vector<4096x32xf32>
    %c0_3 = arith.constant 0 : index
    %c0_4 = arith.constant 0 : index
    %3 = vector.load %arg2[%c0_3, %c0_4] : memref<1x32xf32, #tpu.memory_space<vmem>>, vector<1x32xf32>
    %4 = vector.broadcast %3 : vector<1x32xf32> to vector<4096x32xf32>
    %5 = arith.addf %2, %4 : vector<4096x32xf32>
    %cst_5 = arith.constant 0.000000e+00 : f32
    %6 = vector.broadcast %cst_5 : f32 to vector<4096x32xf32>
    %7 = arith.maximumf %5, %6 : vector<4096x32xf32>
    %8 = tpu.iota {dimensions = array<i32: 0>} : vector<16x4096xi32>
    %9 = tpu.iota {dimensions = array<i32: 1>} : vector<16x4096xi32>
    %c256_i32 = arith.constant 256 : i32
    %10 = vector.broadcast %c256_i32 : i32 to vector<16x4096xi32>
    %11 = arith.muli %8, %10 : vector<16x4096xi32>
    %12 = arith.cmpi sge, %9, %11 : vector<16x4096xi32>
    %c256_i32_6 = arith.constant 256 : i32
    %13 = vector.broadcast %c256_i32_6 : i32 to vector<16x4096xi32>
    %14 = arith.addi %11, %13 : vector<16x4096xi32>
    %15 = arith.cmpi slt, %9, %14 : vector<16x4096xi32>
    %16 = arith.andi %12, %15 : vector<16x4096xi1>
    %cst_7 = arith.constant 3.906250e-03 : f32
    %cst_8 = arith.constant 0.000000e+00 : f32
    %17 = vector.broadcast %cst_7 : f32 to vector<16x4096xf32>
    %18 = vector.broadcast %cst_8 : f32 to vector<16x4096xf32>
    %19 = arith.select %16, %17, %18 : vector<16x4096xi1>, vector<16x4096xf32>
    %cst_9 = arith.constant dense<0.000000e+00> : vector<16x32xf32>
    %20 = tpu.matmul %19, %7, %cst_9 {dimension_numbers = #tpu.dot_dimension_numbers<[1], [0], [0], [1], [0, 0, 1, 1], [], []>} : vector<16x4096xf32>, vector<4096x32xf32>, vector<16x32xf32> -> vector<16x32xf32>
    %21 = vector.extract_strided_slice %20 {offsets = [0, 0], sizes = [8, 32], strides = [1, 1]} : vector<16x32xf32> to vector<8x32xf32>
    %22 = vector.extract_strided_slice %20 {offsets = [8, 0], sizes = [8, 32], strides = [1, 1]} : vector<16x32xf32> to vector<8x32xf32>
    %c0_10 = arith.constant 0 : index
    %c0_11 = arith.constant 0 : index
    %23 = vector.load %arg3[%c0_10, %c0_11] : memref<32x64xf32, #tpu.memory_space<vmem>>, vector<32x64xf32>
    %c0_12 = arith.constant 0 : index
    %c0_13 = arith.constant 0 : index
    %24 = vector.load %arg4[%c0_12, %c0_13] : memref<1x64xf32, #tpu.memory_space<vmem>>, vector<1x64xf32>
    %c0_14 = arith.constant 0 : index
    %c0_15 = arith.constant 0 : index
    %25 = vector.load %arg5[%c0_14, %c0_15] : memref<1x64xf32, #tpu.memory_space<vmem>>, vector<1x64xf32>
    %cst_16 = arith.constant dense<0.000000e+00> : vector<8x64xf32>
    %26 = tpu.matmul %21, %23, %cst_16 {dimension_numbers = #tpu.dot_dimension_numbers<[1], [0], [0], [1], [0, 0, 1, 1], [], []>} : vector<8x32xf32>, vector<32x64xf32>, vector<8x64xf32> -> vector<8x64xf32>
    %cst_17 = arith.constant dense<0.000000e+00> : vector<64xf32>
    %27 = vector.multi_reduction <add>, %26, %cst_17 [0] : vector<8x64xf32> to vector<64xf32>
    %28 = vector.shape_cast %27 : vector<64xf32> to vector<1x64xf32>
    %cst_18 = arith.constant 8.000000e+00 : f32
    %29 = vector.broadcast %cst_18 : f32 to vector<1x64xf32>
    %30 = arith.divf %28, %29 : vector<1x64xf32>
    %31 = vector.broadcast %30 : vector<1x64xf32> to vector<8x64xf32>
    %32 = arith.subf %26, %31 : vector<8x64xf32>
    %33 = arith.mulf %32, %32 : vector<8x64xf32>
    %cst_19 = arith.constant dense<0.000000e+00> : vector<64xf32>
    %34 = vector.multi_reduction <add>, %33, %cst_19 [0] : vector<8x64xf32> to vector<64xf32>
    %35 = vector.shape_cast %34 : vector<64xf32> to vector<1x64xf32>
    %cst_20 = arith.constant 8.000000e+00 : f32
    %36 = vector.broadcast %cst_20 : f32 to vector<1x64xf32>
    %37 = arith.divf %35, %36 : vector<1x64xf32>
    %38 = vector.broadcast %30 : vector<1x64xf32> to vector<8x64xf32>
    %39 = arith.subf %26, %38 : vector<8x64xf32>
    %cst_21 = arith.constant 9.99999974E-6 : f32
    %40 = vector.broadcast %cst_21 : f32 to vector<1x64xf32>
    %41 = arith.addf %37, %40 : vector<1x64xf32>
    %42 = math.rsqrt %41 : vector<1x64xf32>
    %43 = vector.broadcast %42 : vector<1x64xf32> to vector<8x64xf32>
    %44 = arith.mulf %39, %43 : vector<8x64xf32>
    %45 = vector.broadcast %24 : vector<1x64xf32> to vector<8x64xf32>
    %46 = arith.mulf %44, %45 : vector<8x64xf32>
    %47 = vector.broadcast %25 : vector<1x64xf32> to vector<8x64xf32>
    %48 = arith.addf %46, %47 : vector<8x64xf32>
    %cst_22 = arith.constant 0.000000e+00 : f32
    %49 = vector.broadcast %cst_22 : f32 to vector<8x64xf32>
    %50 = arith.maximumf %48, %49 : vector<8x64xf32>
    %c0_23 = arith.constant 0 : index
    %c0_24 = arith.constant 0 : index
    %51 = vector.load %arg6[%c0_23, %c0_24] : memref<64x32xf32, #tpu.memory_space<vmem>>, vector<64x32xf32>
    %cst_25 = arith.constant dense<0.000000e+00> : vector<8x32xf32>
    %52 = tpu.matmul %50, %51, %cst_25 {dimension_numbers = #tpu.dot_dimension_numbers<[1], [0], [0], [1], [0, 0, 1, 1], [], []>} : vector<8x64xf32>, vector<64x32xf32>, vector<8x32xf32> -> vector<8x32xf32>
    %cst_26 = arith.constant dense<0.000000e+00> : vector<32xf32>
    %53 = vector.multi_reduction <add>, %52, %cst_26 [0] : vector<8x32xf32> to vector<32xf32>
    %54 = vector.shape_cast %53 : vector<32xf32> to vector<1x32xf32>
    %cst_27 = arith.constant 8.000000e+00 : f32
    %55 = vector.broadcast %cst_27 : f32 to vector<1x32xf32>
    %56 = arith.divf %54, %55 : vector<1x32xf32>
    %57 = vector.broadcast %56 : vector<1x32xf32> to vector<8x32xf32>
    %58 = arith.subf %52, %57 : vector<8x32xf32>
    %59 = arith.mulf %58, %58 : vector<8x32xf32>
    %cst_28 = arith.constant dense<0.000000e+00> : vector<32xf32>
    %60 = vector.multi_reduction <add>, %59, %cst_28 [0] : vector<8x32xf32> to vector<32xf32>
    %61 = vector.shape_cast %60 : vector<32xf32> to vector<1x32xf32>
    %cst_29 = arith.constant 8.000000e+00 : f32
    %62 = vector.broadcast %cst_29 : f32 to vector<1x32xf32>
    %63 = arith.divf %61, %62 : vector<1x32xf32>
    %64 = vector.broadcast %56 : vector<1x32xf32> to vector<8x32xf32>
    %65 = arith.subf %52, %64 : vector<8x32xf32>
    %cst_30 = arith.constant 9.99999974E-6 : f32
    %66 = vector.broadcast %cst_30 : f32 to vector<1x32xf32>
    %67 = arith.addf %63, %66 : vector<1x32xf32>
    %68 = math.rsqrt %67 : vector<1x32xf32>
    %69 = vector.broadcast %68 : vector<1x32xf32> to vector<8x32xf32>
    %70 = arith.mulf %65, %69 : vector<8x32xf32>
    %c0_31 = arith.constant 0 : index
    %c0_32 = arith.constant 0 : index
    %71 = vector.load %arg3[%c0_31, %c0_32] : memref<32x64xf32, #tpu.memory_space<vmem>>, vector<32x64xf32>
    %c0_33 = arith.constant 0 : index
    %c0_34 = arith.constant 0 : index
    %72 = vector.load %arg4[%c0_33, %c0_34] : memref<1x64xf32, #tpu.memory_space<vmem>>, vector<1x64xf32>
    %c0_35 = arith.constant 0 : index
    %c0_36 = arith.constant 0 : index
    %73 = vector.load %arg5[%c0_35, %c0_36] : memref<1x64xf32, #tpu.memory_space<vmem>>, vector<1x64xf32>
    %cst_37 = arith.constant dense<0.000000e+00> : vector<8x64xf32>
    %74 = tpu.matmul %22, %71, %cst_37 {dimension_numbers = #tpu.dot_dimension_numbers<[1], [0], [0], [1], [0, 0, 1, 1], [], []>} : vector<8x32xf32>, vector<32x64xf32>, vector<8x64xf32> -> vector<8x64xf32>
    %cst_38 = arith.constant dense<0.000000e+00> : vector<64xf32>
    %75 = vector.multi_reduction <add>, %74, %cst_38 [0] : vector<8x64xf32> to vector<64xf32>
    %76 = vector.shape_cast %75 : vector<64xf32> to vector<1x64xf32>
    %cst_39 = arith.constant 8.000000e+00 : f32
    %77 = vector.broadcast %cst_39 : f32 to vector<1x64xf32>
    %78 = arith.divf %76, %77 : vector<1x64xf32>
    %79 = vector.broadcast %78 : vector<1x64xf32> to vector<8x64xf32>
    %80 = arith.subf %74, %79 : vector<8x64xf32>
    %81 = arith.mulf %80, %80 : vector<8x64xf32>
    %cst_40 = arith.constant dense<0.000000e+00> : vector<64xf32>
    %82 = vector.multi_reduction <add>, %81, %cst_40 [0] : vector<8x64xf32> to vector<64xf32>
    %83 = vector.shape_cast %82 : vector<64xf32> to vector<1x64xf32>
    %cst_41 = arith.constant 8.000000e+00 : f32
    %84 = vector.broadcast %cst_41 : f32 to vector<1x64xf32>
    %85 = arith.divf %83, %84 : vector<1x64xf32>
    %86 = vector.broadcast %78 : vector<1x64xf32> to vector<8x64xf32>
    %87 = arith.subf %74, %86 : vector<8x64xf32>
    %cst_42 = arith.constant 9.99999974E-6 : f32
    %88 = vector.broadcast %cst_42 : f32 to vector<1x64xf32>
    %89 = arith.addf %85, %88 : vector<1x64xf32>
    %90 = math.rsqrt %89 : vector<1x64xf32>
    %91 = vector.broadcast %90 : vector<1x64xf32> to vector<8x64xf32>
    %92 = arith.mulf %87, %91 : vector<8x64xf32>
    %93 = vector.broadcast %72 : vector<1x64xf32> to vector<8x64xf32>
    %94 = arith.mulf %92, %93 : vector<8x64xf32>
    %95 = vector.broadcast %73 : vector<1x64xf32> to vector<8x64xf32>
    %96 = arith.addf %94, %95 : vector<8x64xf32>
    %cst_43 = arith.constant 0.000000e+00 : f32
    %97 = vector.broadcast %cst_43 : f32 to vector<8x64xf32>
    %98 = arith.maximumf %96, %97 : vector<8x64xf32>
    %c0_44 = arith.constant 0 : index
    %c0_45 = arith.constant 0 : index
    %99 = vector.load %arg6[%c0_44, %c0_45] : memref<64x32xf32, #tpu.memory_space<vmem>>, vector<64x32xf32>
    %cst_46 = arith.constant dense<0.000000e+00> : vector<8x32xf32>
    %100 = tpu.matmul %98, %99, %cst_46 {dimension_numbers = #tpu.dot_dimension_numbers<[1], [0], [0], [1], [0, 0, 1, 1], [], []>} : vector<8x64xf32>, vector<64x32xf32>, vector<8x32xf32> -> vector<8x32xf32>
    %cst_47 = arith.constant dense<0.000000e+00> : vector<32xf32>
    %101 = vector.multi_reduction <add>, %100, %cst_47 [0] : vector<8x32xf32> to vector<32xf32>
    %102 = vector.shape_cast %101 : vector<32xf32> to vector<1x32xf32>
    %cst_48 = arith.constant 8.000000e+00 : f32
    %103 = vector.broadcast %cst_48 : f32 to vector<1x32xf32>
    %104 = arith.divf %102, %103 : vector<1x32xf32>
    %105 = vector.broadcast %104 : vector<1x32xf32> to vector<8x32xf32>
    %106 = arith.subf %100, %105 : vector<8x32xf32>
    %107 = arith.mulf %106, %106 : vector<8x32xf32>
    %cst_49 = arith.constant dense<0.000000e+00> : vector<32xf32>
    %108 = vector.multi_reduction <add>, %107, %cst_49 [0] : vector<8x32xf32> to vector<32xf32>
    %109 = vector.shape_cast %108 : vector<32xf32> to vector<1x32xf32>
    %cst_50 = arith.constant 8.000000e+00 : f32
    %110 = vector.broadcast %cst_50 : f32 to vector<1x32xf32>
    %111 = arith.divf %109, %110 : vector<1x32xf32>
    %112 = vector.broadcast %104 : vector<1x32xf32> to vector<8x32xf32>
    %113 = arith.subf %100, %112 : vector<8x32xf32>
    %cst_51 = arith.constant 9.99999974E-6 : f32
    %114 = vector.broadcast %cst_51 : f32 to vector<1x32xf32>
    %115 = arith.addf %111, %114 : vector<1x32xf32>
    %116 = math.rsqrt %115 : vector<1x32xf32>
    %117 = vector.broadcast %116 : vector<1x32xf32> to vector<8x32xf32>
    %118 = arith.mulf %113, %117 : vector<8x32xf32>
    %c0_52 = arith.constant 0 : index
    %c0_53 = arith.constant 0 : index
    %119 = vector.load %arg7[%c0_52, %c0_53] : memref<32x64xf32, #tpu.memory_space<vmem>>, vector<32x64xf32>
    %c0_54 = arith.constant 0 : index
    %c0_55 = arith.constant 0 : index
    %120 = vector.load %arg8[%c0_54, %c0_55] : memref<1x64xf32, #tpu.memory_space<vmem>>, vector<1x64xf32>
    %c0_56 = arith.constant 0 : index
    %c0_57 = arith.constant 0 : index
    %121 = vector.load %arg9[%c0_56, %c0_57] : memref<1x64xf32, #tpu.memory_space<vmem>>, vector<1x64xf32>
    %cst_58 = arith.constant dense<0.000000e+00> : vector<8x64xf32>
    %122 = tpu.matmul %70, %119, %cst_58 {dimension_numbers = #tpu.dot_dimension_numbers<[1], [0], [0], [1], [0, 0, 1, 1], [], []>} : vector<8x32xf32>, vector<32x64xf32>, vector<8x64xf32> -> vector<8x64xf32>
    %cst_59 = arith.constant dense<0.000000e+00> : vector<64xf32>
    %123 = vector.multi_reduction <add>, %122, %cst_59 [0] : vector<8x64xf32> to vector<64xf32>
    %124 = vector.shape_cast %123 : vector<64xf32> to vector<1x64xf32>
    %cst_60 = arith.constant 8.000000e+00 : f32
    %125 = vector.broadcast %cst_60 : f32 to vector<1x64xf32>
    %126 = arith.divf %124, %125 : vector<1x64xf32>
    %127 = vector.broadcast %126 : vector<1x64xf32> to vector<8x64xf32>
    %128 = arith.subf %122, %127 : vector<8x64xf32>
    %129 = arith.mulf %128, %128 : vector<8x64xf32>
    %cst_61 = arith.constant dense<0.000000e+00> : vector<64xf32>
    %130 = vector.multi_reduction <add>, %129, %cst_61 [0] : vector<8x64xf32> to vector<64xf32>
    %131 = vector.shape_cast %130 : vector<64xf32> to vector<1x64xf32>
    %cst_62 = arith.constant 8.000000e+00 : f32
    %132 = vector.broadcast %cst_62 : f32 to vector<1x64xf32>
    %133 = arith.divf %131, %132 : vector<1x64xf32>
    %134 = vector.broadcast %126 : vector<1x64xf32> to vector<8x64xf32>
    %135 = arith.subf %122, %134 : vector<8x64xf32>
    %cst_63 = arith.constant 9.99999974E-6 : f32
    %136 = vector.broadcast %cst_63 : f32 to vector<1x64xf32>
    %137 = arith.addf %133, %136 : vector<1x64xf32>
    %138 = math.rsqrt %137 : vector<1x64xf32>
    %139 = vector.broadcast %138 : vector<1x64xf32> to vector<8x64xf32>
    %140 = arith.mulf %135, %139 : vector<8x64xf32>
    %141 = vector.broadcast %120 : vector<1x64xf32> to vector<8x64xf32>
    %142 = arith.mulf %140, %141 : vector<8x64xf32>
    %143 = vector.broadcast %121 : vector<1x64xf32> to vector<8x64xf32>
    %144 = arith.addf %142, %143 : vector<8x64xf32>
    %cst_64 = arith.constant 0.000000e+00 : f32
    %145 = vector.broadcast %cst_64 : f32 to vector<8x64xf32>
    %146 = arith.maximumf %144, %145 : vector<8x64xf32>
    %c0_65 = arith.constant 0 : index
    %c0_66 = arith.constant 0 : index
    %147 = vector.load %arg10[%c0_65, %c0_66] : memref<64x32xf32, #tpu.memory_space<vmem>>, vector<64x32xf32>
    %cst_67 = arith.constant dense<0.000000e+00> : vector<8x32xf32>
    %148 = tpu.matmul %146, %147, %cst_67 {dimension_numbers = #tpu.dot_dimension_numbers<[1], [0], [0], [1], [0, 0, 1, 1], [], []>} : vector<8x64xf32>, vector<64x32xf32>, vector<8x32xf32> -> vector<8x32xf32>
    %c0_68 = arith.constant 0 : index
    %c0_69 = arith.constant 0 : index
    %149 = vector.load %arg11[%c0_68, %c0_69] : memref<1x32xf32, #tpu.memory_space<vmem>>, vector<1x32xf32>
    %150 = vector.broadcast %149 : vector<1x32xf32> to vector<8x32xf32>
    %151 = arith.addf %148, %150 : vector<8x32xf32>
    %c0_70 = arith.constant 0 : index
    %c0_71 = arith.constant 0 : index
    %152 = vector.load %arg12[%c0_70, %c0_71] : memref<4x32xf32, #tpu.memory_space<vmem>>, vector<4x32xf32>
    %153 = arith.mulf %152, %152 : vector<4x32xf32>
    %cst_72 = arith.constant dense<0.000000e+00> : vector<4xf32>
    %154 = vector.multi_reduction <add>, %153, %cst_72 [1] : vector<4x32xf32> to vector<4xf32>
    %155 = vector.shape_cast %154 : vector<4xf32> to vector<4x1xf32>
    %cst_73 = arith.constant 1.000000e-24 : f32
    %156 = vector.broadcast %cst_73 : f32 to vector<4x1xf32>
    %157 = arith.maximumf %155, %156 : vector<4x1xf32>
    %158 = math.rsqrt %157 : vector<4x1xf32>
    %159 = vector.broadcast %158 : vector<4x1xf32> to vector<4x32xf32>
    %160 = arith.mulf %152, %159 : vector<4x32xf32>
    %161 = arith.mulf %118, %118 : vector<8x32xf32>
    %cst_74 = arith.constant dense<0.000000e+00> : vector<8xf32>
    %162 = vector.multi_reduction <add>, %161, %cst_74 [1] : vector<8x32xf32> to vector<8xf32>
    %163 = vector.shape_cast %162 : vector<8xf32> to vector<8x1xf32>
    %cst_75 = arith.constant 1.000000e-24 : f32
    %164 = vector.broadcast %cst_75 : f32 to vector<8x1xf32>
    %165 = arith.maximumf %163, %164 : vector<8x1xf32>
    %166 = math.rsqrt %165 : vector<8x1xf32>
    %167 = vector.broadcast %166 : vector<8x1xf32> to vector<8x32xf32>
    %168 = arith.mulf %118, %167 : vector<8x32xf32>
    %cst_76 = arith.constant dense<0.000000e+00> : vector<8x4xf32>
    %169 = tpu.matmul %168, %160, %cst_76 {dimension_numbers = #tpu.dot_dimension_numbers<[1], [1], [0], [0], [0, 0, 1, 0], [], []>} : vector<8x32xf32>, vector<4x32xf32>, vector<8x4xf32> -> vector<8x4xf32>
    %cst_77 = arith.constant 1.000000e+01 : f32
    %170 = vector.broadcast %cst_77 : f32 to vector<8x4xf32>
    %171 = arith.mulf %169, %170 : vector<8x4xf32>
    %172 = tpu.iota {dimensions = array<i32: 1>} : vector<8x4xi32>
    %cst_78 = arith.constant dense<0xFF800000> : vector<8xf32>
    %173 = vector.multi_reduction <maximumf>, %171, %cst_78 [1] : vector<8x4xf32> to vector<8xf32>
    %174 = vector.shape_cast %173 : vector<8xf32> to vector<8x1xf32>
    %175 = vector.broadcast %174 : vector<8x1xf32> to vector<8x4xf32>
    %176 = arith.cmpf oeq, %171, %175 : vector<8x4xf32>
    %c4_i32 = arith.constant 4 : i32
    %177 = vector.broadcast %c4_i32 : i32 to vector<8x4xi32>
    %178 = arith.select %176, %172, %177 : vector<8x4xi1>, vector<8x4xi32>
    %cst_79 = arith.constant dense<2147483647> : vector<8xi32>
    %179 = vector.multi_reduction <minsi>, %178, %cst_79 [1] : vector<8x4xi32> to vector<8xi32>
    %180 = vector.shape_cast %179 : vector<8xi32> to vector<8x1xi32>
    %181 = arith.mulf %70, %70 : vector<8x32xf32>
    %cst_80 = arith.constant dense<0.000000e+00> : vector<8xf32>
    %182 = vector.multi_reduction <add>, %181, %cst_80 [1] : vector<8x32xf32> to vector<8xf32>
    %183 = vector.shape_cast %182 : vector<8xf32> to vector<8x1xf32>
    %cst_81 = arith.constant 1.000000e-24 : f32
    %184 = vector.broadcast %cst_81 : f32 to vector<8x1xf32>
    %185 = arith.maximumf %183, %184 : vector<8x1xf32>
    %186 = math.rsqrt %185 : vector<8x1xf32>
    %187 = vector.broadcast %186 : vector<8x1xf32> to vector<8x32xf32>
    %188 = arith.mulf %70, %187 : vector<8x32xf32>
    %cst_82 = arith.constant dense<0.000000e+00> : vector<8x4xf32>
    %189 = tpu.matmul %188, %160, %cst_82 {dimension_numbers = #tpu.dot_dimension_numbers<[1], [1], [0], [0], [0, 0, 1, 0], [], []>} : vector<8x32xf32>, vector<4x32xf32>, vector<8x4xf32> -> vector<8x4xf32>
    %cst_83 = arith.constant 1.000000e+01 : f32
    %190 = vector.broadcast %cst_83 : f32 to vector<8x4xf32>
    %191 = arith.mulf %189, %190 : vector<8x4xf32>
    %192 = tpu.iota {dimensions = array<i32: 1>} : vector<8x4xi32>
    %cst_84 = arith.constant dense<0xFF800000> : vector<8xf32>
    %193 = vector.multi_reduction <maximumf>, %191, %cst_84 [1] : vector<8x4xf32> to vector<8xf32>
    %194 = vector.shape_cast %193 : vector<8xf32> to vector<8x1xf32>
    %195 = vector.broadcast %194 : vector<8x1xf32> to vector<8x4xf32>
    %196 = arith.cmpf oeq, %191, %195 : vector<8x4xf32>
    %c4_i32_85 = arith.constant 4 : i32
    %197 = vector.broadcast %c4_i32_85 : i32 to vector<8x4xi32>
    %198 = arith.select %196, %192, %197 : vector<8x4xi1>, vector<8x4xi32>
    %cst_86 = arith.constant dense<2147483647> : vector<8xi32>
    %199 = vector.multi_reduction <minsi>, %198, %cst_86 [1] : vector<8x4xi32> to vector<8xi32>
    %200 = vector.shape_cast %199 : vector<8xi32> to vector<8x1xi32>
    %201 = tpu.iota {dimensions = array<i32: 1>} : vector<8x4xi32>
    %202 = vector.broadcast %200 : vector<8x1xi32> to vector<8x4xi32>
    %203 = arith.cmpi eq, %201, %202 : vector<8x4xi32>
    %204 = arith.extui %203 : vector<8x4xi1> to vector<8x4xi32>
    %205 = arith.sitofp %204 : vector<8x4xi32> to vector<8x4xf32>
    %cst_87 = arith.constant 1.000000e+00 : f32
    %206 = vector.broadcast %cst_87 : f32 to vector<8x1xf32>
    %207 = tpu.concatenate %70, %206 in 1 : vector<8x32xf32>, vector<8x1xf32> -> vector<8x33xf32>
    %cst_88 = arith.constant dense<0.000000e+00> : vector<4x33xf32>
    %208 = tpu.matmul %205, %207, %cst_88 {dimension_numbers = #tpu.dot_dimension_numbers<[0], [0], [1], [1], [0, 1, 1, 1], [], []>} : vector<8x4xf32>, vector<8x33xf32>, vector<4x33xf32> -> vector<4x33xf32>
    %209 = vector.extract_strided_slice %208 {offsets = [0, 0], sizes = [4, 32], strides = [1, 1]} : vector<4x33xf32> to vector<4x32xf32>
    %210 = vector.extract_strided_slice %208 {offsets = [0, 32], sizes = [4, 1], strides = [1, 1]} : vector<4x33xf32> to vector<4x1xf32>
    %cst_89 = arith.constant 1.000000e+00 : f32
    %211 = vector.broadcast %cst_89 : f32 to vector<4x1xf32>
    %212 = arith.maximumf %210, %211 : vector<4x1xf32>
    %213 = vector.broadcast %212 : vector<4x1xf32> to vector<4x32xf32>
    %214 = arith.divf %209, %213 : vector<4x32xf32>
    %cst_90 = arith.constant 0.000000e+00 : f32
    %215 = vector.broadcast %cst_90 : f32 to vector<4x1xf32>
    %216 = arith.cmpf ogt, %210, %215 : vector<4x1xf32>
    %cst_91 = arith.constant 9.900000e-01 : f32
    %217 = vector.broadcast %cst_91 : f32 to vector<4x32xf32>
    %218 = arith.mulf %217, %152 : vector<4x32xf32>
    %cst_92 = arith.constant 0.00999999977 : f32
    %219 = vector.broadcast %cst_92 : f32 to vector<4x32xf32>
    %220 = arith.mulf %219, %214 : vector<4x32xf32>
    %221 = arith.addf %218, %220 : vector<4x32xf32>
    %222 = vector.shape_cast %216 : vector<4x1xi1> to vector<4x1xi1>
    %223 = vector.broadcast %222 : vector<4x1xi1> to vector<4x32xi1>
    %224 = arith.select %223, %221, %152 : vector<4x32xi1>, vector<4x32xf32>
    %225 = arith.mulf %151, %151 : vector<8x32xf32>
    %cst_93 = arith.constant dense<0.000000e+00> : vector<8xf32>
    %226 = vector.multi_reduction <add>, %225, %cst_93 [1] : vector<8x32xf32> to vector<8xf32>
    %227 = vector.shape_cast %226 : vector<8xf32> to vector<8x1xf32>
    %cst_94 = arith.constant 1.000000e-24 : f32
    %228 = vector.broadcast %cst_94 : f32 to vector<8x1xf32>
    %229 = arith.maximumf %227, %228 : vector<8x1xf32>
    %230 = math.rsqrt %229 : vector<8x1xf32>
    %231 = vector.broadcast %230 : vector<8x1xf32> to vector<8x32xf32>
    %232 = arith.mulf %151, %231 : vector<8x32xf32>
    %233 = arith.mulf %224, %224 : vector<4x32xf32>
    %cst_95 = arith.constant dense<0.000000e+00> : vector<4xf32>
    %234 = vector.multi_reduction <add>, %233, %cst_95 [1] : vector<4x32xf32> to vector<4xf32>
    %235 = vector.shape_cast %234 : vector<4xf32> to vector<4x1xf32>
    %cst_96 = arith.constant 1.000000e-24 : f32
    %236 = vector.broadcast %cst_96 : f32 to vector<4x1xf32>
    %237 = arith.maximumf %235, %236 : vector<4x1xf32>
    %238 = math.rsqrt %237 : vector<4x1xf32>
    %239 = vector.broadcast %238 : vector<4x1xf32> to vector<4x32xf32>
    %240 = arith.mulf %224, %239 : vector<4x32xf32>
    %cst_97 = arith.constant dense<0.000000e+00> : vector<8x4xf32>
    %241 = tpu.matmul %232, %240, %cst_97 {dimension_numbers = #tpu.dot_dimension_numbers<[1], [1], [0], [0], [0, 0, 1, 0], [], []>} : vector<8x32xf32>, vector<4x32xf32>, vector<8x4xf32> -> vector<8x4xf32>
    %cst_98 = arith.constant 1.000000e+01 : f32
    %242 = vector.broadcast %cst_98 : f32 to vector<8x4xf32>
    %243 = arith.mulf %241, %242 : vector<8x4xf32>
    %244 = arith.sitofp %180 : vector<8x1xi32> to vector<8x1xf32>
    %cst_99 = arith.constant 0.000000e+00 : f32
    %245 = vector.broadcast %cst_99 : f32 to vector<8x123xf32>
    %246 = tpu.concatenate %243, %244, %245 in 1 : vector<8x4xf32>, vector<8x1xf32>, vector<8x123xf32> -> vector<8x128xf32>
    %cst_100 = arith.constant 0.000000e+00 : f32
    %247 = vector.broadcast %cst_100 : f32 to vector<4x96xf32>
    %248 = tpu.concatenate %224, %247 in 1 : vector<4x32xf32>, vector<4x96xf32> -> vector<4x128xf32>
    %c0_101 = arith.constant 0 : index
    %c0_102 = arith.constant 0 : index
    %249 = vector.load %arg13[%c0_101, %c0_102] : memref<12x128xf32, #tpu.memory_space<vmem>>, vector<8x128xf32>
    tpu.vector_store %arg13[%c0_101, %c0_102], %246 {strides = array<i32>} : memref<12x128xf32, #tpu.memory_space<vmem>>, vector<8x128xf32>,
    %c8 = arith.constant 8 : index
    %c0_103 = arith.constant 0 : index
    %250 = vector.load %arg13[%c8, %c0_103] : memref<12x128xf32, #tpu.memory_space<vmem>>, vector<4x128xf32>
    tpu.vector_store %arg13[%c8, %c0_103], %248 {strides = array<i32>} : memref<12x128xf32, #tpu.memory_space<vmem>>, vector<4x128xf32>,
    return
  }
}

</mosaic_0001>

<bundles_post_ra>
// kernel: smog_forward.1
= control target key start
LH: loop header
LB: loop body
LE: loop exit
PB: predicated region body
PF: predicated region fallthrough
CT: control target
= control target key end

     0   :  { %vm2102_vm0 = vcmask 1043456   ;;  %vm565_vm1 = vcmask 293888   ;;  %s11406_s1 = inlined_call_operand.vmem [shape: f32[36,32], index: 1, kind: input, shape index: {}]   ;;  %s11407_s2 = inlined_call_operand.vmem [shape: f32[1,32], index: 2, kind: input, shape index: {}]   ;;  %s11408_s0 = inlined_call_operand.vmem [shape: f32[4096,36], index: 0, kind: input, shape index: {}]   ;;  %s11409_s4 = inlined_call_operand.vmem [shape: f32[1,64], index: 4, kind: input, shape index: {}]   ;;  %s11410_s5 = inlined_call_operand.vmem [shape: f32[1,64], index: 5, kind: input, shape index: {}]   ;;  %s11411_s3 = inlined_call_operand.vmem [shape: f32[32,64], index: 3, kind: input, shape index: {}]   ;;  %s11412_s6 = inlined_call_operand.vmem [shape: f32[64,32], index: 6, kind: input, shape index: {}]   ;;  %s11413_s12 = inlined_call_operand.vmem [shape: f32[4,32], index: 12, kind: input, shape index: {}]   ;;  %s11414_s7 = inlined_call_operand.vmem [shape: f32[32,64], index: 7, kind: input, shape index: {}]   ;;  %s11415_s8 = inlined_call_operand.vmem [shape: f32[1,64], index: 8, kind: input, shape index: {}]   ;;  %s11416_s9 = inlined_call_operand.vmem [shape: f32[1,64], index: 9, kind: input, shape index: {}]   ;;  %s11417_s10 = inlined_call_operand.vmem [shape: f32[64,32], index: 10, kind: input, shape index: {}]   ;;  %s11418_s11 = inlined_call_operand.vmem [shape: f32[1,32], index: 11, kind: input, shape index: {}]   ;;  %s11419_s13 = inlined_call_operand.vmem [shape: f32[12,128], index: 13, kind: output, shape index: {}]  }
   0x1   :  { %v560_v0 = vld [vmem:[%s11406_s1 + $0x20] sm:$0xf]  ;;  %v559_v1 = vld [vmem:[%s11406_s1 + $0x18] sm:$0xff]  ;;  %v558_v2 = vld [vmem:[%s11406_s1 + $0x10] sm:$0xff] }
   0x2   :  { %5856 = vmatpush.msk.msra.mxu0 %vm2102_vm0, %v560_v0  ;;  %6447 = vmatpush.msk.msra.mxu1 %vm2102_vm0, %v560_v0  ;;  %v557_v3 = vld [vmem:[%s11406_s1 + $0x8] sm:$0xff]  ;;  %v556_v4 = vld [vmem:[%s11406_s1] sm:$0xff]  ;;  %v46_v7 = vld [vmem:[%s11408_s0 + $0x10] sm:$0xff] }
   0x3   :  { %6448 = vmatpush.msk.msra.mxu2 %vm2102_vm0, %v560_v0  ;;  %6449 = vmatpush.msk.msra.mxu3 %vm2102_vm0, %v560_v0  ;;  %v44_v5 = vld [vmem:[%s11408_s0] sm:$0xff]  ;;  %v45_v6 = vld [vmem:[%s11408_s0 + $0x8] sm:$0xff]  ;;  %v47_v8 = vld [vmem:[%s11408_s0 + $0x18] sm:$0xff] }
   0x4   :  { %2118 = vmatpush.msra.mxu0 %v559_v1  ;;  %6450 = vmatpush.msra.mxu1 %v559_v1  ;;  %v48_v9 = vld [vmem:[%s11408_s0 + $0x20] sm:$0xff]  ;;  %v49_v10 = vld [vmem:[%s11408_s0 + $0x28] sm:$0xff]  ;;  %v50_v11 = vld [vmem:[%s11408_s0 + $0x30] sm:$0xff] }
   0x5   :  { %6451 = vmatpush.msra.mxu2 %v559_v1  ;;  %6452 = vmatpush.msra.mxu3 %v559_v1  ;;  %v207_v12 = vld [vmem:[%s11408_s0 + $0x518] sm:$0xff]  ;;  %v208_v14 = vld [vmem:[%s11408_s0 + $0x520] sm:$0xff]  ;;  %v209_v16 = vld [vmem:[%s11408_s0 + $0x528] sm:$0xff] }
   0x6   :  { %2119 = vmatpush.msra.mxu0 %v558_v2  ;;  %6453 = vmatpush.msra.mxu1 %v558_v2  ;;  %v51_v13 = vld [vmem:[%s11408_s0 + $0x38] sm:$0xff]  ;;  %v52_v15 = vld [vmem:[%s11408_s0 + $0x40] sm:$0xff]  ;;  %v53_v17 = vld [vmem:[%s11408_s0 + $0x48] sm:$0xff] }
   0x7   :  { %6454 = vmatpush.msra.mxu2 %v558_v2  ;;  %6455 = vmatpush.msra.mxu3 %v558_v2  ;;  %v210_v18 = vld [vmem:[%s11408_s0 + $0x530] sm:$0xff]  ;;  %v211_v20 = vld [vmem:[%s11408_s0 + $0x538] sm:$0xff]  ;;  %v212_v22 = vld [vmem:[%s11408_s0 + $0x540] sm:$0xff] }
   0x8   :  { %2120 = vmatpush.msra.mxu0 %v557_v3  ;;  %6456 = vmatpush.msra.mxu1 %v557_v3  ;;  %v54_v19 = vld [vmem:[%s11408_s0 + $0x50] sm:$0xff]  ;;  %v55_v21 = vld [vmem:[%s11408_s0 + $0x58] sm:$0xff]  ;;  %v56_v23 = vld [vmem:[%s11408_s0 + $0x60] sm:$0xff] }
   0x9   :  { %6457 = vmatpush.msra.mxu2 %v557_v3  ;;  %6458 = vmatpush.msra.mxu3 %v557_v3  ;;  %v213_v24 = vld [vmem:[%s11408_s0 + $0x548] sm:$0xff]  ;;  %v214_v26 = vld [vmem:[%s11408_s0 + $0x550] sm:$0xff]  ;;  %v215_v28 = vld [vmem:[%s11408_s0 + $0x558] sm:$0xff] }
   0xa   :  { %2121 = vmatpush.msra.mxu0 %v556_v4  ;;  %6459 = vmatpush.msra.mxu1 %v556_v4  ;;  %v57_v25 = vld [vmem:[%s11408_s0 + $0x68] sm:$0xff]  ;;  %v58_v27 = vld [vmem:[%s11408_s0 + $0x70] sm:$0xff]  ;;  %v59_v29 = vld [vmem:[%s11408_s0 + $0x78] sm:$0xff] }
   0xb   :  { %5857 = vmatmul.msk.f32.vlgmr.msra.gmra.mxu0 %vm565_vm1, %v44_v5  ;;  %6460 = vmatpush.msra.mxu2 %v556_v4  ;;  %v216_v30 = vld [vmem:[%s11408_s0 + $0x560] sm:$0xff]  ;;  %v217_v33 = vld [vmem:[%s11408_s0 + $0x568] sm:$0xff]  ;;  %v218_v36 = vld [vmem:[%s11408_s0 + $0x570] sm:$0xff] }
   0xc   :  { %6461 = vmatpush.msra.mxu3 %v556_v4  ;;  %6020 = vmatmul.msk.f32.vlgmr.msra.gmra.mxu1 %vm565_vm1, %v207_v12  ;;  %v60_v32 = vld [vmem:[%s11408_s0 + $0x80] sm:$0xff]  ;;  %v61_v35 = vld [vmem:[%s11408_s0 + $0x88] sm:$0xff]  ;;  %v62_v38 = vld [vmem:[%s11408_s0 + $0x90] sm:$0xff] }
   0xd   :  { %v219_v39 = vld [vmem:[%s11408_s0 + $0x578] sm:$0xff]  ;;  %v220_v42 = vld [vmem:[%s11408_s0 + $0x580] sm:$0xff]  ;;  %v221_v45 = vld [vmem:[%s11408_s0 + $0x588] sm:$0xff] }
   0xe   :  { %v63_v41 = vld [vmem:[%s11408_s0 + $0x98] sm:$0xff]  ;;  %v64_v44 = vld [vmem:[%s11408_s0 + $0xa0] sm:$0xff]  ;;  %v65_v47 = vld [vmem:[%s11408_s0 + $0xa8] sm:$0xff] }
   0xf   :  { %v222_v48 = vld [vmem:[%s11408_s0 + $0x590] sm:$0xff]  ;;  %v223_v51 = vld [vmem:[%s11408_s0 + $0x598] sm:$0xff]  ;;  %v224_v54 = vld [vmem:[%s11408_s0 + $0x5a0] sm:$0xff] }
  0x10   :  { %v66_v50 = vld [vmem:[%s11408_s0 + $0xb0] sm:$0xff]  ;;  %v67_v53 = vld [vmem:[%s11408_s0 + $0xb8] sm:$0xff]  ;;  %v68_v56 = vld [vmem:[%s11408_s0 + $0xc0] sm:$0xff] }
  0x11   :  { %v225_v57 = vld [vmem:[%s11408_s0 + $0x5a8] sm:$0xff]  ;;  %v226_v60 = vld [vmem:[%s11408_s0 + $0x5b0] sm:$0xff]  ;;  %v227_v63 = vld [vmem:[%s11408_s0 + $0x5b8] sm:$0xff] }
  0x12   :  { %v69_v59 = vld [vmem:[%s11408_s0 + $0xc8] sm:$0xff]  ;;  %v70_v62 = vld [vmem:[%s11408_s0 + $0xd0] sm:$0xff]  ;;  %v324_v0 = vld [vmem:[%s11408_s0 + $0x8c0] sm:$0xff] }
  0x13   :  { %5858 = vmatmul.msk.f32.gmra.mxu0 %vm565_vm1, %v45_v6  ;;  %6137 = vmatmul.msk.f32.vlgmr.msra.gmra.mxu2 %vm565_vm1, %v324_v0  ;;  %v71_v2 = vld [vmem:[%s11408_s0 + $0xd8] sm:$0xff]  ;;  %v228_v3 = vld [vmem:[%s11408_s0 + $0x5c0] sm:$0xff]  ;;  %v325_v4 = vld [vmem:[%s11408_s0 + $0x8c8] sm:$0xff] }
  0x14   :  { %6021 = vmatmul.msk.f32.gmra.mxu1 %vm565_vm1, %v208_v14  ;;  %v72_v6 = vld [vmem:[%s11408_s0 + $0xe0] sm:$0xff]  ;;  %v327_v12 = vld [vmem:[%s11408_s0 + $0x8d8] sm:$0xff]  ;;  %v74_v14 = vld [vmem:[%s11408_s0 + $0xf0] sm:$0xff] }
  0x15   :  { %v78_v0 = vld [vmem:[%s11408_s0 + $0x110] sm:$0xff] }
  0x1b   :  { %5859 = vmatmul.msk.f32.gmra.mxu0 %vm565_vm1, %v46_v7  ;;  %6138 = vmatmul.msk.f32.gmra.mxu2 %vm565_vm1, %v325_v4  ;;  %v229_v7 = vld [vmem:[%s11408_s0 + $0x5c8] sm:$0xff]  ;;  %v235_v4 = vld [vmem:[%s11408_s0 + $0x5f8] sm:$0xff] }
  0x1c   :  { %6022 = vmatmul.msk.f32.gmra.mxu1 %vm565_vm1, %v209_v16  ;;  %v231_v16 = vld [vmem:[%s11408_s0 + $0x5d8] sm:$0xff] }
  0x23   :  { %5860 = vmatmul.msk.f32.gmra.mxu0 %vm565_vm1, %v47_v8  ;;  %v326_v8 = vld [vmem:[%s11408_s0 + $0x8d0] sm:$0xff] }
  0x24   :  { %6023 = vmatmul.msk.f32.gmra.mxu1 %vm565_vm1, %v210_v18  ;;  %6139 = vmatmul.msk.f32.gmra.mxu2 %vm565_vm1, %v326_v8  ;;  %v6865_v18 = vld [vmem:[%s11407_s2] ss:$0 sm:$0xff]  ;;  %v79_v8 = vld [vmem:[%s11408_s0 + $0x118] sm:$0xff] }
  0x2b   :  { %5861 = vmatmul.msk.f32.gmra.mxu0 %vm565_vm1, %v48_v9 }
  0x2c   :  { %6024 = vmatmul.msk.f32.gmra.mxu1 %vm565_vm1, %v211_v20  ;;  %6140 = vmatmul.msk.f32.gmra.mxu2 %vm565_vm1, %v327_v12  ;;  %v75_v20 = vld [vmem:[%s11408_s0 + $0xf8] sm:$0xff] }
  0x33   :  { %5862 = vmatmul.msk.f32.gmra.mxu0 %vm565_vm1, %v49_v10  ;;  %v73_v10 = vld [vmem:[%s11408_s0 + $0xe8] sm:$0xff] }
  0x34   :  { %6025 = vmatmul.msk.f32.gmra.mxu1 %vm565_vm1, %v212_v22 }
  0x3b   :  { %5863 = vmatmul.msk.f32.gmra.mxu0 %vm565_vm1, %v50_v11  ;;  %v230_v11 = vld [vmem:[%s11408_s0 + $0x5d0] sm:$0xff] }
  0x3c   :  { %6026 = vmatmul.msk.f32.gmra.mxu1 %vm565_vm1, %v213_v24 }
  0x43   :  { %5864 = vmatmul.msk.f32.gmra.mxu0 %vm565_vm1, %v51_v13 }
  0x44   :  { %6027 = vmatmul.msk.f32.gmra.mxu1 %vm565_vm1, %v214_v26  ;;  %v232_v26 = vld [vmem:[%s11408_s0 + $0x5e0] sm:$0xff] }
  0x4b   :  { %5865 = vmatmul.msk.f32.gmra.mxu0 %vm565_vm1, %v52_v15 }
  0x4c   :  { %6028 = vmatmul.msk.f32.gmra.mxu1 %vm565_vm1, %v215_v28 }
  0x53   :  { %5866 = vmatmul.msk.f32.gmra.mxu0 %vm565_vm1, %v53_v17  ;;  %v328_v17 = vld [vmem:[%s11408_s0 + $0x8e0] sm:$0xff] }
  0x54   :  { %6029 = vmatmul.msk.f32.gmra.mxu1 %vm565_vm1, %v216_v30  ;;  %6141 = vmatmul.msk.f32.gmra.mxu2 %vm565_vm1, %v328_v17  ;;  %v334_v17 = vld [vmem:[%s11408_s0 + $0x910] sm:$0xff] }
  0x5b   :  { %5867 = vmatmul.msk.f32.gmra.mxu0 %vm565_vm1, %v54_v19 }
  0x5c   :  { %6030 = vmatmul.msk.f32.gmra.mxu1 %vm565_vm1, %v217_v33 }
  0x63   :  { %5868 = vmatmul.msk.f32.gmra.mxu0 %vm565_vm1, %v55_v21 }
  0x64   :  { %6031 = vmatmul.msk.f32.gmra.mxu1 %vm565_vm1, %v218_v36 }
  0x6b   :  { %5869 = vmatmul.msk.f32.gmra.mxu0 %vm565_vm1, %v56_v23 }
  0x6c   :  { %6032 = vmatmul.msk.f32.gmra.mxu1 %vm565_vm1, %v219_v39 }
  0x73   :  { %5870 = vmatmul.msk.f32.gmra.mxu0 %vm565_vm1, %v57_v25 }
  0x74   :  { %6033 = vmatmul.msk.f32.gmra.mxu1 %vm565_vm1, %v220_v42 }
  0x7b   :  { %5871 = vmatmul.msk.f32.gmra.mxu0 %vm565_vm1, %v58_v27  ;;  %v329_v27 = vld [vmem:[%s11408_s0 + $0x8e8] sm:$0xff] }
  0x7c   :  { %6034 = vmatmul.msk.f32.gmra.mxu1 %vm565_vm1, %v221_v45  ;;  %6142 = vmatmul.msk.f32.gmra.mxu2 %vm565_vm1, %v329_v27  ;;  %v330_v45 = vld [vmem:[%s11408_s0 + $0x8f0] sm:$0xff] }
  0x83   :  { %5872 = vmatmul.msk.f32.gmra.mxu0 %vm565_vm1, %v59_v29 }
  0x84   :  { %6035 = vmatmul.msk.f32.gmra.mxu1 %vm565_vm1, %v222_v48  ;;  %6143 = vmatmul.msk.f32.gmra.mxu2 %vm565_vm1, %v330_v45  ;;  %v440_v45 = vld [vmem:[%s11408_s0 + $0xc60] sm:$0xff] }
  0x88   :  { %v6700_v31 = vpop.f32.mrf.mxu0 }
  0x89   :  { %v6852_v15 = vpop.f32.mrf.mxu1 }
  0x8b   :  { %5873 = vmatmul.msk.f32.gmra.mxu0 %vm565_vm1, %v60_v32 }
  0x8c   :  { %6036 = vmatmul.msk.f32.gmra.mxu1 %vm565_vm1, %v223_v51 }
  0x90   :  { %v6710_v34 = vpop.f32.mrf.mxu0 }
  0x91   :  { %v6874_v25 = vpop.f32.mrf.mxu1 }
  0x93   :  { %5874 = vmatmul.msk.f32.gmra.mxu0 %vm565_vm1, %v61_v35  ;;  %v76_v35 = vld [vmem:[%s11408_s0 + $0x100] sm:$0xff] }
  0x94   :  { %6037 = vmatmul.msk.f32.gmra.mxu1 %vm565_vm1, %v224_v54  ;;  %v77_v54 = vld [vmem:[%s11408_s0 + $0x108] sm:$0xff] }
  0x98   :  { %v6720_v37 = vpop.f32.mrf.mxu0 }
  0x99   :  { %v6895_v42 = vpop.f32.mrf.mxu1 }
  0x9b   :  { %5875 = vmatmul.msk.f32.gmra.mxu0 %vm565_vm1, %v62_v38 }
  0x9c   :  { %6038 = vmatmul.msk.f32.gmra.mxu1 %vm565_vm1, %v225_v57 }
  0xa0   :  { %v6730_v40 = vpop.f32.mrf.mxu0 }
  0xa3   :  { %5876 = vmatmul.msk.f32.gmra.mxu0 %vm565_vm1, %v63_v41 }
  0xa4   :  { %6039 = vmatmul.msk.f32.gmra.mxu1 %vm565_vm1, %v226_v60  ;;  %v331_v60 = vld [vmem:[%s11408_s0 + $0x8f8] sm:$0xff] }
  0xa5   :  { %6144 = vmatmul.msk.f32.gmra.mxu2 %vm565_vm1, %v331_v60  ;;  %v339_v60 = vld [vmem:[%s11408_s0 + $0x938] sm:$0xff] }
  0xa8   :  { %v6740_v43 = vpop.f32.mrf.mxu0 }
  0xab   :  { %5877 = vmatmul.msk.f32.gmra.mxu0 %vm565_vm1, %v64_v44  ;;  %v233_v44 = vld [vmem:[%s11408_s0 + $0x5e8] sm:$0xff] }
  0xac   :  { %6040 = vmatmul.msk.f32.gmra.mxu1 %vm565_vm1, %v227_v63 }
  0xb0   :  { %v6750_v46 = vpop.f32.mrf.mxu0 }
  0xb3   :  { %5878 = vmatmul.msk.f32.gmra.mxu0 %vm565_vm1, %v65_v47 }
  0xb4   :  { %6041 = vmatmul.msk.f32.gmra.mxu1 %vm565_vm1, %v228_v3 }
  0xb8   :  { %v6760_v49 = vpop.f32.mrf.mxu0 }
  0xbb   :  { %5879 = vmatmul.msk.f32.gmra.mxu0 %vm565_vm1, %v66_v50 }
  0xbc   :  { %6042 = vmatmul.msk.f32.gmra.mxu1 %vm565_vm1, %v229_v7 }
  0xc0   :  { %v6770_v52 = vpop.f32.mrf.mxu0 }
  0xc1   :  { %v2145_v50 = vadd.f32 %v6865_v18, %v6770_v52 }
  0xc3   :  { %5880 = vmatmul.msk.f32.gmra.mxu0 %vm565_vm1, %v67_v53  ;;  %v3666_v52 = vmax.f32 %v2145_v50, 0.0 }
  0xc4   :  { %6043 = vmatmul.msk.f32.gmra.mxu1 %vm565_vm1, %v230_v11  ;;  %v333_v11 = vld [vmem:[%s11408_s0 + $0x908] sm:$0xff] }
  0xc8   :  { %v6780_v55 = vpop.f32.mrf.mxu0 }
  0xc9   :  { %v2148_v47 = vadd.f32 %v6865_v18, %v6780_v55  ;;  %v2139_v55 = vadd.f32 %v6865_v18, %v6750_v46  ;;  %v2136_v46 = vadd.f32 %v6865_v18, %v6740_v43  ;;  %v2127_v43 = vadd.f32 %v6865_v18, %v6710_v34 }
  0xca   :  { %v2124_v34 = vadd.f32 %v6865_v18, %v6700_v31  ;;  %v236_v31 = vld [vmem:[%s11408_s0 + $0x600] sm:$0xff] }
  0xcb   :  { %5881 = vmatmul.msk.f32.gmra.mxu0 %vm565_vm1, %v68_v56  ;;  %v2142_v56 = vadd.f32 %v6865_v18, %v6760_v49  ;;  %v3667_v57 = vmax.f32 %v2148_v47, 0.0 }
  0xcc   :  { %6044 = vmatmul.msk.f32.gmra.mxu1 %vm565_vm1, %v231_v16  ;;  %v237_v16 = vld [vmem:[%s11408_s0 + $0x608] sm:$0xff] }
  0xcd   :  { %v3665_v49 = vmax.f32 %v2142_v56, 0.0  ;;  %v441_v56 = vld [vmem:[%s11408_s0 + $0xc68] sm:$0xff] }
  0xd0   :  { %v6790_v58 = vpop.f32.mrf.mxu0 }
  0xd1   :  { %v2151_v39 = vadd.f32 %v6865_v18, %v6790_v58  ;;  %v6919_v58 = vpop.f32.mrf.mxu1 }
  0xd3   :  { %5882 = vmatmul.msk.f32.gmra.mxu0 %vm565_vm1, %v69_v59  ;;  %v3668_v51 = vmax.f32 %v2151_v39, 0.0  ;;  %v234_v59 = vld [vmem:[%s11408_s0 + $0x5f0] sm:$0xff] }
  0xd4   :  { %6045 = vmatmul.msk.f32.gmra.mxu1 %vm565_vm1, %v232_v26  ;;  %v438_v26 = vld [vmem:[%s11408_s0 + $0xc50] sm:$0xff] }
  0xd8   :  { %v2153_v61 = vpop.f32.mrf.mxu0 }
  0xd9   :  { %v2154_v36 = vadd.f32 %v6865_v18, %v2153_v61  ;;  %v2133_v61 = vadd.f32 %v6865_v18, %v6730_v40  ;;  %v6943_v3 = vpop.f32.mrf.mxu1 }
  0xdb   :  { %5883 = vmatmul.msk.f32.gmra.mxu0 %vm565_vm1, %v70_v62  ;;  %v3669_v48 = vmax.f32 %v2154_v36, 0.0  ;;  %v3664_v62 = vmax.f32 %v2139_v55, 0.0  ;;  %v3662_v40 = vmax.f32 %v2133_v61, 0.0  ;;  %v85_v55 = vld [vmem:[%s11408_s0 + $0x148] sm:$0xff]  ;;  %v86_v61 = vld [vmem:[%s11408_s0 + $0x150] sm:$0xff] }
  0xdc   :  { %6046 = vmatmul.msk.f32.gmra.mxu1 %vm565_vm1, %v233_v44  ;;  %v337_v44 = vld [vmem:[%s11408_s0 + $0x928] sm:$0xff] }
  0xe0   :  { %v2156_v1 = vpop.f32.mrf.mxu0 }
  0xe1   :  { %v2157_v30 = vadd.f32 %v6865_v18, %v2156_v1  ;;  %v2130_v1 = vadd.f32 %v6865_v18, %v6720_v37 }
  0xe3   :  { %5884 = vmatmul.msk.f32.gmra.mxu0 %vm565_vm1, %v71_v2  ;;  %v3670_v41 = vmax.f32 %v2157_v30, 0.0  ;;  %v3663_v2 = vmax.f32 %v2136_v46, 0.0  ;;  %v3661_v37 = vmax.f32 %v2130_v1, 0.0  ;;  %v239_v30 = vld [vmem:[%s11408_s0 + $0x618] sm:$0xff]  ;;  %v442_v46 = vld [vmem:[%s11408_s0 + $0xc70] sm:$0xff]  ;;  %v340_v1 = vld [vmem:[%s11408_s0 + $0x940] sm:$0xff] }
  0xe4   :  { %6047 = vmatmul.msk.f32.gmra.mxu1 %vm565_vm1, %v234_v59  ;;  %v242_v59 = vld [vmem:[%s11408_s0 + $0x630] sm:$0xff] }
  0xe8   :  { %v2159_v5 = vpop.f32.mrf.mxu0 }
  0xe9   :  { %v2160_v28 = vadd.f32 %v6865_v18, %v2159_v5  ;;  %v332_v5 = vld [vmem:[%s11408_s0 + $0x900] sm:$0xff] }
  0xea   :  { %6145 = vmatmul.msk.f32.gmra.mxu2 %vm565_vm1, %v332_v5  ;;  %v244_v5 = vld [vmem:[%s11408_s0 + $0x640] sm:$0xff] }
  0xeb   :  { %5885 = vmatmul.msk.f32.gmra.mxu0 %vm565_vm1, %v72_v6  ;;  %v3671_v38 = vmax.f32 %v2160_v28, 0.0  ;;  %v3660_v6 = vmax.f32 %v2127_v43, 0.0  ;;  %v82_v28 = vld [vmem:[%s11408_s0 + $0x130] sm:$0xff] }
  0xec   :  { %6048 = vmatmul.msk.f32.gmra.mxu1 %vm565_vm1, %v235_v4 }
  0xf0   :  { %v2162_v9 = vpop.f32.mrf.mxu0 }
  0xf1   :  { %v2163_v23 = vadd.f32 %v6865_v18, %v2162_v9  ;;  %v3659_v9 = vmax.f32 %v2124_v34, 0.0  ;;  %v341_v34 = vld [vmem:[%s11408_s0 + $0x948] sm:$0xff] }
  0xf2   :  { %6146 = vmatmul.msk.f32.gmra.mxu2 %vm565_vm1, %v333_v11  ;;  %v342_v11 = vld [vmem:[%s11408_s0 + $0x950] sm:$0xff] }
  0xf3   :  { %5886 = vmatmul.msk.f32.gmra.mxu0 %vm565_vm1, %v73_v10  ;;  %v3672_v32 = vmax.f32 %v2163_v23, 0.0  ;;  %v6961_v10 = vpop.f32.mrf.mxu1  ;;  %v238_v23 = vld [vmem:[%s11408_s0 + $0x610] sm:$0xff] }
  0xf4   :  { %6049 = vmatmul.msk.f32.gmra.mxu1 %vm565_vm1, %v236_v31  ;;  %v245_v31 = vld [vmem:[%s11408_s0 + $0x648] sm:$0xff] }
  0xf8   :  { %v2165_v13 = vpop.f32.mrf.mxu0 }
  0xf9   :  { %v2166_v21 = vadd.f32 %v6865_v18, %v2165_v13  ;;  %v80_v13 = vld [vmem:[%s11408_s0 + $0x120] sm:$0xff] }
  0xfa   :  { %6147 = vmatmul.msk.f32.gmra.mxu2 %vm565_vm1, %v334_v17  ;;  %v89_v17 = vld [vmem:[%s11408_s0 + $0x168] sm:$0xff] }
  0xfb   :  { %5887 = vmatmul.msk.f32.gmra.mxu0 %vm565_vm1, %v74_v14  ;;  %v3673_v29 = vmax.f32 %v2166_v21, 0.0  ;;  %v6977_v14 = vpop.f32.mrf.mxu1  ;;  %v81_v21 = vld [vmem:[%s11408_s0 + $0x128] sm:$0xff] }
  0xfc   :  { %6050 = vmatmul.msk.f32.gmra.mxu1 %vm565_vm1, %v237_v16 }
 0x100   :  { %v2168_v19 = vpop.f32.mrf.mxu0 }
 0x101   :  { %v2169_v22 = vadd.f32 %v6865_v18, %v2168_v19  ;;  %v437_v19 = vld [vmem:[%s11408_s0 + $0xc48] sm:$0xff] }
 0x102   :  { %6250 = vmatmul.msk.f32.vlgmr.msra.gmra.mxu3 %vm565_vm1, %v437_v19 }
 0x103   :  { %5888 = vmatmul.msk.f32.gmra.mxu0 %vm565_vm1, %v75_v20  ;;  %v3674_v24 = vmax.f32 %v2169_v22, 0.0  ;;  %v6997_v22 = vpop.f32.mrf.mxu1 }
 0x104   :  { %6051 = vmatmul.msk.f32.gmra.mxu1 %vm565_vm1, %v238_v23  ;;  %v343_v23 = vld [vmem:[%s11408_s0 + $0x958] sm:$0xff] }
 0x105   :  { %4467 = vmatpush.msrb.mxu1 %v3674_v24  ;;  %v335_v24 = vld [vmem:[%s11408_s0 + $0x918] sm:$0xff] }
 0x106   :  { %6148 = vmatmul.msk.f32.gmra.mxu2 %vm565_vm1, %v335_v24  ;;  %v446_v24 = vld [vmem:[%s11408_s0 + $0xc90] sm:$0xff] }
 0x107   :  { %4468 = vmatpush.msrb.mxu1 %v3673_v29 }
 0x108   :  { %v6886_v33 = vpop.f32.mrf.mxu0 }
 0x109   :  { %4469 = vmatpush.msrb.mxu1 %v3672_v32  ;;  %v336_v32 = vld [vmem:[%s11408_s0 + $0x920] sm:$0xff] }
 0x10a   :  { %6251 = vmatmul.msk.f32.gmra.mxu3 %vm565_vm1, %v438_v26 }
 0x10b   :  { %5889 = vmatmul.msk.f32.gmra.mxu0 %vm565_vm1, %v76_v35  ;;  %4470 = vmatpush.msrb.mxu1 %v3671_v38  ;;  %v7017_v29 = vpop.f32.mrf.mxu1  ;;  %v439_v35 = vld [vmem:[%s11408_s0 + $0xc58] sm:$0xff] }
 0x10c   :  { %6052 = vmatmul.msk.f32.gmra.mxu1 %vm565_vm1, %v239_v30  ;;  %v83_v38 = vld [vmem:[%s11408_s0 + $0x138] sm:$0xff] }
 0x10d   :  { %4471 = vmatpush.msrb.mxu1 %v3670_v41  ;;  %v240_v41 = vld [vmem:[%s11408_s0 + $0x620] sm:$0xff] }
 0x10e   :  { %6149 = vmatmul.msk.f32.gmra.mxu2 %vm565_vm1, %v336_v32  ;;  %v247_v32 = vld [vmem:[%s11408_s0 + $0x658] sm:$0xff] }
 0x10f   :  { %4472 = vmatpush.msrb.mxu1 %v3669_v48  ;;  %v84_v48 = vld [vmem:[%s11408_s0 + $0x140] sm:$0xff] }
 0x110   :  { %v6909_v53 = vpop.f32.mrf.mxu0 }
 0x111   :  { %4473 = vmatpush.msrb.mxu1 %v3668_v51  ;;  %v241_v51 = vld [vmem:[%s11408_s0 + $0x628] sm:$0xff] }
 0x112   :  { %6252 = vmatmul.msk.f32.gmra.mxu3 %vm565_vm1, %v439_v35  ;;  %v344_v35 = vld [vmem:[%s11408_s0 + $0x960] sm:$0xff] }
 0x113   :  { %5890 = vmatmul.msk.f32.gmra.mxu0 %vm565_vm1, %v77_v54  ;;  %4474 = vmatpush.msrb.mxu1 %v3667_v57  ;;  %v7037_v39 = vpop.f32.mrf.mxu1  ;;  %v338_v54 = vld [vmem:[%s11408_s0 + $0x930] sm:$0xff] }
 0x114   :  { %6053 = vmatmul.msk.f32.gmra.mxu1 %vm565_vm1, %v240_v41 }
 0x115   :  { %4475 = vmatpush.msrb.mxu1 %v3666_v52 }
 0x116   :  { %6150 = vmatmul.msk.f32.gmra.mxu2 %vm565_vm1, %v337_v44  ;;  %v91_v44 = vld [vmem:[%s11408_s0 + $0x178] sm:$0xff] }
 0x117   :  { %4476 = vmatpush.msrb.mxu1 %v3665_v49 }
 0x118   :  { %v6933_v63 = vpop.f32.mrf.mxu0 }
 0x119   :  { %4477 = vmatpush.msrb.mxu1 %v3664_v62 }
 0x11a   :  { %6253 = vmatmul.msk.f32.gmra.mxu3 %vm565_vm1, %v440_v45 }
 0x11b   :  { %5891 = vmatmul.msk.f32.gmra.mxu0 %vm565_vm1, %v78_v0  ;;  %4478 = vmatpush.msrb.mxu1 %v3663_v2  ;;  %v7057_v50 = vpop.f32.mrf.mxu1  ;;  %v243_v0 = vld [vmem:[%s11408_s0 + $0x638] sm:$0xff] }
 0x11c   :  { %6054 = vmatmul.msk.f32.gmra.mxu1 %vm565_vm1, %v241_v51  ;;  %v443_v2 = vld [vmem:[%s11408_s0 + $0xc78] sm:$0xff] }
 0x11d   :  { %4479 = vmatpush.msrb.mxu1 %v3662_v40  ;;  %v87_v40 = vld [vmem:[%s11408_s0 + $0x158] sm:$0xff] }
 0x11e   :  { %6151 = vmatmul.msk.f32.gmra.mxu2 %vm565_vm1, %v338_v54 }
 0x11f   :  { %4480 = vmatpush.msrb.mxu1 %v3661_v37  ;;  %v444_v37 = vld [vmem:[%s11408_s0 + $0xc80] sm:$0xff] }
 0x120   :  { %v6955_v7 = vpop.f32.mrf.mxu0 }
 0x121   :  { %4481 = vmatpush.msrb.mxu1 %v3660_v6 }
 0x122   :  { %6254 = vmatmul.msk.f32.gmra.mxu3 %vm565_vm1, %v441_v56 }
 0x123   :  { %5892 = vmatmul.msk.f32.gmra.mxu0 %vm565_vm1, %v79_v8  ;;  %4482 = vmatpush.msrb.mxu1 %v3659_v9  ;;  %v7077_v52 = vpop.f32.mrf.mxu1  ;;  %v88_v8 = vld [vmem:[%s11408_s0 + $0x160] sm:$0xff] }
 0x124   :  { %6055 = vmatmul.msk.f32.gmra.mxu1 %vm565_vm1, %v242_v59  ;;  %v345_v59 = vld [vmem:[%s11408_s0 + $0x968] sm:$0xff] }
 0x126   :  { %6152 = vmatmul.msk.f32.gmra.mxu2 %vm565_vm1, %v339_v60  ;;  %v448_v60 = vld [vmem:[%s11408_s0 + $0xca0] sm:$0xff] }
 0x128   :  { %v6971_v12 = vpop.f32.mrf.mxu0 }
 0x12a   :  { %6255 = vmatmul.msk.f32.gmra.mxu3 %vm565_vm1, %v442_v46 }
 0x12b   :  { %5893 = vmatmul.msk.f32.gmra.mxu0 %vm565_vm1, %v80_v13  ;;  %v7097_v62 = vpop.f32.mrf.mxu1  ;;  %v445_v13 = vld [vmem:[%s11408_s0 + $0xc88] sm:$0xff] }
 0x12c   :  { %6056 = vmatmul.msk.f32.gmra.mxu1 %vm565_vm1, %v243_v0 }
 0x12e   :  { %6153 = vmatmul.msk.f32.gmra.mxu2 %vm565_vm1, %v340_v1 }
 0x130   :  { %v6991_v20 = vpop.f32.mrf.mxu0 }
 0x132   :  { %6256 = vmatmul.msk.f32.gmra.mxu3 %vm565_vm1, %v443_v2 }
 0x133   :  { %5894 = vmatmul.msk.f32.gmra.mxu0 %vm565_vm1, %v81_v21  ;;  %v7115_v4 = vpop.f32.mrf.mxu1  ;;  %v246_v21 = vld [vmem:[%s11408_s0 + $0x650] sm:$0xff] }
 0x134   :  { %6057 = vmatmul.msk.f32.gmra.mxu1 %vm565_vm1, %v244_v5 }
 0x136   :  { %6154 = vmatmul.msk.f32.gmra.mxu2 %vm565_vm1, %v341_v34 }
 0x138   :  { %v7011_v27 = vpop.f32.mrf.mxu0 }
 0x13a   :  { %6257 = vmatmul.msk.f32.gmra.mxu3 %vm565_vm1, %v444_v37 }
 0x13b   :  { %5895 = vmatmul.msk.f32.gmra.mxu0 %vm565_vm1, %v82_v28  ;;  %v7133_v9 = vpop.f32.mrf.mxu1  ;;  %v90_v28 = vld [vmem:[%s11408_s0 + $0x170] sm:$0xff] }
 0x13c   :  { %6058 = vmatmul.msk.f32.gmra.mxu1 %vm565_vm1, %v245_v31  ;;  %v346_v31 = vld [vmem:[%s11408_s0 + $0x970] sm:$0xff] }
 0x13e   :  { %6155 = vmatmul.msk.f32.gmra.mxu2 %vm565_vm1, %v342_v11 }
 0x140   :  { %v7031_v36 = vpop.f32.mrf.mxu0 }
 0x142   :  { %6258 = vmatmul.msk.f32.gmra.mxu3 %vm565_vm1, %v445_v13  ;;  %v2193_v13 = vadd.f32 %v6865_v18, %v7031_v36 }
 0x143   :  { %5896 = vmatmul.msk.f32.gmra.mxu0 %vm565_vm1, %v83_v38  ;;  %v7151_v19 = vpop.f32.mrf.mxu1  ;;  %v447_v38 = vld [vmem:[%s11408_s0 + $0xc98] sm:$0xff] }
 0x144   :  { %6059 = vmatmul.msk.f32.gmra.mxu1 %vm565_vm1, %v246_v21  ;;  %v93_v21 = vld [vmem:[%s11408_s0 + $0x188] sm:$0xff]  ;;  %v3682_v36 = vmax.f32 %v2193_v13, 0.0  ;;  %v350_v13 = vld [vmem:[%s11408_s0 + $0x990] sm:$0xff] }
 0x146   :  { %6156 = vmatmul.msk.f32.gmra.mxu2 %vm565_vm1, %v343_v23  ;;  %v2190_v23 = vadd.f32 %v6865_v18, %v7011_v27  ;;  %v450_v27 = vld [vmem:[%s11408_s0 + $0xcb0] sm:$0xff] }
 0x148   :  { %v7051_v47 = vpop.f32.mrf.mxu0 }
 0x14a   :  { %6259 = vmatmul.msk.f32.gmra.mxu3 %vm565_vm1, %v446_v24  ;;  %v2187_v24 = vadd.f32 %v6865_v18, %v6991_v20  ;;  %v2184_v20 = vadd.f32 %v6865_v18, %v6971_v12 }
 0x14b   :  { %5897 = vmatmul.msk.f32.gmra.mxu0 %vm565_vm1, %v84_v48  ;;  %v7169_v30 = vpop.f32.mrf.mxu1 }
 0x14c   :  { %6060 = vmatmul.msk.f32.gmra.mxu1 %vm565_vm1, %v247_v32  ;;  %v347_v32 = vld [vmem:[%s11408_s0 + $0x978] sm:$0xff]  ;;  %v3679_v12 = vmax.f32 %v2184_v20, 0.0  ;;  %v98_v20 = vld [vmem:[%s11408_s0 + $0x1b0] sm:$0xff] }
 0x14e   :  { %6157 = vmatmul.msk.f32.gmra.mxu2 %vm565_vm1, %v344_v35  ;;  %v3681_v35 = vmax.f32 %v2190_v23, 0.0  ;;  %v97_v23 = vld [vmem:[%s11408_s0 + $0x1a8] sm:$0xff] }
 0x150   :  { %v7071_v57 = vpop.f32.mrf.mxu0 }
 0x151   :  { %v2199_v37 = vadd.f32 %v6865_v18, %v7071_v57  ;;  %v2196_v57 = vadd.f32 %v6865_v18, %v7051_v47 }
 0x152   :  { %6260 = vmatmul.msk.f32.gmra.mxu3 %vm565_vm1, %v447_v38  ;;  %v2181_v38 = vadd.f32 %v6865_v18, %v6955_v7 }
 0x153   :  { %5898 = vmatmul.msk.f32.gmra.mxu0 %vm565_vm1, %v85_v55  ;;  %v7190_v56 = vpop.f32.mrf.mxu1  ;;  %v248_v55 = vld [vmem:[%s11408_s0 + $0x660] sm:$0xff]  ;;  %v3683_v47 = vmax.f32 %v2196_v57, 0.0  ;;  %v253_v57 = vld [vmem:[%s11408_s0 + $0x688] sm:$0xff] }
 0x154   :  { %6061 = vmatmul.msk.f32.gmra.mxu1 %vm565_vm1, %v248_v55  ;;  %v3678_v7 = vmax.f32 %v2181_v38, 0.0  ;;  %v251_v55 = vld [vmem:[%s11408_s0 + $0x678] sm:$0xff] }
 0x155   :  { %v255_v38 = vld [vmem:[%s11408_s0 + $0x698] sm:$0xff] }
 0x156   :  { %6158 = vmatmul.msk.f32.gmra.mxu2 %vm565_vm1, %v345_v59  ;;  %v7277_v59 = vpop.f32.mrf.mxu2 }
 0x157   :  { %11424 = vst [vmem:[#allocation2_spill] sm:$0xff] %v7277_v59 }
 0x158   :  { %v7091_v49 = vpop.f32.mrf.mxu0 }
 0x159   :  { %v2202_v5 = vadd.f32 %v6865_v18, %v7091_v49  ;;  %v449_v49 = vld [vmem:[%s11408_s0 + $0xca8] sm:$0xff] }
 0x15a   :  { %6261 = vmatmul.msk.f32.gmra.mxu3 %vm565_vm1, %v448_v60  ;;  %v2172_v60 = vadd.f32 %v6865_v18, %v6886_v33  ;;  %v252_v33 = vld [vmem:[%s11408_s0 + $0x680] sm:$0xff] }
 0x15b   :  { %5899 = vmatmul.msk.f32.gmra.mxu0 %vm565_vm1, %v86_v61  ;;  %v3685_v11 = vmax.f32 %v2202_v5, 0.0 }
 0x15e   :  { %6159 = vmatmul.msk.f32.gmra.mxu2 %vm565_vm1, %v346_v31  ;;  %v96_v31 = vld [vmem:[%s11408_s0 + $0x1a0] sm:$0xff] }
 0x160   :  { %v2204_v43 = vpop.f32.mrf.mxu0 }
 0x161   :  { %v2205_v0 = vadd.f32 %v6865_v18, %v2204_v43 }
 0x162   :  { %6262 = vmatmul.msk.f32.gmra.mxu3 %vm565_vm1, %v449_v49 }
 0x163   :  { %5900 = vmatmul.msk.f32.gmra.mxu0 %vm565_vm1, %v87_v40  ;;  %v92_v40 = vld [vmem:[%s11408_s0 + $0x180] sm:$0xff]  ;;  %v3686_v43 = vmax.f32 %v2205_v0, 0.0 }
 0x166   :  { %6160 = vmatmul.msk.f32.gmra.mxu2 %vm565_vm1, %v347_v32  ;;  %v454_v32 = vld [vmem:[%s11408_s0 + $0xcd0] sm:$0xff] }
 0x168   :  { %v2207_v6 = vpop.f32.mrf.mxu0 }
 0x169   :  { %v2208_v46 = vadd.f32 %v6865_v18, %v2207_v6  ;;  %v7216_v6 = vpop.f32.mrf.mxu1 }
 0x16a   :  { %6263 = vmatmul.msk.f32.gmra.mxu3 %vm565_vm1, %v450_v27 }
 0x16b   :  { %5901 = vmatmul.msk.f32.gmra.mxu0 %vm565_vm1, %v88_v8  ;;  %v3687_v34 = vmax.f32 %v2208_v46, 0.0  ;;  %v249_v8 = vld [vmem:[%s11408_s0 + $0x668] sm:$0xff] }
 0x16c   :  { %6062 = vmatmul.msk.f32.gmra.mxu1 %vm565_vm1, %v249_v8 }
 0x170   :  { %v2210_v16 = vpop.f32.mrf.mxu0 }
 0x171   :  { %v2211_v51 = vadd.f32 %v6865_v18, %v2210_v16  ;;  %v3684_v16 = vmax.f32 %v2199_v37, 0.0  ;;  %v349_v37 = vld [vmem:[%s11408_s0 + $0x988] sm:$0xff] }
 0x173   :  { %5902 = vmatmul.msk.f32.gmra.mxu0 %vm565_vm1, %v89_v17  ;;  %v3688_v1 = vmax.f32 %v2211_v51, 0.0  ;;  %v2175_v51 = vadd.f32 %v6865_v18, %v6909_v53  ;;  %v451_v53 = vld [vmem:[%s11408_s0 + $0xcb8] sm:$0xff] }
 0x174   :  { %6264 = vmatmul.msk.f32.gmra.mxu3 %vm565_vm1, %v451_v53  ;;  %v353_v53 = vld [vmem:[%s11408_s0 + $0x9a8] sm:$0xff] }
 0x178   :  { %v2213_v26 = vpop.f32.mrf.mxu0 }
 0x179   :  { %v2214_v45 = vadd.f32 %v6865_v18, %v2213_v26  ;;  %v7244_v26 = vpop.f32.mrf.mxu1 }
 0x17b   :  { %5903 = vmatmul.msk.f32.gmra.mxu0 %vm565_vm1, %v90_v28  ;;  %v3689_v61 = vmax.f32 %v2214_v45, 0.0  ;;  %v250_v28 = vld [vmem:[%s11408_s0 + $0x670] sm:$0xff] }
 0x17c   :  { %6063 = vmatmul.msk.f32.gmra.mxu1 %vm565_vm1, %v250_v28  ;;  %v94_v45 = vld [vmem:[%s11408_s0 + $0x190] sm:$0xff]  ;;  %v351_v28 = vld [vmem:[%s11408_s0 + $0x998] sm:$0xff] }
 0x180   :  { %v2216_v41 = vpop.f32.mrf.mxu0 }
 0x181   :  { %v2217_v48 = vadd.f32 %v6865_v18, %v2216_v41  ;;  %v3680_v41 = vmax.f32 %v2187_v24, 0.0  ;;  %v254_v24 = vld [vmem:[%s11408_s0 + $0x690] sm:$0xff] }
 0x183   :  { %5904 = vmatmul.msk.f32.gmra.mxu0 %vm565_vm1, %v91_v44  ;;  %v3690_v54 = vmax.f32 %v2217_v48, 0.0  ;;  %v2178_v48 = vadd.f32 %v6865_v18, %v6933_v63  ;;  %v348_v63 = vld [vmem:[%s11408_s0 + $0x980] sm:$0xff] }
 0x184   :  { %6161 = vmatmul.msk.f32.gmra.mxu2 %vm565_vm1, %v348_v63 }
 0x185   :  { %4490 = vmatpush.msrb.mxu2 %v3690_v54  ;;  %v7272_v54 = vpop.f32.mrf.mxu1  ;;  %6064 = vmatmul.msk.f32.gmra.mxu1 %vm565_vm1, %v251_v55  ;;  %v3677_v46 = vmax.f32 %v2178_v48, 0.0  ;;  %v455_v48 = vld [vmem:[%s11408_s0 + $0xcd8] sm:$0xff]  ;;  %v256_v55 = vld [vmem:[%s11408_s0 + $0x6a0] sm:$0xff] }
 0x187   :  { %4491 = vmatpush.msrb.mxu2 %v3689_v61  ;;  %v3676_v61 = vmax.f32 %v2175_v51, 0.0  ;;  %v99_v51 = vld [vmem:[%s11408_s0 + $0x1b8] sm:$0xff] }
 0x188   :  { %v7206_v2 = vpop.f32.mrf.mxu0 }
 0x189   :  { %4492 = vmatpush.msrb.mxu2 %v3688_v1  ;;  %v95_v1 = vld [vmem:[%s11408_s0 + $0x198] sm:$0xff] }
 0x18b   :  { %5905 = vmatmul.msk.f32.gmra.mxu0 %vm565_vm1, %v92_v40  ;;  %4493 = vmatpush.msrb.mxu2 %v3687_v34  ;;  %v3675_v40 = vmax.f32 %v2172_v60, 0.0  ;;  %v7301_v34 = vpop.f32.mrf.mxu2  ;;  %v456_v60 = vld [vmem:[%s11408_s0 + $0xce0] sm:$0xff] }
 0x18c   :  { %11425 = vst [vmem:[#allocation3_spill] sm:$0xff] %v7301_v34  ;;  %6162 = vmatmul.msk.f32.gmra.mxu2 %vm565_vm1, %v349_v37  ;;  %v354_v37 = vld [vmem:[%s11408_s0 + $0x9b0] sm:$0xff] }
 0x18d   :  { %4494 = vmatpush.msrb.mxu2 %v3686_v43  ;;  %v7296_v5 = vpop.f32.mrf.mxu1  ;;  %v452_v43 = vld [vmem:[%s11408_s0 + $0xcc0] sm:$0xff]  ;;  %6065 = vmatmul.msk.f32.gmra.mxu1 %vm565_vm1, %v252_v33 }
 0x18e   :  { %6265 = vmatmul.msk.f32.gmra.mxu3 %vm565_vm1, %v452_v43  ;;  %v457_v43 = vld [vmem:[%s11408_s0 + $0xce8] sm:$0xff] }
 0x18f   :  { %4495 = vmatpush.msrb.mxu2 %v3685_v11 }
 0x190   :  { %v7234_v17 = vpop.f32.mrf.mxu0 }
 0x191   :  { %4496 = vmatpush.msrb.mxu2 %v3684_v16  ;;  %v453_v16 = vld [vmem:[%s11408_s0 + $0xcc8] sm:$0xff] }
 0x193   :  { %5906 = vmatmul.msk.f32.gmra.mxu0 %vm565_vm1, %v93_v21  ;;  %4497 = vmatpush.msrb.mxu2 %v3683_v47  ;;  %v7323_v11 = vpop.f32.mrf.mxu2 }
 0x194   :  { %11426 = vst [vmem:[#allocation4_spill] sm:$0xff] %v7323_v11  ;;  %6163 = vmatmul.msk.f32.gmra.mxu2 %vm565_vm1, %v350_v13 }
 0x195   :  { %4498 = vmatpush.msrb.mxu2 %v3682_v36  ;;  %v7318_v49 = vpop.f32.mrf.mxu1  ;;  %6066 = vmatmul.msk.f32.gmra.mxu1 %vm565_vm1, %v253_v57  ;;  %v101_v57 = vld [vmem:[%s11408_s0 + $0x1c8] sm:$0xff] }
 0x196   :  { %6266 = vmatmul.msk.f32.gmra.mxu3 %vm565_vm1, %v453_v16  ;;  %v258_v16 = vld [vmem:[%s11408_s0 + $0x6b0] sm:$0xff] }
 0x197   :  { %4499 = vmatpush.msrb.mxu2 %v3681_v35 }
 0x198   :  { %v7262_v44 = vpop.f32.mrf.mxu0 }
 0x199   :  { %4500 = vmatpush.msrb.mxu2 %v3680_v41 }
 0x19b   :  { %5907 = vmatmul.msk.f32.gmra.mxu0 %vm565_vm1, %v94_v45  ;;  %4501 = vmatpush.msrb.mxu2 %v3679_v12  ;;  %v7345_v36 = vpop.f32.mrf.mxu2  ;;  %v352_v45 = vld [vmem:[%s11408_s0 + $0x9a0] sm:$0xff] }
 0x19c   :  { %11427 = vst [vmem:[#allocation5_spill] sm:$0xff] %v7345_v36  ;;  %6164 = vmatmul.msk.f32.gmra.mxu2 %vm565_vm1, %v351_v28  ;;  %v458_v28 = vld [vmem:[%s11408_s0 + $0xcf0] sm:$0xff] }
 0x19d   :  { %4502 = vmatpush.msrb.mxu2 %v3678_v7  ;;  %v7340_v47 = vpop.f32.mrf.mxu1  ;;  %6067 = vmatmul.msk.f32.gmra.mxu1 %vm565_vm1, %v254_v24  ;;  %v355_v24 = vld [vmem:[%s11408_s0 + $0x9b8] sm:$0xff] }
 0x19e   :  { %6267 = vmatmul.msk.f32.gmra.mxu3 %vm565_vm1, %v454_v32 }
 0x19f   :  { %4503 = vmatpush.msrb.mxu2 %v3677_v46 }
 0x1a0   :  { %v7290_v0 = vpop.f32.mrf.mxu0 }
 0x1a1   :  { %4504 = vmatpush.msrb.mxu2 %v3676_v61  ;;  %v100_v61 = vld [vmem:[%s11408_s0 + $0x1c0] sm:$0xff] }
 0x1a3   :  { %5908 = vmatmul.msk.f32.gmra.mxu0 %vm565_vm1, %v95_v1  ;;  %4505 = vmatpush.msrb.mxu2 %v3675_v40  ;;  %v7367_v41 = vpop.f32.mrf.mxu2  ;;  %v257_v40 = vld [vmem:[%s11408_s0 + $0x6a8] sm:$0xff] }
 0x1a4   :  { %11428 = vst [vmem:[#allocation6_spill] sm:$0xff] %v7367_v41  ;;  %6165 = vmatmul.msk.f32.gmra.mxu2 %vm565_vm1, %v352_v45  ;;  %v259_v45 = vld [vmem:[%s11408_s0 + $0x6b8] sm:$0xff] }
 0x1a5   :  { %v7362_v35 = vpop.f32.mrf.mxu1  ;;  %6068 = vmatmul.msk.f32.gmra.mxu1 %vm565_vm1, %v255_v38 }
 0x1a6   :  { %6268 = vmatmul.msk.f32.gmra.mxu3 %vm565_vm1, %v455_v48 }
 0x1a8   :  { %v7312_v8 = vpop.f32.mrf.mxu0 }
 0x1ab   :  { %5909 = vmatmul.msk.f32.gmra.mxu0 %vm565_vm1, %v96_v31  ;;  %v7389_v63 = vpop.f32.mrf.mxu2 }
 0x1ac   :  { %11429 = vst [vmem:[#allocation7_spill] sm:$0xff] %v7389_v63  ;;  %6166 = vmatmul.msk.f32.gmra.mxu2 %vm565_vm1, %v353_v53 }
 0x1ad   :  { %v7384_v7 = vpop.f32.mrf.mxu1  ;;  %6069 = vmatmul.msk.f32.gmra.mxu1 %vm565_vm1, %v256_v55  ;;  %v459_v55 = vld [vmem:[%s11408_s0 + $0xcf8] sm:$0xff] }
 0x1ae   :  { %6269 = vmatmul.msk.f32.gmra.mxu3 %vm565_vm1, %v456_v60  ;;  %v103_v60 = vld [vmem:[%s11408_s0 + $0x1d8] sm:$0xff] }
 0x1b0   :  { %v7334_v21 = vpop.f32.mrf.mxu0 }
 0x1b3   :  { %5910 = vmatmul.msk.f32.gmra.mxu0 %vm565_vm1, %v97_v23  ;;  %v7411_v33 = vpop.f32.mrf.mxu2 }
 0x1b4   :  { %11430 = vst [vmem:[#allocation8_spill] sm:$0xff] %v7411_v33  ;;  %6167 = vmatmul.msk.f32.gmra.mxu2 %vm565_vm1, %v354_v37 }
 0x1b5   :  { %v7406_v1 = vpop.f32.mrf.mxu1  ;;  %6070 = vmatmul.msk.f32.gmra.mxu1 %vm565_vm1, %v257_v40  ;;  %v260_v40 = vld [vmem:[%s11408_s0 + $0x6c0] sm:$0xff] }
 0x1b6   :  { %6270 = vmatmul.msk.f32.gmra.mxu3 %vm565_vm1, %v457_v43  ;;  %v357_v43 = vld [vmem:[%s11408_s0 + $0x9c8] sm:$0xff] }
 0x1b8   :  { %v7356_v27 = vpop.f32.mrf.mxu0 }
 0x1bb   :  { %5911 = vmatmul.msk.f32.gmra.mxu0 %vm565_vm1, %v98_v20  ;;  %v7433_v23 = vpop.f32.mrf.mxu2  ;;  %v102_v20 = vld [vmem:[%s11408_s0 + $0x1d0] sm:$0xff] }
 0x1bc   :  { %11431 = vst [vmem:[#allocation9_spill] sm:$0xff] %v7433_v23  ;;  %6168 = vmatmul.msk.f32.gmra.mxu2 %vm565_vm1, %v355_v24  ;;  %v104_v24 = vld [vmem:[%s11408_s0 + $0x1e0] sm:$0xff] }
 0x1bd   :  { %v7428_v13 = vpop.f32.mrf.mxu1  ;;  %6071 = vmatmul.msk.f32.gmra.mxu1 %vm565_vm1, %v258_v16 }
 0x1be   :  { %6271 = vmatmul.msk.f32.gmra.mxu3 %vm565_vm1, %v458_v28 }
 0x1c0   :  { %v7378_v12 = vpop.f32.mrf.mxu0 }
 0x1c3   :  { %5912 = vmatmul.msk.f32.gmra.mxu0 %vm565_vm1, %v99_v51  ;;  %v7455_v48 = vpop.f32.mrf.mxu2  ;;  %v356_v51 = vld [vmem:[%s11408_s0 + $0x9c0] sm:$0xff] }
 0x1c4   :  { %11432 = vst [vmem:[#allocation10_spill] sm:$0xff] %v7455_v48  ;;  %6169 = vmatmul.msk.f32.gmra.mxu2 %vm565_vm1, %v356_v51  ;;  %v358_v51 = vld [vmem:[%s11408_s0 + $0x9d0] sm:$0xff] }
 0x1c5   :  { %v7450_v38 = vpop.f32.mrf.mxu1  ;;  %6072 = vmatmul.msk.f32.gmra.mxu1 %vm565_vm1, %v259_v45  ;;  %v106_v48 = vld [vmem:[%s11408_s0 + $0x1f0] sm:$0xff] }
 0x1c6   :  { %6272 = vmatmul.msk.f32.gmra.mxu3 %vm565_vm1, %v459_v55  ;;  %v461_v55 = vld [vmem:[%s11408_s0 + $0xd08] sm:$0xff] }
 0x1c8   :  { %v7400_v46 = vpop.f32.mrf.mxu0 }
 0x1cb   :  { %5913 = vmatmul.msk.f32.gmra.mxu0 %vm565_vm1, %v100_v61  ;;  %v7477_v37 = vpop.f32.mrf.mxu2 }
 0x1cc   :  { %11434 = vst [vmem:[#allocation12_spill] sm:$0xff] %v7477_v37  ;;  %6170 = vmatmul.msk.f32.gmra.mxu2 %vm565_vm1, %v357_v43  ;;  %v105_v43 = vld [vmem:[%s11408_s0 + $0x1e8] sm:$0xff] }
 0x1cd   :  { %v7472_v61 = vpop.f32.mrf.mxu1  ;;  %6073 = vmatmul.msk.f32.gmra.mxu1 %vm565_vm1, %v260_v40 }
 0x1ce   :  { %11433 = vst [vmem:[#allocation11_spill] sm:$0xff] %v7472_v61 }
 0x1d0   :  { %v7422_v31 = vpop.f32.mrf.mxu0 }
 0x1d3   :  { %5914 = vmatmul.msk.f32.gmra.mxu0 %vm565_vm1, %v101_v57  ;;  %v460_v57 = vld [vmem:[%s11408_s0 + $0xd00] sm:$0xff]  ;;  %v7497_v45 = vpop.f32.mrf.mxu2 }
 0x1d4   :  { %6273 = vmatmul.msk.f32.gmra.mxu3 %vm565_vm1, %v460_v57  ;;  %11436 = vst [vmem:[#allocation14_spill] sm:$0xff] %v7497_v45  ;;  %6171 = vmatmul.msk.f32.gmra.mxu2 %vm565_vm1, %v358_v51  ;;  %v359_v51 = vld [vmem:[%s11408_s0 + $0x9d8] sm:$0xff] }
 0x1d5   :  { %v7492_v28 = vpop.f32.mrf.mxu1  ;;  %v263_v45 = vld [vmem:[%s11408_s0 + $0x6d8] sm:$0xff] }
 0x1d6   :  { %11435 = vst [vmem:[#allocation13_spill] sm:$0xff] %v7492_v28 }
 0x1d8   :  { %v7444_v32 = vpop.f32.mrf.mxu0 }
 0x1db   :  { %5915 = vmatmul.msk.f32.gmra.mxu0 %vm565_vm1, %v102_v20  ;;  %v261_v20 = vld [vmem:[%s11408_s0 + $0x6c8] sm:$0xff] }
 0x1dc   :  { %6074 = vmatmul.msk.f32.gmra.mxu1 %vm565_vm1, %v261_v20  ;;  %v7519_v20 = vpop.f32.mrf.mxu2  ;;  %6172 = vmatmul.msk.f32.gmra.mxu2 %vm565_vm1, %v359_v51  ;;  %v360_v51 = vld [vmem:[%s11408_s0 + $0x9e0] sm:$0xff] }
 0x1dd   :  { %v7514_v57 = vpop.f32.mrf.mxu1  ;;  %11439 = vst [vmem:[#allocation17_spill] sm:$0xff] %v7519_v20  ;;  %v107_v20 = vld [vmem:[%s11408_s0 + $0x1f8] sm:$0xff] }
 0x1de   :  { %11438 = vst [vmem:[#allocation16_spill] sm:$0xff] %v7514_v57 }
 0x1e0   :  { %v7466_v53 = vpop.f32.mrf.mxu0 }
 0x1e3   :  { %5916 = vmatmul.msk.f32.gmra.mxu0 %vm565_vm1, %v103_v60  ;;  %v7507_v60 = vpop.f32.mrf.mxu3  ;;  %6274 = vmatmul.msk.f32.gmra.mxu3 %vm565_vm1, %v461_v55  ;;  %v462_v55 = vld [vmem:[%s11408_s0 + $0xd10] sm:$0xff] }
 0x1e4   :  { %11437 = vst [vmem:[#allocation15_spill] sm:$0xff] %v7507_v60 }
 0x1e5   :  { %v7536_v37 = vpop.f32.mrf.mxu1 }
 0x1e6   :  { %11441 = vst [vmem:[#allocation19_spill] sm:$0xff] %v7536_v37 }
 0x1e8   :  { %v2255_v16 = vpop.f32.mrf.mxu0 }
 0x1eb   :  { %5917 = vmatmul.msk.f32.gmra.mxu0 %vm565_vm1, %v104_v24  ;;  %v262_v24 = vld [vmem:[%s11408_s0 + $0x6d0] sm:$0xff] }
 0x1ec   :  { %6075 = vmatmul.msk.f32.gmra.mxu1 %vm565_vm1, %v262_v24  ;;  %v7541_v24 = vpop.f32.mrf.mxu2  ;;  %6173 = vmatmul.msk.f32.gmra.mxu2 %vm565_vm1, %v360_v51  ;;  %v264_v51 = vld [vmem:[%s11408_s0 + $0x6e0] sm:$0xff] }
 0x1ed   :  { %11442 = vst [vmem:[#allocation20_spill] sm:$0xff] %v7541_v24  ;;  %v7561_v37 = vpop.f32.mrf.mxu1 }
 0x1ee   :  { %11444 = vst [vmem:[#allocation22_spill] sm:$0xff] %v7561_v37 }
 0x1f0   :  { %v2258_v40 = vpop.f32.mrf.mxu0 }
 0x1f1   :  { %v2259_v61 = vadd.f32 %v6865_v18, %v2258_v40 }
 0x1f3   :  { %5918 = vmatmul.msk.f32.gmra.mxu0 %vm565_vm1, %v105_v43  ;;  %v7529_v43 = vpop.f32.mrf.mxu3  ;;  %6275 = vmatmul.msk.f32.gmra.mxu3 %vm565_vm1, %v462_v55  ;;  %v463_v55 = vld [vmem:[%s11408_s0 + $0xd18] sm:$0xff] }
 0x1f4   :  { %11440 = vst [vmem:[#allocation18_spill] sm:$0xff] %v7529_v43  ;;  %6076 = vmatmul.msk.f32.gmra.mxu1 %vm565_vm1, %v263_v45 }
 0x1f8   :  { %v2261_v60 = vpop.f32.mrf.mxu0 }
 0x1f9   :  { %v2262_v24 = vadd.f32 %v6865_v18, %v2261_v60  ;;  %v464_v60 = vld [vmem:[%s11408_s0 + $0xd20] sm:$0xff] }
 0x1fb   :  { %5919 = vmatmul.msk.f32.gmra.mxu0 %vm565_vm1, %v106_v48  ;;  %v7551_v48 = vpop.f32.mrf.mxu3  ;;  %6276 = vmatmul.msk.f32.gmra.mxu3 %vm565_vm1, %v463_v55  ;;  %v7566_v55 = vpop.f32.mrf.mxu2 }
 0x1fc   :  { %11443 = vst [vmem:[#allocation21_spill] sm:$0xff] %v7551_v48  ;;  %v361_v48 = vld [vmem:[%s11408_s0 + $0x9e8] sm:$0xff]  ;;  %6077 = vmatmul.msk.f32.gmra.mxu1 %vm565_vm1, %v264_v51  ;;  %v108_v51 = vld [vmem:[%s11408_s0 + $0x200] sm:$0xff] }
 0x1fd   :  { %11445 = vst [vmem:[#allocation23_spill] sm:$0xff] %v7566_v55  ;;  %6174 = vmatmul.msk.f32.gmra.mxu2 %vm565_vm1, %v361_v48  ;;  %v3704_v55 = vmax.f32 %v2259_v61, 0.0  ;;  %v2250_v48 = vadd.f32 %v6865_v18, %v7444_v32  ;;  %v265_v61 = vld [vmem:[%s11408_s0 + $0x6e8] sm:$0xff]  ;;  %v362_v32 = vld [vmem:[%s11408_s0 + $0x9f0] sm:$0xff] }
 0x200   :  { %v2264_v43 = vpop.f32.mrf.mxu0 }
 0x201   :  { %v2265_v57 = vadd.f32 %v6865_v18, %v2264_v43  ;;  %v2253_v43 = vadd.f32 %v6865_v18, %v7466_v53 }
 0x203   :  { %5920 = vmatmul.msk.f32.gmra.mxu0 %vm565_vm1, %v107_v20  ;;  %v3706_v45 = vmax.f32 %v2265_v57, 0.0  ;;  %v7576_v40 = vpop.f32.mrf.mxu3  ;;  %v2256_v57 = vadd.f32 %v6865_v18, %v2255_v16  ;;  %v3705_v20 = vmax.f32 %v2262_v24, 0.0  ;;  %6277 = vmatmul.msk.f32.gmra.mxu3 %vm565_vm1, %v464_v60  ;;  %v2247_v24 = vadd.f32 %v6865_v18, %v7422_v31  ;;  %v7597_v60 = vpop.f32.mrf.mxu2  ;;  %v465_v31 = vld [vmem:[%s11408_s0 + $0xd28] sm:$0xff] }
 0x204   :  { %11446 = vst [vmem:[#allocation24_spill] sm:$0xff] %v7576_v40  ;;  %v3702_v53 = vmax.f32 %v2253_v43, 0.0  ;;  %v2241_v43 = vadd.f32 %v6865_v18, %v7378_v12 }
 0x205   :  { %4513 = vmatpush.msrb.mxu3 %v3706_v45  ;;  %v3703_v16 = vmax.f32 %v2256_v57, 0.0  ;;  %v7592_v45 = vpop.f32.mrf.mxu1  ;;  %11448 = vst [vmem:[#allocation26_spill] sm:$0xff] %v7597_v60  ;;  %6078 = vmatmul.msk.f32.gmra.mxu1 %vm565_vm1, %v265_v61  ;;  %v2244_v57 = vadd.f32 %v6865_v18, %v7400_v46  ;;  %v109_v61 = vld [vmem:[%s11408_s0 + $0x208] sm:$0xff]  ;;  %v115_v60 = vld [vmem:[%s11408_s0 + $0x238] sm:$0xff] }
 0x206   :  { %11447 = vst [vmem:[#allocation25_spill] sm:$0xff] %v7592_v45  ;;  %6175 = vmatmul.msk.f32.gmra.mxu2 %vm565_vm1, %v362_v32  ;;  %v2238_v32 = vadd.f32 %v6865_v18, %v7356_v27  ;;  %v3698_v12 = vmax.f32 %v2241_v43, 0.0  ;;  %v363_v27 = vld [vmem:[%s11408_s0 + $0x9f8] sm:$0xff] }
 0x207   :  { %4514 = vmatpush.msrb.mxu3 %v3705_v20  ;;  %v3701_v20 = vmax.f32 %v2250_v48, 0.0  ;;  %v3699_v46 = vmax.f32 %v2244_v57, 0.0  ;;  %v2235_v48 = vadd.f32 %v6865_v18, %v7334_v21  ;;  %v466_v21 = vld [vmem:[%s11408_s0 + $0xd30] sm:$0xff] }
 0x208   :  { %v7582_v37 = vpop.f32.mrf.mxu0  ;;  %v3697_v43 = vmax.f32 %v2238_v32, 0.0  ;;  %v2223_v32 = vadd.f32 %v6865_v18, %v7234_v17  ;;  %v467_v17 = vld [vmem:[%s11408_s0 + $0xd38] sm:$0xff] }
 0x209   :  { %4515 = vmatpush.msrb.mxu3 %v3704_v55 }
 0x20b   :  { %5921 = vmatmul.msk.f32.gmra.mxu0 %vm565_vm1, %v108_v51  ;;  %4516 = vmatpush.msrb.mxu3 %v3703_v16  ;;  %v7607_v55 = vpop.f32.mrf.mxu3  ;;  %v3700_v51 = vmax.f32 %v2247_v24, 0.0  ;;  %v266_v24 = vld [vmem:[%s11408_s0 + $0x6f0] sm:$0xff] }
 0x20c   :  { %11449 = vst [vmem:[#allocation27_spill] sm:$0xff] %v7607_v55  ;;  %6278 = vmatmul.msk.f32.gmra.mxu3 %vm565_vm1, %v465_v31  ;;  %v7629_v31 = vpop.f32.mrf.mxu2  ;;  %v114_v55 = vld [vmem:[%s11408_s0 + $0x230] sm:$0xff] }
 0x20d   :  { %4517 = vmatpush.msrb.mxu3 %v3702_v53  ;;  %v7624_v53 = vpop.f32.mrf.mxu1  ;;  %11451 = vst [vmem:[#allocation29_spill] sm:$0xff] %v7629_v31  ;;  %6079 = vmatmul.msk.f32.gmra.mxu1 %vm565_vm1, %v266_v24  ;;  %v110_v24 = vld [vmem:[%s11408_s0 + $0x210] sm:$0xff] }
 0x20e   :  { %11450 = vst [vmem:[#allocation28_spill] sm:$0xff] %v7624_v53  ;;  %6176 = vmatmul.msk.f32.gmra.mxu2 %vm565_vm1, %v363_v27  ;;  %v2226_v27 = vadd.f32 %v6865_v18, %v7262_v44  ;;  %v364_v44 = vld [vmem:[%s11408_s0 + $0xa00] sm:$0xff] }
 0x20f   :  { %4518 = vmatpush.msrb.mxu3 %v3701_v20  ;;  %v2232_v20 = vadd.f32 %v6865_v18, %v7312_v8 }
 0x210   :  { %v7614_v16 = vpop.f32.mrf.mxu0 }
 0x211   :  { %4519 = vmatpush.msrb.mxu3 %v3700_v51  ;;  %v2229_v51 = vadd.f32 %v6865_v18, %v7290_v0  ;;  %v3695_v8 = vmax.f32 %v2232_v20, 0.0 }
 0x213   :  { %5922 = vmatmul.msk.f32.gmra.mxu0 %vm565_vm1, %v109_v61  ;;  %4520 = vmatpush.msrb.mxu3 %v3699_v46  ;;  %v7639_v57 = vpop.f32.mrf.mxu3  ;;  %v3696_v61 = vmax.f32 %v2235_v48, 0.0  ;;  %v3694_v0 = vmax.f32 %v2229_v51, 0.0  ;;  %v267_v48 = vld [vmem:[%s11408_s0 + $0x6f8] sm:$0xff]  ;;  %v3693_v51 = vmax.f32 %v2226_v27, 0.0  ;;  %v365_v27 = vld [vmem:[%s11408_s0 + $0xa08] sm:$0xff] }
 0x214   :  { %11452 = vst [vmem:[#allocation30_spill] sm:$0xff] %v7639_v57  ;;  %6279 = vmatmul.msk.f32.gmra.mxu3 %vm565_vm1, %v466_v21  ;;  %v7661_v21 = vpop.f32.mrf.mxu2 }
 0x215   :  { %4521 = vmatpush.msrb.mxu3 %v3698_v12  ;;  %v7656_v12 = vpop.f32.mrf.mxu1  ;;  %11454 = vst [vmem:[#allocation32_spill] sm:$0xff] %v7661_v21  ;;  %6080 = vmatmul.msk.f32.gmra.mxu1 %vm565_vm1, %v267_v48 }
 0x216   :  { %11453 = vst [vmem:[#allocation31_spill] sm:$0xff] %v7656_v12  ;;  %6177 = vmatmul.msk.f32.gmra.mxu2 %vm565_vm1, %v364_v44 }
 0x217   :  { %4522 = vmatpush.msrb.mxu3 %v3697_v43  ;;  %v2220_v43 = vadd.f32 %v6865_v18, %v7206_v2  ;;  %v268_v18 = vld [vmem:[%s11408_s0 + $0x700] sm:$0xff] }
 0x218   :  { %v7646_v46 = vpop.f32.mrf.mxu0 }
 0x219   :  { %4523 = vmatpush.msrb.mxu3 %v3696_v61  ;;  %v3692_v61 = vmax.f32 %v2223_v32, 0.0  ;;  %v3691_v48 = vmax.f32 %v2220_v43, 0.0  ;;  %v468_v32 = vld [vmem:[%s11408_s0 + $0xd40] sm:$0xff] }
 0x21a   :  { %v112_v43 = vld [vmem:[%s11408_s0 + $0x220] sm:$0xff] }
 0x21b   :  { %5923 = vmatmul.msk.f32.gmra.mxu0 %vm565_vm1, %v110_v24  ;;  %4524 = vmatpush.msrb.mxu3 %v3695_v8  ;;  %v7671_v20 = vpop.f32.mrf.mxu3  ;;  %v111_v8 = vld [vmem:[%s11408_s0 + $0x218] sm:$0xff] }
 0x21c   :  { %11455 = vst [vmem:[#allocation33_spill] sm:$0xff] %v7671_v20  ;;  %6280 = vmatmul.msk.f32.gmra.mxu3 %vm565_vm1, %v467_v17  ;;  %v7687_v2 = vpop.f32.mrf.mxu2 }
 0x21d   :  { %4525 = vmatpush.msrb.mxu3 %v3694_v0  ;;  %v7682_v44 = vpop.f32.mrf.mxu1  ;;  %11457 = vst [vmem:[#allocation35_spill] sm:$0xff] %v7687_v2  ;;  %6081 = vmatmul.msk.f32.gmra.mxu1 %vm565_vm1, %v268_v18  ;;  %v469_v18 = vld [vmem:[%s11408_s0 + $0xd48] sm:$0xff]  ;;  %v116_v2 = vld [vmem:[%s11408_s0 + $0x240] sm:$0xff] }
 0x21e   :  { %11456 = vst [vmem:[#allocation34_spill] sm:$0xff] %v7682_v44  ;;  %6178 = vmatmul.msk.f32.gmra.mxu2 %vm565_vm1, %v365_v27  ;;  %v277_v44 = vld [vmem:[%s11408_s0 + $0x748] sm:$0xff] }
 0x21f   :  { %4526 = vmatpush.msrb.mxu3 %v3693_v51 }
 0x220   :  { %v7676_v24 = vpop.f32.mrf.mxu0 }
 0x221   :  { %4527 = vmatpush.msrb.mxu3 %v3692_v61  ;;  %v269_v61 = vld [vmem:[%s11408_s0 + $0x708] sm:$0xff] }
 0x223   :  { %5924 = vmatmul.msk.f32.gmra.mxu0 %vm565_vm1, %v111_v8  ;;  %4528 = vmatpush.msrb.mxu3 %v3691_v48  ;;  %v7697_v0 = vpop.f32.mrf.mxu3  ;;  %v366_v48 = vld [vmem:[%s11408_s0 + $0xa10] sm:$0xff] }
 0x224   :  { %11458 = vst [vmem:[#allocation36_spill] sm:$0xff] %v7697_v0  ;;  %6281 = vmatmul.msk.f32.gmra.mxu3 %vm565_vm1, %v468_v32  ;;  %v7711_v8 = vpop.f32.mrf.mxu2 }
 0x225   :  { %v7706_v51 = vpop.f32.mrf.mxu1  ;;  %11460 = vst [vmem:[#allocation38_spill] sm:$0xff] %v7711_v8  ;;  %6082 = vmatmul.msk.f32.gmra.mxu1 %vm565_vm1, %v269_v61  ;;  %v270_v61 = vld [vmem:[%s11408_s0 + $0x710] sm:$0xff] }
 0x226   :  { %11459 = vst [vmem:[#allocation37_spill] sm:$0xff] %v7706_v51  ;;  %6179 = vmatmul.msk.f32.gmra.mxu2 %vm565_vm1, %v366_v48  ;;  %v367_v48 = vld [vmem:[%s11408_s0 + $0xa18] sm:$0xff]  ;;  %v278_v51 = vld [vmem:[%s11408_s0 + $0x750] sm:$0xff] }
 0x228   :  { %v7700_v17 = vpop.f32.mrf.mxu0 }
 0x22b   :  { %5925 = vmatmul.msk.f32.gmra.mxu0 %vm565_vm1, %v112_v43  ;;  %v7721_v27 = vpop.f32.mrf.mxu3  ;;  %v113_v43 = vld [vmem:[%s11408_s0 + $0x228] sm:$0xff] }
 0x22c   :  { %11461 = vst [vmem:[#allocation39_spill] sm:$0xff] %v7721_v27  ;;  %6282 = vmatmul.msk.f32.gmra.mxu3 %vm565_vm1, %v469_v18  ;;  %v7735_v40 = vpop.f32.mrf.mxu2  ;;  %v470_v18 = vld [vmem:[%s11408_s0 + $0xd50] sm:$0xff] }
 0x22d   :  { %v7730_v0 = vpop.f32.mrf.mxu1  ;;  %11463 = vst [vmem:[#allocation41_spill] sm:$0xff] %v7735_v40  ;;  %6083 = vmatmul.msk.f32.gmra.mxu1 %vm565_vm1, %v270_v61  ;;  %v271_v61 = vld [vmem:[%s11408_s0 + $0x718] sm:$0xff] }
 0x22e   :  { %11462 = vst [vmem:[#allocation40_spill] sm:$0xff] %v7730_v0  ;;  %6180 = vmatmul.msk.f32.gmra.mxu2 %vm565_vm1, %v367_v48  ;;  %v368_v48 = vld [vmem:[%s11408_s0 + $0xa20] sm:$0xff]  ;;  %v279_v0 = vld [vmem:[%s11408_s0 + $0x758] sm:$0xff] }
 0x230   :  { %v7724_v32 = vpop.f32.mrf.mxu0 }
 0x233   :  { %5926 = vmatmul.msk.f32.gmra.mxu0 %vm565_vm1, %v113_v43  ;;  %v7745_v43 = vpop.f32.mrf.mxu3 }
 0x234   :  { %11464 = vst [vmem:[#allocation42_spill] sm:$0xff] %v7745_v43  ;;  %6283 = vmatmul.msk.f32.gmra.mxu3 %vm565_vm1, %v470_v18  ;;  %v7759_v20 = vpop.f32.mrf.mxu2  ;;  %v471_v18 = vld [vmem:[%s11408_s0 + $0xd58] sm:$0xff] }
 0x235   :  { %v7754_v57 = vpop.f32.mrf.mxu1  ;;  %11466 = vst [vmem:[#allocation44_spill] sm:$0xff] %v7759_v20  ;;  %6084 = vmatmul.msk.f32.gmra.mxu1 %vm565_vm1, %v271_v61  ;;  %v272_v61 = vld [vmem:[%s11408_s0 + $0x720] sm:$0xff]  ;;  %v117_v20 = vld [vmem:[%s11408_s0 + $0x248] sm:$0xff] }
 0x236   :  { %11465 = vst [vmem:[#allocation43_spill] sm:$0xff] %v7754_v57  ;;  %6181 = vmatmul.msk.f32.gmra.mxu2 %vm565_vm1, %v368_v48  ;;  %v369_v48 = vld [vmem:[%s11408_s0 + $0xa28] sm:$0xff] }
 0x238   :  { %v7748_v27 = vpop.f32.mrf.mxu0 }
 0x23b   :  { %5927 = vmatmul.msk.f32.gmra.mxu0 %vm565_vm1, %v114_v55  ;;  %v7769_v55 = vpop.f32.mrf.mxu3 }
 0x23c   :  { %11467 = vst [vmem:[#allocation45_spill] sm:$0xff] %v7769_v55  ;;  %6284 = vmatmul.msk.f32.gmra.mxu3 %vm565_vm1, %v471_v18  ;;  %v7783_v21 = vpop.f32.mrf.mxu2  ;;  %v472_v18 = vld [vmem:[%s11408_s0 + $0xd60] sm:$0xff] }
 0x23d   :  { %v7778_v31 = vpop.f32.mrf.mxu1  ;;  %11469 = vst [vmem:[#allocation47_spill] sm:$0xff] %v7783_v21  ;;  %6085 = vmatmul.msk.f32.gmra.mxu1 %vm565_vm1, %v272_v61  ;;  %v273_v61 = vld [vmem:[%s11408_s0 + $0x728] sm:$0xff] }
 0x23e   :  { %11468 = vst [vmem:[#allocation46_spill] sm:$0xff] %v7778_v31  ;;  %6182 = vmatmul.msk.f32.gmra.mxu2 %vm565_vm1, %v369_v48  ;;  %v370_v48 = vld [vmem:[%s11408_s0 + $0xa30] sm:$0xff] }
 0x240   :  { %v7772_v43 = vpop.f32.mrf.mxu0 }
 0x243   :  { %5928 = vmatmul.msk.f32.gmra.mxu0 %vm565_vm1, %v115_v60  ;;  %v7793_v60 = vpop.f32.mrf.mxu3 }
 0x244   :  { %11470 = vst [vmem:[#allocation48_spill] sm:$0xff] %v7793_v60  ;;  %6285 = vmatmul.msk.f32.gmra.mxu3 %vm565_vm1, %v472_v18  ;;  %v7807_v40 = vpop.f32.mrf.mxu2  ;;  %v473_v18 = vld [vmem:[%s11408_s0 + $0xd68] sm:$0xff] }
 0x245   :  { %v7802_v8 = vpop.f32.mrf.mxu1  ;;  %11472 = vst [vmem:[#allocation50_spill] sm:$0xff] %v7807_v40  ;;  %6086 = vmatmul.msk.f32.gmra.mxu1 %vm565_vm1, %v273_v61  ;;  %v274_v61 = vld [vmem:[%s11408_s0 + $0x730] sm:$0xff] }
 0x246   :  { %11471 = vst [vmem:[#allocation49_spill] sm:$0xff] %v7802_v8  ;;  %6183 = vmatmul.msk.f32.gmra.mxu2 %vm565_vm1, %v370_v48  ;;  %v371_v48 = vld [vmem:[%s11408_s0 + $0xa38] sm:$0xff] }
 0x248   :  { %v7796_v55 = vpop.f32.mrf.mxu0 }
 0x24b   :  { %5929 = vmatmul.msk.f32.gmra.mxu0 %vm565_vm1, %v116_v2  ;;  %v7817_v2 = vpop.f32.mrf.mxu3 }
 0x24c   :  { %11473 = vst [vmem:[#allocation51_spill] sm:$0xff] %v7817_v2  ;;  %6286 = vmatmul.msk.f32.gmra.mxu3 %vm565_vm1, %v473_v18  ;;  %v7831_v40 = vpop.f32.mrf.mxu2  ;;  %v474_v18 = vld [vmem:[%s11408_s0 + $0xd70] sm:$0xff] }
 0x24d   :  { %v7826_v21 = vpop.f32.mrf.mxu1  ;;  %11475 = vst [vmem:[#allocation53_spill] sm:$0xff] %v7831_v40  ;;  %6087 = vmatmul.msk.f32.gmra.mxu1 %vm565_vm1, %v274_v61  ;;  %v118_v40 = vld [vmem:[%s11408_s0 + $0x250] sm:$0xff]  ;;  %v275_v61 = vld [vmem:[%s11408_s0 + $0x738] sm:$0xff] }
 0x24e   :  { %11474 = vst [vmem:[#allocation52_spill] sm:$0xff] %v7826_v21  ;;  %6184 = vmatmul.msk.f32.gmra.mxu2 %vm565_vm1, %v371_v48  ;;  %v372_v48 = vld [vmem:[%s11408_s0 + $0xa40] sm:$0xff]  ;;  %v377_v21 = vld [vmem:[%s11408_s0 + $0xa68] sm:$0xff] }
 0x250   :  { %v7820_v60 = vpop.f32.mrf.mxu0 }
 0x253   :  { %5930 = vmatmul.msk.f32.gmra.mxu0 %vm565_vm1, %v117_v20  ;;  %v7841_v20 = vpop.f32.mrf.mxu3 }
 0x254   :  { %11476 = vst [vmem:[#allocation54_spill] sm:$0xff] %v7841_v20  ;;  %6287 = vmatmul.msk.f32.gmra.mxu3 %vm565_vm1, %v474_v18  ;;  %v7855_v45 = vpop.f32.mrf.mxu2  ;;  %v475_v18 = vld [vmem:[%s11408_s0 + $0xd78] sm:$0xff] }
 0x255   :  { %v7850_v28 = vpop.f32.mrf.mxu1  ;;  %11478 = vst [vmem:[#allocation56_spill] sm:$0xff] %v7855_v45  ;;  %6088 = vmatmul.msk.f32.gmra.mxu1 %vm565_vm1, %v275_v61  ;;  %v119_v45 = vld [vmem:[%s11408_s0 + $0x258] sm:$0xff]  ;;  %v276_v61 = vld [vmem:[%s11408_s0 + $0x740] sm:$0xff] }
 0x256   :  { %11477 = vst [vmem:[#allocation55_spill] sm:$0xff] %v7850_v28  ;;  %6185 = vmatmul.msk.f32.gmra.mxu2 %vm565_vm1, %v372_v48  ;;  %v373_v48 = vld [vmem:[%s11408_s0 + $0xa48] sm:$0xff] }
 0x258   :  { %v7844_v2 = vpop.f32.mrf.mxu0 }
 0x25b   :  { %5931 = vmatmul.msk.f32.gmra.mxu0 %vm565_vm1, %v118_v40  ;;  %v7865_v40 = vpop.f32.mrf.mxu3 }
 0x25c   :  { %11479 = vst [vmem:[#allocation57_spill] sm:$0xff] %v7865_v40  ;;  %6288 = vmatmul.msk.f32.gmra.mxu3 %vm565_vm1, %v475_v18  ;;  %v7879_v12 = vpop.f32.mrf.mxu2  ;;  %v476_v18 = vld [vmem:[%s11408_s0 + $0xd80] sm:$0xff] }
 0x25d   :  { %v7874_v53 = vpop.f32.mrf.mxu1  ;;  %11481 = vst [vmem:[#allocation59_spill] sm:$0xff] %v7879_v12  ;;  %6089 = vmatmul.msk.f32.gmra.mxu1 %vm565_vm1, %v276_v61  ;;  %v120_v12 = vld [vmem:[%s11408_s0 + $0x260] sm:$0xff] }
 0x25e   :  { %11480 = vst [vmem:[#allocation58_spill] sm:$0xff] %v7874_v53  ;;  %6186 = vmatmul.msk.f32.gmra.mxu2 %vm565_vm1, %v373_v48  ;;  %v374_v48 = vld [vmem:[%s11408_s0 + $0xa50] sm:$0xff] }
 0x260   :  { %v7868_v20 = vpop.f32.mrf.mxu0 }
 0x263   :  { %5932 = vmatmul.msk.f32.gmra.mxu0 %vm565_vm1, %v119_v45  ;;  %v7889_v45 = vpop.f32.mrf.mxu3 }
 0x264   :  { %11482 = vst [vmem:[#allocation60_spill] sm:$0xff] %v7889_v45  ;;  %6289 = vmatmul.msk.f32.gmra.mxu3 %vm565_vm1, %v476_v18  ;;  %v7901_v61 = vpop.f32.mrf.mxu2  ;;  %v477_v18 = vld [vmem:[%s11408_s0 + $0xd88] sm:$0xff] }
 0x265   :  { %v7896_v53 = vpop.f32.mrf.mxu1  ;;  %11484 = vst [vmem:[#allocation62_spill] sm:$0xff] %v7901_v61  ;;  %6090 = vmatmul.msk.f32.gmra.mxu1 %vm565_vm1, %v277_v44  ;;  %v121_v61 = vld [vmem:[%s11408_s0 + $0x268] sm:$0xff] }
 0x266   :  { %11483 = vst [vmem:[#allocation61_spill] sm:$0xff] %v7896_v53  ;;  %6187 = vmatmul.msk.f32.gmra.mxu2 %vm565_vm1, %v374_v48  ;;  %v375_v48 = vld [vmem:[%s11408_s0 + $0xa58] sm:$0xff] }
 0x268   :  { %v2303_v40 = vpop.f32.mrf.mxu0 }
 0x26b   :  { %5933 = vmatmul.msk.f32.gmra.mxu0 %vm565_vm1, %v120_v12  ;;  %v7911_v12 = vpop.f32.mrf.mxu3 }
 0x26c   :  { %11485 = vst [vmem:[#allocation63_spill] sm:$0xff] %v7911_v12  ;;  %6290 = vmatmul.msk.f32.gmra.mxu3 %vm565_vm1, %v477_v18  ;;  %v7923_v44 = vpop.f32.mrf.mxu2  ;;  %v478_v18 = vld [vmem:[%s11408_s0 + $0xd90] sm:$0xff] }
 0x26d   :  { %v7918_v53 = vpop.f32.mrf.mxu1  ;;  %11487 = vst [vmem:[#allocation65_spill] sm:$0xff] %v7923_v44  ;;  %6091 = vmatmul.msk.f32.gmra.mxu1 %vm565_vm1, %v278_v51  ;;  %v122_v44 = vld [vmem:[%s11408_s0 + $0x270] sm:$0xff] }
 0x26e   :  { %11486 = vst [vmem:[#allocation64_spill] sm:$0xff] %v7918_v53  ;;  %6188 = vmatmul.msk.f32.gmra.mxu2 %vm565_vm1, %v375_v48  ;;  %v376_v48 = vld [vmem:[%s11408_s0 + $0xa60] sm:$0xff] }
 0x270   :  { %v2306_v45 = vpop.f32.mrf.mxu0 }
 0x273   :  { %5934 = vmatmul.msk.f32.gmra.mxu0 %vm565_vm1, %v121_v61  ;;  %v7933_v61 = vpop.f32.mrf.mxu3 }
 0x274   :  { %11488 = vst [vmem:[#allocation66_spill] sm:$0xff] %v7933_v61  ;;  %6291 = vmatmul.msk.f32.gmra.mxu3 %vm565_vm1, %v478_v18  ;;  %v7945_v51 = vpop.f32.mrf.mxu2  ;;  %v479_v18 = vld [vmem:[%s11408_s0 + $0xd98] sm:$0xff] }
 0x275   :  { %v7940_v53 = vpop.f32.mrf.mxu1  ;;  %11490 = vst [vmem:[#allocation68_spill] sm:$0xff] %v7945_v51  ;;  %6092 = vmatmul.msk.f32.gmra.mxu1 %vm565_vm1, %v279_v0  ;;  %v123_v51 = vld [vmem:[%s11408_s0 + $0x278] sm:$0xff] }
 0x276   :  { %11489 = vst [vmem:[#allocation67_spill] sm:$0xff] %v7940_v53  ;;  %6189 = vmatmul.msk.f32.gmra.mxu2 %vm565_vm1, %v376_v48  ;;  %v7964_v53 = vld [vmem:[%s11407_s2] ss:$0 sm:$0xff] }
 0x277   :  { %v2307_v48 = vadd.f32 %v7964_v53, %v2306_v45 }
 0x278   :  { %v2309_v12 = vpop.f32.mrf.mxu0 }
 0x279   :  { %v2310_v57 = vadd.f32 %v7964_v53, %v2309_v12  ;;  %v480_v12 = vld [vmem:[%s11408_s0 + $0xda0] sm:$0xff] }
 0x27b   :  { %5935 = vmatmul.msk.f32.gmra.mxu0 %vm565_vm1, %v122_v44  ;;  %v7955_v44 = vpop.f32.mrf.mxu3 }
 0x27c   :  { %11491 = vst [vmem:[#allocation69_spill] sm:$0xff] %v7955_v44  ;;  %6292 = vmatmul.msk.f32.gmra.mxu3 %vm565_vm1, %v479_v18  ;;  %v280_v44 = vld [vmem:[%s11408_s0 + $0x760] sm:$0xff]  ;;  %v7975_v8 = vpop.f32.mrf.mxu2 }
 0x27d   :  { %v7970_v18 = vpop.f32.mrf.mxu1  ;;  %11493 = vst [vmem:[#allocation71_spill] sm:$0xff] %v7975_v8  ;;  %6093 = vmatmul.msk.f32.gmra.mxu1 %vm565_vm1, %v280_v44  ;;  %v3720_v8 = vmax.f32 %v2307_v48, 0.0  ;;  %v124_v44 = vld [vmem:[%s11408_s0 + $0x280] sm:$0xff] }
 0x27e   :  { %11492 = vst [vmem:[#allocation70_spill] sm:$0xff] %v7970_v18  ;;  %6190 = vmatmul.msk.f32.gmra.mxu2 %vm565_vm1, %v377_v21  ;;  %v2298_v21 = vadd.f32 %v7964_v53, %v7844_v2  ;;  %v378_v2 = vld [vmem:[%s11408_s0 + $0xa70] sm:$0xff] }
 0x280   :  { %v2312_v61 = vpop.f32.mrf.mxu0 }
 0x281   :  { %v2313_v0 = vadd.f32 %v7964_v53, %v2312_v61  ;;  %v2304_v61 = vadd.f32 %v7964_v53, %v2303_v40  ;;  %v281_v40 = vld [vmem:[%s11408_s0 + $0x768] sm:$0xff] }
 0x283   :  { %v3722_v31 = vmax.f32 %v2313_v0, 0.0  ;;  %5936 = vmatmul.msk.f32.gmra.mxu0 %vm565_vm1, %v123_v51  ;;  %v7985_v45 = vpop.f32.mrf.mxu3  ;;  %v3721_v51 = vmax.f32 %v2310_v57, 0.0  ;;  %v2301_v0 = vadd.f32 %v7964_v53, %v7868_v20 }
 0x284   :  { %11494 = vst [vmem:[#allocation72_spill] sm:$0xff] %v7985_v45  ;;  %6293 = vmatmul.msk.f32.gmra.mxu3 %vm565_vm1, %v480_v12  ;;  %v3719_v45 = vmax.f32 %v2304_v61, 0.0  ;;  %v8006_v48 = vpop.f32.mrf.mxu2  ;;  %v2292_v12 = vadd.f32 %v7964_v53, %v7796_v55  ;;  %v2289_v61 = vadd.f32 %v7964_v53, %v7772_v43  ;;  %v2283_v55 = vadd.f32 %v7964_v53, %v7724_v32  ;;  %v482_v32 = vld [vmem:[%s11408_s0 + $0xdb0] sm:$0xff] }
 0x285   :  { %4536 = vmatpush.msra.mxu1 %v3722_v31  ;;  %v2295_v31 = vadd.f32 %v7964_v53, %v7820_v60  ;;  %v3718_v57 = vmax.f32 %v2301_v0, 0.0  ;;  %v8001_v20 = vpop.f32.mrf.mxu1  ;;  %11496 = vst [vmem:[#allocation74_spill] sm:$0xff] %v8006_v48  ;;  %v130_v48 = vld [vmem:[%s11408_s0 + $0x2b0] sm:$0xff] }
 0x286   :  { %11495 = vst [vmem:[#allocation73_spill] sm:$0xff] %v8001_v20  ;;  %6094 = vmatmul.msk.f32.gmra.mxu1 %vm565_vm1, %v281_v40  ;;  %6191 = vmatmul.msk.f32.gmra.mxu2 %vm565_vm1, %v378_v2  ;;  %v2286_v40 = vadd.f32 %v7964_v53, %v7748_v27  ;;  %v3715_v2 = vmax.f32 %v2292_v12, 0.0  ;;  %v379_v27 = vld [vmem:[%s11408_s0 + $0xa78] sm:$0xff]  ;;  %v2280_v12 = vadd.f32 %v7964_v53, %v7700_v17 }
 0x287   :  { %4537 = vmatpush.msra.mxu1 %v3721_v51  ;;  %v3716_v51 = vmax.f32 %v2295_v31, 0.0  ;;  %v282_v31 = vld [vmem:[%s11408_s0 + $0x770] sm:$0xff]  ;;  %v2271_v17 = vadd.f32 %v7964_v53, %v7614_v16  ;;  %v483_v16 = vld [vmem:[%s11408_s0 + $0xdb8] sm:$0xff] }
 0x288   :  { %v7991_v18 = vpop.f32.mrf.mxu0 }
 0x289   :  { %4538 = vmatpush.msra.mxu1 %v3720_v8  ;;  %v481_v8 = vld [vmem:[%s11408_s0 + $0xda8] sm:$0xff] }
 0x28b   :  { %5937 = vmatmul.msk.f32.gmra.mxu0 %vm565_vm1, %v124_v44  ;;  %4539 = vmatpush.msra.mxu1 %v3719_v45  ;;  %v8016_v60 = vpop.f32.mrf.mxu3  ;;  %v3717_v45 = vmax.f32 %v2298_v21, 0.0  ;;  %v125_v44 = vld [vmem:[%s11408_s0 + $0x288] sm:$0xff]  ;;  %v3714_v21 = vmax.f32 %v2289_v61, 0.0  ;;  %v2277_v61 = vadd.f32 %v7964_v53, %v7676_v24 }
 0x28c   :  { %11497 = vst [vmem:[#allocation75_spill] sm:$0xff] %v8016_v60  ;;  %6294 = vmatmul.msk.f32.gmra.mxu3 %vm565_vm1, %v481_v8 }
 0x28d   :  { %4540 = vmatpush.msra.mxu1 %v3718_v57  ;;  %v8033_v43 = vpop.f32.mrf.mxu1  ;;  %v8038_v57 = vpop.f32.mrf.mxu2 }
 0x28e   :  { %11498 = vst [vmem:[#allocation76_spill] sm:$0xff] %v8033_v43  ;;  %6095 = vmatmul.msk.f32.gmra.mxu1 %vm565_vm1, %v282_v31  ;;  %6192 = vmatmul.msk.f32.gmra.mxu2 %vm565_vm1, %v379_v27  ;;  %v2274_v31 = vadd.f32 %v7964_v53, %v7646_v46  ;;  %v3711_v27 = vmax.f32 %v2280_v12, 0.0  ;;  %v380_v46 = vld [vmem:[%s11408_s0 + $0xa80] sm:$0xff]  ;;  %v2268_v12 = vadd.f32 %v7964_v53, %v7582_v37 }
 0x28f   :  { %4541 = vmatpush.msra.mxu1 %v3717_v45  ;;  %11499 = vst [vmem:[#allocation77_spill] sm:$0xff] %v8038_v57  ;;  %v3713_v45 = vmax.f32 %v2286_v40, 0.0  ;;  %v3710_v40 = vmax.f32 %v2277_v61, 0.0  ;;  %v3708_v61 = vmax.f32 %v2271_v17, 0.0  ;;  %v284_v37 = vld [vmem:[%s11408_s0 + $0x780] sm:$0xff]  ;;  %v381_v17 = vld [vmem:[%s11408_s0 + $0xa88] sm:$0xff] }
 0x290   :  { %v8023_v0 = vpop.f32.mrf.mxu0 }
 0x291   :  { %4542 = vmatpush.msra.mxu1 %v3716_v51  ;;  %v3712_v51 = vmax.f32 %v2283_v55, 0.0  ;;  %v283_v55 = vld [vmem:[%s11408_s0 + $0x778] sm:$0xff] }
 0x293   :  { %5938 = vmatmul.msk.f32.gmra.mxu0 %vm565_vm1, %v125_v44  ;;  %4543 = vmatpush.msra.mxu1 %v3715_v2  ;;  %v8048_v8 = vpop.f32.mrf.mxu3  ;;  %v126_v2 = vld [vmem:[%s11408_s0 + $0x290] sm:$0xff] }
 0x294   :  { %11500 = vst [vmem:[#allocation78_spill] sm:$0xff] %v8048_v8  ;;  %6295 = vmatmul.msk.f32.gmra.mxu3 %vm565_vm1, %v482_v32 }
 0x295   :  { %4544 = vmatpush.msra.mxu1 %v3714_v21  ;;  %v8065_v24 = vpop.f32.mrf.mxu1  ;;  %v8070_v21 = vpop.f32.mrf.mxu2 }
 0x296   :  { %11501 = vst [vmem:[#allocation79_spill] sm:$0xff] %v8065_v24  ;;  %6096 = vmatmul.msk.f32.gmra.mxu1 %vm565_vm1, %v283_v55  ;;  %6193 = vmatmul.msk.f32.gmra.mxu2 %vm565_vm1, %v380_v46 }
 0x297   :  { %4545 = vmatpush.msra.mxu1 %v3713_v45  ;;  %11502 = vst [vmem:[#allocation80_spill] sm:$0xff] %v8070_v21  ;;  %v3709_v45 = vmax.f32 %v2274_v31, 0.0 }
 0x298   :  { %v8055_v44 = vpop.f32.mrf.mxu0 }
 0x299   :  { %4546 = vmatpush.msra.mxu1 %v3712_v51 }
 0x29b   :  { %5939 = vmatmul.msk.f32.gmra.mxu0 %vm565_vm1, %v126_v2  ;;  %4547 = vmatpush.msra.mxu1 %v3711_v27  ;;  %v8080_v32 = vpop.f32.mrf.mxu3  ;;  %v127_v2 = vld [vmem:[%s11408_s0 + $0x298] sm:$0xff]  ;;  %v3707_v27 = vmax.f32 %v2268_v12, 0.0  ;;  %v128_v12 = vld [vmem:[%s11408_s0 + $0x2a0] sm:$0xff] }
 0x29c   :  { %11503 = vst [vmem:[#allocation81_spill] sm:$0xff] %v8080_v32  ;;  %6296 = vmatmul.msk.f32.gmra.mxu3 %vm565_vm1, %v483_v16 }
 0x29d   :  { %4548 = vmatpush.msra.mxu1 %v3710_v40  ;;  %v8091_v55 = vpop.f32.mrf.mxu1  ;;  %v8096_v31 = vpop.f32.mrf.mxu2  ;;  %v484_v40 = vld [vmem:[%s11408_s0 + $0xdc0] sm:$0xff] }
 0x29e   :  { %11504 = vst [vmem:[#allocation82_spill] sm:$0xff] %v8091_v55  ;;  %6097 = vmatmul.msk.f32.gmra.mxu1 %vm565_vm1, %v284_v37  ;;  %6194 = vmatmul.msk.f32.gmra.mxu2 %vm565_vm1, %v381_v17  ;;  %v485_v37 = vld [vmem:[%s11408_s0 + $0xdc8] sm:$0xff]  ;;  %v135_v55 = vld [vmem:[%s11408_s0 + $0x2d8] sm:$0xff] }
 0x29f   :  { %4549 = vmatpush.msra.mxu1 %v3709_v45  ;;  %11505 = vst [vmem:[#allocation83_spill] sm:$0xff] %v8096_v31 }
 0x2a0   :  { %v8085_v51 = vpop.f32.mrf.mxu0 }
 0x2a1   :  { %4550 = vmatpush.msra.mxu1 %v3708_v61  ;;  %v285_v61 = vld [vmem:[%s11408_s0 + $0x788] sm:$0xff] }
 0x2a3   :  { %5940 = vmatmul.msk.f32.gmra.mxu0 %vm565_vm1, %v127_v2  ;;  %4551 = vmatpush.msra.mxu1 %v3707_v27  ;;  %v8106_v46 = vpop.f32.mrf.mxu3  ;;  %v382_v27 = vld [vmem:[%s11408_s0 + $0xa90] sm:$0xff] }
 0x2a4   :  { %11506 = vst [vmem:[#allocation84_spill] sm:$0xff] %v8106_v46  ;;  %6297 = vmatmul.msk.f32.gmra.mxu3 %vm565_vm1, %v484_v40 }
 0x2a5   :  { %v8115_v45 = vpop.f32.mrf.mxu1  ;;  %v8120_v2 = vpop.f32.mrf.mxu2 }
 0x2a6   :  { %11507 = vst [vmem:[#allocation85_spill] sm:$0xff] %v8115_v45  ;;  %6098 = vmatmul.msk.f32.gmra.mxu1 %vm565_vm1, %v285_v61  ;;  %6195 = vmatmul.msk.f32.gmra.mxu2 %vm565_vm1, %v382_v27  ;;  %v286_v61 = vld [vmem:[%s11408_s0 + $0x790] sm:$0xff]  ;;  %v383_v27 = vld [vmem:[%s11408_s0 + $0xa98] sm:$0xff] }
 0x2a7   :  { %11508 = vst [vmem:[#allocation86_spill] sm:$0xff] %v8120_v2  ;;  %v131_v2 = vld [vmem:[%s11408_s0 + $0x2b8] sm:$0xff] }
 0x2a8   :  { %v8109_v16 = vpop.f32.mrf.mxu0 }
 0x2ab   :  { %5941 = vmatmul.msk.f32.gmra.mxu0 %vm565_vm1, %v128_v12  ;;  %v8130_v17 = vpop.f32.mrf.mxu3  ;;  %v129_v12 = vld [vmem:[%s11408_s0 + $0x2a8] sm:$0xff] }
 0x2ac   :  { %11509 = vst [vmem:[#allocation87_spill] sm:$0xff] %v8130_v17  ;;  %6298 = vmatmul.msk.f32.gmra.mxu3 %vm565_vm1, %v485_v37  ;;  %v486_v37 = vld [vmem:[%s11408_s0 + $0xdd0] sm:$0xff] }
 0x2ad   :  { %v8139_v60 = vpop.f32.mrf.mxu1  ;;  %v8144_v8 = vpop.f32.mrf.mxu2 }
 0x2ae   :  { %11510 = vst [vmem:[#allocation88_spill] sm:$0xff] %v8139_v60  ;;  %6099 = vmatmul.msk.f32.gmra.mxu1 %vm565_vm1, %v286_v61  ;;  %6196 = vmatmul.msk.f32.gmra.mxu2 %vm565_vm1, %v383_v27  ;;  %v287_v61 = vld [vmem:[%s11408_s0 + $0x798] sm:$0xff]  ;;  %v384_v27 = vld [vmem:[%s11408_s0 + $0xaa0] sm:$0xff] }
 0x2af   :  { %11511 = vst [vmem:[#allocation89_spill] sm:$0xff] %v8144_v8 }
 0x2b0   :  { %v8133_v40 = vpop.f32.mrf.mxu0 }
 0x2b3   :  { %5942 = vmatmul.msk.f32.gmra.mxu0 %vm565_vm1, %v129_v12  ;;  %v8154_v12 = vpop.f32.mrf.mxu3 }
 0x2b4   :  { %11512 = vst [vmem:[#allocation90_spill] sm:$0xff] %v8154_v12  ;;  %6299 = vmatmul.msk.f32.gmra.mxu3 %vm565_vm1, %v486_v37  ;;  %v487_v37 = vld [vmem:[%s11408_s0 + $0xdd8] sm:$0xff] }
 0x2b5   :  { %v8163_v57 = vpop.f32.mrf.mxu1  ;;  %v8168_v21 = vpop.f32.mrf.mxu2 }
 0x2b6   :  { %11513 = vst [vmem:[#allocation91_spill] sm:$0xff] %v8163_v57  ;;  %6100 = vmatmul.msk.f32.gmra.mxu1 %vm565_vm1, %v287_v61  ;;  %6197 = vmatmul.msk.f32.gmra.mxu2 %vm565_vm1, %v384_v27  ;;  %v288_v61 = vld [vmem:[%s11408_s0 + $0x7a0] sm:$0xff]  ;;  %v385_v27 = vld [vmem:[%s11408_s0 + $0xaa8] sm:$0xff] }
 0x2b7   :  { %11514 = vst [vmem:[#allocation92_spill] sm:$0xff] %v8168_v21  ;;  %v136_v57 = vld [vmem:[%s11408_s0 + $0x2e0] sm:$0xff] }
 0x2b8   :  { %v8157_v32 = vpop.f32.mrf.mxu0 }
 0x2bb   :  { %5943 = vmatmul.msk.f32.gmra.mxu0 %vm565_vm1, %v130_v48  ;;  %v8178_v48 = vpop.f32.mrf.mxu3 }
 0x2bc   :  { %11515 = vst [vmem:[#allocation93_spill] sm:$0xff] %v8178_v48  ;;  %6300 = vmatmul.msk.f32.gmra.mxu3 %vm565_vm1, %v487_v37  ;;  %v488_v37 = vld [vmem:[%s11408_s0 + $0xde0] sm:$0xff] }
 0x2bd   :  { %v8187_v8 = vpop.f32.mrf.mxu1  ;;  %v8192_v21 = vpop.f32.mrf.mxu2 }
 0x2be   :  { %11516 = vst [vmem:[#allocation94_spill] sm:$0xff] %v8187_v8  ;;  %6101 = vmatmul.msk.f32.gmra.mxu1 %vm565_vm1, %v288_v61  ;;  %6198 = vmatmul.msk.f32.gmra.mxu2 %vm565_vm1, %v385_v27  ;;  %v289_v61 = vld [vmem:[%s11408_s0 + $0x7a8] sm:$0xff]  ;;  %v386_v27 = vld [vmem:[%s11408_s0 + $0xab0] sm:$0xff] }
 0x2bf   :  { %11517 = vst [vmem:[#allocation95_spill] sm:$0xff] %v8192_v21  ;;  %v132_v21 = vld [vmem:[%s11408_s0 + $0x2c0] sm:$0xff] }
 0x2c0   :  { %v8181_v31 = vpop.f32.mrf.mxu0 }
 0x2c3   :  { %5944 = vmatmul.msk.f32.gmra.mxu0 %vm565_vm1, %v131_v2  ;;  %v8202_v2 = vpop.f32.mrf.mxu3 }
 0x2c4   :  { %11518 = vst [vmem:[#allocation96_spill] sm:$0xff] %v8202_v2  ;;  %6301 = vmatmul.msk.f32.gmra.mxu3 %vm565_vm1, %v488_v37  ;;  %v489_v37 = vld [vmem:[%s11408_s0 + $0xde8] sm:$0xff] }
 0x2c5   :  { %v8211_v17 = vpop.f32.mrf.mxu1  ;;  %v8216_v12 = vpop.f32.mrf.mxu2 }
 0x2c6   :  { %11519 = vst [vmem:[#allocation97_spill] sm:$0xff] %v8211_v17  ;;  %6102 = vmatmul.msk.f32.gmra.mxu1 %vm565_vm1, %v289_v61  ;;  %6199 = vmatmul.msk.f32.gmra.mxu2 %vm565_vm1, %v386_v27  ;;  %v290_v61 = vld [vmem:[%s11408_s0 + $0x7b0] sm:$0xff]  ;;  %v387_v27 = vld [vmem:[%s11408_s0 + $0xab8] sm:$0xff]  ;;  %v293_v17 = vld [vmem:[%s11408_s0 + $0x7c8] sm:$0xff] }
 0x2c7   :  { %11520 = vst [vmem:[#allocation98_spill] sm:$0xff] %v8216_v12  ;;  %v133_v12 = vld [vmem:[%s11408_s0 + $0x2c8] sm:$0xff] }
 0x2c8   :  { %v8205_v46 = vpop.f32.mrf.mxu0 }
 0x2cb   :  { %5945 = vmatmul.msk.f32.gmra.mxu0 %vm565_vm1, %v132_v21  ;;  %v8226_v21 = vpop.f32.mrf.mxu3 }
 0x2cc   :  { %11521 = vst [vmem:[#allocation99_spill] sm:$0xff] %v8226_v21  ;;  %6302 = vmatmul.msk.f32.gmra.mxu3 %vm565_vm1, %v489_v37  ;;  %v490_v37 = vld [vmem:[%s11408_s0 + $0xdf0] sm:$0xff] }
 0x2cd   :  { %v8235_v2 = vpop.f32.mrf.mxu1  ;;  %v8240_v20 = vpop.f32.mrf.mxu2 }
 0x2ce   :  { %11522 = vst [vmem:[#allocation100_spill] sm:$0xff] %v8235_v2  ;;  %6103 = vmatmul.msk.f32.gmra.mxu1 %vm565_vm1, %v290_v61  ;;  %6200 = vmatmul.msk.f32.gmra.mxu2 %vm565_vm1, %v387_v27  ;;  %v291_v61 = vld [vmem:[%s11408_s0 + $0x7b8] sm:$0xff]  ;;  %v388_v27 = vld [vmem:[%s11408_s0 + $0xac0] sm:$0xff]  ;;  %v137_v2 = vld [vmem:[%s11408_s0 + $0x2e8] sm:$0xff] }
 0x2cf   :  { %11523 = vst [vmem:[#allocation101_spill] sm:$0xff] %v8240_v20  ;;  %v134_v20 = vld [vmem:[%s11408_s0 + $0x2d0] sm:$0xff] }
 0x2d0   :  { %v8229_v48 = vpop.f32.mrf.mxu0 }
 0x2d3   :  { %5946 = vmatmul.msk.f32.gmra.mxu0 %vm565_vm1, %v133_v12  ;;  %v8250_v12 = vpop.f32.mrf.mxu3 }
 0x2d4   :  { %11524 = vst [vmem:[#allocation102_spill] sm:$0xff] %v8250_v12  ;;  %6303 = vmatmul.msk.f32.gmra.mxu3 %vm565_vm1, %v490_v37  ;;  %v491_v37 = vld [vmem:[%s11408_s0 + $0xdf8] sm:$0xff] }
 0x2d5   :  { %v8259_v43 = vpop.f32.mrf.mxu1  ;;  %v8264_v24 = vpop.f32.mrf.mxu2 }
 0x2d6   :  { %11525 = vst [vmem:[#allocation103_spill] sm:$0xff] %v8259_v43  ;;  %6104 = vmatmul.msk.f32.gmra.mxu1 %vm565_vm1, %v291_v61  ;;  %6201 = vmatmul.msk.f32.gmra.mxu2 %vm565_vm1, %v388_v27  ;;  %v292_v61 = vld [vmem:[%s11408_s0 + $0x7c0] sm:$0xff]  ;;  %v389_v27 = vld [vmem:[%s11408_s0 + $0xac8] sm:$0xff]  ;;  %v294_v43 = vld [vmem:[%s11408_s0 + $0x7d0] sm:$0xff] }
 0x2d7   :  { %11526 = vst [vmem:[#allocation104_spill] sm:$0xff] %v8264_v24 }
 0x2d8   :  { %v8253_v21 = vpop.f32.mrf.mxu0 }
 0x2db   :  { %5947 = vmatmul.msk.f32.gmra.mxu0 %vm565_vm1, %v134_v20  ;;  %v8274_v20 = vpop.f32.mrf.mxu3 }
 0x2dc   :  { %11527 = vst [vmem:[#allocation105_spill] sm:$0xff] %v8274_v20  ;;  %6304 = vmatmul.msk.f32.gmra.mxu3 %vm565_vm1, %v491_v37  ;;  %v492_v37 = vld [vmem:[%s11408_s0 + $0xe00] sm:$0xff] }
 0x2dd   :  { %v8283_v45 = vpop.f32.mrf.mxu1  ;;  %v8288_v60 = vpop.f32.mrf.mxu2 }
 0x2de   :  { %11528 = vst [vmem:[#allocation106_spill] sm:$0xff] %v8283_v45  ;;  %6105 = vmatmul.msk.f32.gmra.mxu1 %vm565_vm1, %v292_v61  ;;  %6202 = vmatmul.msk.f32.gmra.mxu2 %vm565_vm1, %v389_v27  ;;  %v390_v27 = vld [vmem:[%s11408_s0 + $0xad0] sm:$0xff] }
 0x2df   :  { %11529 = vst [vmem:[#allocation107_spill] sm:$0xff] %v8288_v60  ;;  %v138_v60 = vld [vmem:[%s11408_s0 + $0x2f0] sm:$0xff] }
 0x2e0   :  { %v8277_v12 = vpop.f32.mrf.mxu0 }
 0x2e3   :  { %5948 = vmatmul.msk.f32.gmra.mxu0 %vm565_vm1, %v135_v55  ;;  %v8298_v55 = vpop.f32.mrf.mxu3 }
 0x2e4   :  { %11530 = vst [vmem:[#allocation108_spill] sm:$0xff] %v8298_v55  ;;  %6305 = vmatmul.msk.f32.gmra.mxu3 %vm565_vm1, %v492_v37  ;;  %v493_v37 = vld [vmem:[%s11408_s0 + $0xe08] sm:$0xff] }
 0x2e5   :  { %v8305_v8 = vpop.f32.mrf.mxu1  ;;  %v8310_v61 = vpop.f32.mrf.mxu2 }
 0x2e6   :  { %11531 = vst [vmem:[#allocation109_spill] sm:$0xff] %v8305_v8  ;;  %6106 = vmatmul.msk.f32.gmra.mxu1 %vm565_vm1, %v293_v17  ;;  %6203 = vmatmul.msk.f32.gmra.mxu2 %vm565_vm1, %v390_v27  ;;  %v391_v27 = vld [vmem:[%s11408_s0 + $0xad8] sm:$0xff]  ;;  %v309_v8 = vld [vmem:[%s11408_s0 + $0x848] sm:$0xff] }
 0x2e7   :  { %11532 = vst [vmem:[#allocation110_spill] sm:$0xff] %v8310_v61  ;;  %v295_v61 = vld [vmem:[%s11408_s0 + $0x7d8] sm:$0xff] }
 0x2e8   :  { %v2351_v20 = vpop.f32.mrf.mxu0 }
 0x2eb   :  { %5949 = vmatmul.msk.f32.gmra.mxu0 %vm565_vm1, %v136_v57  ;;  %v8320_v57 = vpop.f32.mrf.mxu3 }
 0x2ec   :  { %11533 = vst [vmem:[#allocation111_spill] sm:$0xff] %v8320_v57  ;;  %6306 = vmatmul.msk.f32.gmra.mxu3 %vm565_vm1, %v493_v37  ;;  %v494_v37 = vld [vmem:[%s11408_s0 + $0xe10] sm:$0xff] }
 0x2ed   :  { %v8327_v28 = vpop.f32.mrf.mxu1  ;;  %v8332_v17 = vpop.f32.mrf.mxu2 }
 0x2ee   :  { %11534 = vst [vmem:[#allocation112_spill] sm:$0xff] %v8327_v28  ;;  %6107 = vmatmul.msk.f32.gmra.mxu1 %vm565_vm1, %v294_v43  ;;  %6204 = vmatmul.msk.f32.gmra.mxu2 %vm565_vm1, %v391_v27  ;;  %v392_v27 = vld [vmem:[%s11408_s0 + $0xae0] sm:$0xff]  ;;  %v310_v28 = vld [vmem:[%s11408_s0 + $0x850] sm:$0xff] }
 0x2ef   :  { %11535 = vst [vmem:[#allocation113_spill] sm:$0xff] %v8332_v17  ;;  %v139_v17 = vld [vmem:[%s11408_s0 + $0x2f8] sm:$0xff] }
 0x2f0   :  { %v2354_v55 = vpop.f32.mrf.mxu0 }
 0x2f1   :  { %v2355_v34 = vadd.f32 %v7964_v53, %v2354_v55  ;;  %v2352_v55 = vadd.f32 %v7964_v53, %v2351_v20 }
 0x2f3   :  { %5950 = vmatmul.msk.f32.gmra.mxu0 %vm565_vm1, %v137_v2  ;;  %v8342_v2 = vpop.f32.mrf.mxu3 }
 0x2f4   :  { %11536 = vst [vmem:[#allocation114_spill] sm:$0xff] %v8342_v2  ;;  %6307 = vmatmul.msk.f32.gmra.mxu3 %vm565_vm1, %v494_v37  ;;  %v495_v37 = vld [vmem:[%s11408_s0 + $0xe18] sm:$0xff] }
 0x2f5   :  { %v8349_v24 = vpop.f32.mrf.mxu1  ;;  %v8354_v43 = vpop.f32.mrf.mxu2 }
 0x2f6   :  { %11537 = vst [vmem:[#allocation115_spill] sm:$0xff] %v8349_v24  ;;  %6108 = vmatmul.msk.f32.gmra.mxu1 %vm565_vm1, %v295_v61  ;;  %6205 = vmatmul.msk.f32.gmra.mxu2 %vm565_vm1, %v392_v27  ;;  %v296_v27 = vld [vmem:[%s11408_s0 + $0x7e0] sm:$0xff]  ;;  %v311_v24 = vld [vmem:[%s11408_s0 + $0x858] sm:$0xff] }
 0x2f7   :  { %11538 = vst [vmem:[#allocation116_spill] sm:$0xff] %v8354_v43 }
 0x2f8   :  { %v2357_v57 = vpop.f32.mrf.mxu0 }
 0x2f9   :  { %v2358_v43 = vadd.f32 %v7964_v53, %v2357_v57  ;;  %v496_v57 = vld [vmem:[%s11408_s0 + $0xe20] sm:$0xff] }
 0x2fb   :  { %5951 = vmatmul.msk.f32.gmra.mxu0 %vm565_vm1, %v138_v60  ;;  %v8364_v60 = vpop.f32.mrf.mxu3 }
 0x2fc   :  { %11539 = vst [vmem:[#allocation117_spill] sm:$0xff] %v8364_v60  ;;  %6308 = vmatmul.msk.f32.gmra.mxu3 %vm565_vm1, %v495_v37  ;;  %v393_v60 = vld [vmem:[%s11408_s0 + $0xae8] sm:$0xff] }
 0x2fd   :  { %v8374_v61 = vpop.f32.mrf.mxu1  ;;  %v8379_v37 = vpop.f32.mrf.mxu2 }
 0x2fe   :  { %11540 = vst [vmem:[#allocation118_spill] sm:$0xff] %v8374_v61  ;;  %6109 = vmatmul.msk.f32.gmra.mxu1 %vm565_vm1, %v296_v27  ;;  %6206 = vmatmul.msk.f32.gmra.mxu2 %vm565_vm1, %v393_v60  ;;  %v140_v27 = vld [vmem:[%s11408_s0 + $0x300] sm:$0xff]  ;;  %v2346_v60 = vadd.f32 %v7964_v53, %v8253_v21  ;;  %v394_v21 = vld [vmem:[%s11408_s0 + $0xaf0] sm:$0xff] }
 0x2ff   :  { %11541 = vst [vmem:[#allocation119_spill] sm:$0xff] %v8379_v37  ;;  %v3736_v37 = vmax.f32 %v2355_v34, 0.0 }
 0x300   :  { %v2360_v2 = vpop.f32.mrf.mxu0 }
 0x301   :  { %v2361_v59 = vadd.f32 %v7964_v53, %v2360_v2  ;;  %v2349_v2 = vadd.f32 %v7964_v53, %v8277_v12  ;;  %v297_v12 = vld [vmem:[%s11408_s0 + $0x7e8] sm:$0xff] }
 0x303   :  { %v3738_v11 = vmax.f32 %v2361_v59, 0.0  ;;  %5952 = vmatmul.msk.f32.gmra.mxu0 %vm565_vm1, %v139_v17  ;;  %v8389_v59 = vpop.f32.mrf.mxu3  ;;  %v3737_v17 = vmax.f32 %v2358_v43, 0.0  ;;  %v3734_v20 = vmax.f32 %v2349_v2, 0.0 }
 0x304   :  { %11542 = vst [vmem:[#allocation120_spill] sm:$0xff] %v8389_v59  ;;  %6309 = vmatmul.msk.f32.gmra.mxu3 %vm565_vm1, %v496_v57  ;;  %v3735_v59 = vmax.f32 %v2352_v55, 0.0  ;;  %v2340_v57 = vadd.f32 %v7964_v53, %v8205_v46  ;;  %v2337_v55 = vadd.f32 %v7964_v53, %v8181_v31  ;;  %v2331_v46 = vadd.f32 %v7964_v53, %v8133_v40  ;;  %v498_v40 = vld [vmem:[%s11408_s0 + $0xe30] sm:$0xff] }
 0x305   :  { %4559 = vmatpush.msra.mxu2 %v3738_v11  ;;  %v2343_v11 = vadd.f32 %v7964_v53, %v8229_v48  ;;  %v8405_v34 = vpop.f32.mrf.mxu1  ;;  %v8410_v43 = vpop.f32.mrf.mxu2  ;;  %v497_v48 = vld [vmem:[%s11408_s0 + $0xe28] sm:$0xff] }
 0x306   :  { %11543 = vst [vmem:[#allocation121_spill] sm:$0xff] %v8405_v34  ;;  %6110 = vmatmul.msk.f32.gmra.mxu1 %vm565_vm1, %v297_v12  ;;  %6207 = vmatmul.msk.f32.gmra.mxu2 %vm565_vm1, %v394_v21  ;;  %v2334_v12 = vadd.f32 %v7964_v53, %v8157_v32  ;;  %v3731_v21 = vmax.f32 %v2340_v57, 0.0  ;;  %v395_v32 = vld [vmem:[%s11408_s0 + $0xaf8] sm:$0xff]  ;;  %v2328_v57 = vadd.f32 %v7964_v53, %v8109_v16 }
 0x307   :  { %4560 = vmatpush.msra.mxu2 %v3737_v17  ;;  %11544 = vst [vmem:[#allocation122_spill] sm:$0xff] %v8410_v43  ;;  %v3732_v17 = vmax.f32 %v2343_v11, 0.0  ;;  %v298_v11 = vld [vmem:[%s11408_s0 + $0x7f0] sm:$0xff]  ;;  %v2319_v16 = vadd.f32 %v7964_v53, %v8023_v0  ;;  %v499_v0 = vld [vmem:[%s11408_s0 + $0xe38] sm:$0xff] }
 0x308   :  { %v8395_v36 = vpop.f32.mrf.mxu0 }
 0x309   :  { %4561 = vmatpush.msra.mxu2 %v3736_v37 }
 0x30b   :  { %5953 = vmatmul.msk.f32.gmra.mxu0 %vm565_vm1, %v140_v27  ;;  %4562 = vmatpush.msra.mxu2 %v3735_v59  ;;  %v8420_v37 = vpop.f32.mrf.mxu3  ;;  %v3733_v59 = vmax.f32 %v2346_v60, 0.0  ;;  %v141_v27 = vld [vmem:[%s11408_s0 + $0x308] sm:$0xff]  ;;  %v3730_v60 = vmax.f32 %v2337_v55, 0.0  ;;  %v2325_v55 = vadd.f32 %v7964_v53, %v8085_v51 }
 0x30c   :  { %11545 = vst [vmem:[#allocation123_spill] sm:$0xff] %v8420_v37  ;;  %6310 = vmatmul.msk.f32.gmra.mxu3 %vm565_vm1, %v497_v48 }
 0x30d   :  { %4563 = vmatpush.msra.mxu2 %v3734_v20  ;;  %v8437_v31 = vpop.f32.mrf.mxu1  ;;  %v8442_v20 = vpop.f32.mrf.mxu2 }
 0x30e   :  { %11546 = vst [vmem:[#allocation124_spill] sm:$0xff] %v8437_v31  ;;  %6111 = vmatmul.msk.f32.gmra.mxu1 %vm565_vm1, %v298_v11  ;;  %6208 = vmatmul.msk.f32.gmra.mxu2 %vm565_vm1, %v395_v32  ;;  %v2322_v11 = vadd.f32 %v7964_v53, %v8055_v44  ;;  %v3727_v32 = vmax.f32 %v2328_v57, 0.0  ;;  %v396_v44 = vld [vmem:[%s11408_s0 + $0xb00] sm:$0xff]  ;;  %v2316_v57 = vadd.f32 %v7964_v53, %v7991_v18 }
 0x30f   :  { %4564 = vmatpush.msra.mxu2 %v3733_v59  ;;  %11547 = vst [vmem:[#allocation125_spill] sm:$0xff] %v8442_v20  ;;  %v3729_v59 = vmax.f32 %v2334_v12, 0.0  ;;  %v3726_v12 = vmax.f32 %v2325_v55, 0.0  ;;  %v3724_v55 = vmax.f32 %v2319_v16, 0.0  ;;  %v300_v18 = vld [vmem:[%s11408_s0 + $0x800] sm:$0xff]  ;;  %v397_v16 = vld [vmem:[%s11408_s0 + $0xb08] sm:$0xff] }
 0x310   :  { %v8427_v2 = vpop.f32.mrf.mxu0  ;;  %v147_v20 = vld [vmem:[%s11408_s0 + $0x338] sm:$0xff] }
 0x311   :  { %4565 = vmatpush.msra.mxu2 %v3732_v17  ;;  %v3728_v17 = vmax.f32 %v2331_v46, 0.0  ;;  %v299_v46 = vld [vmem:[%s11408_s0 + $0x7f8] sm:$0xff] }
 0x313   :  { %5954 = vmatmul.msk.f32.gmra.mxu0 %vm565_vm1, %v141_v27  ;;  %4566 = vmatpush.msra.mxu2 %v3731_v21  ;;  %v8452_v48 = vpop.f32.mrf.mxu3  ;;  %v142_v21 = vld [vmem:[%s11408_s0 + $0x310] sm:$0xff] }
 0x314   :  { %11548 = vst [vmem:[#allocation126_spill] sm:$0xff] %v8452_v48  ;;  %6311 = vmatmul.msk.f32.gmra.mxu3 %vm565_vm1, %v498_v40  ;;  %v146_v48 = vld [vmem:[%s11408_s0 + $0x330] sm:$0xff] }
 0x315   :  { %4567 = vmatpush.msra.mxu2 %v3730_v60  ;;  %v8469_v51 = vpop.f32.mrf.mxu1  ;;  %v8474_v60 = vpop.f32.mrf.mxu2 }
 0x316   :  { %11549 = vst [vmem:[#allocation127_spill] sm:$0xff] %v8469_v51  ;;  %6112 = vmatmul.msk.f32.gmra.mxu1 %vm565_vm1, %v299_v46  ;;  %6209 = vmatmul.msk.f32.gmra.mxu2 %vm565_vm1, %v396_v44 }
 0x317   :  { %4568 = vmatpush.msra.mxu2 %v3729_v59  ;;  %11550 = vst [vmem:[#allocation128_spill] sm:$0xff] %v8474_v60  ;;  %v3725_v59 = vmax.f32 %v2322_v11, 0.0 }
 0x318   :  { %v8459_v27 = vpop.f32.mrf.mxu0 }
 0x319   :  { %4569 = vmatpush.msra.mxu2 %v3728_v17 }
 0x31b   :  { %5955 = vmatmul.msk.f32.gmra.mxu0 %vm565_vm1, %v142_v21  ;;  %4570 = vmatpush.msra.mxu2 %v3727_v32  ;;  %v8484_v40 = vpop.f32.mrf.mxu3  ;;  %v143_v21 = vld [vmem:[%s11408_s0 + $0x318] sm:$0xff]  ;;  %v3723_v32 = vmax.f32 %v2316_v57, 0.0  ;;  %v144_v57 = vld [vmem:[%s11408_s0 + $0x320] sm:$0xff] }
 0x31c   :  { %11551 = vst [vmem:[#allocation129_spill] sm:$0xff] %v8484_v40  ;;  %6312 = vmatmul.msk.f32.gmra.mxu3 %vm565_vm1, %v499_v0 }
 0x31d   :  { %4571 = vmatpush.msra.mxu2 %v3726_v12  ;;  %v8495_v46 = vpop.f32.mrf.mxu1  ;;  %v8500_v11 = vpop.f32.mrf.mxu2  ;;  %v500_v12 = vld [vmem:[%s11408_s0 + $0xe40] sm:$0xff] }
 0x31e   :  { %11552 = vst [vmem:[#allocation130_spill] sm:$0xff] %v8495_v46  ;;  %6113 = vmatmul.msk.f32.gmra.mxu1 %vm565_vm1, %v300_v18  ;;  %6210 = vmatmul.msk.f32.gmra.mxu2 %vm565_vm1, %v397_v16  ;;  %v501_v18 = vld [vmem:[%s11408_s0 + $0xe48] sm:$0xff] }
 0x31f   :  { %4572 = vmatpush.msra.mxu2 %v3725_v59  ;;  %11553 = vst [vmem:[#allocation131_spill] sm:$0xff] %v8500_v11 }
 0x320   :  { %v8489_v17 = vpop.f32.mrf.mxu0 }
 0x321   :  { %4573 = vmatpush.msra.mxu2 %v3724_v55  ;;  %v301_v55 = vld [vmem:[%s11408_s0 + $0x808] sm:$0xff] }
 0x323   :  { %5956 = vmatmul.msk.f32.gmra.mxu0 %vm565_vm1, %v143_v21  ;;  %4574 = vmatpush.msra.mxu2 %v3723_v32  ;;  %v8510_v44 = vpop.f32.mrf.mxu3  ;;  %v398_v32 = vld [vmem:[%s11408_s0 + $0xb10] sm:$0xff] }
 0x324   :  { %11554 = vst [vmem:[#allocation132_spill] sm:$0xff] %v8510_v44  ;;  %6313 = vmatmul.msk.f32.gmra.mxu3 %vm565_vm1, %v500_v12 }
 0x325   :  { %v8519_v59 = vpop.f32.mrf.mxu1  ;;  %v8524_v21 = vpop.f32.mrf.mxu2 }
 0x326   :  { %11555 = vst [vmem:[#allocation133_spill] sm:$0xff] %v8519_v59  ;;  %6114 = vmatmul.msk.f32.gmra.mxu1 %vm565_vm1, %v301_v55  ;;  %6211 = vmatmul.msk.f32.gmra.mxu2 %vm565_vm1, %v398_v32  ;;  %v302_v55 = vld [vmem:[%s11408_s0 + $0x810] sm:$0xff]  ;;  %v399_v32 = vld [vmem:[%s11408_s0 + $0xb18] sm:$0xff] }
 0x327   :  { %11556 = vst [vmem:[#allocation134_spill] sm:$0xff] %v8524_v21  ;;  %v148_v21 = vld [vmem:[%s11408_s0 + $0x340] sm:$0xff] }
 0x328   :  { %v8513_v0 = vpop.f32.mrf.mxu0 }
 0x32b   :  { %5957 = vmatmul.msk.f32.gmra.mxu0 %vm565_vm1, %v144_v57  ;;  %v8534_v16 = vpop.f32.mrf.mxu3  ;;  %v145_v57 = vld [vmem:[%s11408_s0 + $0x328] sm:$0xff] }
 0x32c   :  { %11557 = vst [vmem:[#allocation135_spill] sm:$0xff] %v8534_v16  ;;  %6314 = vmatmul.msk.f32.gmra.mxu3 %vm565_vm1, %v501_v18  ;;  %v502_v18 = vld [vmem:[%s11408_s0 + $0xe50] sm:$0xff] }
 0x32d   :  { %v8543_v44 = vpop.f32.mrf.mxu1  ;;  %v8548_v37 = vpop.f32.mrf.mxu2 }
 0x32e   :  { %11558 = vst [vmem:[#allocation136_spill] sm:$0xff] %v8543_v44  ;;  %6115 = vmatmul.msk.f32.gmra.mxu1 %vm565_vm1, %v302_v55  ;;  %6212 = vmatmul.msk.f32.gmra.mxu2 %vm565_vm1, %v399_v32  ;;  %v303_v55 = vld [vmem:[%s11408_s0 + $0x818] sm:$0xff]  ;;  %v400_v32 = vld [vmem:[%s11408_s0 + $0xb20] sm:$0xff] }
 0x32f   :  { %11559 = vst [vmem:[#allocation137_spill] sm:$0xff] %v8548_v37 }
 0x330   :  { %v8537_v12 = vpop.f32.mrf.mxu0 }
 0x333   :  { %5958 = vmatmul.msk.f32.gmra.mxu0 %vm565_vm1, %v145_v57  ;;  %v8558_v57 = vpop.f32.mrf.mxu3 }
 0x334   :  { %11560 = vst [vmem:[#allocation138_spill] sm:$0xff] %v8558_v57  ;;  %6315 = vmatmul.msk.f32.gmra.mxu3 %vm565_vm1, %v502_v18  ;;  %v503_v18 = vld [vmem:[%s11408_s0 + $0xe58] sm:$0xff] }
 0x335   :  { %v8567_v40 = vpop.f32.mrf.mxu1  ;;  %v8572_v43 = vpop.f32.mrf.mxu2 }
 0x336   :  { %11561 = vst [vmem:[#allocation139_spill] sm:$0xff] %v8567_v40  ;;  %6116 = vmatmul.msk.f32.gmra.mxu1 %vm565_vm1, %v303_v55  ;;  %6213 = vmatmul.msk.f32.gmra.mxu2 %vm565_vm1, %v400_v32  ;;  %v304_v55 = vld [vmem:[%s11408_s0 + $0x820] sm:$0xff]  ;;  %v401_v32 = vld [vmem:[%s11408_s0 + $0xb28] sm:$0xff] }
 0x337   :  { %11562 = vst [vmem:[#allocation140_spill] sm:$0xff] %v8572_v43 }
 0x338   :  { %v8561_v16 = vpop.f32.mrf.mxu0 }
 0x33b   :  { %5959 = vmatmul.msk.f32.gmra.mxu0 %vm565_vm1, %v146_v48  ;;  %v8582_v48 = vpop.f32.mrf.mxu3 }
 0x33c   :  { %11563 = vst [vmem:[#allocation141_spill] sm:$0xff] %v8582_v48  ;;  %6316 = vmatmul.msk.f32.gmra.mxu3 %vm565_vm1, %v503_v18  ;;  %v504_v18 = vld [vmem:[%s11408_s0 + $0xe60] sm:$0xff] }
 0x33d   :  { %v8591_v60 = vpop.f32.mrf.mxu1  ;;  %v8596_v11 = vpop.f32.mrf.mxu2 }
 0x33e   :  { %11564 = vst [vmem:[#allocation142_spill] sm:$0xff] %v8591_v60  ;;  %6117 = vmatmul.msk.f32.gmra.mxu1 %vm565_vm1, %v304_v55  ;;  %6214 = vmatmul.msk.f32.gmra.mxu2 %vm565_vm1, %v401_v32  ;;  %v305_v55 = vld [vmem:[%s11408_s0 + $0x828] sm:$0xff]  ;;  %v402_v32 = vld [vmem:[%s11408_s0 + $0xb30] sm:$0xff] }
 0x33f   :  { %11565 = vst [vmem:[#allocation143_spill] sm:$0xff] %v8596_v11  ;;  %v149_v11 = vld [vmem:[%s11408_s0 + $0x348] sm:$0xff] }
 0x340   :  { %v8585_v57 = vpop.f32.mrf.mxu0 }
 0x343   :  { %5960 = vmatmul.msk.f32.gmra.mxu0 %vm565_vm1, %v147_v20  ;;  %v8606_v20 = vpop.f32.mrf.mxu3 }
 0x344   :  { %11566 = vst [vmem:[#allocation144_spill] sm:$0xff] %v8606_v20  ;;  %6317 = vmatmul.msk.f32.gmra.mxu3 %vm565_vm1, %v504_v18  ;;  %v505_v18 = vld [vmem:[%s11408_s0 + $0xe68] sm:$0xff] }
 0x345   :  { %v8615_v37 = vpop.f32.mrf.mxu1  ;;  %v8620_v43 = vpop.f32.mrf.mxu2 }
 0x346   :  { %11567 = vst [vmem:[#allocation145_spill] sm:$0xff] %v8620_v43  ;;  %6118 = vmatmul.msk.f32.gmra.mxu1 %vm565_vm1, %v305_v55  ;;  %6215 = vmatmul.msk.f32.gmra.mxu2 %vm565_vm1, %v402_v32  ;;  %v306_v55 = vld [vmem:[%s11408_s0 + $0x830] sm:$0xff]  ;;  %v403_v32 = vld [vmem:[%s11408_s0 + $0xb38] sm:$0xff] }
 0x348   :  { %v8609_v48 = vpop.f32.mrf.mxu0 }
 0x34b   :  { %5961 = vmatmul.msk.f32.gmra.mxu0 %vm565_vm1, %v148_v21  ;;  %v8630_v21 = vpop.f32.mrf.mxu3 }
 0x34c   :  { %11568 = vst [vmem:[#allocation146_spill] sm:$0xff] %v8630_v21  ;;  %6318 = vmatmul.msk.f32.gmra.mxu3 %vm565_vm1, %v505_v18  ;;  %v506_v18 = vld [vmem:[%s11408_s0 + $0xe70] sm:$0xff] }
 0x34d   :  { %v8639_v43 = vpop.f32.mrf.mxu1  ;;  %v8644_v41 = vpop.f32.mrf.mxu2 }
 0x34e   :  { %11569 = vst [vmem:[#allocation147_spill] sm:$0xff] %v8644_v41  ;;  %6119 = vmatmul.msk.f32.gmra.mxu1 %vm565_vm1, %v306_v55  ;;  %6216 = vmatmul.msk.f32.gmra.mxu2 %vm565_vm1, %v403_v32  ;;  %v150_v41 = vld [vmem:[%s11408_s0 + $0x350] sm:$0xff]  ;;  %v307_v55 = vld [vmem:[%s11408_s0 + $0x838] sm:$0xff]  ;;  %v404_v32 = vld [vmem:[%s11408_s0 + $0xb40] sm:$0xff] }
 0x350   :  { %v8633_v20 = vpop.f32.mrf.mxu0 }
 0x353   :  { %5962 = vmatmul.msk.f32.gmra.mxu0 %vm565_vm1, %v149_v11  ;;  %v8654_v11 = vpop.f32.mrf.mxu3 }
 0x354   :  { %11570 = vst [vmem:[#allocation148_spill] sm:$0xff] %v8654_v11  ;;  %6319 = vmatmul.msk.f32.gmra.mxu3 %vm565_vm1, %v506_v18  ;;  %v507_v18 = vld [vmem:[%s11408_s0 + $0xe78] sm:$0xff] }
 0x355   :  { %v8663_v63 = vpop.f32.mrf.mxu1  ;;  %v8668_v33 = vpop.f32.mrf.mxu2 }
 0x356   :  { %11571 = vst [vmem:[#allocation149_spill] sm:$0xff] %v8668_v33  ;;  %6120 = vmatmul.msk.f32.gmra.mxu1 %vm565_vm1, %v307_v55  ;;  %6217 = vmatmul.msk.f32.gmra.mxu2 %vm565_vm1, %v404_v32  ;;  %v151_v33 = vld [vmem:[%s11408_s0 + $0x358] sm:$0xff]  ;;  %v308_v55 = vld [vmem:[%s11408_s0 + $0x840] sm:$0xff]  ;;  %v405_v32 = vld [vmem:[%s11408_s0 + $0xb48] sm:$0xff] }
 0x358   :  { %v8657_v21 = vpop.f32.mrf.mxu0 }
 0x35b   :  { %5963 = vmatmul.msk.f32.gmra.mxu0 %vm565_vm1, %v150_v41  ;;  %v8678_v41 = vpop.f32.mrf.mxu3 }
 0x35c   :  { %11572 = vst [vmem:[#allocation150_spill] sm:$0xff] %v8678_v41  ;;  %6320 = vmatmul.msk.f32.gmra.mxu3 %vm565_vm1, %v507_v18  ;;  %v508_v18 = vld [vmem:[%s11408_s0 + $0xe80] sm:$0xff] }
 0x35d   :  { %v8687_v23 = vpop.f32.mrf.mxu1  ;;  %v8692_v45 = vpop.f32.mrf.mxu2 }
 0x35e   :  { %11573 = vst [vmem:[#allocation151_spill] sm:$0xff] %v8687_v23  ;;  %6121 = vmatmul.msk.f32.gmra.mxu1 %vm565_vm1, %v308_v55  ;;  %6218 = vmatmul.msk.f32.gmra.mxu2 %vm565_vm1, %v405_v32  ;;  %v406_v32 = vld [vmem:[%s11408_s0 + $0xb50] sm:$0xff] }
 0x35f   :  { %11574 = vst [vmem:[#allocation152_spill] sm:$0xff] %v8692_v45  ;;  %v152_v45 = vld [vmem:[%s11408_s0 + $0x360] sm:$0xff] }
 0x360   :  { %v8681_v11 = vpop.f32.mrf.mxu0 }
 0x363   :  { %5964 = vmatmul.msk.f32.gmra.mxu0 %vm565_vm1, %v151_v33  ;;  %v8702_v33 = vpop.f32.mrf.mxu3 }
 0x364   :  { %11575 = vst [vmem:[#allocation153_spill] sm:$0xff] %v8702_v33  ;;  %6321 = vmatmul.msk.f32.gmra.mxu3 %vm565_vm1, %v508_v18  ;;  %v509_v18 = vld [vmem:[%s11408_s0 + $0xe88] sm:$0xff] }
 0x365   :  { %v8709_v23 = vpop.f32.mrf.mxu1  ;;  %v8714_v55 = vpop.f32.mrf.mxu2 }
 0x366   :  { %11576 = vst [vmem:[#allocation154_spill] sm:$0xff] %v8709_v23  ;;  %6122 = vmatmul.msk.f32.gmra.mxu1 %vm565_vm1, %v309_v8  ;;  %6219 = vmatmul.msk.f32.gmra.mxu2 %vm565_vm1, %v406_v32  ;;  %v407_v32 = vld [vmem:[%s11408_s0 + $0xb58] sm:$0xff] }
 0x367   :  { %11577 = vst [vmem:[#allocation155_spill] sm:$0xff] %v8714_v55  ;;  %v153_v55 = vld [vmem:[%s11408_s0 + $0x368] sm:$0xff] }
 0x368   :  { %v2399_v41 = vpop.f32.mrf.mxu0 }
 0x36b   :  { %5965 = vmatmul.msk.f32.gmra.mxu0 %vm565_vm1, %v152_v45  ;;  %v8724_v45 = vpop.f32.mrf.mxu3 }
 0x36c   :  { %11578 = vst [vmem:[#allocation156_spill] sm:$0xff] %v8724_v45  ;;  %6322 = vmatmul.msk.f32.gmra.mxu3 %vm565_vm1, %v509_v18  ;;  %v510_v18 = vld [vmem:[%s11408_s0 + $0xe90] sm:$0xff] }
 0x36d   :  { %v8731_v23 = vpop.f32.mrf.mxu1  ;;  %v8736_v8 = vpop.f32.mrf.mxu2 }
 0x36e   :  { %11579 = vst [vmem:[#allocation157_spill] sm:$0xff] %v8731_v23  ;;  %6123 = vmatmul.msk.f32.gmra.mxu1 %vm565_vm1, %v310_v28  ;;  %6220 = vmatmul.msk.f32.gmra.mxu2 %vm565_vm1, %v407_v32  ;;  %v408_v32 = vld [vmem:[%s11408_s0 + $0xb60] sm:$0xff] }
 0x36f   :  { %11580 = vst [vmem:[#allocation158_spill] sm:$0xff] %v8736_v8  ;;  %v154_v8 = vld [vmem:[%s11408_s0 + $0x370] sm:$0xff] }
 0x370   :  { %v2402_v33 = vpop.f32.mrf.mxu0 }
 0x371   :  { %v2403_v34 = vadd.f32 %v7964_v53, %v2402_v33  ;;  %v2400_v33 = vadd.f32 %v7964_v53, %v2399_v41 }
 0x373   :  { %5966 = vmatmul.msk.f32.gmra.mxu0 %vm565_vm1, %v153_v55  ;;  %v8746_v55 = vpop.f32.mrf.mxu3 }
 0x374   :  { %11581 = vst [vmem:[#allocation159_spill] sm:$0xff] %v8746_v55  ;;  %6323 = vmatmul.msk.f32.gmra.mxu3 %vm565_vm1, %v510_v18  ;;  %v511_v18 = vld [vmem:[%s11408_s0 + $0xe98] sm:$0xff] }
 0x375   :  { %v8753_v23 = vpop.f32.mrf.mxu1  ;;  %v8758_v28 = vpop.f32.mrf.mxu2 }
 0x376   :  { %11582 = vst [vmem:[#allocation160_spill] sm:$0xff] %v8753_v23  ;;  %6124 = vmatmul.msk.f32.gmra.mxu1 %vm565_vm1, %v311_v24  ;;  %6221 = vmatmul.msk.f32.gmra.mxu2 %vm565_vm1, %v408_v32  ;;  %v312_v32 = vld [vmem:[%s11408_s0 + $0x860] sm:$0xff] }
 0x377   :  { %11583 = vst [vmem:[#allocation161_spill] sm:$0xff] %v8758_v28  ;;  %v155_v28 = vld [vmem:[%s11408_s0 + $0x378] sm:$0xff] }
 0x378   :  { %v2405_v45 = vpop.f32.mrf.mxu0 }
 0x379   :  { %v2406_v23 = vadd.f32 %v7964_v53, %v2405_v45  ;;  %v512_v45 = vld [vmem:[%s11408_s0 + $0xea0] sm:$0xff] }
 0x37b   :  { %5967 = vmatmul.msk.f32.gmra.mxu0 %vm565_vm1, %v154_v8  ;;  %v8768_v8 = vpop.f32.mrf.mxu3 }
 0x37c   :  { %11584 = vst [vmem:[#allocation162_spill] sm:$0xff] %v8768_v8  ;;  %6324 = vmatmul.msk.f32.gmra.mxu3 %vm565_vm1, %v511_v18  ;;  %v409_v8 = vld [vmem:[%s11408_s0 + $0xb68] sm:$0xff] }
 0x37d   :  { %v8778_v24 = vpop.f32.mrf.mxu1  ;;  %v8783_v18 = vpop.f32.mrf.mxu2 }
 0x37e   :  { %11585 = vst [vmem:[#allocation163_spill] sm:$0xff] %v8778_v24  ;;  %6125 = vmatmul.msk.f32.gmra.mxu1 %vm565_vm1, %v312_v32  ;;  %6222 = vmatmul.msk.f32.gmra.mxu2 %vm565_vm1, %v409_v8  ;;  %v156_v32 = vld [vmem:[%s11408_s0 + $0x380] sm:$0xff]  ;;  %v2394_v8 = vadd.f32 %v7964_v53, %v8657_v21  ;;  %v410_v21 = vld [vmem:[%s11408_s0 + $0xb70] sm:$0xff] }
 0x37f   :  { %11586 = vst [vmem:[#allocation164_spill] sm:$0xff] %v8783_v18  ;;  %v3752_v18 = vmax.f32 %v2403_v34, 0.0 }
 0x380   :  { %v2408_v55 = vpop.f32.mrf.mxu0 }
 0x381   :  { %v2409_v61 = vadd.f32 %v7964_v53, %v2408_v55  ;;  %v3753_v55 = vmax.f32 %v2406_v23, 0.0  ;;  %v2391_v23 = vadd.f32 %v7964_v53, %v8633_v20 }
 0x383   :  { %v3754_v31 = vmax.f32 %v2409_v61, 0.0  ;;  %5968 = vmatmul.msk.f32.gmra.mxu0 %vm565_vm1, %v155_v28  ;;  %v8793_v61 = vpop.f32.mrf.mxu3  ;;  %v2397_v28 = vadd.f32 %v7964_v53, %v8681_v11  ;;  %v313_v11 = vld [vmem:[%s11408_s0 + $0x868] sm:$0xff] }
 0x384   :  { %11587 = vst [vmem:[#allocation165_spill] sm:$0xff] %v8793_v61  ;;  %6325 = vmatmul.msk.f32.gmra.mxu3 %vm565_vm1, %v512_v45  ;;  %v3751_v61 = vmax.f32 %v2400_v33, 0.0  ;;  %v513_v53 = vld [vmem:[%s11408_s0 + $0xea8] sm:$0xff] }
 0x385   :  { %4582 = vmatpush.msra.mxu3 %v3754_v31  ;;  %v3750_v31 = vmax.f32 %v2397_v28, 0.0  ;;  %v8809_v34 = vpop.f32.mrf.mxu1  ;;  %v8814_v41 = vpop.f32.mrf.mxu2 }
 0x386   :  { %11588 = vst [vmem:[#allocation166_spill] sm:$0xff] %v8809_v34  ;;  %6126 = vmatmul.msk.f32.gmra.mxu1 %vm565_vm1, %v313_v11  ;;  %6223 = vmatmul.msk.f32.gmra.mxu2 %vm565_vm1, %v410_v21 }
 0x387   :  { %4583 = vmatpush.msra.mxu3 %v3753_v55  ;;  %11589 = vst [vmem:[#allocation167_spill] sm:$0xff] %v8814_v41  ;;  %v3748_v55 = vmax.f32 %v2391_v23, 0.0  ;;  %v314_v23 = vld [vmem:[%s11408_s0 + $0x870] sm:$0xff] }
 0x388   :  { %v8799_v24 = vpop.f32.mrf.mxu0 }
 0x389   :  { %4584 = vmatpush.msra.mxu3 %v3752_v18  ;;  %v8829_v18 = vld [vmem:[%s11407_s2] ss:$0 sm:$0xff] }
 0x38a   :  { %v2388_v45 = vadd.f32 %v8829_v18, %v8609_v48  ;;  %v2385_v33 = vadd.f32 %v8829_v18, %v8585_v57  ;;  %v2382_v11 = vadd.f32 %v8829_v18, %v8561_v16  ;;  %v2379_v48 = vadd.f32 %v8829_v18, %v8537_v12  ;;  %v411_v16 = vld [vmem:[%s11408_s0 + $0xb78] sm:$0xff]  ;;  %v514_v12 = vld [vmem:[%s11408_s0 + $0xeb0] sm:$0xff] }
 0x38b   :  { %5969 = vmatmul.msk.f32.gmra.mxu0 %vm565_vm1, %v156_v32  ;;  %4585 = vmatpush.msra.mxu3 %v3751_v61  ;;  %v8824_v20 = vpop.f32.mrf.mxu3  ;;  %v3749_v61 = vmax.f32 %v2394_v8, 0.0  ;;  %v157_v32 = vld [vmem:[%s11408_s0 + $0x388] sm:$0xff] }
 0x38c   :  { %11590 = vst [vmem:[#allocation168_spill] sm:$0xff] %v8824_v20  ;;  %6326 = vmatmul.msk.f32.gmra.mxu3 %vm565_vm1, %v513_v53  ;;  %v3747_v21 = vmax.f32 %v2388_v45, 0.0  ;;  %v3746_v8 = vmax.f32 %v2385_v33, 0.0  ;;  %v2376_v45 = vadd.f32 %v8829_v18, %v8513_v0  ;;  %v2373_v33 = vadd.f32 %v8829_v18, %v8489_v17 }
 0x38d   :  { %4586 = vmatpush.msra.mxu3 %v3750_v31  ;;  %v8846_v57 = vpop.f32.mrf.mxu1  ;;  %v8851_v31 = vpop.f32.mrf.mxu2  ;;  %v2367_v0 = vadd.f32 %v8829_v18, %v8427_v2  ;;  %v515_v2 = vld [vmem:[%s11408_s0 + $0xeb8] sm:$0xff] }
 0x38e   :  { %11591 = vst [vmem:[#allocation169_spill] sm:$0xff] %v8846_v57  ;;  %6127 = vmatmul.msk.f32.gmra.mxu1 %vm565_vm1, %v314_v23  ;;  %6224 = vmatmul.msk.f32.gmra.mxu2 %vm565_vm1, %v411_v16  ;;  %v2370_v23 = vadd.f32 %v8829_v18, %v8459_v27  ;;  %v3743_v16 = vmax.f32 %v2376_v45, 0.0  ;;  %v412_v27 = vld [vmem:[%s11408_s0 + $0xb80] sm:$0xff]  ;;  %v2364_v45 = vadd.f32 %v8829_v18, %v8395_v36 }
 0x38f   :  { %4587 = vmatpush.msra.mxu3 %v3749_v61  ;;  %11592 = vst [vmem:[#allocation170_spill] sm:$0xff] %v8851_v31  ;;  %v3745_v61 = vmax.f32 %v2382_v11, 0.0  ;;  %v3742_v11 = vmax.f32 %v2373_v33, 0.0  ;;  %v3740_v33 = vmax.f32 %v2367_v0, 0.0  ;;  %v316_v36 = vld [vmem:[%s11408_s0 + $0x880] sm:$0xff]  ;;  %v413_v0 = vld [vmem:[%s11408_s0 + $0xb88] sm:$0xff] }
 0x390   :  { %v8836_v28 = vpop.f32.mrf.mxu0  ;;  %v163_v31 = vld [vmem:[%s11408_s0 + $0x3b8] sm:$0xff] }
 0x391   :  { %4588 = vmatpush.msra.mxu3 %v3748_v55  ;;  %v3744_v55 = vmax.f32 %v2379_v48, 0.0  ;;  %v315_v48 = vld [vmem:[%s11408_s0 + $0x878] sm:$0xff] }
 0x393   :  { %5970 = vmatmul.msk.f32.gmra.mxu0 %vm565_vm1, %v157_v32  ;;  %4589 = vmatpush.msra.mxu3 %v3747_v21  ;;  %v8861_v53 = vpop.f32.mrf.mxu3  ;;  %v158_v21 = vld [vmem:[%s11408_s0 + $0x390] sm:$0xff] }
 0x394   :  { %11593 = vst [vmem:[#allocation171_spill] sm:$0xff] %v8861_v53  ;;  %6327 = vmatmul.msk.f32.gmra.mxu3 %vm565_vm1, %v514_v12  ;;  %v162_v53 = vld [vmem:[%s11408_s0 + $0x3b0] sm:$0xff] }
 0x395   :  { %4590 = vmatpush.msra.mxu3 %v3746_v8  ;;  %v8878_v17 = vpop.f32.mrf.mxu1  ;;  %v8883_v8 = vpop.f32.mrf.mxu2 }
 0x396   :  { %11594 = vst [vmem:[#allocation172_spill] sm:$0xff] %v8878_v17  ;;  %6128 = vmatmul.msk.f32.gmra.mxu1 %vm565_vm1, %v315_v48  ;;  %6225 = vmatmul.msk.f32.gmra.mxu2 %vm565_vm1, %v412_v27 }
 0x397   :  { %4591 = vmatpush.msra.mxu3 %v3745_v61  ;;  %11595 = vst [vmem:[#allocation173_spill] sm:$0xff] %v8883_v8  ;;  %v3741_v61 = vmax.f32 %v2370_v23, 0.0 }
 0x398   :  { %v8868_v32 = vpop.f32.mrf.mxu0 }
 0x399   :  { %4592 = vmatpush.msra.mxu3 %v3744_v55 }
 0x39b   :  { %5971 = vmatmul.msk.f32.gmra.mxu0 %vm565_vm1, %v158_v21  ;;  %4593 = vmatpush.msra.mxu3 %v3743_v16  ;;  %v8893_v12 = vpop.f32.mrf.mxu3  ;;  %v159_v21 = vld [vmem:[%s11408_s0 + $0x398] sm:$0xff]  ;;  %v3739_v16 = vmax.f32 %v2364_v45, 0.0  ;;  %v160_v45 = vld [vmem:[%s11408_s0 + $0x3a0] sm:$0xff] }
 0x39c   :  { %11596 = vst [vmem:[#allocation174_spill] sm:$0xff] %v8893_v12  ;;  %6328 = vmatmul.msk.f32.gmra.mxu3 %vm565_vm1, %v515_v2 }
 0x39d   :  { %4594 = vmatpush.msra.mxu3 %v3742_v11  ;;  %v8904_v48 = vpop.f32.mrf.mxu1  ;;  %v8909_v23 = vpop.f32.mrf.mxu2  ;;  %v516_v11 = vld [vmem:[%s11408_s0 + $0xec0] sm:$0xff] }
 0x39e   :  { %11597 = vst [vmem:[#allocation175_spill] sm:$0xff] %v8904_v48  ;;  %6129 = vmatmul.msk.f32.gmra.mxu1 %vm565_vm1, %v316_v36  ;;  %6226 = vmatmul.msk.f32.gmra.mxu2 %vm565_vm1, %v413_v0  ;;  %v517_v36 = vld [vmem:[%s11408_s0 + $0xec8] sm:$0xff] }
 0x39f   :  { %4595 = vmatpush.msra.mxu3 %v3741_v61  ;;  %11598 = vst [vmem:[#allocation176_spill] sm:$0xff] %v8909_v23 }
 0x3a0   :  { %v8898_v55 = vpop.f32.mrf.mxu0 }
 0x3a1   :  { %4596 = vmatpush.msra.mxu3 %v3740_v33  ;;  %v317_v33 = vld [vmem:[%s11408_s0 + $0x888] sm:$0xff] }
 0x3a3   :  { %5972 = vmatmul.msk.f32.gmra.mxu0 %vm565_vm1, %v159_v21  ;;  %4597 = vmatpush.msra.mxu3 %v3739_v16  ;;  %v8919_v27 = vpop.f32.mrf.mxu3  ;;  %v414_v16 = vld [vmem:[%s11408_s0 + $0xb90] sm:$0xff] }
 0x3a4   :  { %11599 = vst [vmem:[#allocation177_spill] sm:$0xff] %v8919_v27  ;;  %6329 = vmatmul.msk.f32.gmra.mxu3 %vm565_vm1, %v516_v11 }
 0x3a5   :  { %v8928_v61 = vpop.f32.mrf.mxu1  ;;  %v8933_v21 = vpop.f32.mrf.mxu2 }
 0x3a6   :  { %11600 = vst [vmem:[#allocation178_spill] sm:$0xff] %v8928_v61  ;;  %6130 = vmatmul.msk.f32.gmra.mxu1 %vm565_vm1, %v317_v33  ;;  %6227 = vmatmul.msk.f32.gmra.mxu2 %vm565_vm1, %v414_v16  ;;  %v318_v33 = vld [vmem:[%s11408_s0 + $0x890] sm:$0xff]  ;;  %v415_v16 = vld [vmem:[%s11408_s0 + $0xb98] sm:$0xff] }
 0x3a7   :  { %11601 = vst [vmem:[#allocation179_spill] sm:$0xff] %v8933_v21  ;;  %v164_v21 = vld [vmem:[%s11408_s0 + $0x3c0] sm:$0xff] }
 0x3a8   :  { %v8922_v2 = vpop.f32.mrf.mxu0 }
 0x3ab   :  { %5973 = vmatmul.msk.f32.gmra.mxu0 %vm565_vm1, %v160_v45  ;;  %v8943_v0 = vpop.f32.mrf.mxu3  ;;  %v161_v45 = vld [vmem:[%s11408_s0 + $0x3a8] sm:$0xff] }
 0x3ac   :  { %11602 = vst [vmem:[#allocation180_spill] sm:$0xff] %v8943_v0  ;;  %6330 = vmatmul.msk.f32.gmra.mxu3 %vm565_vm1, %v517_v36  ;;  %v518_v36 = vld [vmem:[%s11408_s0 + $0xed0] sm:$0xff] }
 0x3ad   :  { %v8952_v27 = vpop.f32.mrf.mxu1  ;;  %v8957_v20 = vpop.f32.mrf.mxu2 }
 0x3ae   :  { %11603 = vst [vmem:[#allocation181_spill] sm:$0xff] %v8952_v27  ;;  %6131 = vmatmul.msk.f32.gmra.mxu1 %vm565_vm1, %v318_v33  ;;  %6228 = vmatmul.msk.f32.gmra.mxu2 %vm565_vm1, %v415_v16  ;;  %v319_v33 = vld [vmem:[%s11408_s0 + $0x898] sm:$0xff]  ;;  %v416_v16 = vld [vmem:[%s11408_s0 + $0xba0] sm:$0xff] }
 0x3af   :  { %11604 = vst [vmem:[#allocation182_spill] sm:$0xff] %v8957_v20  ;;  %v167_v27 = vld [vmem:[%s11408_s0 + $0x3d8] sm:$0xff] }
 0x3b0   :  { %v8946_v11 = vpop.f32.mrf.mxu0 }
 0x3b3   :  { %5974 = vmatmul.msk.f32.gmra.mxu0 %vm565_vm1, %v161_v45  ;;  %v8967_v45 = vpop.f32.mrf.mxu3 }
 0x3b4   :  { %11605 = vst [vmem:[#allocation183_spill] sm:$0xff] %v8967_v45  ;;  %6331 = vmatmul.msk.f32.gmra.mxu3 %vm565_vm1, %v518_v36  ;;  %v519_v36 = vld [vmem:[%s11408_s0 + $0xed8] sm:$0xff] }
 0x3b5   :  { %v8976_v12 = vpop.f32.mrf.mxu1  ;;  %v8981_v41 = vpop.f32.mrf.mxu2 }
 0x3b6   :  { %11606 = vst [vmem:[#allocation184_spill] sm:$0xff] %v8976_v12  ;;  %6132 = vmatmul.msk.f32.gmra.mxu1 %vm565_vm1, %v319_v33  ;;  %6229 = vmatmul.msk.f32.gmra.mxu2 %vm565_vm1, %v416_v16  ;;  %v320_v33 = vld [vmem:[%s11408_s0 + $0x8a0] sm:$0xff]  ;;  %v417_v16 = vld [vmem:[%s11408_s0 + $0xba8] sm:$0xff] }
 0x3b7   :  { %11607 = vst [vmem:[#allocation185_spill] sm:$0xff] %v8981_v41 }
 0x3b8   :  { %v8970_v0 = vpop.f32.mrf.mxu0 }
 0x3bb   :  { %5975 = vmatmul.msk.f32.gmra.mxu0 %vm565_vm1, %v162_v53  ;;  %v8991_v53 = vpop.f32.mrf.mxu3 }
 0x3bc   :  { %11608 = vst [vmem:[#allocation186_spill] sm:$0xff] %v8991_v53  ;;  %6332 = vmatmul.msk.f32.gmra.mxu3 %vm565_vm1, %v519_v36  ;;  %v520_v36 = vld [vmem:[%s11408_s0 + $0xee0] sm:$0xff] }
 0x3bd   :  { %v9000_v8 = vpop.f32.mrf.mxu1  ;;  %v9005_v23 = vpop.f32.mrf.mxu2 }
 0x3be   :  { %11609 = vst [vmem:[#allocation187_spill] sm:$0xff] %v9000_v8  ;;  %6133 = vmatmul.msk.f32.gmra.mxu1 %vm565_vm1, %v320_v33  ;;  %6230 = vmatmul.msk.f32.gmra.mxu2 %vm565_vm1, %v417_v16  ;;  %v321_v33 = vld [vmem:[%s11408_s0 + $0x8a8] sm:$0xff]  ;;  %v418_v16 = vld [vmem:[%s11408_s0 + $0xbb0] sm:$0xff]  ;;  %v524_v8 = vld [vmem:[%s11408_s0 + $0xf00] sm:$0xff] }
 0x3bf   :  { %11610 = vst [vmem:[#allocation188_spill] sm:$0xff] %v9005_v23  ;;  %v165_v23 = vld [vmem:[%s11408_s0 + $0x3c8] sm:$0xff] }
 0x3c0   :  { %v8994_v45 = vpop.f32.mrf.mxu0 }
 0x3c3   :  { %5976 = vmatmul.msk.f32.gmra.mxu0 %vm565_vm1, %v163_v31  ;;  %v9015_v31 = vpop.f32.mrf.mxu3 }
 0x3c4   :  { %11611 = vst [vmem:[#allocation189_spill] sm:$0xff] %v9015_v31  ;;  %6333 = vmatmul.msk.f32.gmra.mxu3 %vm565_vm1, %v520_v36  ;;  %v521_v36 = vld [vmem:[%s11408_s0 + $0xee8] sm:$0xff] }
 0x3c5   :  { %v9024_v20 = vpop.f32.mrf.mxu1  ;;  %v9029_v41 = vpop.f32.mrf.mxu2 }
 0x3c6   :  { %11612 = vst [vmem:[#allocation190_spill] sm:$0xff] %v9024_v20  ;;  %6134 = vmatmul.msk.f32.gmra.mxu1 %vm565_vm1, %v321_v33  ;;  %6231 = vmatmul.msk.f32.gmra.mxu2 %vm565_vm1, %v418_v16  ;;  %v322_v33 = vld [vmem:[%s11408_s0 + $0x8b0] sm:$0xff]  ;;  %v419_v16 = vld [vmem:[%s11408_s0 + $0xbb8] sm:$0xff] }
 0x3c7   :  { %11613 = vst [vmem:[#allocation191_spill] sm:$0xff] %v9029_v41 }
 0x3c8   :  { %v9018_v53 = vpop.f32.mrf.mxu0 }
 0x3cb   :  { %5977 = vmatmul.msk.f32.gmra.mxu0 %vm565_vm1, %v164_v21  ;;  %v9039_v21 = vpop.f32.mrf.mxu3 }
 0x3cc   :  { %11614 = vst [vmem:[#allocation192_spill] sm:$0xff] %v9039_v21  ;;  %6334 = vmatmul.msk.f32.gmra.mxu3 %vm565_vm1, %v521_v36  ;;  %v522_v36 = vld [vmem:[%s11408_s0 + $0xef0] sm:$0xff] }
 0x3cd   :  { %v9048_v41 = vpop.f32.mrf.mxu1  ;;  %v9053_v34 = vpop.f32.mrf.mxu2 }
 0x3ce   :  { %11615 = vst [vmem:[#allocation193_spill] sm:$0xff] %v9048_v41  ;;  %6135 = vmatmul.msk.f32.gmra.mxu1 %vm565_vm1, %v322_v33  ;;  %6232 = vmatmul.msk.f32.gmra.mxu2 %vm565_vm1, %v419_v16  ;;  %v323_v33 = vld [vmem:[%s11408_s0 + $0x8b8] sm:$0xff]  ;;  %v420_v16 = vld [vmem:[%s11408_s0 + $0xbc0] sm:$0xff] }
 0x3cf   :  { %11616 = vst [vmem:[#allocation194_spill] sm:$0xff] %v9053_v34  ;;  %v166_v34 = vld [vmem:[%s11408_s0 + $0x3d0] sm:$0xff]  ;;  %v423_v41 = vld [vmem:[%s11408_s0 + $0xbd8] sm:$0xff] }
 0x3d0   :  { %v9042_v31 = vpop.f32.mrf.mxu0 }
 0x3d3   :  { %5978 = vmatmul.msk.f32.gmra.mxu0 %vm565_vm1, %v165_v23  ;;  %v9063_v23 = vpop.f32.mrf.mxu3 }
 0x3d4   :  { %11617 = vst [vmem:[#allocation195_spill] sm:$0xff] %v9063_v23  ;;  %6335 = vmatmul.msk.f32.gmra.mxu3 %vm565_vm1, %v522_v36  ;;  %v523_v36 = vld [vmem:[%s11408_s0 + $0xef8] sm:$0xff]  ;;  %v4171_v23 = vlaneseq }
 0x3d5   :  { %v9072_v57 = vpop.f32.mrf.mxu1  ;;  %v9077_v17 = vpop.f32.mrf.mxu2 }
 0x3d6   :  { %11618 = vst [vmem:[#allocation196_spill] sm:$0xff] %v9072_v57  ;;  %6136 = vmatmul.msk.f32.gmra.mxu1 %vm565_vm1, %v323_v33  ;;  %6233 = vmatmul.msk.f32.gmra.mxu2 %vm565_vm1, %v420_v16  ;;  %v9089_v48 = vshrl.u32 %v4171_v23, 7  ;;  %v9098_v12 = vand.u32 127, %v4171_v23  ;;  %v11420_v23 = vmov 0.00390625   ;;  %v424_v57 = vld [vmem:[%s11408_s0 + $0xbe0] sm:$0xff] }
 0x3d7   :  { %11619 = vst [vmem:[#allocation197_spill] sm:$0xff] %v9077_v17 }
 0x3d8   :  { %v9066_v21 = vpop.f32.mrf.mxu0  ;;  %v9093_v17 = vmul.u32 256, %v9089_v48 }
 0x3da   :  { %v9101_v33 = vadd.s32 256, %v9093_v17  ;;  %vm4209_vm2 = vcmp.ge.s32.totalorder %v9098_v12, %v9093_v17 }
 0x3db   :  { %5979 = vmatmul.msk.f32.gmra.mxu0 %vm565_vm1, %v166_v34  ;;  %v9087_v34 = vpop.f32.mrf.mxu3 }
 0x3dc   :  { %11620 = vst [vmem:[#allocation198_spill] sm:$0xff] %v9087_v34  ;;  %6336 = vmatmul.msk.f32.gmra.mxu3 %vm565_vm1, %v523_v36  ;;  %v421_v36 = vld [vmem:[%s11408_s0 + $0xbc8] sm:$0xff]  ;;  %vm4275_vm3 = vcmp.lt.s32.totalorder %v9098_v12, %v9101_v33 }
 0x3dd   :  { %v9104_v16 = vpop.f32.mrf.mxu1  ;;  %v9106_v34 = vpop.f32.mrf.mxu2  ;;  %vm4339_vm4 = vmand %vm4209_vm2, %vm4275_vm3 }
 0x3de   :  { %11621 = vst [vmem:[#allocation199_spill] sm:$0xff] %v9104_v16  ;;  %6234 = vmatmul.msk.f32.gmra.mxu2 %vm565_vm1, %v421_v36  ;;  %6369 = vmatmul.msk.f32.vlgmr.msrb.gmra.mxu1 %vm4339_vm4, %v11420_v23  ;;  %v168_v16 = vld [vmem:[%s11408_s0 + $0x3e0] sm:$0xff]  ;;  %v422_v36 = vld [vmem:[%s11408_s0 + $0xbd0] sm:$0xff] }
 0x3df   :  { %11622 = vst [vmem:[#allocation200_spill] sm:$0xff] %v9106_v34 }
 0x3e0   :  { %v2444_v61 = vpop.f32.mrf.mxu0 }
 0x3e3   :  { %5980 = vmatmul.msk.f32.gmra.mxu0 %vm565_vm1, %v167_v27  ;;  %v9119_v27 = vpop.f32.mrf.mxu3 }
 0x3e4   :  { %11623 = vst [vmem:[#allocation201_spill] sm:$0xff] %v9119_v27  ;;  %6337 = vmatmul.msk.f32.gmra.mxu3 %vm565_vm1, %v524_v8  ;;  %v525_v27 = vld [vmem:[%s11408_s0 + $0xf08] sm:$0xff] }
 0x3e5   :  { %v9127_v20 = vpop.f32.mrf.mxu2 }
 0x3e6   :  { %11624 = vst [vmem:[#allocation202_spill] sm:$0xff] %v9127_v20  ;;  %6235 = vmatmul.msk.f32.gmra.mxu2 %vm565_vm1, %v422_v36  ;;  %v526_v36 = vld [vmem:[%s11408_s0 + $0xf10] sm:$0xff] }
 0x3e8   :  { %v2447_v34 = vpop.f32.mrf.mxu0 }
 0x3eb   :  { %5981 = vmatmul.msk.f32.gmra.mxu0 %vm565_vm1, %v168_v16  ;;  %v9136_v8 = vpop.f32.mrf.mxu3  ;;  %v169_v16 = vld [vmem:[%s11408_s0 + $0x3e8] sm:$0xff] }
 0x3ec   :  { %11625 = vst [vmem:[#allocation203_spill] sm:$0xff] %v9136_v8  ;;  %6338 = vmatmul.msk.f32.gmra.mxu3 %vm565_vm1, %v525_v27 }
 0x3ed   :  { %v9143_v20 = vpop.f32.mrf.mxu2 }
 0x3ee   :  { %11626 = vst [vmem:[#allocation204_spill] sm:$0xff] %v9143_v20  ;;  %6236 = vmatmul.msk.f32.gmra.mxu2 %vm565_vm1, %v423_v41  ;;  %v527_v41 = vld [vmem:[%s11408_s0 + $0xf18] sm:$0xff] }
 0x3f0   :  { %v2450_v23 = vpop.f32.mrf.mxu0 }
 0x3f1   :  { %v2451_v46 = vadd.f32 %v8829_v18, %v2450_v23 }
 0x3f3   :  { %5982 = vmatmul.msk.f32.gmra.mxu0 %vm565_vm1, %v169_v16  ;;  %v9152_v27 = vpop.f32.mrf.mxu3  ;;  %v170_v16 = vld [vmem:[%s11408_s0 + $0x3f0] sm:$0xff] }
 0x3f4   :  { %11627 = vst [vmem:[#allocation205_spill] sm:$0xff] %v9152_v27  ;;  %6339 = vmatmul.msk.f32.gmra.mxu3 %vm565_vm1, %v526_v36 }
 0x3f5   :  { %v9159_v20 = vpop.f32.mrf.mxu2 }
 0x3f6   :  { %11628 = vst [vmem:[#allocation206_spill] sm:$0xff] %v9159_v20  ;;  %6237 = vmatmul.msk.f32.gmra.mxu2 %vm565_vm1, %v424_v57  ;;  %v425_v57 = vld [vmem:[%s11408_s0 + $0xbe8] sm:$0xff] }
 0x3f8   :  { %v2453_v8 = vpop.f32.mrf.mxu0 }
 0x3f9   :  { %v2454_v20 = vadd.f32 %v8829_v18, %v2453_v8 }
 0x3fb   :  { %5983 = vmatmul.msk.f32.gmra.mxu0 %vm565_vm1, %v170_v16  ;;  %v9168_v36 = vpop.f32.mrf.mxu3  ;;  %v171_v16 = vld [vmem:[%s11408_s0 + $0x3f8] sm:$0xff]  ;;  %v3769_v23 = vmax.f32 %v2454_v20, 0.0 }
 0x3fc   :  { %11629 = vst [vmem:[#allocation207_spill] sm:$0xff] %v9168_v36  ;;  %6340 = vmatmul.msk.f32.gmra.mxu3 %vm565_vm1, %v527_v41  ;;  %v528_v41 = vld [vmem:[%s11408_s0 + $0xf20] sm:$0xff] }
 0x3fd   :  { %v9178_v44 = vpop.f32.mrf.mxu2 }
 0x3fe   :  { %11630 = vst [vmem:[#allocation208_spill] sm:$0xff] %v9178_v44  ;;  %6238 = vmatmul.msk.f32.gmra.mxu2 %vm565_vm1, %v425_v57  ;;  %v172_v44 = vld [vmem:[%s11408_s0 + $0x400] sm:$0xff]  ;;  %v2442_v57 = vadd.f32 %v8829_v18, %v9066_v21 }
 0x400   :  { %v2456_v27 = vpop.f32.mrf.mxu0 }
 0x401   :  { %v2457_v51 = vadd.f32 %v8829_v18, %v2456_v27  ;;  %v2448_v27 = vadd.f32 %v8829_v18, %v2447_v34  ;;  %v529_v34 = vld [vmem:[%s11408_s0 + $0xf28] sm:$0xff] }
 0x403   :  { %v3770_v59 = vmax.f32 %v2457_v51, 0.0  ;;  %5984 = vmatmul.msk.f32.gmra.mxu0 %vm565_vm1, %v171_v16  ;;  %v9187_v8 = vpop.f32.mrf.mxu3  ;;  %v2445_v51 = vadd.f32 %v8829_v18, %v2444_v61  ;;  %v3768_v16 = vmax.f32 %v2451_v46, 0.0  ;;  %v426_v61 = vld [vmem:[%s11408_s0 + $0xbf0] sm:$0xff] }
 0x404   :  { %11631 = vst [vmem:[#allocation209_spill] sm:$0xff] %v9187_v8  ;;  %6341 = vmatmul.msk.f32.gmra.mxu3 %vm565_vm1, %v528_v41  ;;  %v3767_v8 = vmax.f32 %v2448_v27, 0.0  ;;  %v3765_v41 = vmax.f32 %v2442_v57, 0.0 }
 0x405   :  { %4605 = vmatpush.msrb.mxu1 %v3770_v59  ;;  %v2439_v59 = vadd.f32 %v8829_v18, %v9042_v31  ;;  %v3766_v20 = vmax.f32 %v2445_v51, 0.0  ;;  %v9202_v46 = vpop.f32.mrf.mxu2  ;;  %v2436_v31 = vadd.f32 %v8829_v18, %v9018_v53  ;;  %v2430_v51 = vadd.f32 %v8829_v18, %v8970_v0 }
 0x406   :  { %11632 = vst [vmem:[#allocation210_spill] sm:$0xff] %v9202_v46  ;;  %6239 = vmatmul.msk.f32.gmra.mxu2 %vm565_vm1, %v426_v61  ;;  %v2427_v53 = vadd.f32 %v8829_v18, %v8946_v11  ;;  %v2424_v11 = vadd.f32 %v8829_v18, %v8922_v2  ;;  %v2415_v2 = vadd.f32 %v8829_v18, %v8836_v28 }
 0x407   :  { %4606 = vmatpush.msrb.mxu1 %v3769_v23  ;;  %v173_v23 = vld [vmem:[%s11408_s0 + $0x408] sm:$0xff]  ;;  %v3761_v61 = vmax.f32 %v2430_v51, 0.0  ;;  %v2412_v28 = vadd.f32 %v8829_v18, %v8799_v24 }
 0x408   :  { %v9192_v36 = vpop.f32.mrf.mxu0  ;;  %v429_v24 = vld [vmem:[%s11408_s0 + $0xc08] sm:$0xff] }
 0x409   :  { %4607 = vmatpush.msrb.mxu1 %v3768_v16  ;;  %v3763_v16 = vmax.f32 %v2436_v31, 0.0  ;;  %v3760_v31 = vmax.f32 %v2427_v53, 0.0  ;;  %v531_v53 = vld [vmem:[%s11408_s0 + $0xf38] sm:$0xff] }
 0x40b   :  { %5985 = vmatmul.msk.f32.gmra.mxu0 %vm565_vm1, %v172_v44  ;;  %4608 = vmatpush.msrb.mxu1 %v3767_v8  ;;  %v9211_v21 = vpop.f32.mrf.mxu3  ;;  %v2433_v44 = vadd.f32 %v8829_v18, %v8994_v45  ;;  %v3764_v8 = vmax.f32 %v2439_v59, 0.0  ;;  %v427_v59 = vld [vmem:[%s11408_s0 + $0xbf8] sm:$0xff] }
 0x40c   :  { %11633 = vst [vmem:[#allocation211_spill] sm:$0xff] %v9211_v21  ;;  %6342 = vmatmul.msk.f32.gmra.mxu3 %vm565_vm1, %v529_v34  ;;  %v2421_v34 = vadd.f32 %v8829_v18, %v8898_v55 }
 0x40d   :  { %4609 = vmatpush.msrb.mxu1 %v3766_v20  ;;  %v3762_v57 = vmax.f32 %v2433_v44, 0.0  ;;  %v9228_v45 = vpop.f32.mrf.mxu2  ;;  %v530_v20 = vld [vmem:[%s11408_s0 + $0xf30] sm:$0xff] }
 0x40e   :  { %11634 = vst [vmem:[#allocation212_spill] sm:$0xff] %v9228_v45  ;;  %6240 = vmatmul.msk.f32.gmra.mxu2 %vm565_vm1, %v427_v59  ;;  %v174_v44 = vld [vmem:[%s11408_s0 + $0x410] sm:$0xff]  ;;  %v3758_v51 = vmax.f32 %v2421_v34, 0.0  ;;  %v3756_v59 = vmax.f32 %v2415_v2, 0.0 }
 0x40f   :  { %4610 = vmatpush.msrb.mxu1 %v3765_v41  ;;  %v434_v45 = vld [vmem:[%s11408_s0 + $0xc30] sm:$0xff] }
 0x410   :  { %v9218_v27 = vpop.f32.mrf.mxu0 }
 0x411   :  { %4611 = vmatpush.msrb.mxu1 %v3764_v8  ;;  %v2418_v8 = vadd.f32 %v8829_v18, %v8868_v32 }
 0x413   :  { %5986 = vmatmul.msk.f32.gmra.mxu0 %vm565_vm1, %v173_v23  ;;  %4612 = vmatpush.msrb.mxu1 %v3763_v16  ;;  %v9237_v0 = vpop.f32.mrf.mxu3  ;;  %v3759_v23 = vmax.f32 %v2424_v11, 0.0  ;;  %v428_v16 = vld [vmem:[%s11408_s0 + $0xc00] sm:$0xff]  ;;  %v175_v11 = vld [vmem:[%s11408_s0 + $0x418] sm:$0xff] }
 0x414   :  { %11635 = vst [vmem:[#allocation213_spill] sm:$0xff] %v9237_v0  ;;  %6343 = vmatmul.msk.f32.gmra.mxu3 %vm565_vm1, %v530_v20  ;;  %v433_v0 = vld [vmem:[%s11408_s0 + $0xc28] sm:$0xff] }
 0x415   :  { %4613 = vmatpush.msrb.mxu1 %v3762_v57  ;;  %v9254_v55 = vpop.f32.mrf.mxu2  ;;  %v3757_v57 = vmax.f32 %v2418_v8, 0.0 }
 0x416   :  { %11636 = vst [vmem:[#allocation214_spill] sm:$0xff] %v9254_v55  ;;  %6241 = vmatmul.msk.f32.gmra.mxu2 %vm565_vm1, %v428_v16  ;;  %v533_v16 = vld [vmem:[%s11408_s0 + $0xf48] sm:$0xff] }
 0x417   :  { %4614 = vmatpush.msrb.mxu1 %v3761_v61  ;;  %v3755_v61 = vmax.f32 %v2412_v28, 0.0 }
 0x418   :  { %v9244_v41 = vpop.f32.mrf.mxu0 }
 0x419   :  { %4615 = vmatpush.msrb.mxu1 %v3760_v31  ;;  %v532_v31 = vld [vmem:[%s11408_s0 + $0xf40] sm:$0xff] }
 0x41b   :  { %5987 = vmatmul.msk.f32.gmra.mxu0 %vm565_vm1, %v174_v44  ;;  %4616 = vmatpush.msrb.mxu1 %v3759_v23  ;;  %v9263_v32 = vpop.f32.mrf.mxu3  ;;  %v176_v23 = vld [vmem:[%s11408_s0 + $0x420] sm:$0xff] }
 0x41c   :  { %11637 = vst [vmem:[#allocation215_spill] sm:$0xff] %v9263_v32  ;;  %6344 = vmatmul.msk.f32.gmra.mxu3 %vm565_vm1, %v531_v53 }
 0x41d   :  { %4617 = vmatpush.msrb.mxu1 %v3758_v51  ;;  %v9274_v34 = vpop.f32.mrf.mxu2  ;;  %v430_v51 = vld [vmem:[%s11408_s0 + $0xc10] sm:$0xff] }
 0x41e   :  { %11638 = vst [vmem:[#allocation216_spill] sm:$0xff] %v9274_v34  ;;  %6242 = vmatmul.msk.f32.gmra.mxu2 %vm565_vm1, %v429_v24 }
 0x41f   :  { %4618 = vmatpush.msrb.mxu1 %v3757_v57  ;;  %v177_v57 = vld [vmem:[%s11408_s0 + $0x428] sm:$0xff] }
 0x420   :  { %v9268_v20 = vpop.f32.mrf.mxu0 }
 0x421   :  { %4619 = vmatpush.msrb.mxu1 %v3756_v59 }
 0x423   :  { %5988 = vmatmul.msk.f32.gmra.mxu0 %vm565_vm1, %v175_v11  ;;  %4620 = vmatpush.msrb.mxu1 %v3755_v61  ;;  %v9283_v44 = vpop.f32.mrf.mxu3  ;;  %v431_v11 = vld [vmem:[%s11408_s0 + $0xc18] sm:$0xff]  ;;  %v534_v61 = vld [vmem:[%s11408_s0 + $0xf50] sm:$0xff] }
 0x424   :  { %11639 = vst [vmem:[#allocation217_spill] sm:$0xff] %v9283_v44  ;;  %6345 = vmatmul.msk.f32.gmra.mxu3 %vm565_vm1, %v532_v31 }
 0x425   :  { %v9292_v2 = vpop.f32.mrf.mxu2 }
 0x426   :  { %11640 = vst [vmem:[#allocation218_spill] sm:$0xff] %v9292_v2  ;;  %6243 = vmatmul.msk.f32.gmra.mxu2 %vm565_vm1, %v430_v51  ;;  %v435_v2 = vld [vmem:[%s11408_s0 + $0xc38] sm:$0xff] }
 0x428   :  { %v9286_v8 = vpop.f32.mrf.mxu0 }
 0x42b   :  { %5989 = vmatmul.msk.f32.gmra.mxu0 %vm565_vm1, %v176_v23  ;;  %v9301_v53 = vpop.f32.mrf.mxu3  ;;  %v178_v23 = vld [vmem:[%s11408_s0 + $0x430] sm:$0xff] }
 0x42c   :  { %11641 = vst [vmem:[#allocation219_spill] sm:$0xff] %v9301_v53  ;;  %6346 = vmatmul.msk.f32.gmra.mxu3 %vm565_vm1, %v533_v16  ;;  %v432_v16 = vld [vmem:[%s11408_s0 + $0xc20] sm:$0xff] }
 0x42d   :  { %v9310_v59 = vpop.f32.mrf.mxu2  ;;  %v540_v53 = vld [vmem:[%s11408_s0 + $0xf80] sm:$0xff] }
 0x42e   :  { %11642 = vst [vmem:[#allocation220_spill] sm:$0xff] %v9310_v59  ;;  %6244 = vmatmul.msk.f32.gmra.mxu2 %vm565_vm1, %v431_v11 }
 0x430   :  { %v9304_v28 = vpop.f32.mrf.mxu0 }
 0x433   :  { %5990 = vmatmul.msk.f32.gmra.mxu0 %vm565_vm1, %v177_v57  ;;  %v9319_v24 = vpop.f32.mrf.mxu3  ;;  %v535_v57 = vld [vmem:[%s11408_s0 + $0xf58] sm:$0xff] }
 0x434   :  { %11643 = vst [vmem:[#allocation221_spill] sm:$0xff] %v9319_v24  ;;  %6347 = vmatmul.msk.f32.gmra.mxu3 %vm565_vm1, %v534_v61 }
 0x435   :  { %v9328_v51 = vpop.f32.mrf.mxu2 }
 0x436   :  { %11644 = vst [vmem:[#allocation222_spill] sm:$0xff] %v9328_v51  ;;  %6245 = vmatmul.msk.f32.gmra.mxu2 %vm565_vm1, %v432_v16  ;;  %v536_v16 = vld [vmem:[%s11408_s0 + $0xf60] sm:$0xff] }
 0x438   :  { %v9322_v31 = vpop.f32.mrf.mxu0 }
 0x43b   :  { %5991 = vmatmul.msk.f32.gmra.mxu0 %vm565_vm1, %v178_v23  ;;  %v9337_v11 = vpop.f32.mrf.mxu3  ;;  %v179_v23 = vld [vmem:[%s11408_s0 + $0x438] sm:$0xff] }
 0x43c   :  { %11645 = vst [vmem:[#allocation223_spill] sm:$0xff] %v9337_v11  ;;  %6348 = vmatmul.msk.f32.gmra.mxu3 %vm565_vm1, %v535_v57  ;;  %v541_v11 = vld [vmem:[%s11408_s0 + $0xf88] sm:$0xff] }
 0x43d   :  { %v9346_v21 = vpop.f32.mrf.mxu2 }
 0x43e   :  { %11646 = vst [vmem:[#allocation224_spill] sm:$0xff] %v9346_v21  ;;  %6246 = vmatmul.msk.f32.gmra.mxu2 %vm565_vm1, %v433_v0  ;;  %v537_v0 = vld [vmem:[%s11408_s0 + $0xf68] sm:$0xff]  ;;  %v436_v21 = vld [vmem:[%s11408_s0 + $0xc40] sm:$0xff] }
 0x440   :  { %v9340_v61 = vpop.f32.mrf.mxu0 }
 0x443   :  { %5992 = vmatmul.msk.f32.gmra.mxu0 %vm565_vm1, %v179_v23  ;;  %v9355_v57 = vpop.f32.mrf.mxu3  ;;  %v180_v23 = vld [vmem:[%s11408_s0 + $0x440] sm:$0xff] }
 0x444   :  { %11647 = vst [vmem:[#allocation225_spill] sm:$0xff] %v9355_v57  ;;  %6349 = vmatmul.msk.f32.gmra.mxu3 %vm565_vm1, %v536_v16 }
 0x445   :  { %v9364_v46 = vpop.f32.mrf.mxu2 }
 0x446   :  { %11648 = vst [vmem:[#allocation226_spill] sm:$0xff] %v9364_v46  ;;  %6247 = vmatmul.msk.f32.gmra.mxu2 %vm565_vm1, %v434_v45  ;;  %v538_v45 = vld [vmem:[%s11408_s0 + $0xf70] sm:$0xff] }
 0x448   :  { %v9358_v32 = vpop.f32.mrf.mxu0 }
 0x44b   :  { %5993 = vmatmul.msk.f32.gmra.mxu0 %vm565_vm1, %v180_v23  ;;  %v9373_v16 = vpop.f32.mrf.mxu3  ;;  %v181_v23 = vld [vmem:[%s11408_s0 + $0x448] sm:$0xff] }
 0x44c   :  { %11649 = vst [vmem:[#allocation227_spill] sm:$0xff] %v9373_v16  ;;  %6350 = vmatmul.msk.f32.gmra.mxu3 %vm565_vm1, %v537_v0 }
 0x44d   :  { %v9382_v34 = vpop.f32.mrf.mxu2 }
 0x44e   :  { %11650 = vst [vmem:[#allocation228_spill] sm:$0xff] %v9382_v34  ;;  %6248 = vmatmul.msk.f32.gmra.mxu2 %vm565_vm1, %v435_v2  ;;  %v539_v2 = vld [vmem:[%s11408_s0 + $0xf78] sm:$0xff]  ;;  %v4176_v34 = vadd.s32 128, %v9098_v12 }
 0x450   :  { %v9376_v55 = vpop.f32.mrf.mxu0  ;;  %vm4210_vm5 = vcmp.ge.s32.totalorder %v4176_v34, %v9093_v17  ;;  %vm4276_vm6 = vcmp.lt.s32.totalorder %v4176_v34, %v9101_v33 }
 0x451   :  { %vm4340_vm7 = vmand %vm4210_vm5, %vm4276_vm6 }
 0x453   :  { %5994 = vmatmul.msk.f32.gmra.mxu0 %vm565_vm1, %v181_v23  ;;  %v9391_v0 = vpop.f32.mrf.mxu3  ;;  %v182_v23 = vld [vmem:[%s11408_s0 + $0x450] sm:$0xff] }
 0x454   :  { %11651 = vst [vmem:[#allocation229_spill] sm:$0xff] %v9391_v0  ;;  %6351 = vmatmul.msk.f32.gmra.mxu3 %vm565_vm1, %v538_v45  ;;  %v542_v0 = vld [vmem:[%s11408_s0 + $0xf90] sm:$0xff] }
 0x455   :  { %v9400_v51 = vpop.f32.mrf.mxu2 }
 0x456   :  { %11652 = vst [vmem:[#allocation230_spill] sm:$0xff] %v9400_v51  ;;  %6249 = vmatmul.msk.f32.gmra.mxu2 %vm565_vm1, %v436_v21 }
 0x458   :  { %v9394_v59 = vpop.f32.mrf.mxu0 }
 0x45b   :  { %5995 = vmatmul.msk.f32.gmra.mxu0 %vm565_vm1, %v182_v23  ;;  %v9409_v45 = vpop.f32.mrf.mxu3  ;;  %v183_v23 = vld [vmem:[%s11408_s0 + $0x458] sm:$0xff] }
 0x45c   :  { %11653 = vst [vmem:[#allocation231_spill] sm:$0xff] %v9409_v45  ;;  %6352 = vmatmul.msk.f32.gmra.mxu3 %vm565_vm1, %v539_v2  ;;  %v11656_v2 = vmov 0.00390625   ;;  %v4173_v45 = vadd.s32 8, %v9089_v48  ;;  %v543_v48 = vld [vmem:[%s11408_s0 + $0xf98] sm:$0xff] }
 0x45d   :  { %v9417_v44 = vpop.f32.mrf.mxu2 }
 0x45e   :  { %11654 = vst [vmem:[#allocation232_spill] sm:$0xff] %v9417_v44  ;;  %6371 = vmatmul.msk.f32.vlgmr.msrb.gmra.mxu2 %vm4340_vm7, %v11656_v2 }
 0x460   :  { %v2492_v46 = vpop.f32.mrf.mxu0 }
 0x463   :  { %5996 = vmatmul.msk.f32.gmra.mxu0 %vm565_vm1, %v183_v23  ;;  %v9424_v21 = vpop.f32.mrf.mxu3  ;;  %v184_v23 = vld [vmem:[%s11408_s0 + $0x460] sm:$0xff] }
 0x464   :  { %11655 = vst [vmem:[#allocation233_spill] sm:$0xff] %v9424_v21  ;;  %6353 = vmatmul.msk.f32.gmra.mxu3 %vm565_vm1, %v540_v53  ;;  %v185_v53 = vld [vmem:[%s11408_s0 + $0x468] sm:$0xff]  ;;  %v9449_v21 = vmul.u32 256, %v4173_v45 }
 0x466   :  { %v9455_v51 = vadd.s32 256, %v9449_v21  ;;  %vm4242_vm8 = vcmp.ge.s32.totalorder %v4176_v34, %v9449_v21 }
 0x468   :  { %v2495_v24 = vpop.f32.mrf.mxu0  ;;  %vm4308_vm9 = vcmp.lt.s32.totalorder %v4176_v34, %v9455_v51  ;;  %v187_v34 = vld [vmem:[%s11408_s0 + $0x478] sm:$0xff] }
 0x469   :  { %vm4372_vm10 = vmand %vm4242_vm8, %vm4308_vm9 }
 0x46b   :  { %5997 = vmatmul.msk.f32.gmra.mxu0 %vm565_vm1, %v184_v23  ;;  %v9435_v57 = vpop.f32.mrf.mxu3 }
 0x46c   :  { %11657 = vst [vmem:[#allocation234_spill] sm:$0xff] %v9435_v57  ;;  %6354 = vmatmul.msk.f32.gmra.mxu3 %vm565_vm1, %v541_v11  ;;  %v186_v57 = vld [vmem:[%s11408_s0 + $0x470] sm:$0xff] }
 0x470   :  { %v2498_v16 = vpop.f32.mrf.mxu0 }
 0x473   :  { %5998 = vmatmul.msk.f32.gmra.mxu0 %vm565_vm1, %v185_v53  ;;  %v9445_v23 = vpop.f32.mrf.mxu3  ;;  %v9460_v53 = vpop.f32.mrf.mxu2  ;;  %6372 = vmatmul.msk.f32.gmra.mxu2 %vm4372_vm10, %v11656_v2 }
 0x474   :  { %11658 = vst [vmem:[#allocation235_spill] sm:$0xff] %v9445_v23  ;;  %6355 = vmatmul.msk.f32.gmra.mxu3 %vm565_vm1, %v542_v0 }
 0x475   :  { %11659 = vst [vmem:[#allocation236_spill] sm:$0xff] %v9460_v53 }
 0x478   :  { %v2501_v11 = vpop.f32.mrf.mxu0 }
 0x479   :  { %v2502_v23 = vadd.f32 %v8829_v18, %v2501_v11  ;;  %v544_v11 = vld [vmem:[%s11408_s0 + $0xfa0] sm:$0xff] }
 0x47b   :  { %5999 = vmatmul.msk.f32.gmra.mxu0 %vm565_vm1, %v186_v57  ;;  %v9466_v0 = vpop.f32.mrf.mxu3  ;;  %v9473_v57 = vadd.s32 512, %v9098_v12  ;;  %v9483_v53 = vpop.f32.mrf.mxu2  ;;  %v3785_v60 = vmax.f32 %v2502_v23, 0.0 }
 0x47c   :  { %11660 = vst [vmem:[#allocation237_spill] sm:$0xff] %v9466_v0  ;;  %6356 = vmatmul.msk.f32.gmra.mxu3 %vm565_vm1, %v543_v48  ;;  %v2499_v48 = vadd.f32 %v8829_v18, %v2498_v16 }
 0x47d   :  { %11661 = vst [vmem:[#allocation238_spill] sm:$0xff] %v9473_v57  ;;  %vm4213_vm11 = vcmp.ge.s32.totalorder %v9473_v57, %v9093_v17  ;;  %vm4279_vm12 = vcmp.lt.s32.totalorder %v9473_v57, %v9101_v33 }
 0x47e   :  { %11662 = vst [vmem:[#allocation239_spill] sm:$0xff] %v9483_v53  ;;  %vm4343_vm13 = vmand %vm4213_vm11, %vm4279_vm12  ;;  %v3784_v16 = vmax.f32 %v2499_v48, 0.0  ;;  %v2490_v53 = vadd.f32 %v8829_v18, %v9394_v59 }
 0x47f   :  { %6377 = vmatmul.msk.f32.vlgmr.msra.gmra.mxu2 %vm4343_vm13, %v11656_v2  ;;  %vm4241_vm13 = vcmp.ge.s32.totalorder %v9098_v12, %v9449_v21 }
 0x480   :  { %v2504_v45 = vpop.f32.mrf.mxu0  ;;  %v3781_v48 = vmax.f32 %v2490_v53, 0.0 }
 0x481   :  { %v2505_v44 = vadd.f32 %v8829_v18, %v2504_v45  ;;  %v2496_v45 = vadd.f32 %v8829_v18, %v2495_v24  ;;  %v2487_v24 = vadd.f32 %v8829_v18, %v9376_v55  ;;  %v2481_v55 = vadd.f32 %v8829_v18, %v9340_v61 }
 0x483   :  { %v3786_v0 = vmax.f32 %v2505_v44, 0.0  ;;  %6000 = vmatmul.msk.f32.gmra.mxu0 %vm565_vm1, %v187_v34  ;;  %v9486_v40 = vpop.f32.mrf.mxu3  ;;  %v2493_v44 = vadd.f32 %v8829_v18, %v2492_v46  ;;  %v3783_v57 = vmax.f32 %v2496_v45, 0.0  ;;  %v3780_v59 = vmax.f32 %v2487_v24, 0.0 }
 0x484   :  { %11663 = vst [vmem:[#allocation240_spill] sm:$0xff] %v9486_v40  ;;  %6357 = vmatmul.msk.f32.gmra.mxu3 %vm565_vm1, %v544_v11  ;;  %v188_v40 = vld [vmem:[%s11408_s0 + $0x480] sm:$0xff]  ;;  %v2478_v11 = vadd.f32 %v8829_v18, %v9322_v31  ;;  %v3778_v53 = vmax.f32 %v2481_v55, 0.0 }
 0x485   :  { %4628 = vmatpush.msrb.mxu2 %v3786_v0  ;;  %v3782_v23 = vmax.f32 %v2493_v44, 0.0  ;;  %v2484_v0 = vadd.f32 %v8829_v18, %v9358_v32  ;;  %v2475_v32 = vadd.f32 %v8829_v18, %v9304_v28  ;;  %v546_v44 = vld [vmem:[%s11408_s0 + $0xfb0] sm:$0xff]  ;;  %v2469_v28 = vadd.f32 %v8829_v18, %v9268_v20  ;;  %v9544_v20 = vpop.f32.mrf.mxu1 }
 0x486   :  { %v3777_v24 = vmax.f32 %v2478_v11, 0.0  ;;  %11666 = vst [vmem:[#allocation243_spill] sm:$0xff] %v9544_v20 }
 0x487   :  { %4629 = vmatpush.msrb.mxu2 %v3785_v60  ;;  %v545_v60 = vld [vmem:[%s11408_s0 + $0xfa8] sm:$0xff]  ;;  %v3779_v45 = vmax.f32 %v2484_v0, 0.0  ;;  %v3776_v31 = vmax.f32 %v2475_v32, 0.0  ;;  %v2466_v0 = vadd.f32 %v8829_v18, %v9244_v41  ;;  %v3774_v55 = vmax.f32 %v2469_v28, 0.0 }
 0x488   :  { %v9494_v34 = vpop.f32.mrf.mxu0  ;;  %v2460_v41 = vadd.f32 %v8829_v18, %v9192_v36  ;;  %v2646_v32 = vadd.f32 %v8829_v18, %v7077_v52  ;;  %v2643_v36 = vadd.f32 %v8829_v18, %v7057_v50  ;;  %v2640_v52 = vadd.f32 %v8829_v18, %v7037_v39  ;;  %v192_v39 = vld [vmem:[%s11408_s0 + $0x4a0] sm:$0xff] }
 0x489   :  { %4630 = vmatpush.msrb.mxu2 %v3784_v16  ;;  %v2472_v16 = vadd.f32 %v8829_v18, %v9286_v8  ;;  %v2463_v8 = vadd.f32 %v8829_v18, %v9218_v27  ;;  %v3773_v11 = vmax.f32 %v2466_v0, 0.0  ;;  %v2649_v27 = vadd.f32 %v8829_v18, %v7097_v62  ;;  %v548_v62 = vld [vmem:[%s11408_s0 + $0xfc0] sm:$0xff] }
 0x48a   :  { %v3833_v28 = vmax.f32 %v2646_v32, 0.0  ;;  %v2637_v50 = vadd.f32 %v8829_v18, %v7017_v29  ;;  %v3832_v0 = vmax.f32 %v2643_v36, 0.0  ;;  %v549_v29 = vld [vmem:[%s11408_s0 + $0xfc8] sm:$0xff] }
 0x48b   :  { %6001 = vmatmul.msk.f32.gmra.mxu0 %vm565_vm1, %v188_v40  ;;  %4631 = vmatpush.msrb.mxu2 %v3783_v57  ;;  %v9504_v46 = vpop.f32.mrf.mxu3  ;;  %v189_v57 = vld [vmem:[%s11408_s0 + $0x488] sm:$0xff] }
 0x48c   :  { %11664 = vst [vmem:[#allocation241_spill] sm:$0xff] %v9504_v46  ;;  %6358 = vmatmul.msk.f32.gmra.mxu3 %vm565_vm1, %v545_v60  ;;  %v190_v60 = vld [vmem:[%s11408_s0 + $0x490] sm:$0xff] }
 0x48d   :  { %4632 = vmatpush.msrb.mxu2 %v3782_v23 }
 0x48f   :  { %4633 = vmatpush.msrb.mxu2 %v3781_v48  ;;  %v3775_v48 = vmax.f32 %v2472_v16, 0.0  ;;  %v3771_v16 = vmax.f32 %v2460_v41, 0.0  ;;  %v3830_v41 = vmax.f32 %v2637_v50, 0.0 }
 0x490   :  { %v9514_v40 = vpop.f32.mrf.mxu0 }
 0x491   :  { %4634 = vmatpush.msrb.mxu2 %v3780_v59 }
 0x493   :  { %6002 = vmatmul.msk.f32.gmra.mxu0 %vm565_vm1, %v189_v57  ;;  %4635 = vmatpush.msrb.mxu2 %v3779_v45  ;;  %v9524_v61 = vpop.f32.mrf.mxu3  ;;  %v547_v57 = vld [vmem:[%s11408_s0 + $0xfb8] sm:$0xff]  ;;  %v3772_v45 = vmax.f32 %v2463_v8, 0.0  ;;  %v3831_v8 = vmax.f32 %v2640_v52, 0.0 }
 0x494   :  { %11665 = vst [vmem:[#allocation242_spill] sm:$0xff] %v9524_v61  ;;  %6359 = vmatmul.msk.f32.gmra.mxu3 %vm565_vm1, %v546_v44  ;;  %v191_v44 = vld [vmem:[%s11408_s0 + $0x498] sm:$0xff] }
 0x495   :  { %4636 = vmatpush.msrb.mxu2 %v3778_v53 }
 0x497   :  { %4637 = vmatpush.msrb.mxu2 %v3777_v24  ;;  %v3834_v24 = vmax.f32 %v2649_v27, 0.0 }
 0x498   :  { %v9534_v23 = vpop.f32.mrf.mxu0 }
 0x499   :  { %4638 = vmatpush.msrb.mxu2 %v3776_v31  ;;  %v9571_v31 = vpop.f32.mrf.mxu1 }
 0x49a   :  { %11668 = vst [vmem:[#allocation245_spill] sm:$0xff] %v9571_v31 }
 0x49b   :  { %6003 = vmatmul.msk.f32.gmra.mxu0 %vm565_vm1, %v190_v60  ;;  %4639 = vmatpush.msrb.mxu2 %v3775_v48  ;;  %v9546_v59 = vpop.f32.mrf.mxu3  ;;  %v2634_v48 = vadd.f32 %v8829_v18, %v6997_v22  ;;  %v2628_v22 = vadd.f32 %v8829_v18, %v6961_v10  ;;  %v193_v10 = vld [vmem:[%s11408_s0 + $0x4a8] sm:$0xff] }
 0x49c   :  { %11667 = vst [vmem:[#allocation244_spill] sm:$0xff] %v9546_v59  ;;  %6360 = vmatmul.msk.f32.gmra.mxu3 %vm565_vm1, %v547_v57  ;;  %v2631_v57 = vadd.f32 %v8829_v18, %v6977_v14  ;;  %v2625_v14 = vadd.f32 %v8829_v18, %v6943_v3 }
 0x49d   :  { %4640 = vmatpush.msrb.mxu2 %v3774_v55 }
 0x49e   :  { %v3828_v32 = vmax.f32 %v2631_v57, 0.0 }
 0x49f   :  { %4641 = vmatpush.msrb.mxu2 %v3773_v11  ;;  %v3829_v11 = vmax.f32 %v2634_v48, 0.0 }
 0x4a0   :  { %v9558_v53 = vpop.f32.mrf.mxu0 }
 0x4a1   :  { %4642 = vmatpush.msrb.mxu2 %v3772_v45  ;;  %v9593_v27 = vpop.f32.mrf.mxu1 }
 0x4a2   :  { %11670 = vst [vmem:[#allocation247_spill] sm:$0xff] %v9593_v27 }
 0x4a3   :  { %6004 = vmatmul.msk.f32.gmra.mxu0 %vm565_vm1, %v191_v44  ;;  %4643 = vmatpush.msrb.mxu2 %v3771_v16  ;;  %v9573_v60 = vpop.f32.mrf.mxu3  ;;  %v2622_v44 = vadd.f32 %v8829_v18, %v6919_v58  ;;  %v3827_v16 = vmax.f32 %v2628_v22, 0.0  ;;  %v550_v58 = vld [vmem:[%s11408_s0 + $0xfd0] sm:$0xff]  ;;  %v195_v22 = vld [vmem:[%s11408_s0 + $0x4b8] sm:$0xff] }
 0x4a4   :  { %11669 = vst [vmem:[#allocation246_spill] sm:$0xff] %v9573_v60  ;;  %6361 = vmatmul.msk.f32.gmra.mxu3 %vm565_vm1, %v548_v62  ;;  %v3826_v62 = vmax.f32 %v2625_v14, 0.0 }
 0x4a5   :  { %4697 = vmatpush.msra.mxu2 %v3834_v24  ;;  %v9610_v24 = vld [vmem:[%s11407_s2] ss:$0 sm:$0xff]  ;;  %v3825_v52 = vmax.f32 %v2622_v44, 0.0 }
 0x4a6   :  { %v2619_v3 = vadd.f32 %v9610_v24, %v6895_v42  ;;  %v2616_v18 = vadd.f32 %v9610_v24, %v6874_v25  ;;  %v2613_v42 = vadd.f32 %v9610_v24, %v6852_v15  ;;  %v194_v25 = vld [vmem:[%s11408_s0 + $0x4b0] sm:$0xff]  ;;  %v551_v15 = vld [vmem:[%s11408_s0 + $0xfd8] sm:$0xff] }
 0x4a7   :  { %4698 = vmatpush.msra.mxu2 %v3833_v28 }
 0x4a8   :  { %v9580_v55 = vpop.f32.mrf.mxu0  ;;  %v3823_v48 = vmax.f32 %v2616_v18, 0.0  ;;  %v197_v18 = vld [vmem:[%s11408_s0 + $0x4c8] sm:$0xff] }
 0x4a9   :  { %4699 = vmatpush.msra.mxu2 %v3832_v0  ;;  %v9620_v28 = vpop.f32.mrf.mxu1  ;;  %v3824_v0 = vmax.f32 %v2619_v3, 0.0 }
 0x4aa   :  { %11672 = vst [vmem:[#allocation249_spill] sm:$0xff] %v9620_v28 }
 0x4ab   :  { %4700 = vmatpush.msra.mxu2 %v3831_v8  ;;  %6005 = vmatmul.msk.f32.gmra.mxu0 %vm565_vm1, %v192_v39  ;;  %v9595_v45 = vpop.f32.mrf.mxu3  ;;  %v3822_v39 = vmax.f32 %v2613_v42, 0.0 }
 0x4ac   :  { %11671 = vst [vmem:[#allocation248_spill] sm:$0xff] %v9595_v45  ;;  %6362 = vmatmul.msk.f32.gmra.mxu3 %vm565_vm1, %v549_v29  ;;  %v201_v45 = vld [vmem:[%s11408_s0 + $0x4e8] sm:$0xff] }
 0x4ad   :  { %4701 = vmatpush.msra.mxu2 %v3830_v41 }
 0x4af   :  { %4702 = vmatpush.msra.mxu2 %v3829_v11  ;;  %v552_v11 = vld [vmem:[%s11408_s0 + $0xfe0] sm:$0xff] }
 0x4b0   :  { %v9602_v36 = vpop.f32.mrf.mxu0 }
 0x4b1   :  { %4703 = vmatpush.msra.mxu2 %v3828_v32  ;;  %v9636_v57 = vpop.f32.mrf.mxu1 }
 0x4b2   :  { %11674 = vst [vmem:[#allocation251_spill] sm:$0xff] %v9636_v57 }
 0x4b3   :  { %4704 = vmatpush.msra.mxu2 %v3827_v16  ;;  %6006 = vmatmul.msk.f32.gmra.mxu0 %vm565_vm1, %v193_v10  ;;  %v9622_v50 = vpop.f32.mrf.mxu3  ;;  %v196_v16 = vld [vmem:[%s11408_s0 + $0x4c0] sm:$0xff]  ;;  %v553_v10 = vld [vmem:[%s11408_s0 + $0xfe8] sm:$0xff] }
 0x4b4   :  { %11673 = vst [vmem:[#allocation250_spill] sm:$0xff] %v9622_v50  ;;  %6363 = vmatmul.msk.f32.gmra.mxu3 %vm565_vm1, %v550_v58 }
 0x4b5   :  { %4705 = vmatpush.msra.mxu2 %v3826_v62 }
 0x4b7   :  { %4706 = vmatpush.msra.mxu2 %v3825_v52  ;;  %v554_v52 = vld [vmem:[%s11408_s0 + $0xff0] sm:$0xff] }
 0x4b8   :  { %v9627_v8 = vpop.f32.mrf.mxu0 }
 0x4b9   :  { %4707 = vmatpush.msra.mxu2 %v3824_v0  ;;  %v9650_v14 = vpop.f32.mrf.mxu1 }
 0x4ba   :  { %11676 = vst [vmem:[#allocation253_spill] sm:$0xff] %v9650_v14 }
 0x4bb   :  { %4708 = vmatpush.msra.mxu2 %v3823_v48  ;;  %6007 = vmatmul.msk.f32.gmra.mxu0 %vm565_vm1, %v194_v25  ;;  %v9638_v41 = vpop.f32.mrf.mxu3  ;;  %v198_v25 = vld [vmem:[%s11408_s0 + $0x4d0] sm:$0xff] }
 0x4bc   :  { %11675 = vst [vmem:[#allocation252_spill] sm:$0xff] %v9638_v41  ;;  %6364 = vmatmul.msk.f32.gmra.mxu3 %vm565_vm1, %v551_v15  ;;  %v202_v41 = vld [vmem:[%s11408_s0 + $0x4f0] sm:$0xff] }
 0x4bd   :  { %4709 = vmatpush.msra.mxu2 %v3822_v39  ;;  %v555_v39 = vld [vmem:[%s11408_s0 + $0xff8] sm:$0xff] }
 0x4c0   :  { %v9641_v29 = vpop.f32.mrf.mxu0 }
 0x4c1   :  { %v9664_v3 = vpop.f32.mrf.mxu1 }
 0x4c3   :  { %6008 = vmatmul.msk.f32.gmra.mxu0 %vm565_vm1, %v195_v22  ;;  %v9652_v32 = vpop.f32.mrf.mxu3 }
 0x4c4   :  { %11677 = vst [vmem:[#allocation254_spill] sm:$0xff] %v9652_v32  ;;  %6365 = vmatmul.msk.f32.gmra.mxu3 %vm565_vm1, %v552_v11 }
 0x4c8   :  { %v9655_v44 = vpop.f32.mrf.mxu0 }
 0x4c9   :  { %v9678_v42 = vpop.f32.mrf.mxu1 }
 0x4cb   :  { %6009 = vmatmul.msk.f32.gmra.mxu0 %vm565_vm1, %v196_v16  ;;  %v9666_v62 = vpop.f32.mrf.mxu3  ;;  %v199_v16 = vld [vmem:[%s11408_s0 + $0x4d8] sm:$0xff] }
 0x4cc   :  { %11678 = vst [vmem:[#allocation255_spill] sm:$0xff] %v9666_v62  ;;  %6366 = vmatmul.msk.f32.gmra.mxu3 %vm565_vm1, %v553_v10  ;;  %v4177_v10 = vadd.s32 256, %v9098_v12 }
 0x4ce   :  { %vm4211_vm14 = vcmp.ge.s32.totalorder %v4177_v10, %v9093_v17  ;;  %vm4277_vm15 = vcmp.lt.s32.totalorder %v4177_v10, %v9101_v33  ;;  %vm4243_vm2 = vcmp.ge.s32.totalorder %v4177_v10, %v9449_v21  ;;  %vm4309_vm3 = vcmp.lt.s32.totalorder %v4177_v10, %v9455_v51 }
 0x4cf   :  { %vm4341_vm0 = vmand %vm4211_vm14, %vm4277_vm15  ;;  %vm4307_vm14 = vcmp.lt.s32.totalorder %v9098_v12, %v9455_v51 }
 0x4d0   :  { %v9669_v58 = vpop.f32.mrf.mxu0  ;;  %vm4373_vm4 = vmand %vm4243_vm2, %vm4309_vm3 }
 0x4d1   :  { %v9690_v15 = vpop.f32.mrf.mxu1  ;;  %vm4371_vm2 = vmand %vm4241_vm13, %vm4307_vm14 }
 0x4d2   :  { %6370 = vmatmul.msk.f32.gmra.mxu1 %vm4371_vm2, %v11656_v2 }
 0x4d3   :  { %6010 = vmatmul.msk.f32.gmra.mxu0 %vm565_vm1, %v197_v18  ;;  %v9680_v0 = vpop.f32.mrf.mxu3 }
 0x4d4   :  { %11679 = vst [vmem:[#allocation256_spill] sm:$0xff] %v9680_v0  ;;  %6367 = vmatmul.msk.f32.gmra.mxu3 %vm565_vm1, %v554_v52  ;;  %v4180_v0 = vadd.s32 640, %v9098_v12 }
 0x4d6   :  { %vm4214_vm5 = vcmp.ge.s32.totalorder %v4180_v0, %v9093_v17  ;;  %vm4280_vm6 = vcmp.lt.s32.totalorder %v4180_v0, %v9101_v33  ;;  %vm4246_vm8 = vcmp.ge.s32.totalorder %v4180_v0, %v9449_v21  ;;  %vm4312_vm9 = vcmp.lt.s32.totalorder %v4180_v0, %v9455_v51 }
 0x4d7   :  { %vm4344_vm7 = vmand %vm4214_vm5, %vm4280_vm6  ;;  %v2697_v0 = vadd.f32 %v9610_v24, %v7450_v38  ;;  %v2691_v38 = vadd.f32 %v9610_v24, %v7406_v1  ;;  %v2682_v1 = vadd.f32 %v9610_v24, %v7340_v47  ;;  %v2673_v47 = vadd.f32 %v9610_v24, %v7272_v54 }
 0x4d8   :  { %v2537_v48 = vpop.f32.mrf.mxu0  ;;  %vm4376_vm10 = vmand %vm4246_vm8, %vm4312_vm9 }
 0x4d9   :  { %v9704_v52 = vpop.f32.mrf.mxu1 }
 0x4db   :  { %6011 = vmatmul.msk.f32.gmra.mxu0 %vm565_vm1, %v198_v25  ;;  %v9692_v22 = vpop.f32.mrf.mxu3 }
 0x4dc   :  { %11680 = vst [vmem:[#allocation257_spill] sm:$0xff] %v9692_v22  ;;  %6368 = vmatmul.msk.f32.gmra.mxu3 %vm565_vm1, %v555_v39  ;;  %v200_v39 = vld [vmem:[%s11408_s0 + $0x4e0] sm:$0xff] }
 0x4e0   :  { %v2540_v11 = vpop.f32.mrf.mxu0 }
 0x4e1   :  { %v9711_v60 = vpop.f32.mrf.mxu1 }
 0x4e3   :  { %6012 = vmatmul.msk.f32.gmra.mxu0 %vm565_vm1, %v199_v16  ;;  %v9702_v18 = vpop.f32.mrf.mxu3 }
 0x4e4   :  { %11681 = vst [vmem:[#allocation258_spill] sm:$0xff] %v9702_v18  ;;  %6373 = vmatmul.msk.f32.vlgmr.msrb.gmra.mxu3 %vm4341_vm0, %v11656_v2 }
 0x4e8   :  { %v2543_v25 = vpop.f32.mrf.mxu0 }
 0x4e9   :  { %v9720_v32 = vpop.f32.mrf.mxu1 }
 0x4eb   :  { %6013 = vmatmul.msk.f32.gmra.mxu0 %vm565_vm1, %v200_v39  ;;  %v9725_v39 = vpop.f32.mrf.mxu3 }
 0x4ec   :  { %11682 = vst [vmem:[#allocation259_spill] sm:$0xff] %v9725_v39  ;;  %6374 = vmatmul.msk.f32.gmra.mxu3 %vm4373_vm4, %v11656_v2 }
 0x4f0   :  { %v2546_v16 = vpop.f32.mrf.mxu0 }
 0x4f1   :  { %v9738_v39 = vpop.f32.mrf.mxu1 }
 0x4f3   :  { %6014 = vmatmul.msk.f32.gmra.mxu0 %vm565_vm1, %v201_v45  ;;  %v203_v45 = vld [vmem:[%s11408_s0 + $0x4f8] sm:$0xff]  ;;  %v9740_v46 = vpop.f32.mrf.mxu3 }
 0x4f4   :  { %11683 = vst [vmem:[#allocation260_spill] sm:$0xff] %v9740_v46  ;;  %6379 = vmatmul.msk.f32.vlgmr.msra.gmra.mxu3 %vm4344_vm7, %v11656_v2  ;;  %v9751_v46 = vpop.f32.mrf.mxu2 }
 0x4f8   :  { %v2549_v50 = vpop.f32.mrf.mxu0 }
 0x4f9   :  { %v2550_v22 = vadd.f32 %v9610_v24, %v2549_v50  ;;  %v2544_v50 = vadd.f32 %v9610_v24, %v2543_v25 }
 0x4fb   :  { %6015 = vmatmul.msk.f32.gmra.mxu0 %vm565_vm1, %v202_v41  ;;  %v2547_v41 = vadd.f32 %v9610_v24, %v2546_v16  ;;  %v3801_v61 = vmax.f32 %v2550_v22, 0.0  ;;  %v2538_v16 = vadd.f32 %v9610_v24, %v2537_v48  ;;  %v2535_v22 = vadd.f32 %v9610_v24, %v9669_v58  ;;  %v205_v58 = vld [vmem:[%s11408_s0 + $0x508] sm:$0xff] }
 0x4fd   :  { %v3800_v59 = vmax.f32 %v2547_v41, 0.0  ;;  %v3797_v41 = vmax.f32 %v2538_v16, 0.0  ;;  %v3796_v48 = vmax.f32 %v2535_v22, 0.0  ;;  %v2523_v16 = vadd.f32 %v9610_v24, %v9602_v36  ;;  %v206_v36 = vld [vmem:[%s11408_s0 + $0x510] sm:$0xff] }
 0x4fe   :  { %v2520_v22 = vadd.f32 %v9610_v24, %v9580_v55 }
 0x500   :  { %v2552_v62 = vpop.f32.mrf.mxu0 }
 0x501   :  { %v2553_v18 = vadd.f32 %v9610_v24, %v2552_v62  ;;  %v2541_v62 = vadd.f32 %v9610_v24, %v2540_v11  ;;  %v2532_v11 = vadd.f32 %v9610_v24, %v9655_v44  ;;  %v9771_v44 = vpop.f32.mrf.mxu2 }
 0x503   :  { %v3802_v10 = vmax.f32 %v2553_v18, 0.0  ;;  %6016 = vmatmul.msk.f32.gmra.mxu0 %vm565_vm1, %v203_v45  ;;  %v204_v18 = vld [vmem:[%s11408_s0 + $0x500] sm:$0xff]  ;;  %v3799_v45 = vmax.f32 %v2544_v50, 0.0  ;;  %v3798_v25 = vmax.f32 %v2541_v62, 0.0  ;;  %v2526_v62 = vadd.f32 %v9610_v24, %v9627_v8 }
 0x504   :  { %v2517_v8 = vadd.f32 %v9610_v24, %v9558_v53  ;;  %v2511_v53 = vadd.f32 %v9610_v24, %v9514_v40  ;;  %v9806_v40 = vadd.s32 1024, %v9098_v12 }
 0x505   :  { %4651 = vmatpush.msrb.mxu3 %v3802_v10  ;;  %v9760_v10 = vpop.f32.mrf.mxu1 }
 0x506   :  { %vm4283_vm11 = vcmp.lt.s32.totalorder %v9806_v40, %v9101_v33  ;;  %vm4249_vm15 = vcmp.ge.s32.totalorder %v9806_v40, %v9449_v21  ;;  %vm4315_vm0 = vcmp.lt.s32.totalorder %v9806_v40, %v9455_v51 }
 0x507   :  { %4652 = vmatpush.msrb.mxu3 %v3801_v61  ;;  %v9756_v61 = vpop.f32.mrf.mxu3  ;;  %vm4379_vm3 = vmand %vm4249_vm15, %vm4315_vm0 }
 0x508   :  { %v9745_v20 = vpop.f32.mrf.mxu0  ;;  %11684 = vst [vmem:[#allocation261_spill] sm:$0xff] %v9756_v61  ;;  %6380 = vmatmul.msk.f32.gmra.mxu3 %vm4376_vm10, %v11656_v2 }
 0x509   :  { %4653 = vmatpush.msrb.mxu3 %v3800_v59  ;;  %v2529_v59 = vadd.f32 %v9610_v24, %v9641_v29  ;;  %v9791_v55 = vpop.f32.mrf.mxu2 }
 0x50b   :  { %6017 = vmatmul.msk.f32.gmra.mxu0 %vm565_vm1, %v204_v18  ;;  %4654 = vmatpush.msrb.mxu3 %v3799_v45  ;;  %v3795_v18 = vmax.f32 %v2532_v11, 0.0  ;;  %v3794_v45 = vmax.f32 %v2529_v59, 0.0  ;;  %v3792_v11 = vmax.f32 %v2523_v16, 0.0  ;;  %v2514_v59 = vadd.f32 %v9610_v24, %v9534_v23 }
 0x50c   :  { %v2508_v23 = vadd.f32 %v9610_v24, %v9494_v34 }
 0x50d   :  { %4655 = vmatpush.msrb.mxu3 %v3798_v25  ;;  %v3793_v25 = vmax.f32 %v2526_v62, 0.0  ;;  %v3790_v62 = vmax.f32 %v2517_v8, 0.0  ;;  %v3789_v16 = vmax.f32 %v2514_v59, 0.0  ;;  %v2688_v59 = vadd.f32 %v9610_v24, %v7384_v7 }
 0x50e   :  { %v3787_v8 = vmax.f32 %v2508_v23, 0.0  ;;  %v2679_v7 = vadd.f32 %v9610_v24, %v7318_v49 }
 0x50f   :  { %4656 = vmatpush.msrb.mxu3 %v3797_v41  ;;  %v9776_v29 = vpop.f32.mrf.mxu3  ;;  %v9782_v41 = vpop.f32.mrf.mxu1  ;;  %v3847_v23 = vmax.f32 %v2688_v59, 0.0  ;;  %v2670_v59 = vadd.f32 %v9610_v24, %v7244_v26  ;;  %v2661_v26 = vadd.f32 %v9610_v24, %v7169_v30 }
 0x510   :  { %v9764_v50 = vpop.f32.mrf.mxu0  ;;  %11685 = vst [vmem:[#allocation262_spill] sm:$0xff] %v9776_v29  ;;  %v11704_v29 = vld [vmem:[#allocation115_spill] sm:$0xff] }
 0x511   :  { %4657 = vmatpush.msrb.mxu3 %v3796_v48  ;;  %v9814_v34 = vpop.f32.mrf.mxu2 }
 0x513   :  { %6018 = vmatmul.msk.f32.gmra.mxu0 %vm565_vm1, %v205_v58  ;;  %4658 = vmatpush.msrb.mxu3 %v3795_v18  ;;  %v3791_v58 = vmax.f32 %v2520_v22, 0.0  ;;  %v2694_v22 = vadd.f32 %v9610_v24, %v7428_v13 }
 0x515   :  { %4659 = vmatpush.msrb.mxu3 %v3794_v45  ;;  %v3788_v45 = vmax.f32 %v2511_v53, 0.0  ;;  %v2685_v53 = vadd.f32 %v9610_v24, %v7362_v35  ;;  %v2676_v35 = vadd.f32 %v9610_v24, %v7296_v5  ;;  %v3842_v5 = vmax.f32 %v2673_v47, 0.0 }
 0x516   :  { %v2652_v47 = vadd.f32 %v9610_v24, %v7115_v4  ;;  %v2838_v4 = vadd.f32 %v9610_v24, %v8639_v43 }
 0x517   :  { %4660 = vmatpush.msrb.mxu3 %v3793_v25  ;;  %v9798_v18 = vpop.f32.mrf.mxu3  ;;  %v3843_v49 = vmax.f32 %v2676_v35, 0.0  ;;  %v2658_v35 = vadd.f32 %v9610_v24, %v7151_v19  ;;  %v2655_v19 = vadd.f32 %v9610_v24, %v7133_v9  ;;  %v4178_v9 = vadd.s32 384, %v9098_v12 }
 0x518   :  { %v9784_v48 = vpop.f32.mrf.mxu0  ;;  %11686 = vst [vmem:[#allocation263_spill] sm:$0xff] %v9798_v18  ;;  %v2805_v18 = vadd.f32 %v9610_v24, %v11704_v29 }
 0x519   :  { %4661 = vmatpush.msrb.mxu3 %v3792_v11  ;;  %v9812_v11 = vpop.f32.mrf.mxu1  ;;  %vm4212_vm4 = vcmp.ge.s32.totalorder %v4178_v9, %v9093_v17  ;;  %vm4278_vm5 = vcmp.lt.s32.totalorder %v4178_v9, %v9101_v33  ;;  %vm4310_vm13 = vcmp.lt.s32.totalorder %v4178_v9, %v9455_v51 }
 0x51a   :  { %vm4342_vm8 = vmand %vm4212_vm4, %vm4278_vm5  ;;  %v3886_v29 = vmax.f32 %v2805_v18, 0.0  ;;  %v9989_v18 = vadd.s32 1792, %v9098_v12 }
 0x51b   :  { %6019 = vmatmul.msk.f32.gmra.mxu0 %vm565_vm1, %v206_v36  ;;  %4662 = vmatpush.msrb.mxu3 %v3791_v58  ;;  %vm4217_vm1 = vcmp.ge.s32.totalorder %v9806_v40, %v9093_v17  ;;  %v3850_v36 = vmax.f32 %v2697_v0, 0.0  ;;  %v3849_v58 = vmax.f32 %v2694_v22, 0.0  ;;  %v9833_v0 = vpop.f32.mrf.mxu2  ;;  %v2841_v40 = vadd.f32 %v9610_v24, %v8663_v63 }
 0x51c   :  { %vm4347_vm12 = vmand %vm4217_vm1, %vm4283_vm11  ;;  %v2835_v63 = vadd.f32 %v9610_v24, %v8615_v37  ;;  %6375 = vmatmul.msk.f32.vlgmr.msra.gmra.mxu1 %vm4342_vm8, %v11656_v2  ;;  %v11694_v37 = vld [vmem:[#allocation139_spill] sm:$0xff] }
 0x51d   :  { %4663 = vmatpush.msrb.mxu3 %v3790_v62  ;;  %v3848_v62 = vmax.f32 %v2691_v38, 0.0  ;;  %v3845_v38 = vmax.f32 %v2682_v1, 0.0  ;;  %v2664_v1 = vadd.f32 %v9610_v24, %v7190_v56  ;;  %v3838_v56 = vmax.f32 %v2661_v26, 0.0 }
 0x51e   :  { %v3898_v26 = vmax.f32 %v2841_v40, 0.0  ;;  %v11695_v40 = vld [vmem:[#allocation136_spill] sm:$0xff] }
 0x51f   :  { %4664 = vmatpush.msrb.mxu3 %v3789_v16  ;;  %v9822_v13 = vpop.f32.mrf.mxu3 }
 0x520   :  { %v9810_v25 = vpop.f32.mrf.mxu0  ;;  %11687 = vst [vmem:[#allocation264_spill] sm:$0xff] %v9822_v13 }
 0x521   :  { %4665 = vmatpush.msrb.mxu3 %v3788_v45  ;;  %v3846_v45 = vmax.f32 %v2685_v53, 0.0  ;;  %v9837_v22 = vpop.f32.mrf.mxu1 }
 0x523   :  { %4666 = vmatpush.msrb.mxu3 %v3787_v8  ;;  %v9849_v53 = vpop.f32.mrf.mxu2 }
 0x524   :  { %6385 = vmatmul.msk.f32.vlgmr.msrb.gmra.mxu3 %vm4347_vm12, %v11656_v2  ;;  %vm4244_vm12 = vcmp.ge.s32.totalorder %v4178_v9, %v9449_v21 }
 0x525   :  { %4720 = vmatpush.msra.mxu3 %v3850_v36  ;;  %v3844_v36 = vmax.f32 %v2679_v7, 0.0  ;;  %vm4374_vm14 = vmand %vm4244_vm12, %vm4310_vm13 }
 0x526   :  { %6376 = vmatmul.msk.f32.gmra.mxu1 %vm4374_vm14, %v11656_v2 }
 0x527   :  { %4721 = vmatpush.msra.mxu3 %v3849_v58  ;;  %v9839_v8 = vpop.f32.mrf.mxu3 }
 0x528   :  { %v9831_v16 = vpop.f32.mrf.mxu0  ;;  %11688 = vst [vmem:[#allocation265_spill] sm:$0xff] %v9839_v8 }
 0x529   :  { %4722 = vmatpush.msra.mxu3 %v3848_v62  ;;  %v2667_v62 = vadd.f32 %v9610_v24, %v7216_v6  ;;  %v9857_v7 = vpop.f32.mrf.mxu1  ;;  %v3839_v6 = vmax.f32 %v2664_v1, 0.0 }
 0x52b   :  { %4723 = vmatpush.msra.mxu3 %v3847_v23  ;;  %v3841_v23 = vmax.f32 %v2670_v59, 0.0  ;;  %v9873_v30 = vpop.f32.mrf.mxu2  ;;  %v3837_v59 = vmax.f32 %v2658_v35, 0.0 }
 0x52c   :  { %6386 = vmatmul.msk.f32.gmra.mxu3 %vm4379_vm3, %v11656_v2 }
 0x52d   :  { %4724 = vmatpush.msra.mxu3 %v3846_v45  ;;  %v3840_v45 = vmax.f32 %v2667_v62, 0.0  ;;  %v9887_v62 = vadd.s32 1408, %v9098_v12 }
 0x52f   :  { %4725 = vmatpush.msra.mxu3 %v3845_v38  ;;  %v9855_v54 = vpop.f32.mrf.mxu3  ;;  %vm4220_vm6 = vcmp.ge.s32.totalorder %v9887_v62, %v9093_v17  ;;  %vm4286_vm7 = vcmp.lt.s32.totalorder %v9887_v62, %v9101_v33 }
 0x530   :  { %v9847_v58 = vpop.f32.mrf.mxu0  ;;  %11689 = vst [vmem:[#allocation266_spill] sm:$0xff] %v9855_v54  ;;  %vm4350_vm9 = vmand %vm4220_vm6, %vm4286_vm7  ;;  %vm4252_vm6 = vcmp.ge.s32.totalorder %v9887_v62, %v9449_v21  ;;  %vm4318_vm7 = vcmp.lt.s32.totalorder %v9887_v62, %v9455_v51  ;;  %v11709_v62 = vld [vmem:[#allocation9_spill] sm:$0xff] }
 0x531   :  { %4726 = vmatpush.msra.mxu3 %v3844_v36  ;;  %v9891_v1 = vpop.f32.mrf.mxu1  ;;  %vm4382_vm8 = vmand %vm4252_vm6, %vm4318_vm7 }
 0x533   :  { %4727 = vmatpush.msra.mxu3 %v3843_v49  ;;  %v3836_v49 = vmax.f32 %v2655_v19, 0.0  ;;  %v9903_v43 = vpop.f32.mrf.mxu2 }
 0x535   :  { %4728 = vmatpush.msra.mxu3 %v3842_v5  ;;  %v3835_v5 = vmax.f32 %v2652_v47, 0.0  ;;  %v2829_v47 = vadd.f32 %v9610_v24, %v11694_v37  ;;  %v11697_v37 = vld [vmem:[#allocation130_spill] sm:$0xff] }
 0x537   :  { %4729 = vmatpush.msra.mxu3 %v3841_v23  ;;  %v9881_v36 = vpop.f32.mrf.mxu3 }
 0x538   :  { %v9863_v38 = vpop.f32.mrf.mxu0  ;;  %11690 = vst [vmem:[#allocation267_spill] sm:$0xff] %v9881_v36 }
 0x539   :  { %4730 = vmatpush.msra.mxu3 %v3840_v45  ;;  %v11691_v45 = vld [vmem:[#allocation142_spill] sm:$0xff] }
 0x53a   :  { %v2832_v35 = vadd.f32 %v9610_v24, %v11691_v45 }
 0x53b   :  { %4731 = vmatpush.msra.mxu3 %v3839_v6  ;;  %v3897_v6 = vmax.f32 %v2838_v4, 0.0 }
 0x53d   :  { %4732 = vmatpush.msra.mxu3 %v3838_v56  ;;  %v11693_v56 = vld [vmem:[#allocation238_spill] sm:$0xff] }
 0x53e   :  { %vm4245_vm10 = vcmp.ge.s32.totalorder %v11693_v56, %v9449_v21  ;;  %vm4311_vm1 = vcmp.lt.s32.totalorder %v11693_v56, %v9455_v51  ;;  %v3894_v56 = vmax.f32 %v2829_v47, 0.0  ;;  %v11699_v47 = vld [vmem:[#allocation127_spill] sm:$0xff] }
 0x53f   :  { %4733 = vmatpush.msra.mxu3 %v3837_v59  ;;  %v9908_v19 = vpop.f32.mrf.mxu3  ;;  %v3896_v59 = vmax.f32 %v2835_v63, 0.0  ;;  %vm4375_vm11 = vmand %vm4245_vm10, %vm4311_vm1  ;;  %v9926_v63 = vpop.f32.mrf.mxu1  ;;  %vm4289_vm10 = vcmp.lt.s32.totalorder %v9989_v18, %v9101_v33 }
 0x540   :  { %v9893_v23 = vpop.f32.mrf.mxu0  ;;  %11692 = vst [vmem:[#allocation142_spill] sm:$0xff] %v9908_v19  ;;  %6378 = vmatmul.msk.f32.gmra.mxu2 %vm4375_vm11, %v11656_v2  ;;  %v2952_v14 = vadd.f32 %v9610_v24, %v9926_v63 }
 0x541   :  { %4734 = vmatpush.msra.mxu3 %v3836_v49  ;;  %v2826_v49 = vadd.f32 %v9610_v24, %v11695_v40 }
 0x543   :  { %4735 = vmatpush.msra.mxu3 %v3835_v5  ;;  %v3895_v5 = vmax.f32 %v2832_v35, 0.0  ;;  %v9932_v35 = vadd.s32 896, %v9098_v12  ;;  %v3893_v40 = vmax.f32 %v2826_v49, 0.0  ;;  %v11700_v49 = vld [vmem:[#allocation124_spill] sm:$0xff] }
 0x544   :  { %6391 = vmatmul.msk.f32.vlgmr.msra.gmra.mxu3 %vm4350_vm9, %v11656_v2  ;;  %vm4223_vm9 = vcmp.ge.s32.totalorder %v9989_v18, %v9093_v17 }
 0x545   :  { %4789 = vmatpush.msrb.mxu3 %v3898_v26  ;;  %v11696_v26 = vld [vmem:[#allocation133_spill] sm:$0xff]  ;;  %vm4216_vm15 = vcmp.ge.s32.totalorder %v9932_v35, %v9093_v17  ;;  %vm4282_vm0 = vcmp.lt.s32.totalorder %v9932_v35, %v9101_v33  ;;  %vm4353_vm1 = vmand %vm4223_vm9, %vm4289_vm10  ;;  %vm4248_vm11 = vcmp.ge.s32.totalorder %v9932_v35, %v9449_v21  ;;  %vm4314_vm12 = vcmp.lt.s32.totalorder %v9932_v35, %v9455_v51  ;;  %v11716_v35 = vld [vmem:[#allocation3_spill] sm:$0xff] }
 0x546   :  { %v2823_v45 = vadd.f32 %v9610_v24, %v11696_v26  ;;  %vm4346_vm2 = vmand %vm4216_vm15, %vm4282_vm0 }
 0x547   :  { %4790 = vmatpush.msrb.mxu3 %v3897_v6  ;;  %v9928_v6 = vpop.f32.mrf.mxu2  ;;  %v9936_v9 = vpop.f32.mrf.mxu3  ;;  %vm4378_vm13 = vmand %vm4248_vm11, %vm4314_vm12 }
 0x548   :  { %v9920_v4 = vpop.f32.mrf.mxu0  ;;  %11698 = vst [vmem:[#allocation238_spill] sm:$0xff] %v9936_v9  ;;  %v3892_v26 = vmax.f32 %v2823_v45, 0.0  ;;  %6383 = vmatmul.msk.f32.vlgmr.msrb.gmra.mxu2 %vm4346_vm2, %v11656_v2  ;;  %v11701_v45 = vld [vmem:[#allocation121_spill] sm:$0xff]  ;;  %v9963_v9 = vpop.f32.mrf.mxu1  ;;  %vm4255_vm2 = vcmp.ge.s32.totalorder %v9989_v18, %v9449_v21 }
 0x549   :  { %4791 = vmatpush.msrb.mxu3 %v3896_v59  ;;  %v2820_v59 = vadd.f32 %v9610_v24, %v11697_v37  ;;  %v9946_v37 = vadd.s32 768, %v9098_v12 }
 0x54b   :  { %4792 = vmatpush.msrb.mxu3 %v3895_v5  ;;  %v2817_v5 = vadd.f32 %v9610_v24, %v11699_v47  ;;  %v3891_v54 = vmax.f32 %v2820_v59, 0.0  ;;  %vm4215_vm3 = vcmp.ge.s32.totalorder %v9946_v37, %v9093_v17  ;;  %vm4281_vm4 = vcmp.lt.s32.totalorder %v9946_v37, %v9101_v33  ;;  %v11702_v59 = vld [vmem:[#allocation118_spill] sm:$0xff] }
 0x54c   :  { %vm4345_vm5 = vmand %vm4215_vm3, %vm4281_vm4  ;;  %6392 = vmatmul.msk.f32.gmra.mxu3 %vm4382_vm8, %v11656_v2  ;;  %vm4247_vm14 = vcmp.ge.s32.totalorder %v9946_v37, %v9449_v21  ;;  %vm4313_vm15 = vcmp.lt.s32.totalorder %v9946_v37, %v9455_v51  ;;  %vm4321_vm3 = vcmp.lt.s32.totalorder %v9989_v18, %v9455_v51  ;;  %v11723_v18 = vld [vmem:[#allocation145_spill] sm:$0xff] }
 0x54d   :  { %4793 = vmatpush.msrb.mxu3 %v3894_v56  ;;  %v2814_v56 = vadd.f32 %v9610_v24, %v11700_v49  ;;  %v3890_v47 = vmax.f32 %v2817_v5, 0.0  ;;  %6381 = vmatmul.msk.f32.vlgmr.msrb.gmra.mxu1 %vm4345_vm5, %v11656_v2  ;;  %vm4377_vm0 = vmand %vm4247_vm14, %vm4313_vm15 }
 0x54e   :  { %vm4385_vm4 = vmand %vm4255_vm2, %vm4321_vm3 }
 0x54f   :  { %4794 = vmatpush.msrb.mxu3 %v3893_v40  ;;  %v2811_v40 = vadd.f32 %v9610_v24, %v11701_v45  ;;  %v9958_v19 = vpop.f32.mrf.mxu2  ;;  %v3889_v49 = vmax.f32 %v2814_v56, 0.0  ;;  %v9965_v61 = vpop.f32.mrf.mxu3 }
 0x550   :  { %v9950_v36 = vpop.f32.mrf.mxu0  ;;  %11703 = vst [vmem:[#allocation139_spill] sm:$0xff] %v9965_v61  ;;  %v2985_v61 = vadd.f32 %v9610_v24, %v11709_v62  ;;  %v2957_v31 = vpop.f32.mrf.mxu1  ;;  %v11712_v62 = vld [vmem:[#allocation6_spill] sm:$0xff]  ;;  %6384 = vmatmul.msk.f32.gmra.mxu2 %vm4378_vm13, %v11656_v2 }
 0x551   :  { %4795 = vmatpush.msrb.mxu3 %v3892_v26  ;;  %v2808_v26 = vadd.f32 %v9610_v24, %v11702_v59  ;;  %v3888_v45 = vmax.f32 %v2811_v40, 0.0 }
 0x553   :  { %4796 = vmatpush.msrb.mxu3 %v3891_v54  ;;  %v11705_v54 = vld [vmem:[#allocation112_spill] sm:$0xff]  ;;  %v3887_v13 = vmax.f32 %v2808_v26, 0.0  ;;  %v11707_v26 = vld [vmem:[#allocation106_spill] sm:$0xff] }
 0x554   :  { %v2802_v5 = vadd.f32 %v9610_v24, %v11705_v54 }
 0x555   :  { %4797 = vmatpush.msrb.mxu3 %v3890_v47  ;;  %v11706_v47 = vld [vmem:[#allocation109_spill] sm:$0xff]  ;;  %6382 = vmatmul.msk.f32.gmra.mxu1 %vm4377_vm0, %v11656_v2 }
 0x556   :  { %v2799_v59 = vadd.f32 %v9610_v24, %v11706_v47 }
 0x557   :  { %4798 = vmatpush.msrb.mxu3 %v3889_v49  ;;  %v9979_v40 = vpop.f32.mrf.mxu2  ;;  %v2796_v49 = vadd.f32 %v9610_v24, %v11707_v26  ;;  %v9984_v54 = vpop.f32.mrf.mxu3 }
 0x558   :  { %v9975_v56 = vpop.f32.mrf.mxu0  ;;  %11708 = vst [vmem:[#allocation136_spill] sm:$0xff] %v9984_v54  ;;  %v3884_v8 = vmax.f32 %v2799_v59, 0.0  ;;  %v3946_v59 = vmax.f32 %v2985_v61, 0.0  ;;  %v11714_v61 = vld [vmem:[#allocation5_spill] sm:$0xff]  ;;  %v2960_v54 = vpop.f32.mrf.mxu1 }
 0x559   :  { %4799 = vmatpush.msrb.mxu3 %v3888_v45  ;;  %v3885_v45 = vmax.f32 %v2802_v5, 0.0  ;;  %v3883_v27 = vmax.f32 %v2796_v49, 0.0  ;;  %v11711_v5 = vld [vmem:[#allocation7_spill] sm:$0xff]  ;;  %v2976_v49 = vadd.f32 %v9610_v24, %v11712_v62  ;;  %v2961_v28 = vadd.f32 %v9610_v24, %v2960_v54 }
 0x55a   :  { %v2949_v54 = vadd.f32 %v9610_v24, %v9891_v1  ;;  %v2940_v1 = vadd.f32 %v9610_v24, %v9812_v11  ;;  %v10064_v11 = vadd.s32 2176, %v9098_v12 }
 0x55b   :  { %4800 = vmatpush.msrb.mxu3 %v3887_v13  ;;  %v11710_v13 = vld [vmem:[#allocation8_spill] sm:$0xff]  ;;  %v3943_v62 = vmax.f32 %v2976_v49, 0.0  ;;  %v11718_v49 = vld [vmem:[#allocation2_spill] sm:$0xff] }
 0x55c   :  { %v2982_v47 = vadd.f32 %v9610_v24, %v11710_v13  ;;  %v3934_v63 = vmax.f32 %v2949_v54, 0.0  ;;  %vm4226_vm5 = vcmp.ge.s32.totalorder %v10064_v11, %v9093_v17  ;;  %vm4292_vm6 = vcmp.lt.s32.totalorder %v10064_v11, %v9101_v33 }
 0x55d   :  { %4801 = vmatpush.msrb.mxu3 %v3886_v29  ;;  %v2979_v29 = vadd.f32 %v9610_v24, %v11711_v5  ;;  %vm4356_vm7 = vmand %vm4226_vm5, %vm4292_vm6  ;;  %vm4258_vm8 = vcmp.ge.s32.totalorder %v10064_v11, %v9449_v21  ;;  %vm4324_vm9 = vcmp.lt.s32.totalorder %v10064_v11, %v9455_v51  ;;  %v11738_v11 = vld [vmem:[#allocation103_spill] sm:$0xff] }
 0x55e   :  { %vm4388_vm10 = vmand %vm4258_vm8, %vm4324_vm9 }
 0x55f   :  { %4802 = vmatpush.msrb.mxu3 %v3885_v45  ;;  %v10001_v45 = vpop.f32.mrf.mxu2  ;;  %v10006_v13 = vpop.f32.mrf.mxu3  ;;  %v3944_v5 = vmax.f32 %v2979_v29, 0.0 }
 0x560   :  { %v9999_v26 = vpop.f32.mrf.mxu0  ;;  %11713 = vst [vmem:[#allocation133_spill] sm:$0xff] %v10006_v13 }
 0x561   :  { %4803 = vmatpush.msrb.mxu3 %v3884_v8  ;;  %v3945_v8 = vmax.f32 %v2982_v47, 0.0  ;;  %v11715_v47 = vld [vmem:[#allocation4_spill] sm:$0xff] }
 0x563   :  { %4804 = vmatpush.msrb.mxu3 %v3883_v27  ;;  %v2973_v27 = vadd.f32 %v9610_v24, %v11714_v61  ;;  %v2967_v61 = vadd.f32 %v9610_v24, %v11716_v35 }
 0x564   :  { %6397 = vmatmul.msk.f32.vlgmr.msrb.gmra.mxu3 %vm4353_vm1, %v11656_v2 }
 0x565   :  { %4858 = vmatpush.msra.mxu3 %v3946_v59  ;;  %v2970_v59 = vadd.f32 %v9610_v24, %v11715_v47  ;;  %v3942_v29 = vmax.f32 %v2973_v27, 0.0  ;;  %v3940_v57 = vmax.f32 %v2967_v61, 0.0  ;;  %v2958_v27 = vadd.f32 %v9610_v24, %v2957_v31 }
 0x567   :  { %4859 = vmatpush.msra.mxu3 %v3945_v8  ;;  %v10025_v13 = vpop.f32.mrf.mxu2  ;;  %v3941_v47 = vmax.f32 %v2970_v59, 0.0  ;;  %v10031_v37 = vpop.f32.mrf.mxu3 }
 0x568   :  { %v10023_v8 = vpop.f32.mrf.mxu0  ;;  %11717 = vst [vmem:[#allocation130_spill] sm:$0xff] %v10025_v13  ;;  %v3938_v13 = vmax.f32 %v2961_v28, 0.0  ;;  %v3935_v28 = vmax.f32 %v2952_v14, 0.0 }
 0x569   :  { %4860 = vmatpush.msra.mxu3 %v3944_v5  ;;  %v2964_v5 = vadd.f32 %v9610_v24, %v11718_v49  ;;  %11719 = vst [vmem:[#allocation127_spill] sm:$0xff] %v10031_v37  ;;  %v3937_v49 = vmax.f32 %v2958_v27, 0.0 }
 0x56b   :  { %4861 = vmatpush.msra.mxu3 %v3943_v62  ;;  %v3939_v35 = vmax.f32 %v2964_v5, 0.0  ;;  %v2955_v62 = vadd.f32 %v9610_v24, %v9963_v9  ;;  %v2946_v9 = vadd.f32 %v9610_v24, %v9857_v7  ;;  %v11721_v7 = vld [vmem:[#allocation147_spill] sm:$0xff] }
 0x56c   :  { %6398 = vmatmul.msk.f32.gmra.mxu3 %vm4385_vm4, %v11656_v2 }
 0x56d   :  { %4862 = vmatpush.msra.mxu3 %v3942_v29  ;;  %v3936_v61 = vmax.f32 %v2955_v62, 0.0  ;;  %v3126_v62 = vadd.f32 %v9610_v24, %v11723_v18 }
 0x56f   :  { %4863 = vmatpush.msra.mxu3 %v3941_v47  ;;  %v10038_v29 = vpop.f32.mrf.mxu2  ;;  %v10042_v31 = vpop.f32.mrf.mxu3  ;;  %v3129_v47 = vadd.f32 %v9610_v24, %v11721_v7  ;;  %v11726_v7 = vld [vmem:[#allocation137_spill] sm:$0xff] }
 0x570   :  { %v2594_v59 = vpop.f32.mrf.mxu0  ;;  %11720 = vst [vmem:[#allocation124_spill] sm:$0xff] %v10042_v31  ;;  %v11728_v31 = vld [vmem:[#allocation131_spill] sm:$0xff] }
 0x571   :  { %4864 = vmatpush.msra.mxu3 %v3940_v57  ;;  %v2943_v57 = vadd.f32 %v9610_v24, %v9837_v22 }
 0x573   :  { %4865 = vmatpush.msra.mxu3 %v3939_v35  ;;  %v3932_v22 = vmax.f32 %v2943_v57, 0.0  ;;  %v3931_v35 = vmax.f32 %v2940_v1, 0.0 }
 0x575   :  { %4866 = vmatpush.msra.mxu3 %v3938_v13  ;;  %v3933_v13 = vmax.f32 %v2946_v9, 0.0 }
 0x577   :  { %4867 = vmatpush.msra.mxu3 %v3937_v49  ;;  %v10055_v14 = vpop.f32.mrf.mxu2  ;;  %v10059_v27 = vpop.f32.mrf.mxu3  ;;  %v11724_v49 = vld [vmem:[#allocation143_spill] sm:$0xff] }
 0x578   :  { %v2597_v5 = vpop.f32.mrf.mxu0  ;;  %11722 = vst [vmem:[#allocation121_spill] sm:$0xff] %v10059_v27  ;;  %v3123_v54 = vadd.f32 %v9610_v24, %v11724_v49 }
 0x579   :  { %4868 = vmatpush.msra.mxu3 %v3936_v61  ;;  %v3994_v61 = vmax.f32 %v3129_v47, 0.0  ;;  %v2598_v1 = vadd.f32 %v9610_v24, %v2597_v5  ;;  %v3117_v47 = vadd.f32 %v9610_v24, %v11726_v7  ;;  %v3111_v7 = vadd.f32 %v9610_v24, %v11728_v31 }
 0x57a   :  { %v3992_v18 = vmax.f32 %v3123_v54, 0.0 }
 0x57b   :  { %4869 = vmatpush.msra.mxu3 %v3935_v28  ;;  %v11725_v28 = vld [vmem:[#allocation140_spill] sm:$0xff]  ;;  %v3990_v54 = vmax.f32 %v3117_v47, 0.0  ;;  %v11730_v47 = vld [vmem:[#allocation125_spill] sm:$0xff] }
 0x57c   :  { %v3120_v57 = vadd.f32 %v9610_v24, %v11725_v28 }
 0x57d   :  { %4870 = vmatpush.msra.mxu3 %v3934_v63  ;;  %v3993_v63 = vmax.f32 %v3126_v62, 0.0  ;;  %v11727_v62 = vld [vmem:[#allocation134_spill] sm:$0xff] }
 0x57e   :  { %v3114_v5 = vadd.f32 %v9610_v24, %v11727_v62  ;;  %v3991_v28 = vmax.f32 %v3120_v57, 0.0  ;;  %v11729_v62 = vld [vmem:[#allocation128_spill] sm:$0xff] }
 0x57f   :  { %4871 = vmatpush.msra.mxu3 %v3933_v13  ;;  %v10082_v37 = vpop.f32.mrf.mxu3  ;;  %v3108_v57 = vadd.f32 %v9610_v24, %v11729_v62 }
 0x580   :  { %v2600_v9 = vpop.f32.mrf.mxu0  ;;  %v3989_v27 = vmax.f32 %v3114_v5, 0.0  ;;  %v11731_v5 = vld [vmem:[#allocation122_spill] sm:$0xff] }
 0x581   :  { %4872 = vmatpush.msra.mxu3 %v3932_v22  ;;  %v2601_v13 = vadd.f32 %v9610_v24, %v2600_v9  ;;  %v10076_v22 = vpop.f32.mrf.mxu2  ;;  %v3817_v9 = vmax.f32 %v2598_v1, 0.0 }
 0x583   :  { %4873 = vmatpush.msra.mxu3 %v3931_v35  ;;  %v2595_v35 = vadd.f32 %v9610_v24, %v2594_v59  ;;  %v3818_v49 = vmax.f32 %v2601_v13, 0.0  ;;  %v2589_v59 = vadd.f32 %v9610_v24, %v9999_v26  ;;  %v3105_v26 = vadd.f32 %v9610_v24, %v11730_v47 }
 0x584   :  { %6403 = vmatmul.msk.f32.vlgmr.msra.gmra.mxu3 %vm4356_vm7, %v11656_v2 }
 0x585   :  { %4927 = vmatpush.msrb.mxu3 %v3994_v61  ;;  %v2592_v61 = vadd.f32 %v9610_v24, %v10023_v8  ;;  %4674 = vmatpush.msra.mxu1 %v3818_v49  ;;  %v2586_v8 = vadd.f32 %v9610_v24, %v9975_v56  ;;  %v3814_v49 = vmax.f32 %v2589_v59, 0.0  ;;  %v3102_v56 = vadd.f32 %v9610_v24, %v11731_v5 }
 0x586   :  { %v3986_v62 = vmax.f32 %v3105_v26, 0.0 }
 0x587   :  { %4928 = vmatpush.msrb.mxu3 %v3993_v63  ;;  %v3816_v63 = vmax.f32 %v2595_v35, 0.0  ;;  %4675 = vmatpush.msra.mxu1 %v3817_v9  ;;  %v3815_v1 = vmax.f32 %v2592_v61, 0.0  ;;  %v2583_v35 = vadd.f32 %v9610_v24, %v9950_v36  ;;  %v3987_v61 = vmax.f32 %v3108_v57, 0.0 }
 0x588   :  { %v10092_v13 = vpop.f32.mrf.mxu0  ;;  %v2580_v9 = vadd.f32 %v9610_v24, %v9920_v4  ;;  %v2577_v36 = vadd.f32 %v9610_v24, %v9893_v23  ;;  %v3985_v47 = vmax.f32 %v3102_v56, 0.0  ;;  %v2574_v4 = vadd.f32 %v9610_v24, %v9863_v38 }
 0x589   :  { %4929 = vmatpush.msrb.mxu3 %v3992_v18  ;;  %4676 = vmatpush.msra.mxu1 %v3816_v63  ;;  %v10098_v31 = vpop.f32.mrf.mxu2  ;;  %v3988_v18 = vmax.f32 %v3111_v7, 0.0  ;;  %v11732_v63 = vld [vmem:[#allocation119_spill] sm:$0xff] }
 0x58a   :  { %v3099_v7 = vadd.f32 %v9610_v24, %v11732_v63  ;;  %v3810_v5 = vmax.f32 %v2577_v36, 0.0  ;;  %v3809_v63 = vmax.f32 %v2574_v4, 0.0  ;;  %v10141_v4 = vadd.s32 1280, %v9098_v12 }
 0x58b   :  { %4930 = vmatpush.msrb.mxu3 %v3991_v28  ;;  %4677 = vmatpush.msra.mxu1 %v3815_v1  ;;  %v10104_v28 = vpop.f32.mrf.mxu3  ;;  %v11733_v1 = vld [vmem:[#allocation116_spill] sm:$0xff] }
 0x58c   :  { %v3096_v57 = vadd.f32 %v9610_v24, %v11733_v1  ;;  %v3984_v23 = vmax.f32 %v3099_v7, 0.0  ;;  %6404 = vmatmul.msk.f32.gmra.mxu3 %vm4388_vm10, %v11656_v2  ;;  %vm4219_vm1 = vcmp.ge.s32.totalorder %v10141_v4, %v9093_v17  ;;  %vm4285_vm11 = vcmp.lt.s32.totalorder %v10141_v4, %v9101_v33 }
 0x58d   :  { %4931 = vmatpush.msrb.mxu3 %v3990_v54  ;;  %v3813_v54 = vmax.f32 %v2586_v8, 0.0  ;;  %4678 = vmatpush.msra.mxu1 %v3814_v49  ;;  %v3811_v8 = vmax.f32 %v2580_v9, 0.0  ;;  %v2568_v9 = vadd.f32 %v9610_v24, %v9831_v16  ;;  %v11737_v16 = vld [vmem:[#allocation107_spill] sm:$0xff]  ;;  %vm10189_vm13 = vmand %vm4219_vm1, %vm4285_vm11  ;;  %vm4251_vm4 = vcmp.ge.s32.totalorder %v10141_v4, %v9449_v21 }
 0x58e   :  { %v3983_v38 = vmax.f32 %v3096_v57, 0.0  ;;  %v3087_v1 = vadd.f32 %v9610_v24, %v11737_v16  ;;  %vm4317_vm5 = vcmp.lt.s32.totalorder %v10141_v4, %v9455_v51 }
 0x58f   :  { %4932 = vmatpush.msrb.mxu3 %v3989_v27  ;;  %v3812_v27 = vmax.f32 %v2583_v35, 0.0  ;;  %4679 = vmatpush.msra.mxu1 %v3813_v54  ;;  %v2571_v35 = vadd.f32 %v9610_v24, %v9847_v58  ;;  %v2565_v58 = vadd.f32 %v9610_v24, %v9810_v25  ;;  %v2562_v25 = vadd.f32 %v9610_v24, %v9784_v48  ;;  %vm4381_vm8 = vmand %vm4251_vm4, %vm4317_vm5 }
 0x590   :  { %v2606_v59 = vpop.f32.mrf.mxu0 }
 0x591   :  { %4933 = vmatpush.msrb.mxu3 %v3988_v18  ;;  %4680 = vmatpush.msra.mxu1 %v3812_v27  ;;  %v11734_v18 = vld [vmem:[#allocation113_spill] sm:$0xff]  ;;  %v10120_v49 = vpop.f32.mrf.mxu2  ;;  %v3808_v36 = vmax.f32 %v2571_v35, 0.0  ;;  %v2559_v35 = vadd.f32 %v9610_v24, %v9764_v50 }
 0x592   :  { %v3093_v26 = vadd.f32 %v9610_v24, %v11734_v18  ;;  %v2607_v18 = vadd.f32 %v9610_v24, %v2606_v59  ;;  %v10160_v59 = vld [vmem:[%s11407_s2] ss:$0 sm:$0xff] }
 0x593   :  { %4934 = vmatpush.msrb.mxu3 %v3987_v61  ;;  %4681 = vmatpush.msra.mxu1 %v3811_v8  ;;  %v11735_v61 = vld [vmem:[#allocation110_spill] sm:$0xff]  ;;  %v10126_v54 = vpop.f32.mrf.mxu3  ;;  %v3807_v8 = vmax.f32 %v2568_v9, 0.0  ;;  %v2604_v50 = vadd.f32 %v10160_v59, %v10092_v13  ;;  %v2556_v13 = vadd.f32 %v10160_v59, %v9745_v20  ;;  %v11741_v20 = vld [vmem:[#allocation55_spill] sm:$0xff]  ;;  %v3249_v4 = vadd.f32 %v10160_v59, %v9814_v34 }
 0x594   :  { %v3090_v56 = vadd.f32 %v9610_v24, %v11735_v61  ;;  %v3982_v27 = vmax.f32 %v3093_v26, 0.0 }
 0x595   :  { %4935 = vmatpush.msrb.mxu3 %v3986_v62  ;;  %4682 = vmatpush.msra.mxu1 %v3810_v5  ;;  %v11736_v62 = vld [vmem:[#allocation104_spill] sm:$0xff]  ;;  %v10152_v5 = vadd.s32 1152, %v9098_v12 }
 0x596   :  { %v3084_v7 = vadd.f32 %v9610_v24, %v11736_v62  ;;  %v3981_v57 = vmax.f32 %v3090_v56, 0.0  ;;  %v3806_v56 = vmax.f32 %v2565_v58, 0.0  ;;  %v3805_v62 = vmax.f32 %v2562_v25, 0.0 }
 0x597   :  { %4936 = vmatpush.msrb.mxu3 %v3985_v47  ;;  %4683 = vmatpush.msra.mxu1 %v3809_v63  ;;  %v3804_v58 = vmax.f32 %v2559_v35, 0.0  ;;  %vm4218_vm12 = vcmp.ge.s32.totalorder %v10152_v5, %v9093_v17  ;;  %vm4284_vm14 = vcmp.lt.s32.totalorder %v10152_v5, %v9101_v33  ;;  %v3264_v25 = vadd.f32 %v10160_v59, %v9928_v6 }
 0x598   :  { %v2609_v47 = vpop.f32.mrf.mxu0  ;;  %v3979_v48 = vmax.f32 %v3084_v7, 0.0  ;;  %v3270_v7 = vadd.f32 %v10160_v59, %v9979_v40  ;;  %vm10215_vm3 = vmand %vm4218_vm12, %vm4284_vm14  ;;  %vm4250_vm6 = vcmp.ge.s32.totalorder %v10152_v5, %v9449_v21  ;;  %vm4316_vm7 = vcmp.lt.s32.totalorder %v10152_v5, %v9455_v51 }
 0x599   :  { %4937 = vmatpush.msrb.mxu3 %v3984_v23  ;;  %v2610_v26 = vadd.f32 %v9610_v24, %v2609_v47  ;;  %4684 = vmatpush.msra.mxu1 %v3808_v36  ;;  %v2793_v23 = vadd.f32 %v9610_v24, %v11738_v11  ;;  %v10155_v61 = vpop.f32.mrf.mxu2  ;;  %v3980_v24 = vmax.f32 %v3087_v1, 0.0  ;;  %v3267_v36 = vadd.f32 %v10160_v59, %v9958_v19  ;;  %v11742_v1 = vld [vmem:[#allocation100_spill] sm:$0xff]  ;;  %v11744_v11 = vld [vmem:[#allocation97_spill] sm:$0xff]  ;;  %vm4380_vm9 = vmand %vm4250_vm6, %vm4316_vm7 }
 0x59a   :  { %v2745_v19 = vadd.f32 %v10160_v59, %v11741_v20  ;;  %v3819_v47 = vmax.f32 %v2604_v50, 0.0  ;;  %v2787_v35 = vadd.f32 %v10160_v59, %v11744_v11 }
 0x59b   :  { %4938 = vmatpush.msrb.mxu3 %v3983_v38  ;;  %v3273_v38 = vadd.f32 %v10160_v59, %v10001_v45  ;;  %v3821_v9 = vmax.f32 %v2610_v26, 0.0  ;;  %4685 = vmatpush.msra.mxu1 %v3807_v8  ;;  %v10170_v63 = vpop.f32.mrf.mxu3  ;;  %v3820_v45 = vmax.f32 %v2607_v18, 0.0  ;;  %v4041_v8 = vmax.f32 %v3270_v7, 0.0  ;;  %v11743_v18 = vld [vmem:[#allocation52_spill] sm:$0xff]  ;;  %v11748_v7 = vld [vmem:[#allocation94_spill] sm:$0xff] }
 0x59c   :  { %v2742_v26 = vadd.f32 %v10160_v59, %v11743_v18 }
 0x59d   :  { %4939 = vmatpush.msrb.mxu3 %v3982_v27  ;;  %4686 = vmatpush.msra.mxu1 %v3806_v56  ;;  %v10175_v27 = vadd.s32 2560, %v9098_v12  ;;  %v4042_v16 = vmax.f32 %v3273_v38, 0.0  ;;  %v3882_v56 = vmax.f32 %v2793_v23, 0.0  ;;  %v3803_v38 = vmax.f32 %v2556_v13, 0.0 }
 0x59e   :  { %4710 = vmatpush.msra.mxu2 %v3821_v9  ;;  %v3261_v9 = vadd.f32 %v10160_v59, %v9903_v43  ;;  %v4040_v23 = vmax.f32 %v3267_v36, 0.0  ;;  %v3258_v43 = vadd.f32 %v10160_v59, %v9873_v30  ;;  %v4039_v36 = vmax.f32 %v3264_v25, 0.0  ;;  %v11751_v25 = vld [vmem:[#allocation43_spill] sm:$0xff] }
 0x59f   :  { %4940 = vmatpush.msrb.mxu3 %v3981_v57  ;;  %4687 = vmatpush.msra.mxu1 %v3805_v62  ;;  %vm4229_vm15 = vcmp.ge.s32.totalorder %v10175_v27, %v9093_v17  ;;  %vm4295_vm0 = vcmp.lt.s32.totalorder %v10175_v27, %v9101_v33  ;;  %v2790_v57 = vadd.f32 %v10160_v59, %v11742_v1  ;;  %v3866_v62 = vmax.f32 %v2745_v19, 0.0  ;;  %v11750_v19 = vld [vmem:[#allocation91_spill] sm:$0xff] }
 0x5a0   :  { %4711 = vmatpush.msra.mxu2 %v3820_v45  ;;  %vm4359_vm2 = vmand %vm4229_vm15, %vm4295_vm0  ;;  %v2784_v45 = vadd.f32 %v10160_v59, %v11748_v7  ;;  %v3865_v20 = vmax.f32 %v2742_v26, 0.0  ;;  %v2781_v1 = vadd.f32 %v10160_v59, %v11750_v19  ;;  %v3880_v30 = vmax.f32 %v2787_v35, 0.0  ;;  %v11752_v26 = vld [vmem:[#allocation88_spill] sm:$0xff]  ;;  %v11755_v7 = vld [vmem:[#allocation37_spill] sm:$0xff] }
 0x5a1   :  { %4941 = vmatpush.msrb.mxu3 %v3980_v24  ;;  %4688 = vmatpush.msra.mxu1 %v3804_v58  ;;  %v11747_v24 = vld [vmem:[#allocation49_spill] sm:$0xff]  ;;  %v3881_v13 = vmax.f32 %v2790_v57, 0.0  ;;  %v3255_v57 = vadd.f32 %v10160_v59, %v9849_v53  ;;  %v2778_v11 = vadd.f32 %v10160_v59, %v11752_v26  ;;  %v3252_v53 = vadd.f32 %v10160_v59, %v9833_v0 }
 0x5a2   :  { %4712 = vmatpush.msra.mxu2 %v3819_v47  ;;  %v2739_v50 = vadd.f32 %v10160_v59, %v11747_v24  ;;  %v4038_v47 = vmax.f32 %v3261_v9, 0.0  ;;  %v3879_v35 = vmax.f32 %v2784_v45, 0.0  ;;  %v2727_v45 = vadd.f32 %v10160_v59, %v11755_v7  ;;  %v11763_v7 = vld [vmem:[#allocation239_spill] sm:$0xff] }
 0x5a3   :  { %4942 = vmatpush.msrb.mxu3 %v3979_v48  ;;  %v10220_v48 = vpop.f32.mrf.mxu2  ;;  %6389 = vmatmul.msk.f32.vlgmr.msra.gmra.mxu2 %vm10189_vm13, %v11656_v2  ;;  %v10231_v58 = vpop.f32.mrf.mxu3  ;;  %v4035_v34 = vmax.f32 %v3252_v53, 0.0  ;;  %vm4261_vm6 = vcmp.ge.s32.totalorder %v10175_v27, %v9449_v21  ;;  %vm4327_vm7 = vcmp.lt.s32.totalorder %v10175_v27, %v9455_v51  ;;  %v10513_v27 = vadd.s32 2944, %v9098_v12 }
 0x5a4   :  { %6409 = vmatmul.msk.f32.vlgmr.msrb.gmra.mxu3 %vm4359_vm2, %v11656_v2  ;;  %4766 = vmatpush.msrb.mxu2 %v3882_v56  ;;  %v3864_v18 = vmax.f32 %v2739_v50, 0.0  ;;  %v4037_v56 = vmax.f32 %v3258_v43, 0.0  ;;  %v3878_v50 = vmax.f32 %v2781_v1, 0.0  ;;  %v11756_v43 = vld [vmem:[#allocation82_spill] sm:$0xff]  ;;  %v3860_v26 = vmax.f32 %v2727_v45, 0.0 }
 0x5a5   :  { %4996 = vmatpush.msra.mxu3 %v4042_v16  ;;  %4689 = vmatpush.msra.mxu1 %v3803_v38  ;;  %v11749_v16 = vld [vmem:[#allocation46_spill] sm:$0xff]  ;;  %v11753_v38 = vld [vmem:[#allocation40_spill] sm:$0xff]  ;;  %v3237_v45 = vadd.f32 %v10160_v59, %v11763_v7 }
 0x5a6   :  { %6387 = vmatmul.msk.f32.vlgmr.msra.gmra.mxu1 %vm10215_vm3, %v11656_v2  ;;  %v2736_v40 = vadd.f32 %v10160_v59, %v11749_v16  ;;  %4767 = vmatpush.msrb.mxu2 %v3881_v13  ;;  %v2730_v6 = vadd.f32 %v10160_v59, %v11753_v38  ;;  %v3877_v16 = vmax.f32 %v2778_v11, 0.0  ;;  %v11760_v11 = vld [vmem:[#allocation76_spill] sm:$0xff]  ;;  %v3240_v38 = vadd.f32 %v10160_v59, %v9751_v46 }
 0x5a7   :  { %4997 = vmatpush.msra.mxu3 %v4041_v8  ;;  %4743 = vmatpush.msrb.mxu1 %v3866_v62  ;;  %v2733_v8 = vadd.f32 %v10160_v59, %v11751_v25  ;;  %v4036_v62 = vmax.f32 %v3255_v57, 0.0  ;;  %v3243_v25 = vadd.f32 %v10160_v59, %v9771_v44  ;;  %v11761_v44 = vld [vmem:[#allocation28_spill] sm:$0xff] }
 0x5a8   :  { %4768 = vmatpush.msrb.mxu2 %v3880_v30  ;;  %v3863_v9 = vmax.f32 %v2736_v40, 0.0  ;;  %v3246_v40 = vadd.f32 %v10160_v59, %v9791_v55  ;;  %v3861_v1 = vmax.f32 %v2730_v6, 0.0  ;;  %v11758_v30 = vld [vmem:[#allocation79_spill] sm:$0xff] }
 0x5a9   :  { %4998 = vmatpush.msra.mxu3 %v4040_v23  ;;  %4744 = vmatpush.msrb.mxu1 %v3865_v20  ;;  %v11754_v23 = vld [vmem:[#allocation85_spill] sm:$0xff]  ;;  %v3862_v13 = vmax.f32 %v2733_v8, 0.0  ;;  %v11757_v20 = vld [vmem:[#allocation34_spill] sm:$0xff]  ;;  %v2769_v57 = vadd.f32 %v10160_v59, %v11758_v30  ;;  %v4034_v8 = vmax.f32 %v3249_v4, 0.0  ;;  %v11759_v55 = vld [vmem:[#allocation31_spill] sm:$0xff] }
 0x5aa   :  { %v2775_v24 = vadd.f32 %v10160_v59, %v11754_v23  ;;  %4769 = vmatpush.msrb.mxu2 %v3879_v35  ;;  %v2724_v19 = vadd.f32 %v10160_v59, %v11757_v20  ;;  %v2766_v35 = vadd.f32 %v10160_v59, %v11760_v11  ;;  %v4033_v6 = vmax.f32 %v3246_v40, 0.0  ;;  %v11767_v30 = vld [vmem:[#allocation236_spill] sm:$0xff] }
 0x5ab   :  { %4999 = vmatpush.msra.mxu3 %v4039_v36  ;;  %4745 = vmatpush.msrb.mxu1 %v3864_v18  ;;  %v10274_v0 = vpop.f32.mrf.mxu2  ;;  %v2772_v36 = vadd.f32 %v10160_v59, %v11756_v43  ;;  %v10283_v5 = vpop.f32.mrf.mxu3  ;;  %v2721_v18 = vadd.f32 %v10160_v59, %v11759_v55  ;;  %v3874_v4 = vmax.f32 %v2769_v57, 0.0  ;;  %v11764_v43 = vld [vmem:[#allocation25_spill] sm:$0xff]  ;;  %v3234_v57 = vadd.f32 %v10160_v59, %v11767_v30 }
 0x5ac   :  { %6390 = vmatmul.msk.f32.gmra.mxu2 %vm4381_vm8, %v11656_v2  ;;  %v3859_v23 = vmax.f32 %v2724_v19, 0.0  ;;  %v2715_v46 = vadd.f32 %v10160_v59, %v11764_v43  ;;  %v11766_v19 = vld [vmem:[#allocation13_spill] sm:$0xff]  ;;  %v11774_v43 = vld [vmem:[#allocation230_spill] sm:$0xff]  ;;  %vm10502_vm8 = vmand %vm4261_vm6, %vm4327_vm7 }
 0x5ad   :  { %5000 = vmatpush.msra.mxu3 %v4038_v47  ;;  %4746 = vmatpush.msrb.mxu1 %v3863_v9  ;;  %v3876_v47 = vmax.f32 %v2775_v24, 0.0  ;;  %v3875_v53 = vmax.f32 %v2772_v36, 0.0  ;;  %v2718_v9 = vadd.f32 %v10160_v59, %v11761_v44  ;;  %v11762_v24 = vld [vmem:[#allocation73_spill] sm:$0xff]  ;;  %v3858_v36 = vmax.f32 %v2721_v18, 0.0  ;;  %v11769_v18 = vld [vmem:[#allocation67_spill] sm:$0xff] }
 0x5ae   :  { %4770 = vmatpush.msrb.mxu2 %v3878_v50  ;;  %6388 = vmatmul.msk.f32.gmra.mxu1 %vm4380_vm9, %v11656_v2  ;;  %v2763_v50 = vadd.f32 %v10160_v59, %v11762_v24  ;;  %vm4232_vm9 = vcmp.ge.s32.totalorder %v10513_v27, %v9093_v17 }
 0x5af   :  { %5001 = vmatpush.msra.mxu3 %v4037_v56  ;;  %4747 = vmatpush.msrb.mxu1 %v3862_v13  ;;  %v10298_v56 = vpop.f32.mrf.mxu1  ;;  %v4032_v13 = vmax.f32 %v3243_v25, 0.0  ;;  %v11768_v25 = vld [vmem:[#allocation22_spill] sm:$0xff]  ;;  %v3857_v55 = vmax.f32 %v2718_v9, 0.0  ;;  %v11773_v9 = vld [vmem:[#allocation64_spill] sm:$0xff] }
 0x5b0   :  { %4771 = vmatpush.msrb.mxu2 %v3877_v16  ;;  %v11765_v16 = vld [vmem:[#allocation70_spill] sm:$0xff]  ;;  %v3872_v11 = vmax.f32 %v2763_v50, 0.0  ;;  %v2754_v7 = vadd.f32 %v10160_v59, %v11773_v9  ;;  %6410 = vmatmul.msk.f32.gmra.mxu3 %vm10502_vm8, %v11656_v2 }
 0x5b1   :  { %5002 = vmatpush.msra.mxu3 %v4036_v62  ;;  %4748 = vmatpush.msrb.mxu1 %v3861_v1  ;;  %v2760_v40 = vadd.f32 %v10160_v59, %v11765_v16  ;;  %v10316_v1 = vadd.f32 %v10160_v59, %v11766_v19  ;;  %v4029_v16 = vmax.f32 %v3234_v57, 0.0  ;;  %v11775_v19 = vld [vmem:[#allocation16_spill] sm:$0xff] }
 0x5b2   :  { %4772 = vmatpush.msrb.mxu2 %v3876_v47  ;;  %v4031_v47 = vmax.f32 %v3240_v38, 0.0  ;;  %v11772_v38 = vld [vmem:[#allocation11_spill] sm:$0xff] }
 0x5b3   :  { %5003 = vmatpush.msra.mxu3 %v4035_v34  ;;  %4749 = vmatpush.msrb.mxu1 %v3860_v26  ;;  %v4507_v62 = vpop.f32.mrf.mxu2  ;;  %v3873_v34 = vmax.f32 %v2766_v35, 0.0  ;;  %v10312_v20 = vpop.f32.mrf.mxu3  ;;  %v2757_v26 = vadd.f32 %v10160_v59, %v11769_v18  ;;  %v11770_v35 = vld [vmem:[#allocation19_spill] sm:$0xff]  ;;  %v10330_v24 = vadd.f32 %v10160_v59, %v11772_v38  ;;  %v3852_v50 = vmax.f32 %v10316_v1, 0.0 }
 0x5b4   :  { %4773 = vmatpush.msrb.mxu2 %v3875_v53  ;;  %v2709_v53 = vadd.f32 %v10160_v59, %v11770_v35 }
 0x5b5   :  { %5004 = vmatpush.msra.mxu3 %v4034_v8  ;;  %4750 = vmatpush.msrb.mxu1 %v3859_v23  ;;  %v2712_v8 = vadd.f32 %v10160_v59, %v11768_v25  ;;  %v4030_v23 = vmax.f32 %v3237_v45, 0.0  ;;  %v10338_v45 = vadd.s32 1664, %v9098_v12  ;;  %v3870_v25 = vmax.f32 %v2757_v26, 0.0 }
 0x5b6   :  { %4774 = vmatpush.msrb.mxu2 %v3874_v4  ;;  %v3856_v4 = vmax.f32 %v2715_v46, 0.0  ;;  %v2706_v46 = vadd.f32 %v10160_v59, %v11775_v19  ;;  %v3854_v1 = vmax.f32 %v2709_v53, 0.0  ;;  %v4508_v26 = vadd.f32 %v4507_v62, %v10298_v56  ;;  %v11780_v62 = vld [vmem:[#allocation123_spill] sm:$0xff]  ;;  %v11781_v19 = vld [vmem:[#allocation196_spill] sm:$0xff] }
 0x5b7   :  { %5005 = vmatpush.msra.mxu3 %v4033_v6  ;;  %4751 = vmatpush.msrb.mxu1 %v3858_v36  ;;  %v11771_v6 = vld [vmem:[#allocation232_spill] sm:$0xff]  ;;  %v3228_v36 = vadd.f32 %v10160_v59, %v11774_v43  ;;  %v3855_v30 = vmax.f32 %v2712_v8, 0.0  ;;  %v3869_v8 = vmax.f32 %v2754_v7, 0.0  ;;  %vm4222_vm10 = vcmp.ge.s32.totalorder %v10338_v45, %v9093_v17 }
 0x5b8   :  { %4775 = vmatpush.msrb.mxu2 %v3873_v34  ;;  %v3231_v44 = vadd.f32 %v10160_v59, %v11771_v6  ;;  %v4487_v34 = vpop.f32.mrf.mxu1  ;;  %v11778_v6 = vld [vmem:[#allocation58_spill] sm:$0xff]  ;;  %vm4288_vm1 = vcmp.lt.s32.totalorder %v10338_v45, %v9101_v33  ;;  %v2937_v7 = vadd.f32 %v10160_v59, %v9782_v41  ;;  %v2934_v41 = vadd.f32 %v10160_v59, %v9760_v10 }
 0x5b9   :  { %5006 = vmatpush.msra.mxu3 %v4032_v13  ;;  %v3871_v13 = vmax.f32 %v2760_v40, 0.0  ;;  %4752 = vmatpush.msrb.mxu1 %v3857_v55  ;;  %v11777_v55 = vld [vmem:[#allocation129_spill] sm:$0xff]  ;;  %v4027_v9 = vmax.f32 %v3228_v36, 0.0  ;;  %v3411_v36 = vadd.f32 %v10160_v59, %v11780_v62  ;;  %vm10378_vm13 = vmand %vm4222_vm10, %vm4288_vm1  ;;  %v3851_v10 = vmax.f32 %v10330_v24, 0.0  ;;  %v11788_v24 = vld [vmem:[#allocation114_spill] sm:$0xff] }
 0x5ba   :  { %4776 = vmatpush.msrb.mxu2 %v3872_v11  ;;  %v3417_v18 = vadd.f32 %v10160_v59, %v11777_v55  ;;  %v4028_v57 = vmax.f32 %v3231_v44, 0.0  ;;  %v10347_v11 = vadd.s32 1536, %v9098_v12  ;;  %v11785_v55 = vld [vmem:[#allocation193_spill] sm:$0xff]  ;;  %vm4254_vm15 = vcmp.ge.s32.totalorder %v10338_v45, %v9449_v21 }
 0x5bb   :  { %5007 = vmatpush.msra.mxu3 %v4031_v47  ;;  %v11776_v47 = vld [vmem:[#allocation61_spill] sm:$0xff]  ;;  %4753 = vmatpush.msrb.mxu1 %v3856_v4  ;;  %v4510_v35 = vpop.f32.mrf.mxu2  ;;  %v11779_v4 = vld [vmem:[#allocation126_spill] sm:$0xff]  ;;  %v4533_v44 = vpop.f32.mrf.mxu3  ;;  %vm4320_vm0 = vcmp.lt.s32.totalorder %v10338_v45, %v9455_v51  ;;  %vm4298_vm10 = vcmp.lt.s32.totalorder %v10513_v27, %v9101_v33 }
 0x5bc   :  { %v2751_v40 = vadd.f32 %v10160_v59, %v11776_v47  ;;  %4777 = vmatpush.msrb.mxu2 %v3871_v13  ;;  %v4511_v38 = vadd.f32 %v4510_v35, %v4487_v34  ;;  %v3414_v53 = vadd.f32 %v10160_v59, %v11779_v4  ;;  %v3853_v13 = vmax.f32 %v2706_v46, 0.0  ;;  %vm4384_vm4 = vmand %vm4254_vm15, %vm4320_vm0  ;;  %v11796_v45 = vld [vmem:[#allocation105_spill] sm:$0xff] }
 0x5bd   :  { %5008 = vmatpush.msra.mxu3 %v4030_v23  ;;  %v2748_v23 = vadd.f32 %v10160_v59, %v11778_v6  ;;  %4754 = vmatpush.msrb.mxu1 %v3855_v30  ;;  %vm4221_vm11 = vcmp.ge.s32.totalorder %v10347_v11, %v9093_v17  ;;  %vm4287_vm12 = vcmp.lt.s32.totalorder %v10347_v11, %v9101_v33  ;;  %v3930_v35 = vmax.f32 %v2937_v7, 0.0  ;;  %v11793_v30 = vld [vmem:[#allocation184_spill] sm:$0xff] }
 0x5be   :  { %4778 = vmatpush.msrb.mxu2 %v3870_v25  ;;  %v3868_v43 = vmax.f32 %v2751_v40, 0.0  ;;  %v10360_v56 = vadd.f32 %v4533_v44, %v4511_v38  ;;  %v2889_v46 = vadd.f32 %v10160_v59, %v11781_v19  ;;  %v4531_v47 = vadd.f32 %v10312_v20, %v4508_v26  ;;  %v11784_v40 = vld [vmem:[#allocation120_spill] sm:$0xff]  ;;  %vm10396_vm14 = vmand %vm4221_vm11, %vm4287_vm12  ;;  %v11790_v26 = vld [vmem:[#allocation190_spill] sm:$0xff] }
 0x5bf   :  { %5009 = vmatpush.msra.mxu3 %v4029_v16  ;;  %4755 = vmatpush.msrb.mxu1 %v3854_v1  ;;  %v4090_v16 = vmax.f32 %v3417_v18, 0.0  ;;  %v3867_v34 = vmax.f32 %v2748_v23, 0.0  ;;  %v3408_v25 = vadd.f32 %v10160_v59, %v11784_v40  ;;  %v4089_v1 = vmax.f32 %v3414_v53, 0.0  ;;  %v11789_v23 = vld [vmem:[#allocation117_spill] sm:$0xff]  ;;  %v11792_v19 = vld [vmem:[#allocation111_spill] sm:$0xff]  ;;  %vm4362_vm12 = vmand %vm4232_vm9, %vm4298_vm10 }
 0x5c0   :  { %4779 = vmatpush.msrb.mxu2 %v3869_v8  ;;  %v2886_v18 = vadd.f32 %v10160_v59, %v11785_v55  ;;  %v3402_v6 = vadd.f32 %v10160_v59, %v11788_v24  ;;  %v3405_v8 = vadd.f32 %v10160_v59, %v11789_v23  ;;  %v4553_v38 = vpop.f32.mrf.mxu1  ;;  %v3914_v4 = vmax.f32 %v2889_v46, 0.0 }
 0x5c1   :  { %5010 = vmatpush.msra.mxu3 %v4028_v57  ;;  %4756 = vmatpush.msrb.mxu1 %v3853_v13  ;;  %v2931_v57 = vadd.f32 %v10160_v59, %v9738_v39  ;;  %v4088_v39 = vmax.f32 %v3411_v36, 0.0  ;;  %v2928_v53 = vadd.f32 %v10160_v59, %v9720_v32  ;;  %v4554_v44 = vadd.f32 %v4553_v38, %v4531_v47 }
 0x5c2   :  { %4780 = vmatpush.msrb.mxu2 %v3868_v43  ;;  %v4087_v13 = vmax.f32 %v3408_v25, 0.0  ;;  %v11791_v43 = vld [vmem:[#allocation187_spill] sm:$0xff]  ;;  %v3913_v62 = vmax.f32 %v2886_v18, 0.0  ;;  %v2925_v36 = vadd.f32 %v10160_v59, %v9711_v60  ;;  %v3399_v46 = vadd.f32 %v10160_v59, %v11792_v19 }
 0x5c3   :  { %5011 = vmatpush.msra.mxu3 %v4027_v9  ;;  %4757 = vmatpush.msrb.mxu1 %v3852_v50  ;;  %v2883_v50 = vadd.f32 %v10160_v59, %v11790_v26  ;;  %v3929_v9 = vmax.f32 %v2934_v41, 0.0  ;;  %v2880_v7 = vadd.f32 %v10160_v59, %v11791_v43  ;;  %v4576_v32 = vpop.f32.mrf.mxu2  ;;  %v4086_v41 = vmax.f32 %v3405_v8, 0.0 }
 0x5c4   :  { %4781 = vmatpush.msrb.mxu2 %v3867_v34  ;;  %v4577_v34 = vadd.f32 %v4576_v32, %v4554_v44  ;;  %vm4253_vm2 = vcmp.ge.s32.totalorder %v10347_v11, %v9449_v21  ;;  %vm4319_vm3 = vcmp.lt.s32.totalorder %v10347_v11, %v9455_v51  ;;  %v2877_v47 = vadd.f32 %v10160_v59, %v11793_v30  ;;  %v11798_v11 = vld [vmem:[#allocation102_spill] sm:$0xff]  ;;  %v11802_v30 = vld [vmem:[#allocation253_spill] sm:$0xff] }
 0x5c5   :  { %5065 = vmatpush.msrb.mxu3 %v4090_v16  ;;  %6395 = vmatmul.msk.f32.vlgmr.msrb.gmra.mxu2 %vm10378_vm13, %v11656_v2  ;;  %v3928_v16 = vmax.f32 %v2931_v57, 0.0  ;;  %v3912_v40 = vmax.f32 %v2883_v50, 0.0  ;;  %v2922_v60 = vadd.f32 %v10160_v59, %v9704_v52  ;;  %v3927_v25 = vmax.f32 %v2928_v53, 0.0  ;;  %vm4383_vm5 = vmand %vm4253_vm2, %vm4319_vm3 }
 0x5c6   :  { %4835 = vmatpush.msra.mxu2 %v3930_v35  ;;  %4758 = vmatpush.msrb.mxu1 %v3851_v10  ;;  %v11794_v10 = vld [vmem:[#allocation108_spill] sm:$0xff]  ;;  %v4085_v18 = vmax.f32 %v3402_v6, 0.0  ;;  %v11795_v35 = vld [vmem:[#allocation181_spill] sm:$0xff]  ;;  %v3911_v20 = vmax.f32 %v2880_v7, 0.0  ;;  %v2919_v24 = vadd.f32 %v10160_v59, %v9690_v15  ;;  %v3926_v23 = vmax.f32 %v2925_v36, 0.0  ;;  %v11800_v36 = vld [vmem:[#allocation99_spill] sm:$0xff] }
 0x5c7   :  { %5066 = vmatpush.msrb.mxu3 %v4089_v1  ;;  %6393 = vmatmul.msk.f32.vlgmr.msrb.gmra.mxu1 %vm10396_vm14, %v11656_v2  ;;  %v4599_v1 = vpop.f32.mrf.mxu3  ;;  %v3396_v55 = vadd.f32 %v10160_v59, %v11794_v10  ;;  %v2874_v52 = vadd.f32 %v10160_v59, %v11795_v35  ;;  %v3393_v6 = vadd.f32 %v10160_v59, %v11796_v45  ;;  %v4084_v8 = vmax.f32 %v3399_v46, 0.0  ;;  %v11801_v46 = vld [vmem:[#allocation172_spill] sm:$0xff]  ;;  %v11806_v45 = vld [vmem:[#allocation166_spill] sm:$0xff] }
 0x5c8   :  { %4812 = vmatpush.msra.mxu1 %v3914_v4  ;;  %4836 = vmatpush.msra.mxu2 %v3929_v9  ;;  %v10440_v57 = vadd.f32 %v4599_v1, %v4577_v34  ;;  %v3910_v26 = vmax.f32 %v2877_v47, 0.0  ;;  %v2916_v50 = vadd.f32 %v10160_v59, %v9678_v42  ;;  %v3925_v38 = vmax.f32 %v2922_v60, 0.0  ;;  %v4556_v4 = vpop.f32.mrf.mxu1  ;;  %v11803_v60 = vld [vmem:[#allocation96_spill] sm:$0xff] }
 0x5c9   :  { %5067 = vmatpush.msrb.mxu3 %v4088_v39  ;;  %v11797_v39 = vld [vmem:[#allocation178_spill] sm:$0xff]  ;;  %v3390_v53 = vadd.f32 %v10160_v59, %v11798_v11  ;;  %v4083_v9 = vmax.f32 %v3396_v55, 0.0  ;;  %v4557_v44 = vadd.f32 %v4556_v4, %v10360_v56  ;;  %v3909_v7 = vmax.f32 %v2874_v52, 0.0  ;;  %v11804_v55 = vld [vmem:[#allocation169_spill] sm:$0xff]  ;;  %v11805_v52 = vld [vmem:[#allocation251_spill] sm:$0xff] }
 0x5ca   :  { %4813 = vmatpush.msra.mxu1 %v3913_v62  ;;  %4837 = vmatpush.msra.mxu2 %v3928_v16  ;;  %v2871_v15 = vadd.f32 %v10160_v59, %v11797_v39  ;;  %v2913_v42 = vadd.f32 %v10160_v59, %v9664_v3  ;;  %v3924_v32 = vmax.f32 %v2919_v24, 0.0  ;;  %v3387_v16 = vadd.f32 %v10160_v59, %v11800_v36  ;;  %v11807_v39 = vld [vmem:[#allocation249_spill] sm:$0xff] }
 0x5cb   :  { %5068 = vmatpush.msrb.mxu3 %v4087_v13  ;;  %v11799_v13 = vld [vmem:[#allocation175_spill] sm:$0xff]  ;;  %v4579_v62 = vpop.f32.mrf.mxu2  ;;  %v4082_v34 = vmax.f32 %v3393_v6, 0.0  ;;  %v2865_v56 = vadd.f32 %v10160_v59, %v11801_v46  ;;  %v2910_v47 = vadd.f32 %v10160_v59, %v11802_v30  ;;  %v4081_v1 = vmax.f32 %v3390_v53, 0.0 }
 0x5cc   :  { %4814 = vmatpush.msra.mxu1 %v3912_v40  ;;  %4838 = vmatpush.msra.mxu2 %v3927_v25  ;;  %v2868_v43 = vadd.f32 %v10160_v59, %v11799_v13  ;;  %v4580_v19 = vadd.f32 %v4579_v62, %v4557_v44  ;;  %v3923_v40 = vmax.f32 %v2916_v50, 0.0  ;;  %v3384_v25 = vadd.f32 %v10160_v59, %v11803_v60  ;;  %v11813_v62 = vld [vmem:[#allocation90_spill] sm:$0xff] }
 0x5cd   :  { %5069 = vmatpush.msrb.mxu3 %v4086_v41  ;;  %6396 = vmatmul.msk.f32.gmra.mxu2 %vm4384_vm4, %v11656_v2  ;;  %v3908_v41 = vmax.f32 %v2871_v15, 0.0  ;;  %v3922_v24 = vmax.f32 %v2913_v42, 0.0  ;;  %v2859_v6 = vadd.f32 %v10160_v59, %v11806_v45  ;;  %v2904_v15 = vadd.f32 %v10160_v59, %v11807_v39 }
 0x5ce   :  { %4815 = vmatpush.msra.mxu1 %v3911_v20  ;;  %4839 = vmatpush.msra.mxu2 %v3926_v23  ;;  %v3907_v35 = vmax.f32 %v2868_v43, 0.0  ;;  %v2907_v20 = vadd.f32 %v10160_v59, %v11805_v52  ;;  %v4080_v23 = vmax.f32 %v3387_v16, 0.0  ;;  %v4079_v11 = vmax.f32 %v3384_v25, 0.0  ;;  %v11810_v43 = vld [vmem:[#allocation247_spill] sm:$0xff]  ;;  %v11814_v16 = vld [vmem:[#allocation160_spill] sm:$0xff]  ;;  %v11817_v25 = vld [vmem:[#allocation157_spill] sm:$0xff] }
 0x5cf   :  { %5070 = vmatpush.msrb.mxu3 %v4085_v18  ;;  %6394 = vmatmul.msk.f32.gmra.mxu1 %vm4383_vm5, %v11656_v2  ;;  %v4602_v3 = vpop.f32.mrf.mxu3  ;;  %v2862_v18 = vadd.f32 %v10160_v59, %v11804_v55  ;;  %v3378_v36 = vadd.f32 %v10160_v59, %v11813_v62  ;;  %v3904_v46 = vmax.f32 %v2859_v6, 0.0  ;;  %v3919_v30 = vmax.f32 %v2904_v15, 0.0  ;;  %v11825_v62 = vld [vmem:[#allocation242_spill] sm:$0xff] }
 0x5d0   :  { %4816 = vmatpush.msra.mxu1 %v3910_v26  ;;  %4840 = vmatpush.msra.mxu2 %v3925_v38  ;;  %v10475_v10 = vadd.f32 %v4602_v3, %v4580_v19  ;;  %v3921_v26 = vmax.f32 %v2910_v47, 0.0  ;;  %v4622_v50 = vpop.f32.mrf.mxu1  ;;  %v11808_v38 = vld [vmem:[#allocation93_spill] sm:$0xff]  ;;  %v3920_v42 = vmax.f32 %v2907_v20, 0.0 }
 0x5d1   :  { %5071 = vmatpush.msrb.mxu3 %v4084_v8  ;;  %v3906_v8 = vmax.f32 %v2865_v56, 0.0  ;;  %v3381_v4 = vadd.f32 %v10160_v59, %v11808_v38  ;;  %v4623_v53 = vadd.f32 %v4622_v50, %v10440_v57  ;;  %v3905_v13 = vmax.f32 %v2862_v18, 0.0  ;;  %v11815_v56 = vld [vmem:[#allocation245_spill] sm:$0xff] }
 0x5d2   :  { %4817 = vmatpush.msra.mxu1 %v3909_v7  ;;  %4841 = vmatpush.msra.mxu2 %v3924_v32  ;;  %v2901_v7 = vadd.f32 %v10160_v59, %v11810_v43  ;;  %v4077_v6 = vmax.f32 %v3378_v36, 0.0  ;;  %v10538_v50 = vadd.s32 1920, %v9098_v12  ;;  %v11824_v32 = vld [vmem:[#allocation101_spill] sm:$0xff]  ;;  %v3558_v36 = vadd.f32 %v10160_v59, %v11825_v62 }
 0x5d3   :  { %5072 = vmatpush.msrb.mxu3 %v4083_v9  ;;  %v11809_v9 = vld [vmem:[#allocation163_spill] sm:$0xff]  ;;  %v4645_v57 = vpop.f32.mrf.mxu2  ;;  %v4078_v60 = vmax.f32 %v3381_v4, 0.0  ;;  %v11838_v62 = vld [vmem:[#allocation41_spill] sm:$0xff] }
 0x5d4   :  { %4818 = vmatpush.msra.mxu1 %v3908_v41  ;;  %4842 = vmatpush.msra.mxu2 %v3923_v40  ;;  %v2856_v44 = vadd.f32 %v10160_v59, %v11809_v9  ;;  %v4646_v19 = vadd.f32 %v4645_v57, %v4623_v53  ;;  %v2898_v41 = vadd.f32 %v10160_v59, %v11815_v56  ;;  %v11816_v40 = vld [vmem:[#allocation87_spill] sm:$0xff]  ;;  %v3918_v20 = vmax.f32 %v2901_v7, 0.0 }
 0x5d5   :  { %5073 = vmatpush.msrb.mxu3 %v4082_v34  ;;  %v2853_v34 = vadd.f32 %v10160_v59, %v11814_v16  ;;  %v3375_v3 = vadd.f32 %v10160_v59, %v11816_v40  ;;  %v11821_v4 = vld [vmem:[#allocation151_spill] sm:$0xff]  ;;  %v3081_v57 = vadd.f32 %v10160_v59, %v11824_v32  ;;  %vm4224_vm13 = vcmp.ge.s32.totalorder %v10538_v50, %v9093_v17  ;;  %v11828_v40 = vld [vmem:[#allocation241_spill] sm:$0xff] }
 0x5d6   :  { %4819 = vmatpush.msra.mxu1 %v3907_v35  ;;  %4843 = vmatpush.msra.mxu2 %v3922_v24  ;;  %v3903_v18 = vmax.f32 %v2856_v44, 0.0  ;;  %v11818_v35 = vld [vmem:[#allocation243_spill] sm:$0xff]  ;;  %v10527_v24 = vadd.s32 2048, %v9098_v12  ;;  %v11823_v44 = vld [vmem:[#allocation244_spill] sm:$0xff]  ;;  %vm4290_vm14 = vcmp.lt.s32.totalorder %v10538_v50, %v9101_v33  ;;  %vm4256_vm4 = vcmp.ge.s32.totalorder %v10538_v50, %v9449_v21 }
 0x5d7   :  { %5074 = vmatpush.msrb.mxu3 %v4081_v1  ;;  %v4668_v47 = vpop.f32.mrf.mxu3  ;;  %v2850_v1 = vadd.f32 %v10160_v59, %v11817_v25  ;;  %v2895_v52 = vadd.f32 %v10160_v59, %v11818_v35  ;;  %v3902_v15 = vmax.f32 %v2853_v34, 0.0  ;;  %v4076_v38 = vmax.f32 %v3375_v3, 0.0  ;;  %v11822_v53 = vld [vmem:[#allocation199_spill] sm:$0xff]  ;;  %v11826_v34 = vld [vmem:[#allocation53_spill] sm:$0xff]  ;;  %vm4354_vm0 = vmand %vm4224_vm13, %vm4290_vm14 }
 0x5d8   :  { %4820 = vmatpush.msra.mxu1 %v3906_v8  ;;  %4844 = vmatpush.msra.mxu2 %v3921_v26  ;;  %v10522_v55 = vadd.f32 %v4668_v47, %v4646_v19  ;;  %v11820_v8 = vld [vmem:[#allocation154_spill] sm:$0xff]  ;;  %v3917_v26 = vmax.f32 %v2898_v41, 0.0  ;;  %v2892_v9 = vadd.f32 %v10160_v59, %v11822_v53  ;;  %vm4225_vm1 = vcmp.ge.s32.totalorder %v10527_v24, %v9093_v17  ;;  %v11835_v53 = vld [vmem:[#allocation44_spill] sm:$0xff] }
 0x5d9   :  { %5075 = vmatpush.msrb.mxu3 %v4080_v23  ;;  %v11819_v23 = vld [vmem:[#allocation84_spill] sm:$0xff]  ;;  %v2847_v39 = vadd.f32 %v10160_v59, %v11820_v8  ;;  %v3901_v43 = vmax.f32 %v2850_v1, 0.0  ;;  %v3916_v7 = vmax.f32 %v2895_v52, 0.0  ;;  %vm4291_vm11 = vcmp.lt.s32.totalorder %v10527_v24, %v9101_v33  ;;  %v11830_v1 = vld [vmem:[#allocation95_spill] sm:$0xff] }
 0x5da   :  { %4821 = vmatpush.msra.mxu1 %v3905_v13  ;;  %4845 = vmatpush.msra.mxu2 %v3920_v42  ;;  %v3372_v45 = vadd.f32 %v10160_v59, %v11819_v23  ;;  %v3561_v13 = vadd.f32 %v10160_v59, %v11823_v44  ;;  %v3033_v19 = vadd.f32 %v10160_v59, %v11826_v34  ;;  %v3915_v41 = vmax.f32 %v2892_v9, 0.0  ;;  %vm4355_vm15 = vmand %vm4225_vm1, %vm4291_vm11  ;;  %v11839_v34 = vld [vmem:[#allocation86_spill] sm:$0xff] }
 0x5db   :  { %5076 = vmatpush.msrb.mxu3 %v4079_v11  ;;  %v2844_v11 = vadd.f32 %v10160_v59, %v11821_v4  ;;  %v3900_v16 = vmax.f32 %v2847_v39, 0.0  ;;  %v3555_v3 = vadd.f32 %v10160_v59, %v11828_v40  ;;  %v3978_v35 = vmax.f32 %v3081_v57, 0.0  ;;  %v11833_v39 = vld [vmem:[#allocation92_spill] sm:$0xff] }
 0x5dc   :  { %4822 = vmatpush.msra.mxu1 %v3904_v46  ;;  %4846 = vmatpush.msra.mxu2 %v3919_v30  ;;  %v4075_v42 = vmax.f32 %v3372_v45, 0.0  ;;  %v11827_v46 = vld [vmem:[#allocation98_spill] sm:$0xff]  ;;  %v4138_v30 = vmax.f32 %v3561_v13, 0.0  ;;  %v4137_v52 = vmax.f32 %v3558_v36, 0.0  ;;  %v11832_v45 = vld [vmem:[#allocation47_spill] sm:$0xff]  ;;  %v3962_v8 = vmax.f32 %v3033_v19, 0.0 }
 0x5dd   :  { %5077 = vmatpush.msrb.mxu3 %v4078_v60  ;;  %v3078_v56 = vadd.f32 %v10160_v59, %v11827_v46  ;;  %v3899_v47 = vmax.f32 %v2844_v11, 0.0  ;;  %v11829_v60 = vld [vmem:[#allocation50_spill] sm:$0xff]  ;;  %v4136_v11 = vmax.f32 %v3555_v3, 0.0  ;;  %vm4257_vm2 = vcmp.ge.s32.totalorder %v10527_v24, %v9449_v21  ;;  %v11836_v13 = vld [vmem:[#allocation89_spill] sm:$0xff] }
 0x5de   :  { %4823 = vmatpush.msra.mxu1 %v3903_v18  ;;  %4847 = vmatpush.msra.mxu2 %v3918_v20  ;;  %v3030_v25 = vadd.f32 %v10160_v59, %v11829_v60  ;;  %v3075_v18 = vadd.f32 %v10160_v59, %v11830_v1  ;;  %v11831_v20 = vld [vmem:[#allocation240_spill] sm:$0xff]  ;;  %vm4323_vm3 = vcmp.lt.s32.totalorder %v10527_v24, %v9455_v51  ;;  %v11842_v60 = vld [vmem:[#allocation83_spill] sm:$0xff] }
 0x5df   :  { %5078 = vmatpush.msrb.mxu3 %v4077_v6  ;;  %v3552_v23 = vadd.f32 %v10160_v59, %v11831_v20  ;;  %v3027_v6 = vadd.f32 %v10160_v59, %v11832_v45  ;;  %v3024_v9 = vadd.f32 %v10160_v59, %v11835_v53  ;;  %vm4322_vm5 = vcmp.lt.s32.totalorder %v10538_v50, %v9455_v51  ;;  %vm4387_vm6 = vmand %vm4257_vm2, %vm4323_vm3  ;;  %v11846_v45 = vld [vmem:[#allocation35_spill] sm:$0xff]  ;;  %v11849_v53 = vld [vmem:[#allocation32_spill] sm:$0xff] }
 0x5e0   :  { %4824 = vmatpush.msra.mxu1 %v3902_v15  ;;  %4848 = vmatpush.msra.mxu2 %v3917_v26  ;;  %v3072_v15 = vadd.f32 %v10160_v59, %v11833_v39  ;;  %v3977_v26 = vmax.f32 %v3078_v56, 0.0  ;;  %v3961_v44 = vmax.f32 %v3030_v25, 0.0  ;;  %v3021_v36 = vadd.f32 %v10160_v59, %v11838_v62  ;;  %v11840_v56 = vld [vmem:[#allocation234_spill] sm:$0xff]  ;;  %vm10633_vm7 = vmand %vm4256_vm4, %vm4322_vm5  ;;  %v11847_v39 = vld [vmem:[#allocation80_spill] sm:$0xff] }
 0x5e1   :  { %5079 = vmatpush.msrb.mxu3 %v4076_v38  ;;  %v11834_v38 = vld [vmem:[#allocation237_spill] sm:$0xff]  ;;  %v4135_v57 = vmax.f32 %v3552_v23, 0.0  ;;  %v3066_v19 = vadd.f32 %v10160_v59, %v11839_v34  ;;  %v3959_v3 = vmax.f32 %v3024_v9, 0.0  ;;  %v3063_v25 = vadd.f32 %v10160_v59, %v11842_v60 }
 0x5e2   :  { %4825 = vmatpush.msra.mxu1 %v3901_v43  ;;  %4849 = vmatpush.msra.mxu2 %v3916_v7  ;;  %v3549_v4 = vadd.f32 %v10160_v59, %v11834_v38  ;;  %v3069_v43 = vadd.f32 %v10160_v59, %v11836_v13  ;;  %v3976_v7 = vmax.f32 %v3075_v18, 0.0  ;;  %v3975_v46 = vmax.f32 %v3072_v15, 0.0  ;;  %v4625_v18 = vpop.f32.mrf.mxu1  ;;  %v11848_v38 = vld [vmem:[#allocation231_spill] sm:$0xff]  ;;  %v11850_v13 = vld [vmem:[#allocation77_spill] sm:$0xff] }
 0x5e3   :  { %5080 = vmatpush.msrb.mxu3 %v4075_v42  ;;  %v11837_v42 = vld [vmem:[#allocation235_spill] sm:$0xff]  ;;  %v4626_v23 = vadd.f32 %v4625_v18, %v10475_v10  ;;  %v3060_v50 = vadd.f32 %v10160_v59, %v11847_v39  ;;  %v3973_v15 = vmax.f32 %v3066_v19, 0.0  ;;  %v3012_v9 = vadd.f32 %v10160_v59, %v11849_v53  ;;  %v11862_v53 = vld [vmem:[#allocation65_spill] sm:$0xff] }
 0x5e4   :  { %6415 = vmatmul.msk.f32.vlgmr.msra.gmra.mxu3 %vm4362_vm12, %v11656_v2  ;;  %4826 = vmatpush.msra.mxu1 %v3900_v16  ;;  %v3546_v32 = vadd.f32 %v10160_v59, %v11837_v42  ;;  %v3960_v16 = vmax.f32 %v3027_v6, 0.0  ;;  %v3974_v1 = vmax.f32 %v3069_v43, 0.0  ;;  %v3015_v6 = vadd.f32 %v10160_v59, %v11846_v45  ;;  %v4671_v42 = vpop.f32.mrf.mxu3 }
 0x5e5   :  { %5134 = vmatpush.msra.mxu3 %v4138_v30  ;;  %4850 = vmatpush.msra.mxu2 %v3915_v41  ;;  %v3543_v41 = vadd.f32 %v10160_v59, %v11840_v56  ;;  %v4134_v30 = vmax.f32 %v3549_v4, 0.0  ;;  %v3537_v4 = vadd.f32 %v10160_v59, %v11848_v38  ;;  %v3057_v43 = vadd.f32 %v10160_v59, %v11850_v13  ;;  %v11863_v13 = vld [vmem:[#allocation221_spill] sm:$0xff] }
 0x5e6   :  { %6401 = vmatmul.msk.f32.vlgmr.msra.gmra.mxu2 %vm4355_vm15, %v11656_v2  ;;  %4827 = vmatpush.msra.mxu1 %v3899_v47  ;;  %v11841_v47 = vld [vmem:[#allocation38_spill] sm:$0xff]  ;;  %v4133_v20 = vmax.f32 %v3546_v32, 0.0  ;;  %v11851_v32 = vld [vmem:[#allocation229_spill] sm:$0xff]  ;;  %v3956_v19 = vmax.f32 %v3015_v6, 0.0  ;;  %vm4264_vm4 = vcmp.ge.s32.totalorder %v10513_v27, %v9449_v21  ;;  %vm4330_vm5 = vcmp.lt.s32.totalorder %v10513_v27, %v9455_v51 }
 0x5e7   :  { %4904 = vmatpush.msrb.mxu2 %v3978_v35  ;;  %5135 = vmatpush.msra.mxu3 %v4137_v52  ;;  %v3018_v40 = vadd.f32 %v10160_v59, %v11841_v47  ;;  %v11845_v35 = vld [vmem:[#allocation233_spill] sm:$0xff]  ;;  %v3970_v18 = vmax.f32 %v3057_v43, 0.0  ;;  %v3522_v43 = vadd.f32 %v10160_v59, %v11863_v13 }
 0x5e8   :  { %6399 = vmatmul.msk.f32.vlgmr.msra.gmra.mxu1 %vm4354_vm0, %v11656_v2  ;;  %v3540_v52 = vadd.f32 %v10160_v59, %v11845_v35  ;;  %v11857_v35 = vld [vmem:[#allocation225_spill] sm:$0xff] }
 0x5e9   :  { %4881 = vmatpush.msrb.mxu1 %v3962_v8  ;;  %4905 = vmatpush.msrb.mxu2 %v3977_v26  ;;  %v3958_v8 = vmax.f32 %v3021_v36, 0.0  ;;  %v4648_v26 = vpop.f32.mrf.mxu2 }
 0x5ea   :  { %5136 = vmatpush.msra.mxu3 %v4136_v11  ;;  %v4132_v11 = vmax.f32 %v3543_v41, 0.0  ;;  %v4649_v10 = vadd.f32 %v4648_v26, %v4626_v23  ;;  %v4131_v62 = vmax.f32 %v3540_v52, 0.0  ;;  %v3971_v41 = vmax.f32 %v3060_v50, 0.0  ;;  %v11858_v23 = vld [vmem:[#allocation23_spill] sm:$0xff] }
 0x5eb   :  { %4882 = vmatpush.msrb.mxu1 %v3961_v44  ;;  %4906 = vmatpush.msrb.mxu2 %v3976_v7  ;;  %v3957_v44 = vmax.f32 %v3018_v40, 0.0  ;;  %v3972_v7 = vmax.f32 %v3063_v25, 0.0  ;;  %v4130_v40 = vmax.f32 %v3537_v4, 0.0  ;;  %v3955_v25 = vmax.f32 %v3012_v9, 0.0  ;;  %v11861_v4 = vld [vmem:[#allocation20_spill] sm:$0xff] }
 0x5ec   :  { %5137 = vmatpush.msra.mxu3 %v4135_v57  ;;  %v3534_v57 = vadd.f32 %v10160_v59, %v11851_v32  ;;  %v10656_v36 = vadd.f32 %v4671_v42, %v4649_v10  ;;  %v3528_v52 = vadd.f32 %v10160_v59, %v11857_v35  ;;  %v3003_v45 = vadd.f32 %v10160_v59, %v11858_v23  ;;  %v10685_v42 = vld [vmem:[%s11407_s2] ss:$0 sm:$0xff]  ;;  %v11864_v32 = vld [vmem:[#allocation17_spill] sm:$0xff] }
 0x5ed   :  { %4883 = vmatpush.msrb.mxu1 %v3960_v16  ;;  %4907 = vmatpush.msrb.mxu2 %v3975_v46  ;;  %v11852_v16 = vld [vmem:[#allocation29_spill] sm:$0xff]  ;;  %v11853_v46 = vld [vmem:[#allocation74_spill] sm:$0xff]  ;;  %v3045_v9 = vadd.f32 %v10160_v59, %v11862_v53  ;;  %v10703_v35 = vadd.s32 2304, %v9098_v12 }
 0x5ee   :  { %5138 = vmatpush.msra.mxu3 %v4134_v30  ;;  %6402 = vmatmul.msk.f32.gmra.mxu2 %vm4387_vm6, %v11656_v2  ;;  %v3009_v34 = vadd.f32 %v10160_v59, %v11852_v16  ;;  %v3054_v56 = vadd.f32 %v10160_v59, %v11853_v46  ;;  %v11854_v30 = vld [vmem:[#allocation227_spill] sm:$0xff]  ;;  %v11865_v16 = vld [vmem:[#allocation62_spill] sm:$0xff]  ;;  %vm4394_vm6 = vmand %vm4264_vm4, %vm4330_vm5 }
 0x5ef   :  { %4884 = vmatpush.msrb.mxu1 %v3959_v3  ;;  %4908 = vmatpush.msrb.mxu2 %v3974_v1  ;;  %v3531_v47 = vadd.f32 %v10160_v59, %v11854_v30  ;;  %v11855_v3 = vld [vmem:[#allocation26_spill] sm:$0xff]  ;;  %v11856_v1 = vld [vmem:[#allocation71_spill] sm:$0xff]  ;;  %vm4227_vm10 = vcmp.ge.s32.totalorder %v10703_v35, %v9093_v17  ;;  %vm4293_vm1 = vcmp.lt.s32.totalorder %v10703_v35, %v9101_v33 }
 0x5f0   :  { %5139 = vmatpush.msra.mxu3 %v4133_v20  ;;  %6400 = vmatmul.msk.f32.gmra.mxu1 %vm10633_vm7, %v11656_v2  ;;  %v3006_v60 = vadd.f32 %v10160_v59, %v11855_v3  ;;  %v3051_v24 = vadd.f32 %v10160_v59, %v11856_v1  ;;  %v4129_v20 = vmax.f32 %v3534_v57, 0.0  ;;  %v3954_v6 = vmax.f32 %v3009_v34, 0.0  ;;  %v11866_v46 = vld [vmem:[#allocation219_spill] sm:$0xff]  ;;  %v11867_v30 = vld [vmem:[#allocation14_spill] sm:$0xff]  ;;  %v11869_v1 = vld [vmem:[#allocation217_spill] sm:$0xff] }
 0x5f1   :  { %4885 = vmatpush.msrb.mxu1 %v3958_v8  ;;  %4909 = vmatpush.msrb.mxu2 %v3973_v15  ;;  %v11859_v8 = vld [vmem:[#allocation68_spill] sm:$0xff]  ;;  %v3969_v50 = vmax.f32 %v3054_v56, 0.0  ;;  %v11860_v15 = vld [vmem:[#allocation223_spill] sm:$0xff]  ;;  %v4128_v38 = vmax.f32 %v3531_v47, 0.0  ;;  %v2997_v57 = vadd.f32 %v10685_v42, %v11864_v32  ;;  %v3042_v34 = vadd.f32 %v10685_v42, %v11865_v16  ;;  %vm4357_vm12 = vmand %vm4227_vm10, %vm4293_vm1 }
 0x5f2   :  { %5140 = vmatpush.msra.mxu3 %v4132_v11  ;;  %v3048_v39 = vadd.f32 %v10160_v59, %v11859_v8  ;;  %v3525_v26 = vadd.f32 %v10160_v59, %v11860_v15  ;;  %v3000_v11 = vadd.f32 %v10160_v59, %v11861_v4  ;;  %v3953_v10 = vmax.f32 %v3006_v60, 0.0  ;;  %v11868_v3 = vld [vmem:[#allocation59_spill] sm:$0xff]  ;;  %v11873_v4 = vld [vmem:[#allocation228_spill] sm:$0xff] }
 0x5f3   :  { %4886 = vmatpush.msrb.mxu1 %v3957_v44  ;;  %4910 = vmatpush.msrb.mxu2 %v3972_v7  ;;  %v3968_v44 = vmax.f32 %v3051_v24, 0.0  ;;  %v4127_v7 = vmax.f32 %v3528_v52, 0.0  ;;  %v3519_v59 = vadd.f32 %v10685_v42, %v11866_v46  ;;  %v2994_v47 = vadd.f32 %v10685_v42, %v11867_v30  ;;  %v11870_v52 = vld [vmem:[#allocation12_spill] sm:$0xff]  ;;  %v11879_v30 = vld [vmem:[#allocation222_spill] sm:$0xff] }
 0x5f4   :  { %5141 = vmatpush.msra.mxu3 %v4131_v62  ;;  %v3952_v62 = vmax.f32 %v3003_v45, 0.0  ;;  %v4126_v56 = vmax.f32 %v3525_v26, 0.0  ;;  %v3039_v60 = vadd.f32 %v10685_v42, %v11868_v3  ;;  %v3516_v24 = vadd.f32 %v10685_v42, %v11869_v1  ;;  %v11871_v45 = vld [vmem:[#allocation56_spill] sm:$0xff]  ;;  %v11880_v3 = vld [vmem:[#allocation185_spill] sm:$0xff] }
 0x5f5   :  { %4887 = vmatpush.msrb.mxu1 %v3956_v19  ;;  %4911 = vmatpush.msrb.mxu2 %v3971_v41  ;;  %v3967_v19 = vmax.f32 %v3048_v39, 0.0  ;;  %v10694_v41 = vadd.s32 2432, %v9098_v12  ;;  %v3950_v23 = vmax.f32 %v2997_v57, 0.0  ;;  %v3965_v8 = vmax.f32 %v3042_v34, 0.0  ;;  %v11876_v57 = vld [vmem:[#allocation191_spill] sm:$0xff]  ;;  %v11877_v16 = vld [vmem:[#allocation224_spill] sm:$0xff] }
 0x5f6   :  { %5142 = vmatpush.msra.mxu3 %v4130_v40  ;;  %v3951_v40 = vmax.f32 %v3000_v11, 0.0  ;;  %v4124_v39 = vmax.f32 %v3519_v59, 0.0  ;;  %v3949_v26 = vmax.f32 %v2994_v47, 0.0  ;;  %v3225_v11 = vadd.f32 %v10685_v42, %v11873_v4  ;;  %v11878_v46 = vld [vmem:[#allocation188_spill] sm:$0xff] }
 0x5f7   :  { %4888 = vmatpush.msrb.mxu1 %v3955_v25  ;;  %4912 = vmatpush.msrb.mxu2 %v3970_v18  ;;  %v3966_v25 = vmax.f32 %v3045_v9, 0.0  ;;  %v4125_v18 = vmax.f32 %v3522_v43, 0.0  ;;  %vm4228_vm8 = vcmp.ge.s32.totalorder %v10694_v41, %v9093_v17  ;;  %vm4294_vm9 = vcmp.lt.s32.totalorder %v10694_v41, %v9101_v33  ;;  %v11875_v43 = vld [vmem:[#allocation226_spill] sm:$0xff]  ;;  %v11881_v1 = vld [vmem:[#allocation220_spill] sm:$0xff] }
 0x5f8   :  { %5143 = vmatpush.msra.mxu3 %v4129_v20  ;;  %v2991_v20 = vadd.f32 %v10685_v42, %v11870_v52  ;;  %vm4358_vm11 = vmand %vm4228_vm8, %vm4294_vm9  ;;  %v3219_v34 = vadd.f32 %v10685_v42, %v11877_v16  ;;  %v3171_v59 = vadd.f32 %v10685_v42, %v11878_v46  ;;  %v3216_v47 = vadd.f32 %v10685_v42, %v11879_v30  ;;  %v11882_v52 = vld [vmem:[#allocation182_spill] sm:$0xff] }
 0x5f9   :  { %4889 = vmatpush.msrb.mxu1 %v3954_v6  ;;  %4913 = vmatpush.msrb.mxu2 %v3969_v50  ;;  %v3036_v6 = vadd.f32 %v10685_v42, %v11871_v45  ;;  %v11872_v50 = vld [vmem:[#allocation10_spill] sm:$0xff]  ;;  %vm4260_vm13 = vcmp.ge.s32.totalorder %v10694_v41, %v9449_v21  ;;  %vm4326_vm14 = vcmp.lt.s32.totalorder %v10694_v41, %v9455_v51 }
 0x5fa   :  { %5144 = vmatpush.msra.mxu3 %v4128_v38  ;;  %v2988_v15 = vadd.f32 %v10685_v42, %v11872_v50  ;;  %v3964_v38 = vmax.f32 %v3039_v60, 0.0  ;;  %v3948_v53 = vmax.f32 %v2991_v20, 0.0  ;;  %v3168_v60 = vadd.f32 %v10685_v42, %v11880_v3  ;;  %v11883_v45 = vld [vmem:[#allocation218_spill] sm:$0xff]  ;;  %vm4390_vm2 = vmand %vm4260_vm13, %vm4326_vm14 }
 0x5fb   :  { %4890 = vmatpush.msrb.mxu1 %v3953_v10  ;;  %4914 = vmatpush.msrb.mxu2 %v3968_v44  ;;  %v4123_v10 = vmax.f32 %v3516_v24, 0.0  ;;  %v3963_v9 = vmax.f32 %v3036_v6, 0.0  ;;  %v11874_v44 = vld [vmem:[#allocation194_spill] sm:$0xff]  ;;  %v3213_v24 = vadd.f32 %v10685_v42, %v11881_v1  ;;  %vm4259_vm15 = vcmp.ge.s32.totalorder %v10703_v35, %v9449_v21 }
 0x5fc   :  { %5145 = vmatpush.msra.mxu3 %v4127_v7  ;;  %v3177_v13 = vadd.f32 %v10685_v42, %v11874_v44  ;;  %v3222_v7 = vadd.f32 %v10685_v42, %v11875_v43  ;;  %v3947_v32 = vmax.f32 %v2988_v15, 0.0  ;;  %vm4325_vm0 = vcmp.lt.s32.totalorder %v10703_v35, %v9455_v51  ;;  %v11888_v35 = vld [vmem:[#allocation173_spill] sm:$0xff] }
 0x5fd   :  { %4891 = vmatpush.msrb.mxu1 %v3952_v62  ;;  %4915 = vmatpush.msrb.mxu2 %v3967_v19  ;;  %v3174_v62 = vadd.f32 %v10685_v42, %v11876_v57  ;;  %v4026_v19 = vmax.f32 %v3225_v11, 0.0  ;;  %v3165_v20 = vadd.f32 %v10685_v42, %v11882_v52  ;;  %v3210_v6 = vadd.f32 %v10685_v42, %v11883_v45  ;;  %vm4389_vm3 = vmand %vm4259_vm15, %vm4325_vm0  ;;  %v11886_v11 = vld [vmem:[#allocation176_spill] sm:$0xff] }
 0x5fe   :  { %5146 = vmatpush.msra.mxu3 %v4126_v56  ;;  %v4010_v56 = vmax.f32 %v3177_v13, 0.0  ;;  %v4007_v15 = vmax.f32 %v3168_v60, 0.0  ;;  %v4022_v4 = vmax.f32 %v3213_v24, 0.0  ;;  %v3156_v13 = vadd.f32 %v10685_v42, %v11888_v35  ;;  %v11894_v60 = vld [vmem:[#allocation164_spill] sm:$0xff]  ;;  %v11895_v24 = vld [vmem:[#allocation206_spill] sm:$0xff] }
 0x5ff   :  { %4892 = vmatpush.msrb.mxu1 %v3951_v40  ;;  %4916 = vmatpush.msrb.mxu2 %v3966_v25  ;;  %v4025_v40 = vmax.f32 %v3222_v7, 0.0  ;;  %v4009_v25 = vmax.f32 %v3174_v62, 0.0  ;;  %v4006_v41 = vmax.f32 %v3165_v20, 0.0  ;;  %v4021_v44 = vmax.f32 %v3210_v6, 0.0  ;;  %v11889_v7 = vld [vmem:[#allocation212_spill] sm:$0xff]  ;;  %v11890_v62 = vld [vmem:[#allocation170_spill] sm:$0xff] }
 0x600   :  { %5147 = vmatpush.msra.mxu3 %v4125_v18  ;;  %v4024_v18 = vmax.f32 %v3219_v34, 0.0  ;;  %v3153_v16 = vadd.f32 %v10685_v42, %v11890_v62  ;;  %v4003_v30 = vmax.f32 %v3156_v13, 0.0  ;;  %v11896_v20 = vld [vmem:[#allocation161_spill] sm:$0xff]  ;;  %v11897_v6 = vld [vmem:[#allocation204_spill] sm:$0xff] }
 0x601   :  { %4893 = vmatpush.msrb.mxu1 %v3950_v23  ;;  %4917 = vmatpush.msrb.mxu2 %v3965_v8  ;;  %v4008_v23 = vmax.f32 %v3171_v59, 0.0  ;;  %v4023_v8 = vmax.f32 %v3216_v47, 0.0  ;;  %v11892_v59 = vld [vmem:[#allocation167_spill] sm:$0xff]  ;;  %v11893_v47 = vld [vmem:[#allocation208_spill] sm:$0xff]  ;;  %v11903_v62 = vld [vmem:[#allocation197_spill] sm:$0xff] }
 0x602   :  { %5148 = vmatpush.msra.mxu3 %v4124_v39  ;;  %v11884_v39 = vld [vmem:[#allocation179_spill] sm:$0xff]  ;;  %v4002_v1 = vmax.f32 %v3153_v16, 0.0  ;;  %v3180_v16 = vadd.f32 %v10685_v42, %v11903_v62 }
 0x603   :  { %4894 = vmatpush.msrb.mxu1 %v3949_v26  ;;  %4918 = vmatpush.msrb.mxu2 %v3964_v38  ;;  %v3162_v50 = vadd.f32 %v10685_v42, %v11884_v39  ;;  %v11885_v26 = vld [vmem:[#allocation216_spill] sm:$0xff] }
 0x604   :  { %5149 = vmatpush.msra.mxu3 %v4123_v10  ;;  %v3207_v38 = vadd.f32 %v10685_v42, %v11885_v26  ;;  %v3159_v10 = vadd.f32 %v10685_v42, %v11886_v11 }
 0x605   :  { %4895 = vmatpush.msrb.mxu1 %v3948_v53  ;;  %4919 = vmatpush.msrb.mxu2 %v3963_v9  ;;  %v11887_v53 = vld [vmem:[#allocation214_spill] sm:$0xff]  ;;  %v4005_v43 = vmax.f32 %v3162_v50, 0.0 }
 0x606   :  { %6407 = vmatmul.msk.f32.vlgmr.msrb.gmra.mxu2 %vm4358_vm11, %v11656_v2  ;;  %v3204_v9 = vadd.f32 %v10685_v42, %v11887_v53  ;;  %v4020_v57 = vmax.f32 %v3207_v38, 0.0  ;;  %6416 = vmatmul.msk.f32.gmra.mxu3 %vm4394_vm6, %v11656_v2  ;;  %v4004_v34 = vmax.f32 %v3159_v10, 0.0  ;;  %v11898_v50 = vld [vmem:[#allocation158_spill] sm:$0xff]  ;;  %v10812_v10 = vadd.s32 2816, %v9098_v12 }
 0x607   :  { %4973 = vmatpush.msra.mxu2 %v4026_v19  ;;  %4896 = vmatpush.msrb.mxu1 %v3947_v32  ;;  %v3201_v32 = vadd.f32 %v10685_v42, %v11889_v7  ;;  %v11891_v19 = vld [vmem:[#allocation210_spill] sm:$0xff]  ;;  %v11902_v7 = vld [vmem:[#allocation152_spill] sm:$0xff] }
 0x608   :  { %6405 = vmatmul.msk.f32.vlgmr.msrb.gmra.mxu1 %vm4357_vm12, %v11656_v2  ;;  %v3198_v27 = vadd.f32 %v10685_v42, %v11891_v19  ;;  %v4019_v46 = vmax.f32 %v3204_v9, 0.0  ;;  %v11899_v38 = vld [vmem:[#allocation202_spill] sm:$0xff]  ;;  %vm4231_vm7 = vcmp.ge.s32.totalorder %v10812_v10, %v9093_v17  ;;  %vm4297_vm8 = vcmp.lt.s32.totalorder %v10812_v10, %v9101_v33  ;;  %v11904_v19 = vld [vmem:[#allocation81_spill] sm:$0xff] }
 0x609   :  { %4950 = vmatpush.msra.mxu1 %v4010_v56  ;;  %4974 = vmatpush.msra.mxu2 %v4025_v40  ;;  %v3150_v56 = vadd.f32 %v10685_v42, %v11892_v59  ;;  %v3195_v40 = vadd.f32 %v10685_v42, %v11893_v47  ;;  %v4018_v3 = vmax.f32 %v3201_v32, 0.0  ;;  %v3135_v32 = vadd.f32 %v10685_v42, %v11902_v7  ;;  %v11906_v47 = vld [vmem:[#allocation33_spill] sm:$0xff]  ;;  %vm4361_vm1 = vmand %vm4231_vm7, %vm4297_vm8 }
 0x60a   :  { %v4017_v52 = vmax.f32 %v3198_v27, 0.0  ;;  %v3369_v27 = vadd.f32 %v10685_v42, %v11904_v19  ;;  %vm4263_vm13 = vcmp.ge.s32.totalorder %v10812_v10, %v9449_v21  ;;  %vm4329_vm14 = vcmp.lt.s32.totalorder %v10812_v10, %v9455_v51 }
 0x60b   :  { %4951 = vmatpush.msra.mxu1 %v4009_v25  ;;  %4975 = vmatpush.msra.mxu2 %v4024_v18  ;;  %v3147_v25 = vadd.f32 %v10685_v42, %v11894_v60  ;;  %v3192_v18 = vadd.f32 %v10685_v42, %v11895_v24  ;;  %v4001_v45 = vmax.f32 %v3150_v56, 0.0  ;;  %v4016_v39 = vmax.f32 %v3195_v40, 0.0  ;;  %v11908_v24 = vld [vmem:[#allocation30_spill] sm:$0xff]  ;;  %vm4393_vm4 = vmand %vm4263_vm13, %vm4329_vm14 }
 0x60c   :  { %v3321_v40 = vadd.f32 %v10685_v42, %v11906_v47  ;;  %v11917_v47 = vld [vmem:[#allocation63_spill] sm:$0xff] }
 0x60d   :  { %4952 = vmatpush.msra.mxu1 %v4008_v23  ;;  %4976 = vmatpush.msra.mxu2 %v4023_v8  ;;  %v3144_v23 = vadd.f32 %v10685_v42, %v11896_v20  ;;  %v3189_v8 = vadd.f32 %v10685_v42, %v11897_v6  ;;  %v4000_v26 = vmax.f32 %v3147_v25, 0.0  ;;  %v4015_v11 = vmax.f32 %v3192_v18, 0.0 }
 0x60e   :  { %6408 = vmatmul.msk.f32.gmra.mxu2 %vm4390_vm2, %v11656_v2  ;;  %v3996_v25 = vmax.f32 %v3135_v32, 0.0  ;;  %v3318_v18 = vadd.f32 %v10685_v42, %v11908_v24  ;;  %v11919_v24 = vld [vmem:[#allocation60_spill] sm:$0xff] }
 0x60f   :  { %4953 = vmatpush.msra.mxu1 %v4007_v15  ;;  %4977 = vmatpush.msra.mxu2 %v4022_v4  ;;  %v3141_v15 = vadd.f32 %v10685_v42, %v11898_v50  ;;  %v3186_v4 = vadd.f32 %v10685_v42, %v11899_v38  ;;  %v3999_v9 = vmax.f32 %v3144_v23, 0.0  ;;  %v4014_v13 = vmax.f32 %v3189_v8, 0.0  ;;  %v11910_v50 = vld [vmem:[#allocation27_spill] sm:$0xff] }
 0x610   :  { %6406 = vmatmul.msk.f32.gmra.mxu1 %vm4389_vm3, %v11656_v2  ;;  %v4058_v38 = vmax.f32 %v3321_v40, 0.0  ;;  %v3351_v40 = vadd.f32 %v10685_v42, %v11917_v47  ;;  %v11926_v47 = vld [vmem:[#allocation39_spill] sm:$0xff] }
 0x611   :  { %4954 = vmatpush.msra.mxu1 %v4006_v41  ;;  %4978 = vmatpush.msra.mxu2 %v4021_v44  ;;  %v11900_v41 = vld [vmem:[#allocation155_spill] sm:$0xff]  ;;  %v11901_v44 = vld [vmem:[#allocation200_spill] sm:$0xff] }
 0x612   :  { %v3138_v53 = vadd.f32 %v10685_v42, %v11900_v41  ;;  %v3183_v35 = vadd.f32 %v10685_v42, %v11901_v44  ;;  %v4057_v44 = vmax.f32 %v3318_v18, 0.0  ;;  %v3348_v18 = vadd.f32 %v10685_v42, %v11919_v24 }
 0x613   :  { %4955 = vmatpush.msra.mxu1 %v4005_v43  ;;  %4979 = vmatpush.msra.mxu2 %v4020_v57  ;;  %v10819_v43 = vadd.s32 2688, %v9098_v12  ;;  %v3998_v57 = vmax.f32 %v3141_v15, 0.0  ;;  %v3315_v15 = vadd.f32 %v10685_v42, %v11910_v50  ;;  %v3279_v24 = vadd.f32 %v10685_v42, %v10038_v29 }
 0x614   :  { %v3997_v56 = vmax.f32 %v3138_v53, 0.0  ;;  %v11912_v53 = vld [vmem:[#allocation24_spill] sm:$0xff] }
 0x615   :  { %4956 = vmatpush.msra.mxu1 %v4004_v34  ;;  %4980 = vmatpush.msra.mxu2 %v4019_v46  ;;  %v4013_v34 = vmax.f32 %v3186_v4, 0.0  ;;  %v11905_v46 = vld [vmem:[#allocation149_spill] sm:$0xff]  ;;  %vm4230_vm9 = vcmp.ge.s32.totalorder %v10819_v43, %v9093_v17  ;;  %vm4296_vm10 = vcmp.lt.s32.totalorder %v10819_v43, %v9101_v33  ;;  %v11911_v4 = vld [vmem:[#allocation72_spill] sm:$0xff]  ;;  %vm4262_vm2 = vcmp.ge.s32.totalorder %v10819_v43, %v9449_v21 }
 0x616   :  { %v3132_v59 = vadd.f32 %v10685_v42, %v11905_v46  ;;  %vm4360_vm11 = vmand %vm4230_vm9, %vm4296_vm10  ;;  %vm4328_vm3 = vcmp.lt.s32.totalorder %v10819_v43, %v9455_v51  ;;  %v11916_v46 = vld [vmem:[#allocation18_spill] sm:$0xff] }
 0x617   :  { %4957 = vmatpush.msra.mxu1 %v4003_v30  ;;  %4981 = vmatpush.msra.mxu2 %v4018_v3  ;;  %v4012_v30 = vmax.f32 %v3183_v35, 0.0  ;;  %v11907_v3 = vld [vmem:[#allocation78_spill] sm:$0xff]  ;;  %v11913_v35 = vld [vmem:[#allocation69_spill] sm:$0xff]  ;;  %vm4392_vm5 = vmand %vm4262_vm2, %vm4328_vm3 }
 0x618   :  { %v3366_v60 = vadd.f32 %v10685_v42, %v11907_v3  ;;  %v3995_v6 = vmax.f32 %v3132_v59, 0.0  ;;  %v3306_v59 = vadd.f32 %v10685_v42, %v11916_v46 }
 0x619   :  { %4958 = vmatpush.msra.mxu1 %v4002_v1  ;;  %4982 = vmatpush.msra.mxu2 %v4017_v52  ;;  %v4011_v1 = vmax.f32 %v3180_v16, 0.0  ;;  %v11909_v52 = vld [vmem:[#allocation75_spill] sm:$0xff]  ;;  %v4056_v16 = vmax.f32 %v3315_v15, 0.0 }
 0x61a   :  { %v3363_v20 = vadd.f32 %v10685_v42, %v11909_v52  ;;  %v4073_v41 = vmax.f32 %v3366_v60, 0.0  ;;  %v11918_v60 = vld [vmem:[#allocation15_spill] sm:$0xff] }
 0x61b   :  { %4959 = vmatpush.msra.mxu1 %v4001_v45  ;;  %4983 = vmatpush.msra.mxu2 %v4016_v39  ;;  %v4074_v45 = vmax.f32 %v3369_v27, 0.0  ;;  %v4201_v39 = vadd.s32 3328, %v9098_v12 }
 0x61c   :  { %v4072_v7 = vmax.f32 %v3363_v20, 0.0  ;;  %v4053_v20 = vmax.f32 %v3306_v59, 0.0 }
 0x61d   :  { %4960 = vmatpush.msra.mxu1 %v4000_v26  ;;  %4984 = vmatpush.msra.mxu2 %v4015_v11  ;;  %v10862_v26 = vpop.f32.mrf.mxu3  ;;  %v3360_v11 = vadd.f32 %v10685_v42, %v11911_v4  ;;  %vm4235_vm12 = vcmp.ge.s32.totalorder %v4201_v39, %v9093_v17  ;;  %vm4301_vm15 = vcmp.lt.s32.totalorder %v4201_v39, %v9101_v33 }
 0x61e   :  { %vm4365_vm0 = vmand %vm4235_vm12, %vm4301_vm15  ;;  %vm4267_vm6 = vcmp.ge.s32.totalorder %v4201_v39, %v9449_v21  ;;  %vm4333_vm7 = vcmp.lt.s32.totalorder %v4201_v39, %v9455_v51  ;;  %v3297_v39 = vadd.f32 %v10685_v42, %v10220_v48  ;;  %v3291_v48 = vadd.f32 %v10685_v42, %v10120_v49 }
 0x61f   :  { %4961 = vmatpush.msra.mxu1 %v3999_v9  ;;  %4985 = vmatpush.msra.mxu2 %v4014_v13  ;;  %v3357_v13 = vadd.f32 %v10685_v42, %v11913_v35  ;;  %v4071_v27 = vmax.f32 %v3360_v11, 0.0  ;;  %vm4397_vm8 = vmand %vm4267_vm6, %vm4333_vm7  ;;  %v4067_v11 = vmax.f32 %v3348_v18, 0.0  ;;  %v11923_v35 = vld [vmem:[#allocation48_spill] sm:$0xff]  ;;  %v3285_v49 = vadd.f32 %v10685_v42, %v10076_v22 }
 0x620   :  { %6421 = vmatmul.msk.f32.vlgmr.msrb.gmra.mxu3 %vm4365_vm0, %v11656_v2  ;;  %v11927_v22 = vld [vmem:[#allocation36_spill] sm:$0xff] }
 0x621   :  { %4962 = vmatpush.msra.mxu1 %v3998_v57  ;;  %4986 = vmatpush.msra.mxu2 %v4013_v34  ;;  %v11914_v57 = vld [vmem:[#allocation21_spill] sm:$0xff]  ;;  %v11915_v34 = vld [vmem:[#allocation66_spill] sm:$0xff]  ;;  %v4070_v3 = vmax.f32 %v3357_v13, 0.0  ;;  %v3336_v13 = vadd.f32 %v10685_v42, %v11923_v35  ;;  %v4046_v18 = vmax.f32 %v3285_v49, 0.0 }
 0x622   :  { %v3309_v62 = vadd.f32 %v10685_v42, %v11914_v57  ;;  %v3354_v19 = vadd.f32 %v10685_v42, %v11915_v34  ;;  %v4050_v57 = vmax.f32 %v3297_v39, 0.0  ;;  %v11933_v39 = vld [vmem:[#allocation211_spill] sm:$0xff]  ;;  %v11938_v49 = vld [vmem:[#allocation162_spill] sm:$0xff] }
 0x623   :  { %4963 = vmatpush.msra.mxu1 %v3997_v56  ;;  %4987 = vmatpush.msra.mxu2 %v4012_v30  ;;  %v4691_v23 = vpop.f32.mrf.mxu1  ;;  %v4063_v59 = vmax.f32 %v3336_v13, 0.0 }
 0x624   :  { %v4692_v8 = vadd.f32 %v4691_v23, %v10522_v55  ;;  %v3312_v55 = vadd.f32 %v10685_v42, %v11912_v53  ;;  %v4069_v52 = vmax.f32 %v3354_v19, 0.0  ;;  %v11922_v53 = vld [vmem:[#allocation51_spill] sm:$0xff] }
 0x625   :  { %4964 = vmatpush.msra.mxu1 %v3996_v25  ;;  %4988 = vmatpush.msra.mxu2 %v4011_v1  ;;  %v3303_v25 = vadd.f32 %v10685_v42, %v11918_v60  ;;  %v4054_v1 = vmax.f32 %v3309_v62, 0.0  ;;  %v4740_v23 = vpop.f32.mrf.mxu3  ;;  %v11924_v62 = vld [vmem:[#allocation45_spill] sm:$0xff]  ;;  %v10948_v60 = vadd.s32 3072, %v9098_v12 }
 0x626   :  { %6413 = vmatmul.msk.f32.vlgmr.msra.gmra.mxu2 %vm4361_vm1, %v11656_v2  ;;  %v4714_v9 = vpop.f32.mrf.mxu2  ;;  %v4055_v30 = vmax.f32 %v3312_v55, 0.0 }
 0x627   :  { %5042 = vmatpush.msrb.mxu2 %v4074_v45  ;;  %4965 = vmatpush.msra.mxu1 %v3995_v6  ;;  %v10877_v32 = vadd.f32 %v4714_v9, %v4692_v8  ;;  %v4068_v6 = vmax.f32 %v3351_v40, 0.0  ;;  %v3300_v8 = vadd.f32 %v10685_v42, %v10274_v0  ;;  %v4052_v15 = vmax.f32 %v3303_v25, 0.0 }
 0x628   :  { %6411 = vmatmul.msk.f32.vlgmr.msra.gmra.mxu1 %vm4360_vm11, %v11656_v2  ;;  %6422 = vmatmul.msk.f32.gmra.mxu3 %vm4397_vm8, %v11656_v2  ;;  %v3339_v0 = vadd.f32 %v10685_v42, %v11922_v53  ;;  %v3294_v9 = vadd.f32 %v10685_v42, %v10155_v61  ;;  %v3288_v61 = vadd.f32 %v10685_v42, %v10098_v31 }
 0x629   :  { %5019 = vmatpush.msrb.mxu1 %v4058_v38  ;;  %5043 = vmatpush.msrb.mxu2 %v4073_v41  ;;  %v11921_v38 = vld [vmem:[#allocation54_spill] sm:$0xff]  ;;  %v3327_v40 = vadd.f32 %v10685_v42, %v11926_v47  ;;  %v3324_v25 = vadd.f32 %v10685_v42, %v11927_v22  ;;  %vm4233_vm1 = vcmp.ge.s32.totalorder %v10948_v60, %v9093_v17 }
 0x62a   :  { %v3342_v4 = vadd.f32 %v10685_v42, %v11921_v38  ;;  %v4064_v34 = vmax.f32 %v3339_v0, 0.0  ;;  %v4049_v19 = vmax.f32 %v3294_v9, 0.0  ;;  %vm4299_vm11 = vcmp.lt.s32.totalorder %v10948_v60, %v9101_v33  ;;  %v11932_v38 = vld [vmem:[#allocation171_spill] sm:$0xff] }
 0x62b   :  { %5020 = vmatpush.msrb.mxu1 %v4057_v44  ;;  %5044 = vmatpush.msrb.mxu2 %v4072_v7  ;;  %v4694_v56 = vpop.f32.mrf.mxu1  ;;  %v4051_v44 = vmax.f32 %v3300_v8, 0.0  ;;  %v4059_v29 = vmax.f32 %v3324_v25, 0.0  ;;  %v11931_v8 = vld [vmem:[#allocation213_spill] sm:$0xff]  ;;  %v3507_v53 = vadd.f32 %v10685_v42, %v11933_v39  ;;  %vm4363_vm13 = vmand %vm4233_vm1, %vm4299_vm11  ;;  %v4204_v9 = vadd.s32 3712, %v9098_v12  ;;  %v11946_v39 = vld [vmem:[#allocation150_spill] sm:$0xff] }
 0x62c   :  { %v4695_v10 = vadd.f32 %v4694_v56, %v10656_v36  ;;  %v11920_v36 = vld [vmem:[#allocation57_spill] sm:$0xff]  ;;  %v4065_v7 = vmax.f32 %v3342_v4, 0.0  ;;  %v4048_v56 = vmax.f32 %v3291_v48, 0.0  ;;  %v3462_v4 = vadd.f32 %v10685_v42, %v11932_v38 }
 0x62d   :  { %5021 = vmatpush.msrb.mxu1 %v4056_v16  ;;  %5045 = vmatpush.msrb.mxu2 %v4071_v27  ;;  %v3345_v45 = vadd.f32 %v10685_v42, %v11920_v36  ;;  %v3333_v16 = vadd.f32 %v10685_v42, %v11924_v62  ;;  %v11925_v27 = vld [vmem:[#allocation42_spill] sm:$0xff]  ;;  %v10992_v13 = vpop.f32.mrf.mxu3  ;;  %v11935_v48 = vld [vmem:[#allocation209_spill] sm:$0xff]  ;;  %vm4238_vm14 = vcmp.ge.s32.totalorder %v4204_v9, %v9093_v17 }
 0x62e   :  { %6414 = vmatmul.msk.f32.gmra.mxu2 %vm4393_vm4, %v11656_v2  ;;  %v3330_v46 = vadd.f32 %v10685_v42, %v11925_v27  ;;  %vm4304_vm2 = vcmp.lt.s32.totalorder %v4204_v9, %v9101_v33  ;;  %v11937_v27 = vld [vmem:[#allocation207_spill] sm:$0xff]  ;;  %vm4265_vm4 = vcmp.ge.s32.totalorder %v10948_v60, %v9449_v21  ;;  %vm4270_vm8 = vcmp.ge.s32.totalorder %v4204_v9, %v9449_v21 }
 0x62f   :  { %5022 = vmatpush.msrb.mxu1 %v4055_v30  ;;  %5046 = vmatpush.msrb.mxu2 %v4070_v3  ;;  %v4717_v43 = vpop.f32.mrf.mxu2  ;;  %v4066_v55 = vmax.f32 %v3345_v45, 0.0  ;;  %v10941_v30 = vadd.s32 3200, %v9098_v12  ;;  %v4062_v31 = vmax.f32 %v3333_v16, 0.0  ;;  %v3282_v3 = vadd.f32 %v10685_v42, %v10055_v14  ;;  %v11930_v45 = vld [vmem:[#allocation174_spill] sm:$0xff]  ;;  %vm4368_vm3 = vmand %vm4238_vm14, %vm4304_vm2 }
 0x630   :  { %6412 = vmatmul.msk.f32.gmra.mxu1 %vm4392_vm5, %v11656_v2  ;;  %v4718_v50 = vadd.f32 %v4717_v43, %v4695_v10  ;;  %v4047_v10 = vmax.f32 %v3288_v61, 0.0  ;;  %v4060_v14 = vmax.f32 %v3327_v40, 0.0  ;;  %v11929_v43 = vld [vmem:[#allocation130_spill] sm:$0xff]  ;;  %vm4331_vm5 = vcmp.lt.s32.totalorder %v10948_v60, %v9455_v51  ;;  %6427 = vmatmul.msk.f32.vlgmr.msra.gmra.mxu3 %vm4368_vm3, %v11656_v2  ;;  %v11939_v40 = vld [vmem:[#allocation205_spill] sm:$0xff] }
 0x631   :  { %5023 = vmatpush.msrb.mxu1 %v4054_v1  ;;  %5047 = vmatpush.msrb.mxu2 %v4069_v52  ;;  %v4061_v1 = vmax.f32 %v3330_v46, 0.0  ;;  %vm4234_vm9 = vcmp.ge.s32.totalorder %v10941_v30, %v9093_v17  ;;  %vm4300_vm10 = vcmp.lt.s32.totalorder %v10941_v30, %v9101_v33  ;;  %v11928_v52 = vld [vmem:[#allocation215_spill] sm:$0xff]  ;;  %v4045_v36 = vmax.f32 %v3282_v3, 0.0  ;;  %vm4395_vm7 = vmand %vm4265_vm4, %vm4331_vm5 }
 0x632   :  { %v10922_v41 = vadd.f32 %v4740_v23, %v4718_v50  ;;  %v3276_v23 = vadd.f32 %v10685_v42, %v11929_v43  ;;  %v3510_v50 = vadd.f32 %v10685_v42, %v11931_v8  ;;  %vm4364_vm12 = vmand %vm4234_vm9, %vm4300_vm10  ;;  %vm4266_vm15 = vcmp.ge.s32.totalorder %v10941_v30, %v9449_v21 }
 0x633   :  { %5024 = vmatpush.msrb.mxu1 %v4053_v20  ;;  %5048 = vmatpush.msrb.mxu2 %v4068_v6  ;;  %v3513_v20 = vadd.f32 %v10685_v42, %v11928_v52  ;;  %v3465_v6 = vadd.f32 %v10685_v42, %v11930_v45  ;;  %vm4332_vm0 = vcmp.lt.s32.totalorder %v10941_v30, %v9455_v51  ;;  %v11942_v52 = vld [vmem:[#allocation156_spill] sm:$0xff]  ;;  %v11944_v45 = vld [vmem:[#allocation153_spill] sm:$0xff] }
 0x634   :  { %v4121_v62 = vmax.f32 %v3510_v50, 0.0  ;;  %v3501_v46 = vadd.f32 %v10685_v42, %v11937_v27  ;;  %vm4396_vm6 = vmand %vm4266_vm15, %vm4332_vm0  ;;  %v3444_v60 = vadd.f32 %v10685_v42, %v11944_v45  ;;  %vm4336_vm9 = vcmp.lt.s32.totalorder %v4204_v9, %v9455_v51  ;;  %v11945_v50 = vld [vmem:[#allocation198_spill] sm:$0xff] }
 0x635   :  { %5025 = vmatpush.msrb.mxu1 %v4052_v15  ;;  %5049 = vmatpush.msrb.mxu2 %v4067_v11  ;;  %v4044_v15 = vmax.f32 %v3279_v24, 0.0  ;;  %v4122_v0 = vmax.f32 %v3513_v20, 0.0  ;;  %v11941_v24 = vld [vmem:[#allocation203_spill] sm:$0xff]  ;;  %v3447_v20 = vadd.f32 %v10685_v42, %v11942_v52  ;;  %vm4400_vm10 = vmand %vm4270_vm8, %vm4336_vm9  ;;  %v11071_v52 = vadd.s32 3584, %v9098_v12 }
 0x637   :  { %5026 = vmatpush.msrb.mxu1 %v4051_v44  ;;  %5050 = vmatpush.msrb.mxu2 %v4066_v55  ;;  %v4043_v55 = vmax.f32 %v3276_v23, 0.0  ;;  %v11934_v44 = vld [vmem:[#allocation168_spill] sm:$0xff]  ;;  %v11943_v23 = vld [vmem:[#allocation201_spill] sm:$0xff]  ;;  %vm4237_vm1 = vcmp.ge.s32.totalorder %v11071_v52, %v9093_v17  ;;  %vm4303_vm11 = vcmp.lt.s32.totalorder %v11071_v52, %v9101_v33  ;;  %vm4269_vm0 = vcmp.ge.s32.totalorder %v11071_v52, %v9449_v21 }
 0x638   :  { %v3459_v35 = vadd.f32 %v10685_v42, %v11934_v44  ;;  %6428 = vmatmul.msk.f32.gmra.mxu3 %vm4400_vm10, %v11656_v2  ;;  %vm4367_vm14 = vmand %vm4237_vm1, %vm4303_vm11  ;;  %vm4335_vm2 = vcmp.lt.s32.totalorder %v11071_v52, %v9455_v51 }
 0x639   :  { %5027 = vmatpush.msrb.mxu1 %v4050_v57  ;;  %5051 = vmatpush.msrb.mxu2 %v4065_v7  ;;  %v4106_v7 = vmax.f32 %v3465_v6, 0.0  ;;  %v3504_v57 = vadd.f32 %v10685_v42, %v11935_v48  ;;  %v4809_v6 = vpop.f32.mrf.mxu3  ;;  %vm4399_vm5 = vmand %vm4269_vm0, %vm4335_vm2 }
 0x63a   :  { %v4104_v47 = vmax.f32 %v3459_v35, 0.0 }
 0x63b   :  { %5028 = vmatpush.msrb.mxu1 %v4049_v19  ;;  %5052 = vmatpush.msrb.mxu2 %v4064_v34  ;;  %v11936_v34 = vld [vmem:[#allocation165_spill] sm:$0xff]  ;;  %v4105_v19 = vmax.f32 %v3462_v4, 0.0  ;;  %v4119_v3 = vmax.f32 %v3504_v57, 0.0  ;;  %v4099_v57 = vmax.f32 %v3444_v60, 0.0  ;;  %v11078_v60 = vadd.s32 3456, %v9098_v12 }
 0x63c   :  { %v3456_v61 = vadd.f32 %v10685_v42, %v11936_v34 }
 0x63d   :  { %5029 = vmatpush.msrb.mxu1 %v4048_v56  ;;  %5053 = vmatpush.msrb.mxu2 %v4063_v59  ;;  %v4120_v59 = vmax.f32 %v3507_v53, 0.0  ;;  %v3453_v56 = vadd.f32 %v10685_v42, %v11938_v49  ;;  %v3441_v53 = vadd.f32 %v10685_v42, %v11946_v39  ;;  %vm4268_vm3 = vcmp.ge.s32.totalorder %v11078_v60, %v9449_v21 }
 0x63e   :  { %vm4334_vm4 = vcmp.lt.s32.totalorder %v11078_v60, %v9455_v51 }
 0x63f   :  { %5030 = vmatpush.msrb.mxu1 %v4047_v10  ;;  %5054 = vmatpush.msrb.mxu2 %v4062_v31  ;;  %v3498_v31 = vadd.f32 %v10685_v42, %v11939_v40  ;;  %v11940_v10 = vld [vmem:[#allocation159_spill] sm:$0xff]  ;;  %v4102_v43 = vmax.f32 %v3453_v56, 0.0 }
 0x640   :  { %v3450_v22 = vadd.f32 %v10685_v42, %v11940_v10 }
 0x641   :  { %5031 = vmatpush.msrb.mxu1 %v4046_v18  ;;  %5055 = vmatpush.msrb.mxu2 %v4061_v1  ;;  %v4103_v1 = vmax.f32 %v3456_v61, 0.0  ;;  %v3495_v18 = vadd.f32 %v10685_v42, %v11941_v24 }
 0x642   :  { %v4101_v8 = vmax.f32 %v3450_v22, 0.0 }
 0x643   :  { %5032 = vmatpush.msrb.mxu1 %v4045_v36  ;;  %5056 = vmatpush.msrb.mxu2 %v4060_v14  ;;  %v4118_v14 = vmax.f32 %v3501_v46, 0.0  ;;  %v3492_v36 = vadd.f32 %v10685_v42, %v11943_v23  ;;  %v4116_v38 = vmax.f32 %v3495_v18, 0.0  ;;  %v4098_v46 = vmax.f32 %v3441_v53, 0.0  ;;  %v11955_v18 = vld [vmem:[#allocation183_spill] sm:$0xff] }
 0x644   :  { %v10978_v11 = vpop.f32.mrf.mxu1 }
 0x645   :  { %5033 = vmatpush.msrb.mxu1 %v4044_v15  ;;  %5057 = vmatpush.msrb.mxu2 %v4059_v29  ;;  %v4117_v29 = vmax.f32 %v3498_v31, 0.0  ;;  %v3489_v15 = vadd.f32 %v10685_v42, %v11945_v50  ;;  %v4115_v35 = vmax.f32 %v3492_v36, 0.0  ;;  %v11957_v36 = vld [vmem:[#allocation180_spill] sm:$0xff]  ;;  %v11959_v50 = vld [vmem:[#allocation177_spill] sm:$0xff] }
 0x646   :  { %6419 = vmatmul.msk.f32.vlgmr.msrb.gmra.mxu2 %vm4364_vm12, %v11656_v2  ;;  %vm4236_vm12 = vcmp.ge.s32.totalorder %v11078_v60, %v9093_v17 }
 0x647   :  { %5111 = vmatpush.msra.mxu2 %v4122_v0  ;;  %5034 = vmatpush.msrb.mxu1 %v4043_v55  ;;  %v4100_v0 = vmax.f32 %v3447_v20, 0.0  ;;  %v11947_v55 = vld [vmem:[#allocation195_spill] sm:$0xff]  ;;  %v4114_v61 = vmax.f32 %v3489_v15, 0.0  ;;  %v11956_v20 = vld [vmem:[#allocation138_spill] sm:$0xff]  ;;  %v3468_v15 = vadd.f32 %v10685_v42, %v11959_v50 }
 0x648   :  { %6417 = vmatmul.msk.f32.vlgmr.msrb.gmra.mxu1 %vm4363_vm13, %v11656_v2  ;;  %v10998_v16 = vpop.f32.mrf.mxu2  ;;  %v3486_v44 = vadd.f32 %v10685_v42, %v11947_v55  ;;  %v3657_v55 = vadd.f32 %v10685_v42, %v10283_v5  ;;  %vm4302_vm13 = vcmp.lt.s32.totalorder %v11078_v60, %v9101_v33  ;;  %v11970_v50 = vld [vmem:[#allocation258_spill] sm:$0xff] }
 0x649   :  { %5088 = vmatpush.msra.mxu1 %v4106_v7  ;;  %5112 = vmatpush.msra.mxu2 %v4121_v62  ;;  %v11948_v7 = vld [vmem:[#allocation148_spill] sm:$0xff]  ;;  %vm4366_vm15 = vmand %vm4236_vm12, %vm4302_vm13  ;;  %v3588_v60 = vadd.f32 %v10685_v42, %v11970_v50 }
 0x64a   :  { %v3438_v48 = vadd.f32 %v10685_v42, %v11948_v7  ;;  %v11949_v62 = vld [vmem:[#allocation192_spill] sm:$0xff]  ;;  %v4113_v56 = vmax.f32 %v3486_v44, 0.0  ;;  %v11961_v7 = vld [vmem:[#allocation265_spill] sm:$0xff] }
 0x64b   :  { %5089 = vmatpush.msra.mxu1 %v4105_v19  ;;  %5113 = vmatpush.msra.mxu2 %v4120_v59  ;;  %v3483_v34 = vadd.f32 %v10685_v42, %v11949_v62  ;;  %v11950_v19 = vld [vmem:[#allocation146_spill] sm:$0xff]  ;;  %v11951_v59 = vld [vmem:[#allocation189_spill] sm:$0xff]  ;;  %v11962_v62 = vld [vmem:[#allocation264_spill] sm:$0xff] }
 0x64c   :  { %v4763_v25 = vpop.f32.mrf.mxu1  ;;  %v3435_v27 = vadd.f32 %v10685_v42, %v11950_v19  ;;  %v3480_v49 = vadd.f32 %v10685_v42, %v11951_v59  ;;  %v4097_v31 = vmax.f32 %v3438_v48, 0.0  ;;  %v3609_v48 = vadd.f32 %v10685_v42, %v11961_v7  ;;  %v11973_v7 = vld [vmem:[#allocation133_spill] sm:$0xff] }
 0x64d   :  { %5090 = vmatpush.msra.mxu1 %v4104_v47  ;;  %5114 = vmatpush.msra.mxu2 %v4119_v3  ;;  %v4764_v30 = vadd.f32 %v4763_v25, %v10922_v41  ;;  %v11952_v47 = vld [vmem:[#allocation144_spill] sm:$0xff]  ;;  %v11953_v3 = vld [vmem:[#allocation186_spill] sm:$0xff]  ;;  %v4112_v22 = vmax.f32 %v3483_v34, 0.0  ;;  %v11954_v25 = vld [vmem:[#allocation141_spill] sm:$0xff]  ;;  %v3606_v34 = vadd.f32 %v10685_v42, %v11962_v62  ;;  %v4170_v19 = vmax.f32 %v3657_v55, 0.0 }
 0x64e   :  { %6420 = vmatmul.msk.f32.gmra.mxu2 %vm4396_vm6, %v11656_v2  ;;  %v3432_v40 = vadd.f32 %v10685_v42, %v11952_v47  ;;  %v3477_v10 = vadd.f32 %v10685_v42, %v11953_v3  ;;  %v4096_v24 = vmax.f32 %v3435_v27, 0.0  ;;  %v11963_v27 = vld [vmem:[#allocation263_spill] sm:$0xff]  ;;  %v4154_v59 = vmax.f32 %v3609_v48, 0.0  ;;  %v11964_v47 = vld [vmem:[#allocation262_spill] sm:$0xff]  ;;  %vm4398_vm6 = vmand %vm4268_vm3, %vm4334_vm4 }
 0x64f   :  { %5091 = vmatpush.msra.mxu1 %v4103_v1  ;;  %5115 = vmatpush.msra.mxu2 %v4118_v14  ;;  %v3429_v1 = vadd.f32 %v10685_v42, %v11954_v25  ;;  %v3474_v14 = vadd.f32 %v10685_v42, %v11955_v18  ;;  %v11972_v55 = vld [vmem:[#allocation257_spill] sm:$0xff]  ;;  %v3630_v48 = vadd.f32 %v10685_v42, %v11973_v7  ;;  %v11974_v62 = vld [vmem:[#allocation256_spill] sm:$0xff]  ;;  %vm5209_vm3 = vcmask 261120  }
 0x650   :  { %6418 = vmatmul.msk.f32.gmra.mxu1 %vm4395_vm7, %v11656_v2  ;;  %v4786_v41 = vpop.f32.mrf.mxu2  ;;  %v4095_v23 = vmax.f32 %v3432_v40, 0.0  ;;  %v4110_v45 = vmax.f32 %v3477_v10, 0.0  ;;  %v3600_v40 = vadd.f32 %v10685_v42, %v11964_v47  ;;  %v11977_v47 = vld [vmem:[#allocation139_spill] sm:$0xff]  ;;  %vm5233_vm4 = vcmask 523264  }
 0x651   :  { %5092 = vmatpush.msra.mxu1 %v4102_v43  ;;  %5116 = vmatpush.msra.mxu2 %v4117_v29  ;;  %v4787_v4 = vadd.f32 %v4786_v41, %v4764_v30  ;;  %v4111_v30 = vmax.f32 %v3480_v49, 0.0  ;;  %v3426_v43 = vadd.f32 %v10685_v42, %v11956_v20  ;;  %v3471_v29 = vadd.f32 %v10685_v42, %v11957_v36  ;;  %v11958_v41 = vld [vmem:[#allocation135_spill] sm:$0xff]  ;;  %v11967_v20 = vld [vmem:[#allocation121_spill] sm:$0xff] }
 0x652   :  { %v3648_v49 = vadd.f32 %v10685_v42, %v10126_v54  ;;  %v3645_v54 = vadd.f32 %v10685_v42, %v10104_v28  ;;  %v11966_v28 = vld [vmem:[#allocation260_spill] sm:$0xff]  ;;  %v11968_v36 = vld [vmem:[#allocation259_spill] sm:$0xff] }
 0x653   :  { %5093 = vmatpush.msra.mxu1 %v4101_v8  ;;  %5117 = vmatpush.msra.mxu2 %v4116_v38  ;;  %v11052_v9 = vadd.f32 %v4809_v6, %v4787_v4  ;;  %v3423_v6 = vadd.f32 %v10685_v42, %v11958_v41  ;;  %v4094_v8 = vmax.f32 %v3429_v1, 0.0  ;;  %v4109_v38 = vmax.f32 %v3474_v14, 0.0  ;;  %v11960_v4 = vld [vmem:[#allocation132_spill] sm:$0xff] }
 0x654   :  { %v3420_v39 = vadd.f32 %v10685_v42, %v11960_v4  ;;  %v4093_v53 = vmax.f32 %v3426_v43, 0.0  ;;  %v4167_v18 = vmax.f32 %v3648_v49, 0.0  ;;  %v3594_v14 = vadd.f32 %v10685_v42, %v11966_v28  ;;  %v11969_v41 = vld [vmem:[#allocation124_spill] sm:$0xff] }
 0x655   :  { %5094 = vmatpush.msra.mxu1 %v4100_v0  ;;  %5118 = vmatpush.msra.mxu2 %v4115_v35  ;;  %v4108_v0 = vmax.f32 %v3471_v29, 0.0  ;;  %v4092_v44 = vmax.f32 %v3423_v6, 0.0  ;;  %v4107_v35 = vmax.f32 %v3468_v15, 0.0  ;;  %v3639_v43 = vadd.f32 %v10685_v42, %v11967_v20  ;;  %v11980_v28 = vld [vmem:[#allocation252_spill] sm:$0xff]  ;;  %v11981_v20 = vld [vmem:[#allocation142_spill] sm:$0xff] }
 0x656   :  { %v4091_v5 = vmax.f32 %v3420_v39, 0.0  ;;  %v3591_v29 = vadd.f32 %v10685_v42, %v11968_v36  ;;  %v3636_v6 = vadd.f32 %v10685_v42, %v11969_v41  ;;  %v4149_v15 = vmax.f32 %v3594_v14, 0.0 }
 0x657   :  { %5095 = vmatpush.msra.mxu1 %v4099_v57  ;;  %5119 = vmatpush.msra.mxu2 %v4114_v61  ;;  %v3654_v57 = vadd.f32 %v10685_v42, %v10231_v58  ;;  %v3651_v61 = vadd.f32 %v10685_v42, %v10170_v63  ;;  %v11120_v63 = vpop.f32.mrf.mxu3 }
 0x659   :  { %5096 = vmatpush.msra.mxu1 %v4098_v46  ;;  %5120 = vmatpush.msra.mxu2 %v4113_v56  ;;  %v3603_v46 = vadd.f32 %v10685_v42, %v11963_v27  ;;  %v4169_v56 = vmax.f32 %v3654_v57, 0.0  ;;  %v4168_v3 = vmax.f32 %v3651_v61, 0.0  ;;  %v4163_v57 = vmax.f32 %v3636_v6, 0.0 }
 0x65a   :  { %v4147_v61 = vmax.f32 %v3588_v60, 0.0  ;;  %v4205_v6 = vadd.s32 3840, %v9098_v12 }
 0x65b   :  { %5097 = vmatpush.msra.mxu1 %v4097_v31  ;;  %5121 = vmatpush.msra.mxu2 %v4112_v22  ;;  %v4153_v31 = vmax.f32 %v3606_v34, 0.0  ;;  %v11965_v22 = vld [vmem:[#allocation261_spill] sm:$0xff]  ;;  %v4152_v1 = vmax.f32 %v3603_v46, 0.0  ;;  %v3582_v34 = vadd.f32 %v10685_v42, %v11974_v62 }
 0x65c   :  { %v3597_v25 = vadd.f32 %v10685_v42, %v11965_v22  ;;  %vm4239_vm9 = vcmp.ge.s32.totalorder %v4205_v6, %v9093_v17  ;;  %vm4305_vm10 = vcmp.lt.s32.totalorder %v4205_v6, %v9101_v33 }
 0x65d   :  { %5098 = vmatpush.msra.mxu1 %v4096_v24  ;;  %5122 = vmatpush.msra.mxu2 %v4111_v30  ;;  %v3642_v24 = vadd.f32 %v10685_v42, %v10082_v37  ;;  %v4151_v30 = vmax.f32 %v3600_v40, 0.0  ;;  %v3624_v40 = vadd.f32 %v10685_v42, %v11977_v47  ;;  %vm4369_vm11 = vmand %vm4239_vm9, %vm4305_vm10 }
 0x65f   :  { %5099 = vmatpush.msra.mxu1 %v4095_v23  ;;  %5123 = vmatpush.msra.mxu2 %v4110_v45  ;;  %v4166_v23 = vmax.f32 %v3645_v54, 0.0  ;;  %v4150_v45 = vmax.f32 %v3597_v25, 0.0  ;;  %v6505_v54 = vld [vmem:[%s11407_s2] ss:$0 sm:$0xff]  ;;  %v4145_v25 = vmax.f32 %v3582_v34, 0.0 }
 0x660   :  { %v3573_v14 = vadd.f32 %v6505_v54, %v11980_v28  ;;  %v4738_v28 = vadd.f32 %v10862_v26, %v10877_v32  ;;  %v11229_v32 = vld [vmem:[%s11411_s3 + $0x8] sm:$0xff] }
 0x661   :  { %5100 = vmatpush.msra.mxu1 %v4094_v8  ;;  %5124 = vmatpush.msra.mxu2 %v4109_v38  ;;  %v4165_v8 = vmax.f32 %v3642_v24, 0.0  ;;  %v11971_v38 = vld [vmem:[#allocation127_spill] sm:$0xff] }
 0x662   :  { %v3633_v4 = vadd.f32 %v10685_v42, %v11971_v38  ;;  %v4142_v60 = vmax.f32 %v3573_v14, 0.0  ;;  %v4761_v14 = vadd.f32 %v10978_v11, %v4738_v28 }
 0x663   :  { %5101 = vmatpush.msra.mxu1 %v4093_v53  ;;  %5125 = vmatpush.msra.mxu2 %v4108_v0  ;;  %v4878_v53 = vpop.f32.mrf.mxu3 }
 0x664   :  { %v4162_v46 = vmax.f32 %v3633_v4, 0.0 }
 0x665   :  { %5102 = vmatpush.msra.mxu1 %v4092_v44  ;;  %5126 = vmatpush.msra.mxu2 %v4107_v35  ;;  %v11113_v58 = vpop.f32.mrf.mxu1  ;;  %v3585_v44 = vadd.f32 %v10685_v42, %v11972_v55  ;;  %v4148_v35 = vmax.f32 %v3591_v29, 0.0  ;;  %v11983_v29 = vld [vmem:[#allocation267_spill] sm:$0xff] }
 0x666   :  { %6425 = vmatmul.msk.f32.vlgmr.msra.gmra.mxu2 %vm4367_vm14, %v11656_v2  ;;  %vm4271_vm14 = vcmp.ge.s32.totalorder %v4205_v6, %v9449_v21 }
 0x667   :  { %5180 = vmatpush.msrb.mxu2 %v4170_v19  ;;  %5103 = vmatpush.msra.mxu1 %v4091_v5  ;;  %v11975_v19 = vld [vmem:[#allocation136_spill] sm:$0xff] }
 0x668   :  { %6423 = vmatmul.msk.f32.vlgmr.msra.gmra.mxu1 %vm4366_vm15, %v11656_v2  ;;  %v3627_v27 = vadd.f32 %v10685_v42, %v11975_v19  ;;  %vm4337_vm15 = vcmp.lt.s32.totalorder %v4205_v6, %v9455_v51 }
 0x669   :  { %5157 = vmatpush.msrb.mxu1 %v4154_v59  ;;  %5181 = vmatpush.msrb.mxu2 %v4169_v56  ;;  %v11131_v10 = vpop.f32.mrf.mxu2  ;;  %v11976_v59 = vld [vmem:[#allocation255_spill] sm:$0xff]  ;;  %v4146_v56 = vmax.f32 %v3585_v44, 0.0  ;;  %vm4401_vm2 = vmand %vm4271_vm14, %vm4337_vm15 }
 0x66a   :  { %v3579_v49 = vadd.f32 %v10685_v42, %v11976_v59  ;;  %v3618_v42 = vadd.f32 %v6505_v54, %v11981_v20 }
 0x66b   :  { %5158 = vmatpush.msrb.mxu1 %v4153_v31  ;;  %5182 = vmatpush.msrb.mxu2 %v4168_v3  ;;  %v4161_v31 = vmax.f32 %v3630_v48, 0.0  ;;  %v11978_v3 = vld [vmem:[#allocation254_spill] sm:$0xff]  ;;  %v4944_v48 = vpop.f32.mrf.mxu3 }
 0x66c   :  { %v3576_v22 = vadd.f32 %v6505_v54, %v11978_v3  ;;  %v4157_v4 = vmax.f32 %v3618_v42, 0.0 }
 0x66d   :  { %5159 = vmatpush.msrb.mxu1 %v4152_v1  ;;  %5183 = vmatpush.msrb.mxu2 %v4167_v18  ;;  %v4832_v37 = vpop.f32.mrf.mxu1  ;;  %v11979_v1 = vld [vmem:[#allocation238_spill] sm:$0xff]  ;;  %v4160_v18 = vmax.f32 %v3627_v27, 0.0 }
 0x66e   :  { %6426 = vmatmul.msk.f32.gmra.mxu2 %vm4399_vm5, %v11656_v2  ;;  %v4833_v52 = vadd.f32 %v4832_v37, %v11052_v9  ;;  %v4164_v9 = vmax.f32 %v3639_v43, 0.0  ;;  %v3621_v24 = vadd.f32 %v6505_v54, %v11979_v1  ;;  %v4159_v43 = vmax.f32 %v3624_v40, 0.0  ;;  %v11982_v37 = vld [vmem:[#allocation250_spill] sm:$0xff] }
 0x66f   :  { %5160 = vmatpush.msrb.mxu1 %v4151_v30  ;;  %5184 = vmatpush.msrb.mxu2 %v4166_v23  ;;  %v4144_v30 = vmax.f32 %v3579_v49, 0.0  ;;  %v4206_v23 = vadd.s32 3968, %v9098_v12  ;;  %v4143_v36 = vmax.f32 %v3576_v22, 0.0 }
 0x670   :  { %6424 = vmatmul.msk.f32.gmra.mxu1 %vm4398_vm6, %v11656_v2  ;;  %v4158_v41 = vmax.f32 %v3621_v24, 0.0  ;;  %vm5555_vm6 = vcmask 257024  }
 0x671   :  { %5161 = vmatpush.msrb.mxu1 %v4150_v45  ;;  %5185 = vmatpush.msrb.mxu2 %v4165_v8  ;;  %v4855_v39 = vpop.f32.mrf.mxu2  ;;  %v3615_v45 = vadd.f32 %v6505_v54, %v11983_v29  ;;  %v11984_v8 = vld [vmem:[#allocation248_spill] sm:$0xff]  ;;  %vm4240_vm7 = vcmp.ge.s32.totalorder %v4206_v23, %v9093_v17  ;;  %vm4306_vm8 = vcmp.lt.s32.totalorder %v4206_v23, %v9101_v33 }
 0x672   :  { %v4856_v0 = vadd.f32 %v4855_v39, %v4833_v52  ;;  %v3570_v52 = vadd.f32 %v6505_v54, %v11982_v37  ;;  %v3567_v50 = vadd.f32 %v6505_v54, %v11984_v8  ;;  %vm4370_vm1 = vmand %vm4240_vm7, %vm4306_vm8  ;;  %vm4272_vm12 = vcmp.ge.s32.totalorder %v4206_v23, %v9449_v21 }
 0x673   :  { %5162 = vmatpush.msrb.mxu1 %v4149_v15  ;;  %5186 = vmatpush.msrb.mxu2 %v4164_v9  ;;  %v11985_v15 = vld [vmem:[#allocation266_spill] sm:$0xff]  ;;  %vm4338_vm13 = vcmp.lt.s32.totalorder %v4206_v23, %v9455_v51  ;;  %v4947_v34 = vpop.f32.mrf.mxu3 }
 0x674   :  { %v11169_v5 = vadd.f32 %v4878_v53, %v4856_v0  ;;  %v3612_v38 = vadd.f32 %v6505_v54, %v11985_v15  ;;  %v11986_v9 = vld [vmem:[#allocation246_spill] sm:$0xff]  ;;  %v4141_v53 = vmax.f32 %v3570_v52, 0.0  ;;  %v4156_v0 = vmax.f32 %v3615_v45, 0.0  ;;  %vm4402_vm0 = vmand %vm4272_vm12, %vm4338_vm13  ;;  %v11223_v52 = vld [vmem:[%s11411_s3 + $0x10] sm:$0xff] }
 0x675   :  { %5163 = vmatpush.msrb.mxu1 %v4148_v35  ;;  %5187 = vmatpush.msrb.mxu2 %v4163_v57  ;;  %v3564_v39 = vadd.f32 %v6505_v54, %v11986_v9  ;;  %v4140_v55 = vmax.f32 %v3567_v50, 0.0 }
 0x676   :  { %v4155_v44 = vmax.f32 %v3612_v38, 0.0 }
 0x677   :  { %5164 = vmatpush.msrb.mxu1 %v4147_v61  ;;  %5188 = vmatpush.msrb.mxu2 %v4162_v46  ;;  %v4139_v35 = vmax.f32 %v3564_v39, 0.0 }
 0x679   :  { %5165 = vmatpush.msrb.mxu1 %v4146_v56  ;;  %5189 = vmatpush.msrb.mxu2 %v4161_v31 }
 0x67b   :  { %5166 = vmatpush.msrb.mxu1 %v4145_v25  ;;  %5190 = vmatpush.msrb.mxu2 %v4160_v18  ;;  %v5013_v46 = vpop.f32.mrf.mxu3  ;;  %v11209_v18 = vld [vmem:[%s11411_s3 + $0x18] sm:$0xff] }
 0x67c   :  { %5225 = vmatpush.msrb.mxu3 %v11209_v18 }
 0x67d   :  { %5167 = vmatpush.msrb.mxu1 %v4144_v30  ;;  %5191 = vmatpush.msrb.mxu2 %v4159_v43  ;;  %v4784_v30 = vadd.f32 %v10998_v16, %v4761_v14  ;;  %v11235_v16 = vld [vmem:[%s11411_s3] sm:$0xff]  ;;  %v5281_v14 = vld [vmem:[%s11412_s6 + $0x8] sm:$0xff] }
 0x67e   :  { %5226 = vmatpush.msrb.mxu3 %v11223_v52 }
 0x67f   :  { %5168 = vmatpush.msrb.mxu1 %v4143_v36  ;;  %5192 = vmatpush.msrb.mxu2 %v4158_v41  ;;  %v4807_v20 = vadd.f32 %v10992_v13, %v4784_v30 }
 0x680   :  { %5227 = vmatpush.msrb.mxu3 %v11229_v32 }
 0x681   :  { %5169 = vmatpush.msrb.mxu1 %v4142_v60  ;;  %5193 = vmatpush.msrb.mxu2 %v4157_v4  ;;  %v4830_v42 = vadd.f32 %v11113_v58, %v4807_v20  ;;  %v5280_v20 = vld [vmem:[%s11412_s6] sm:$0xff] }
 0x682   :  { %5228 = vmatpush.msrb.mxu3 %v11235_v16 }
 0x683   :  { %5170 = vmatpush.msrb.mxu1 %v4141_v53  ;;  %5194 = vmatpush.msrb.mxu2 %v4156_v0  ;;  %v4853_v43 = vadd.f32 %v11131_v10, %v4830_v42 }
 0x685   :  { %5171 = vmatpush.msrb.mxu1 %v4140_v55  ;;  %5195 = vmatpush.msrb.mxu2 %v4155_v44  ;;  %v4898_v7 = vpop.f32.mrf.mxu1  ;;  %v4876_v37 = vadd.f32 %v11120_v63, %v4853_v43  ;;  %v6507_v44 = vmov 8.0  }
 0x686   :  { %6431 = vmatmul.msk.f32.vlgmr.msrb.gmra.mxu2 %vm4370_vm1, %v11656_v2  ;;  %6476 = vrcp.f32 %v6507_v44 }
 0x687   :  { %5172 = vmatpush.msrb.mxu1 %v4139_v35  ;;  %v4899_v26 = vadd.f32 %v4898_v7, %v4876_v37  ;;  %v11280_v37 = vld [vmem:[%s11413_s12] sm:$0xf] }
 0x688   :  { %6429 = vmatmul.msk.f32.vlgmr.msrb.gmra.mxu1 %vm4369_vm11, %v11656_v2 }
 0x689   :  { %v4921_v17 = vpop.f32.mrf.mxu2  ;;  %v5016_v51 = vpop.f32.mrf.mxu3 }
 0x68a   :  { %v4922_v13 = vadd.f32 %v4921_v17, %v4899_v26  ;;  %v5554_v26 = vmul.f32 %v11280_v37, %v11280_v37 }
 0x68c   :  { %v4945_v63 = vadd.f32 %v4944_v48, %v4922_v13  ;;  %v6477_v35 = vpop.eup %6476 }
 0x68d   :  { %v4901_v33 = vpop.f32.mrf.mxu1  ;;  %v5242_v48 = vmul.f32 8.0, %v6477_v35  ;;  %vm5246_vm5 = vweird.f32 %v6477_v35 }
 0x68e   :  { %6432 = vmatmul.msk.f32.gmra.mxu2 %vm4402_vm0, %v11656_v2  ;;  %v4902_v57 = vadd.f32 %v4901_v33, %v11169_v5 }
 0x68f   :  { %v5243_v17 = vsub.f32 1.0, %v5242_v48 }
 0x690   :  { %6430 = vmatmul.msk.f32.gmra.mxu1 %vm4401_vm2, %v11656_v2 }
 0x691   :  { %v4924_v62 = vpop.f32.mrf.mxu2 }
 0x692   :  { %v4925_v61 = vadd.f32 %v4924_v62, %v4902_v57 }
 0x694   :  { %v4948_v19 = vadd.f32 %v4947_v34, %v4925_v61  ;;  %v5244_v34 = vmul.f32 %v6477_v35, %v5243_v17 }
 0x6a3   :  { %v5082_v54 = vpop.f32.mrf.mxu3 }
 0x6a5   :  { %v4967_v27 = vpop.f32.mrf.mxu1 }
 0x6a6   :  { %v4968_v36 = vadd.f32 %v4967_v27, %v4945_v63  ;;  %v5245_v27 = vadd.f32 %v6477_v35, %v5244_v34 }
 0x6a9   :  { %v4990_v59 = vpop.f32.mrf.mxu2 }
 0x6aa   :  { %v4991_v45 = vadd.f32 %v4990_v59, %v4968_v36 }
 0x6ab   :  { %v5085_v2 = vpop.f32.mrf.mxu3 }
 0x6ac   :  { %v5014_v6 = vadd.f32 %v5013_v46, %v4991_v45 }
 0x6ad   :  { %v4970_v49 = vpop.f32.mrf.mxu1 }
 0x6ae   :  { %v4971_v21 = vadd.f32 %v4970_v49, %v4948_v19  ;;  %v11244_v49 = vsel %vm5246_vm5, %v6477_v35, %v5245_v27 }
 0x6b1   :  { %v4993_v56 = vpop.f32.mrf.mxu2 }
 0x6b2   :  { %v4994_v47 = vadd.f32 %v4993_v56, %v4971_v21 }
 0x6b3   :  { %v5151_v4 = vpop.f32.mrf.mxu3 }
 0x6b4   :  { %v5017_v40 = vadd.f32 %v5016_v51, %v4994_v47  ;;  %v5287_v51 = vld [vmem:[%s11412_s6 + $0x38] sm:$0xff] }
 0x6b5   :  { %5299 = vmatpush.msra.mxu3 %v5287_v51  ;;  %5408 = vmatpush.msra.mxu1 %v5287_v51 }
 0x6bb   :  { %v11241_v7 = vpop.f32.mrf.mxu3 }
 0x6c5   :  { %v5036_v31 = vpop.f32.mrf.mxu1 }
 0x6c6   :  { %v5037_v8 = vadd.f32 %v5036_v31, %v5014_v6 }
 0x6c9   :  { %v5059_v3 = vpop.f32.mrf.mxu2 }
 0x6ca   :  { %v5060_v50 = vadd.f32 %v5059_v3, %v5037_v8 }
 0x6cc   :  { %v5083_v60 = vadd.f32 %v5082_v54, %v5060_v50  ;;  %v5285_v54 = vld [vmem:[%s11412_s6 + $0x28] sm:$0xff] }
 0x6cd   :  { %v5039_v22 = vpop.f32.mrf.mxu1 }
 0x6ce   :  { %v5040_v5 = vadd.f32 %v5039_v22, %v5017_v40  ;;  %v5286_v40 = vld [vmem:[%s11412_s6 + $0x30] sm:$0xff] }
 0x6cf   :  { %5300 = vmatpush.msra.mxu3 %v5286_v40  ;;  %5409 = vmatpush.msra.mxu1 %v5286_v40 }
 0x6d1   :  { %v5062_v25 = vpop.f32.mrf.mxu2  ;;  %5301 = vmatpush.msra.mxu3 %v5285_v54  ;;  %5410 = vmatpush.msra.mxu1 %v5285_v54 }
 0x6d2   :  { %v5063_v1 = vadd.f32 %v5062_v25, %v5040_v5  ;;  %v5284_v5 = vld [vmem:[%s11412_s6 + $0x20] sm:$0xff] }
 0x6d3   :  { %5302 = vmatpush.msra.mxu3 %v5284_v5  ;;  %5411 = vmatpush.msra.mxu1 %v5284_v5 }
 0x6d4   :  { %v5086_v24 = vadd.f32 %v5085_v2, %v5063_v1  ;;  %v5283_v2 = vld [vmem:[%s11412_s6 + $0x18] sm:$0xff] }
 0x6d5   :  { %5303 = vmatpush.msra.mxu3 %v5283_v2  ;;  %5412 = vmatpush.msra.mxu1 %v5283_v2 }
 0x6e5   :  { %v5105_v23 = vpop.f32.mrf.mxu1 }
 0x6e6   :  { %v5106_v15 = vadd.f32 %v5105_v23, %v5083_v60 }
 0x6e9   :  { %v5128_v11 = vpop.f32.mrf.mxu2 }
 0x6ea   :  { %v5129_v38 = vadd.f32 %v5128_v11, %v5106_v15 }
 0x6ec   :  { %v5152_v39 = vadd.f32 %v5151_v4, %v5129_v38 }
 0x6ed   :  { %v5108_v58 = vpop.f32.mrf.mxu1 }
 0x6ee   :  { %v5109_v10 = vadd.f32 %v5108_v58, %v5086_v24  ;;  %v5282_v24 = vld [vmem:[%s11412_s6 + $0x10] sm:$0xff] }
 0x6ef   :  { %5304 = vmatpush.msra.mxu3 %v5282_v24  ;;  %5413 = vmatpush.msra.mxu1 %v5282_v24 }
 0x6f1   :  { %v5131_v29 = vpop.f32.mrf.mxu2  ;;  %5305 = vmatpush.msra.mxu3 %v5281_v14  ;;  %5414 = vmatpush.msra.mxu1 %v5281_v14 }
 0x6f2   :  { %v11238_v41 = vadd.f32 %v5131_v29, %v5109_v10  ;;  %v11293_v29 = vld [vmem:[%s11410_s5] ss:$0 sm:$0xff] }
 0x6f3   :  { %5306 = vmatpush.msra.mxu3 %v5280_v20  ;;  %5415 = vmatpush.msra.mxu1 %v5280_v20 }
 0x6f4   :  { %v5155_v60 = vadd.f32 %v11241_v7, %v11238_v41 }
 0x705   :  { %v5174_v9 = vpop.f32.mrf.mxu1 }
 0x706   :  { %v5175_v53 = vadd.f32 %v5174_v9, %v5152_v39 }
 0x709   :  { %v5197_v0 = vpop.f32.mrf.mxu2 }
 0x70a   :  { %v5198_v55 = vadd.f32 %v5197_v0, %v5175_v53 }
 0x70c   :  { %6433 = vmatmul.msk.f32.vlgmr.msrb.gmra.mxu3 %vm5209_vm3, %v5198_v55 }
 0x70d   :  { %5356 = vmatpush.msrb.mxu3 %v11209_v18  ;;  %v5556_v18 = vsel %vm5555_vm6, %v5554_v26, 0.0  ;;  %v5177_v50 = vpop.f32.mrf.mxu1 }
 0x70e   :  { %5557 = vadd.xlane.f32.xlu0 %v5556_v18  ;;  %v5178_v38 = vadd.f32 %v5177_v50, %v5155_v60 }
 0x70f   :  { %5357 = vmatpush.msrb.mxu3 %v11223_v52 }
 0x711   :  { %5358 = vmatpush.msrb.mxu3 %v11229_v32  ;;  %v5200_v15 = vpop.f32.mrf.mxu2 }
 0x712   :  { %v5201_v4 = vadd.f32 %v5200_v15, %v5178_v38 }
 0x713   :  { %5359 = vmatpush.msrb.mxu3 %v11235_v16  ;;  %v11288_v16 = vld [vmem:[%s11409_s4] ss:$0 sm:$0xff] }
 0x781   :  { %v5558_v34 = vpop.xlane.xlu0 %5557 }
 0x782   :  { %v5559_v27 = vmax.f32 %v5558_v34, 1e-24 }
 0x784   :  { %vm5566_vm10 = vweird.f32 %v5559_v27 }
 0x78f   :  { %v5230_v33 = vpop.f32.mrf.mxu3 }
 0x790   :  { %v5234_v57 = vsel %vm5233_vm4, %v5230_v33, 0.0 }
 0x791   :  { %v5235_v62 = vrot.slane %v5234_v57, 4 }
 0x793   :  { %v5236_v61 = vadd.f32 %v5235_v62, %v5234_v57 }
 0x795   :  { %v5237_v19 = vrot.slane %v5236_v61, 2 }
 0x797   :  { %v5238_v46 = vadd.f32 %v5237_v19, %v5236_v61 }
 0x799   :  { %v5239_v59 = vrot.slane %v5238_v46, 1 }
 0x79b   :  { %v5240_v21 = vadd.f32 %v5239_v59, %v5238_v46  ;;  %v5453_v46 = vld [vmem:[%s11414_s7 + $0x18] sm:$0xff] }
 0x79c   :  { %5471 = vmatpush.msra.mxu2 %v5453_v46 }
 0x79d   :  { %v5248_v56 = vmul.f32 %v11244_v49, %v5240_v21 }
 0x79f   :  { %v5249_v47 = vsub.f32 %v5230_v33, %v5248_v56  ;;  %v5452_v56 = vld [vmem:[%s11414_s7 + $0x10] sm:$0xff] }
 0x7a0   :  { %5472 = vmatpush.msra.mxu2 %v5452_v56 }
 0x7a1   :  { %v5250_v31 = vmul.f32 %v5249_v47, %v5249_v47 }
 0x7a3   :  { %v5251_v3 = vsel %vm5233_vm4, %v5250_v31, 0.0  ;;  %v5451_v31 = vld [vmem:[%s11414_s7 + $0x8] sm:$0xff] }
 0x7a4   :  { %v5252_v22 = vrot.slane %v5251_v3, 4  ;;  %5473 = vmatpush.msra.mxu2 %v5451_v31 }
 0x7a6   :  { %v5253_v25 = vadd.f32 %v5252_v22, %v5251_v3  ;;  %v5450_v22 = vld [vmem:[%s11414_s7] sm:$0xff] }
 0x7a7   :  { %5474 = vmatpush.msra.mxu2 %v5450_v22 }
 0x7a8   :  { %v5254_v1 = vrot.slane %v5253_v25, 2 }
 0x7aa   :  { %v5255_v28 = vadd.f32 %v5254_v1, %v5253_v25 }
 0x7ac   :  { %v5256_v30 = vrot.slane %v5255_v28, 1 }
 0x7ae   :  { %v5257_v42 = vadd.f32 %v5256_v30, %v5255_v28 }
 0x7b0   :  { %v5258_v43 = vmul.f32 %v5257_v42, %v11244_v49 }
 0x7b2   :  { %v5259_v23 = vadd.f32 1e-05, %v5258_v43 }
 0x7b4   :  { %6478 = vrsqrt.f32 %v5259_v23  ;;  %vm5266_vm8 = vweird.f32 %v5259_v23 }
 0x7b5   :  { %6480 = vrsqrt.f32 %v5559_v27 }
 0x7ba   :  { %v6479_v11 = vpop.eup %6478 }
 0x7bb   :  { %v5261_v52 = vmul.f32 %v6479_v11, %v5259_v23  ;;  %vm5267_vm7 = vweird.f32 %v6479_v11  ;;  %v6481_v5 = vpop.eup %6480 }
 0x7bc   :  { %vm5268_vm9 = vmor %vm5266_vm8, %vm5267_vm7  ;;  %v5561_v1 = vmul.f32 %v6481_v5, %v5559_v27  ;;  %vm5567_vm1 = vweird.f32 %v6481_v5 }
 0x7bd   :  { %v5262_v13 = vmul.f32 %v6479_v11, %v5261_v52  ;;  %vm5568_vm11 = vmor %vm5566_vm10, %vm5567_vm1 }
 0x7be   :  { %v5562_v14 = vmul.f32 %v6481_v5, %v5561_v1 }
 0x7bf   :  { %v5263_v58 = vmul.f32 0.5, %v5262_v13 }
 0x7c0   :  { %v5563_v43 = vmul.f32 0.5, %v5562_v14 }
 0x7c1   :  { %v5264_v32 = vsub.f32 1.5, %v5263_v58 }
 0x7c2   :  { %v5564_v18 = vsub.f32 1.5, %v5563_v43 }
 0x7c3   :  { %v5265_v63 = vmul.f32 %v6479_v11, %v5264_v32 }
 0x7c4   :  { %v5565_v13 = vmul.f32 %v6481_v5, %v5564_v18 }
 0x7c5   :  { %v5269_v10 = vsel %vm5268_vm9, %v6479_v11, %v5265_v63 }
 0x7c6   :  { %v5270_v36 = vmul.f32 %v5269_v10, %v5249_v47  ;;  %v5569_v63 = vsel %vm5568_vm11, %v6481_v5, %v5565_v13 }
 0x7c8   :  { %v5274_v45 = vmul.f32 %v11288_v16, %v5270_v36  ;;  %v5570_v36 = vmul.f32 %v5569_v63, %v11280_v37 }
 0x7ca   :  { %v5278_v6 = vadd.f32 %v11293_v29, %v5274_v45  ;;  %6439 = vmatpush.xpose.msk.msrb.mxu1 %vm5209_vm3, %v5570_v36  ;;  %6441 = vmatpush.xpose.msk.msrb.mxu2 %vm5209_vm3, %v5570_v36  ;;  %v5522_v36 = vld [vmem:[%s11417_s10 + $0x20] sm:$0xff] }
 0x7cc   :  { %v5279_v8 = vmax.f32 %v5278_v6, 0.0 }
 0x7ce   :  { %6434 = vmatmul.msk.f32.vlgmr.msra.gmra.mxu3 %vm5233_vm4, %v5279_v8 }
 0x7d6   :  { %6435 = vmatmul.msk.f32.vlgmr.msrb.gmra.mxu3 %vm5209_vm3, %v5201_v4 }
 0x851   :  { %v5308_v9 = vpop.f32.mrf.mxu3 }
 0x852   :  { %v5311_v39 = vsel %vm5209_vm3, %v5308_v9, 0.0 }
 0x853   :  { %v5312_v53 = vrot.slane %v5311_v39, 4 }
 0x855   :  { %v5313_v0 = vadd.f32 %v5312_v53, %v5311_v39 }
 0x857   :  { %v5314_v55 = vrot.slane %v5313_v0, 2 }
 0x859   :  { %v5315_v44 = vadd.f32 %v5314_v55, %v5313_v0  ;;  %v5361_v35 = vpop.f32.mrf.mxu3 }
 0x85a   :  { %v5364_v48 = vsel %vm5233_vm4, %v5361_v35, 0.0 }
 0x85b   :  { %v5316_v17 = vrot.slane %v5315_v44, 1  ;;  %v5365_v33 = vrot.slane %v5364_v48, 4 }
 0x85d   :  { %v5317_v57 = vadd.f32 %v5316_v17, %v5315_v44  ;;  %v5366_v62 = vadd.f32 %v5365_v33, %v5364_v48 }
 0x85f   :  { %v5318_v41 = vmul.f32 %v5317_v57, %v11244_v49  ;;  %v5367_v7 = vrot.slane %v5366_v62, 2 }
 0x861   :  { %v11304_v61 = vsub.f32 %v5308_v9, %v5318_v41  ;;  %v5368_v19 = vadd.f32 %v5367_v7, %v5366_v62 }
 0x863   :  { %v5320_v59 = vmul.f32 %v11304_v61, %v11304_v61  ;;  %v5369_v21 = vrot.slane %v5368_v19, 1 }
 0x865   :  { %v5321_v51 = vsel %vm5209_vm3, %v5320_v59, 0.0  ;;  %v5370_v47 = vadd.f32 %v5369_v21, %v5368_v19 }
 0x866   :  { %v5322_v40 = vrot.slane %v5321_v51, 4 }
 0x867   :  { %v5371_v54 = vmul.f32 %v5370_v47, %v11244_v49 }
 0x868   :  { %v5323_v3 = vadd.f32 %v5322_v40, %v5321_v51 }
 0x869   :  { %v5372_v25 = vsub.f32 %v5361_v35, %v5371_v54 }
 0x86a   :  { %v5324_v2 = vrot.slane %v5323_v3, 2 }
 0x86b   :  { %v5373_v24 = vmul.f32 %v5372_v25, %v5372_v25 }
 0x86c   :  { %v5325_v28 = vadd.f32 %v5324_v2, %v5323_v3 }
 0x86d   :  { %v5374_v30 = vsel %vm5233_vm4, %v5373_v24, 0.0 }
 0x86e   :  { %v5326_v20 = vrot.slane %v5325_v28, 1  ;;  %v5375_v42 = vrot.slane %v5374_v30, 4 }
 0x870   :  { %v5327_v23 = vadd.f32 %v5326_v20, %v5325_v28  ;;  %v5376_v26 = vadd.f32 %v5375_v42, %v5374_v30 }
 0x872   :  { %v5328_v11 = vmul.f32 %v5327_v23, %v11244_v49  ;;  %v5377_v52 = vrot.slane %v5376_v26, 2 }
 0x874   :  { %v5329_v58 = vadd.f32 1e-05, %v5328_v11  ;;  %v5378_v32 = vadd.f32 %v5377_v52, %v5376_v26  ;;  %v5525_v26 = vld [vmem:[%s11417_s10 + $0x38] sm:$0xff]  ;;  %v5524_v52 = vld [vmem:[%s11417_s10 + $0x30] sm:$0xff] }
 0x875   :  { %5541 = vmatpush.msra.mxu3 %v5525_v26 }
 0x876   :  { %6482 = vrsqrt.f32 %v5329_v58  ;;  %v5379_v10 = vrot.slane %v5378_v32, 1  ;;  %vm5336_vm13 = vweird.f32 %v5329_v58 }
 0x877   :  { %5542 = vmatpush.msra.mxu3 %v5524_v52 }
 0x878   :  { %v5380_v45 = vadd.f32 %v5379_v10, %v5378_v32  ;;  %v5523_v32 = vld [vmem:[%s11417_s10 + $0x28] sm:$0xff] }
 0x879   :  { %5543 = vmatpush.msra.mxu3 %v5523_v32 }
 0x87a   :  { %v5381_v6 = vmul.f32 %v5380_v45, %v11244_v49 }
 0x87b   :  { %5544 = vmatpush.msra.mxu3 %v5522_v36 }
 0x87c   :  { %v6483_v8 = vpop.eup %6482  ;;  %v5382_v50 = vadd.f32 1e-05, %v5381_v6 }
 0x87d   :  { %v5331_v60 = vmul.f32 %v6483_v8, %v5329_v58  ;;  %vm5337_vm12 = vweird.f32 %v6483_v8 }
 0x87e   :  { %6484 = vrsqrt.f32 %v5382_v50  ;;  %vm5338_vm14 = vmor %vm5336_vm13, %vm5337_vm12  ;;  %vm5389_vm0 = vweird.f32 %v5382_v50 }
 0x87f   :  { %v5332_v15 = vmul.f32 %v6483_v8, %v5331_v60 }
 0x881   :  { %v5333_v38 = vmul.f32 0.5, %v5332_v15  ;;  %v5520_v15 = vld [vmem:[%s11417_s10 + $0x10] sm:$0xff] }
 0x883   :  { %v5334_v4 = vsub.f32 1.5, %v5333_v38 }
 0x884   :  { %v6485_v9 = vpop.eup %6484 }
 0x885   :  { %v5335_v39 = vmul.f32 %v6483_v8, %v5334_v4  ;;  %v5384_v53 = vmul.f32 %v6485_v9, %v5382_v50  ;;  %vm5390_vm15 = vweird.f32 %v6485_v9 }
 0x886   :  { %vm5391_vm2 = vmor %vm5389_vm0, %vm5390_vm15 }
 0x887   :  { %v5339_v0 = vsel %vm5338_vm14, %v6483_v8, %v5335_v39  ;;  %v5385_v55 = vmul.f32 %v6485_v9, %v5384_v53  ;;  %v5521_v8 = vld [vmem:[%s11417_s10 + $0x18] sm:$0xff]  ;;  %vm5614_vm14 = vcmask 31744  }
 0x888   :  { %v5340_v44 = vmul.f32 %v5339_v0, %v11304_v61  ;;  %5545 = vmatpush.msra.mxu3 %v5521_v8  ;;  %v5518_v0 = vld [vmem:[%s11417_s10] sm:$0xff] }
 0x889   :  { %v5386_v35 = vmul.f32 0.5, %v5385_v55 }
 0x88a   :  { %6437 = vmatmul.msk.f32.vlgmr.msra.gmra.mxu2 %vm5209_vm3, %v5340_v44  ;;  %v5635_v48 = vmul.f32 %v5340_v44, %v5340_v44  ;;  %v5698_v61 = vsel %vm5209_vm3, %v5340_v44, 1.0  ;;  %5546 = vmatpush.msra.mxu3 %v5520_v15 }
 0x88b   :  { %v5387_v17 = vsub.f32 1.5, %v5386_v35 }
 0x88c   :  { %v5636_v33 = vsel %vm5209_vm3, %v5635_v48, 0.0 }
 0x88d   :  { %v5388_v57 = vmul.f32 %v6485_v9, %v5387_v17  ;;  %5637 = vadd.xlane.f32.xlu0 %v5636_v33 }
 0x88f   :  { %v5392_v62 = vsel %vm5391_vm2, %v6485_v9, %v5388_v57  ;;  %v5519_v9 = vld [vmem:[%s11417_s10 + $0x8] sm:$0xff] }
 0x890   :  { %v5393_v41 = vmul.f32 %v5392_v62, %v5372_v25  ;;  %5547 = vmatpush.msra.mxu3 %v5519_v9 }
 0x892   :  { %v5394_v7 = vmul.f32 %v11288_v16, %v5393_v41  ;;  %5548 = vmatpush.msra.mxu3 %v5518_v0 }
 0x894   :  { %v5395_v34 = vadd.f32 %v11293_v29, %v5394_v7 }
 0x896   :  { %v5396_v19 = vmax.f32 %v5395_v34, 0.0 }
 0x898   :  { %6436 = vmatmul.msk.f32.vlgmr.msra.gmra.mxu1 %vm5233_vm4, %v5396_v19 }
 0x899   :  { %5750 = vmatpush.msra.mxu1 %v5698_v61 }
 0x900   :  { %v5638_v27 = vpop.xlane.xlu0 %5637 }
 0x901   :  { %v5639_v46 = vmax.f32 %v5638_v27, 1e-24 }
 0x903   :  { %6486 = vrsqrt.f32 %v5639_v46  ;;  %vm5646_vm7 = vweird.f32 %v5639_v46 }
 0x909   :  { %v6487_v59 = vpop.eup %6486 }
 0x90a   :  { %v5641_v21 = vmul.f32 %v6487_v59, %v5639_v46  ;;  %vm5647_vm5 = vweird.f32 %v6487_v59 }
 0x90b   :  { %vm5648_vm8 = vmor %vm5646_vm7, %vm5647_vm5 }
 0x90c   :  { %v5642_v56 = vmul.f32 %v6487_v59, %v5641_v21 }
 0x90d   :  { %v5476_v51 = vpop.f32.mrf.mxu2 }
 0x90e   :  { %v5643_v47 = vmul.f32 0.5, %v5642_v56  ;;  %v5479_v40 = vsel %vm5233_vm4, %v5476_v51, 0.0 }
 0x90f   :  { %v5480_v31 = vrot.slane %v5479_v40, 4 }
 0x910   :  { %v5644_v16 = vsub.f32 1.5, %v5643_v47 }
 0x911   :  { %v5481_v29 = vadd.f32 %v5480_v31, %v5479_v40  ;;  %v6474_v31 = vld [vmem:[%s11416_s9] ss:$0 sm:$0xff] }
 0x912   :  { %v5645_v54 = vmul.f32 %v6487_v59, %v5644_v16 }
 0x913   :  { %v5482_v3 = vrot.slane %v5481_v29, 2 }
 0x914   :  { %v5649_v22 = vsel %vm5648_vm8, %v6487_v59, %v5645_v54  ;;  %vm5731_vm8 = vcmask 64512  }
 0x915   :  { %v5650_v5 = vmul.f32 %v5649_v22, %v5340_v44  ;;  %v5483_v25 = vadd.f32 %v5482_v3, %v5481_v29  ;;  %v5417_v2 = vpop.f32.mrf.mxu1 }
 0x916   :  { %v5420_v1 = vsel %vm5209_vm3, %v5417_v2, 0.0 }
 0x917   :  { %v5484_v24 = vrot.slane %v5483_v25, 1  ;;  %v5421_v28 = vrot.slane %v5420_v1, 4  ;;  %6442 = vmatmul.msk.f32.vlgmr.msrb.gmra.mxu2 %vm5209_vm3, %v5650_v5 }
 0x919   :  { %v5485_v14 = vadd.f32 %v5484_v24, %v5483_v25  ;;  %v5422_v30 = vadd.f32 %v5421_v28, %v5420_v1 }
 0x91b   :  { %v5486_v20 = vmul.f32 %v5485_v14, %v11244_v49  ;;  %v5423_v42 = vrot.slane %v5422_v30, 2 }
 0x91d   :  { %v5487_v43 = vsub.f32 %v5476_v51, %v5486_v20  ;;  %v5424_v23 = vadd.f32 %v5423_v42, %v5422_v30  ;;  %v6473_v51 = vld [vmem:[%s11415_s8] ss:$0 sm:$0xff] }
 0x91f   :  { %v5488_v18 = vmul.f32 %v5487_v43, %v5487_v43  ;;  %v5425_v11 = vrot.slane %v5424_v23, 1 }
 0x921   :  { %v5489_v13 = vsel %vm5233_vm4, %v5488_v18, 0.0  ;;  %v5426_v58 = vadd.f32 %v5425_v11, %v5424_v23 }
 0x922   :  { %v5490_v63 = vrot.slane %v5489_v13, 4 }
 0x923   :  { %v5427_v10 = vmul.f32 %v5426_v58, %v11244_v49 }
 0x924   :  { %v5491_v45 = vadd.f32 %v5490_v63, %v5489_v13 }
 0x925   :  { %v5428_v6 = vsub.f32 %v5417_v2, %v5427_v10 }
 0x926   :  { %v5492_v50 = vrot.slane %v5491_v45, 2 }
 0x927   :  { %v5429_v60 = vmul.f32 %v5428_v6, %v5428_v6 }
 0x928   :  { %v5493_v38 = vadd.f32 %v5492_v50, %v5491_v45 }
 0x929   :  { %v5430_v4 = vsel %vm5209_vm3, %v5429_v60, 0.0 }
 0x92a   :  { %v5494_v39 = vrot.slane %v5493_v38, 1  ;;  %v5431_v53 = vrot.slane %v5430_v4, 4 }
 0x92c   :  { %v5495_v55 = vadd.f32 %v5494_v39, %v5493_v38  ;;  %v5432_v44 = vadd.f32 %v5431_v53, %v5430_v4  ;;  %v6508_v53 = vmov 0.0  }
 0x92e   :  { %v5496_v35 = vmul.f32 %v5495_v55, %v11244_v49  ;;  %v5433_v48 = vrot.slane %v5432_v44, 2 }
 0x930   :  { %v5497_v17 = vadd.f32 1e-05, %v5496_v35  ;;  %v5434_v33 = vadd.f32 %v5433_v48, %v5432_v44 }
 0x932   :  { %6488 = vrsqrt.f32 %v5497_v17  ;;  %v5435_v57 = vrot.slane %v5434_v33, 1  ;;  %vm5504_vm10 = vweird.f32 %v5497_v17 }
 0x934   :  { %v5436_v62 = vadd.f32 %v5435_v57, %v5434_v33 }
 0x936   :  { %v5437_v41 = vmul.f32 %v5436_v62, %v11244_v49  ;;  %v6510_v62 = vmov 0  }
 0x938   :  { %v6489_v7 = vpop.eup %6488  ;;  %v5438_v34 = vadd.f32 1e-05, %v5437_v41 }
 0x939   :  { %v5499_v19 = vmul.f32 %v6489_v7, %v5497_v17  ;;  %vm5505_vm9 = vweird.f32 %v6489_v7  ;;  %v6509_v17 = vmov 32  }
 0x93a   :  { %6490 = vrsqrt.f32 %v5438_v34  ;;  %vm5506_vm1 = vmor %vm5504_vm10, %vm5505_vm9  ;;  %vm5445_vm12 = vweird.f32 %v5438_v34  ;;  %6468 = vset.pattern.permute.xlu2 %v6509_v17  ;;  %6467 = vset.pattern.permute.xlu1 %v6509_v17 }
 0x93b   :  { %v5500_v61 = vmul.f32 %v6489_v7, %v5499_v19 }
 0x93d   :  { %v5501_v27 = vmul.f32 0.5, %v5500_v61 }
 0x93f   :  { %v5502_v46 = vsub.f32 1.5, %v5501_v27 }
 0x940   :  { %v6491_v59 = vpop.eup %6490 }
 0x941   :  { %v5503_v21 = vmul.f32 %v6489_v7, %v5502_v46  ;;  %v5440_v56 = vmul.f32 %v6491_v59, %v5438_v34  ;;  %vm5446_vm11 = vweird.f32 %v6491_v59 }
 0x942   :  { %vm5447_vm13 = vmor %vm5445_vm12, %vm5446_vm11 }
 0x943   :  { %v5507_v47 = vsel %vm5506_vm1, %v6489_v7, %v5503_v21  ;;  %v5441_v40 = vmul.f32 %v6491_v59, %v5440_v56  ;;  %v6475_v7 = vld [vmem:[%s11418_s11] ss:$0 sm:$0xff] }
 0x944   :  { %v5508_v49 = vmul.f32 %v5507_v47, %v5487_v43 }
 0x945   :  { %v5442_v16 = vmul.f32 0.5, %v5441_v40 }
 0x946   :  { %v5512_v29 = vmul.f32 %v6473_v51, %v5508_v49 }
 0x947   :  { %v5443_v54 = vsub.f32 1.5, %v5442_v16 }
 0x948   :  { %v5516_v3 = vadd.f32 %v6474_v31, %v5512_v29 }
 0x949   :  { %v5444_v22 = vmul.f32 %v6491_v59, %v5443_v54  ;;  %v5777_v54 = vmul.f32 0.99, %v11280_v37 }
 0x94a   :  { %v5517_v5 = vmax.f32 %v5516_v3, 0.0 }
 0x94b   :  { %v5448_v25 = vsel %vm5447_vm13, %v6491_v59, %v5444_v22 }
 0x94c   :  { %6438 = vmatmul.msk.f32.vlgmr.msra.gmra.mxu3 %vm5233_vm4, %v5517_v5  ;;  %v5449_v2 = vmul.f32 %v5448_v25, %v5428_v6 }
 0x94e   :  { %v5571_v1 = vmul.f32 %v5449_v2, %v5449_v2 }
 0x950   :  { %v5572_v24 = vsel %vm5209_vm3, %v5571_v1, 0.0 }
 0x951   :  { %5573 = vadd.xlane.f32.xlu2 %v5572_v24 }
 0x99a   :  { %v5671_v28 = vpop.f32.mrf.mxu2 }
 0x99b   :  { %v5674_v14 = vmul.f32 10.0, %v5671_v28 }
 0x99d   :  { %v5675_v30 = vsel %vm5614_vm14, %v5674_v14, -inf }
 0x99e   :  { %5676 = vmax.xlane.f32.xlu1 %v5675_v30 }
 0x9c4   :  { %v5574_v20 = vpop.xlane.xlu2 %5573 }
 0x9c5   :  { %v5575_v42 = vmax.f32 %v5574_v20, 1e-24 }
 0x9c7   :  { %6492 = vrsqrt.f32 %v5575_v42  ;;  %vm5582_vm15 = vweird.f32 %v5575_v42 }
 0x9cd   :  { %v6493_v43 = vpop.eup %6492 }
 0x9ce   :  { %v5577_v23 = vmul.f32 %v6493_v43, %v5575_v42  ;;  %vm5583_vm4 = vweird.f32 %v6493_v43 }
 0x9cf   :  { %vm5584_vm0 = vmor %vm5582_vm15, %vm5583_vm4  ;;  %v5550_v34 = vpop.f32.mrf.mxu3 }
 0x9d0   :  { %v5578_v26 = vmul.f32 %v6493_v43, %v5577_v23  ;;  %v11385_v19 = vadd.f32 %v6475_v7, %v5550_v34 }
 0x9d2   :  { %v5579_v18 = vmul.f32 0.5, %v5578_v26  ;;  %v5786_v61 = vmul.f32 %v11385_v19, %v11385_v19 }
 0x9d4   :  { %v5580_v11 = vsub.f32 1.5, %v5579_v18  ;;  %v5787_v27 = vsel %vm5209_vm3, %v5786_v61, 0.0 }
 0x9d6   :  { %v5581_v52 = vmul.f32 %v6493_v43, %v5580_v11 }
 0x9d8   :  { %v5585_v13 = vsel %vm5584_vm0, %v6493_v43, %v5581_v52 }
 0x9d9   :  { %v5586_v58 = vmul.f32 %v5585_v13, %v5449_v2 }
 0x9db   :  { %6440 = vmatmul.msk.f32.vlgmr.msrb.gmra.mxu1 %vm5209_vm3, %v5586_v58 }
 0xa11   :  { %v5677_v32 = vpop.xlane.xlu1 %5676 }
 0xa12   :  { %vm5678_vm2 = vcmp.eq.f32.partialorder %v5674_v14, %v5677_v32 }
 0xa13   :  { %v5679_v63 = vsel %vm5678_vm2, %v9098_v12, 4 }
 0xa14   :  { %v5680_v10 = vsel %vm5614_vm14, %v5679_v63, 2147483647 }
 0xa15   :  { %v5682_v36 = vshra.s32 %v5680_v10, 16  ;;  %v5681_v6 = vand.u32 65535, %v5680_v10 }
 0xa17   :  { %v5684_v45 = vcvt.s32.f32 %v5682_v36  ;;  %v5683_v50 = vcvt.s32.f32 %v5681_v6 }
 0xa19   :  { %5685 = vmin.xlane.f32.xlu1 %v5684_v45 }
 0xa58   :  { %v5610_v55 = vpop.f32.mrf.mxu1 }
 0xa59   :  { %v5613_v44 = vmul.f32 10.0, %v5610_v55 }
 0xa5b   :  { %v5615_v35 = vsel %vm5614_vm14, %v5613_v44, -inf }
 0xa8c   :  { %v5686_v8 = vpop.xlane.xlu1 %5685 }
 0xa8d   :  { %vm5687_vm5 = vcmp.eq.f32.partialorder %v5684_v45, %v5686_v8  ;;  %v5692_v15 = vcvt.f32.s32 %v5686_v8 }
 0xa8e   :  { %v5688_v60 = vsel %vm5687_vm5, %v5683_v50, inf }
 0xa8f   :  { %5689 = vmin.xlane.f32.xlu2 %v5688_v60  ;;  %v5693_v4 = vshll.u32 %v5692_v15, 16 }
 0xb02   :  { %v5690_v38 = vpop.xlane.xlu2 %5689 }
 0xb03   :  { %v5691_v9 = vcvt.f32.s32 %v5690_v38 }
 0xb05   :  { %v5694_v39 = vadd.s32 %v5693_v4, %v5691_v9 }
 0xb07   :  { %vm5695_vm7 = vcmp.eq.s32.totalorder %v9098_v12, %v5694_v39 }
 0xb08   :  { %v6443_v0 = vsel %vm5695_vm7, 1.0, %v6508_v53 }
 0xb09   :  { %5699 = vxpose.xlu0.b32.start.end [1/1] (short) (narrow) %v6443_v0, 8 }
 0xb70   :  { %6469 = vset.pattern.permute.xlu0 %v6509_v17 }
 0xb7a   :  { %5616 = vmax.xlane.f32.xlu0 %v5615_v35 }
 0xbad   :  { %v5715_v48 = vpop.trf.xlu0 }
 0xbae   :  { %6444 = vmatmul.msk.f32.vlgmr.msra.gmra.mxu1 %vm5731_vm8, %v5715_v48 }
 0xbed   :  { %v5617_v3 = vpop.xlane.xlu0 %5616 }
 0xbee   :  { %vm5618_vm13 = vcmp.eq.f32.partialorder %v5613_v44, %v5617_v3 }
 0xbef   :  { %v5619_v1 = vsel %vm5618_vm13, %v9098_v12, 4 }
 0xbf0   :  { %v5620_v30 = vsel %vm5614_vm14, %v5619_v1, 2147483647 }
 0xbf1   :  { %v5622_v42 = vshra.s32 %v5620_v30, 16  ;;  %v5621_v52 = vand.u32 65535, %v5620_v30 }
 0xbf3   :  { %v5624_v43 = vcvt.s32.f32 %v5622_v42  ;;  %v5623_v32 = vcvt.s32.f32 %v5621_v52 }
 0xc2b   :  { %v5752_v33 = vpop.f32.mrf.mxu1 }
 0xc2c   :  { %v5755_v57 = vmax.f32 %v5752_v33, 1.0  ;;  %vm5776_vm9 = vcmp.gt.f32.partialorder %v5752_v33, 0.0 }
 0xc2d   :  { %v5780_v41 = vsel %vm5776_vm9, 1, %v6510_v62  ;;  %vm5847_vm9 = vcmask 39936  }
 0xc2e   :  { %5782 = vperm.xlu2 %6468, %v5780_v41   ;;  %5758 = vperm.xlu1 %6467, %v5755_v57  }
 0xc58   :  { %5788 = vadd.xlane.f32.xlu1 %v5787_v27 }
 0xc88   :  { %v5783_v5 = vpop.permute.xlu2 %5782 }
 0xc89   :  { %vm5784_vm4 = vcmp.eq.s32.totalorder %v5783_v5, 1 }
 0xca0   :  { %v5759_v46 = vpop.permute.xlu1 %5758 }
 0xca1   :  { %6494 = vrcp.f32 %v5759_v46  ;;  %v5772_v51 = vand.u32 2147483648, %v5759_v46  ;;  %v5770_v40 = vand.u32 2147483647, %v5759_v46  ;;  %vm5766_vm1 = vweird.f32 %v5759_v46 }
 0xca3   :  { %v5773_v31 = vor.u32 1.1754944e-38, %v5772_v51  ;;  %vm5771_vm12 = vcmp.eq.f32.partialorder %v5770_v40, 8.507059e+37 }
 0xca7   :  { %v6495_v59 = vpop.eup %6494 }
 0xca8   :  { %v5762_v21 = vmul.f32 %v6495_v59, %v5759_v46  ;;  %vm5767_vm10 = vweird.f32 %v6495_v59 }
 0xca9   :  { %vm5768_vm11 = vmor %vm5766_vm1, %vm5767_vm10 }
 0xcaa   :  { %v5763_v56 = vsub.f32 1.0, %v5762_v21 }
 0xcac   :  { %v5764_v47 = vmul.f32 %v6495_v59, %v5763_v56 }
 0xcae   :  { %v5765_v49 = vadd.f32 %v6495_v59, %v5764_v47 }
 0xcb0   :  { %v5769_v16 = vsel %vm5768_vm11, %v6495_v59, %v5765_v49 }
 0xcb1   :  { %v5774_v29 = vsel %vm5771_vm12, %v5773_v31, %v5769_v16 }
 0xcb2   :  { %v5775_v22 = vmul.f32 %v5774_v29, %v5752_v33 }
 0xcb4   :  { %v5778_v25 = vmul.f32 0.01, %v5775_v22 }
 0xcb6   :  { %v5779_v2 = vadd.f32 %v5778_v25, %v5777_v54 }
 0xcb8   :  { %v5785_v24 = vsel %vm5784_vm4, %v5779_v2, %v11280_v37 }
 0xcb9   :  { %v5802_v28 = vmul.f32 %v5785_v24, %v5785_v24  ;;  %v5849_v14 = vsel %vm5209_vm3, %v5785_v24, 0.0 }
 0xcba   :  { %5851 = vst [vmem:[%s11419_s13 + $0x8] sm:$0xf] %v5849_v14 }
 0xcbb   :  { %v5803_v20 = vsel %vm5555_vm6, %v5802_v28, 0.0 }
 0xcbc   :  { %5804 = vadd.xlane.f32.xlu2 %v5803_v20 }
 0xcc4   :  { %5625 = vmin.xlane.f32.xlu2 %v5624_v43 }
 0xccb   :  { %v5789_v23 = vpop.xlane.xlu1 %5788 }
 0xccc   :  { %v5790_v26 = vmax.f32 %v5789_v23, 1e-24 }
 0xcce   :  { %6496 = vrsqrt.f32 %v5790_v26  ;;  %vm5797_vm5 = vweird.f32 %v5790_v26 }
 0xcd4   :  { %v6497_v12 = vpop.eup %6496 }
 0xcd5   :  { %v5792_v18 = vmul.f32 %v6497_v12, %v5790_v26  ;;  %vm5798_vm0 = vweird.f32 %v6497_v12 }
 0xcd6   :  { %vm5799_vm8 = vmor %vm5797_vm5, %vm5798_vm0 }
 0xcd7   :  { %v5793_v13 = vmul.f32 %v6497_v12, %v5792_v18 }
 0xcd9   :  { %v5794_v10 = vmul.f32 0.5, %v5793_v13 }
 0xcdb   :  { %v5795_v8 = vsub.f32 1.5, %v5794_v10 }
 0xcdd   :  { %v5796_v15 = vmul.f32 %v6497_v12, %v5795_v8 }
 0xcdf   :  { %v5800_v9 = vsel %vm5799_vm8, %v6497_v12, %v5796_v15 }
 0xce0   :  { %v5801_v53 = vmul.f32 %v5800_v9, %v11385_v19 }
 0xd2f   :  { %v5805_v37 = vpop.xlane.xlu2 %5804 }
 0xd30   :  { %v5806_v11 = vmax.f32 %v5805_v37, 1e-24 }
 0xd32   :  { %6498 = vrsqrt.f32 %v5806_v11  ;;  %vm5813_vm2 = vweird.f32 %v5806_v11 }
 0xd37   :  { %v5626_v58 = vpop.xlane.xlu2 %5625 }
 0xd38   :  { %v6499_v63 = vpop.eup %6498  ;;  %vm5627_vm15 = vcmp.eq.f32.partialorder %v5624_v43, %v5626_v58  ;;  %v5632_v55 = vcvt.f32.s32 %v5626_v58 }
 0xd39   :  { %v5808_v36 = vmul.f32 %v6499_v63, %v5806_v11  ;;  %v5628_v45 = vsel %vm5627_vm15, %v5623_v32, inf  ;;  %vm5814_vm6 = vweird.f32 %v6499_v63 }
 0xd3a   :  { %5629 = vmin.xlane.f32.xlu1 %v5628_v45  ;;  %vm5815_vm7 = vmor %vm5813_vm2, %vm5814_vm6  ;;  %v5633_v35 = vshll.u32 %v5632_v55, 16 }
 0xd3b   :  { %v5809_v6 = vmul.f32 %v6499_v63, %v5808_v36 }
 0xd3d   :  { %v5810_v50 = vmul.f32 0.5, %v5809_v6 }
 0xd3f   :  { %v5811_v60 = vsub.f32 1.5, %v5810_v50 }
 0xd41   :  { %v5812_v38 = vmul.f32 %v6499_v63, %v5811_v60 }
 0xd43   :  { %v5816_v4 = vsel %vm5815_vm7, %v6499_v63, %v5812_v38 }
 0xd44   :  { %v5817_v39 = vmul.f32 %v5816_v4, %v5785_v24 }
 0xd46   :  { %6445 = vmatpush.xpose.msk.msra.mxu2 %vm5209_vm3, %v5817_v39 }
 0xd49   :  { %6446 = vmatmul.msk.f32.vlgmr.msra.gmra.mxu2 %vm5209_vm3, %v5801_v53 }
 0xdad   :  { %v5630_v0 = vpop.xlane.xlu1 %5629 }
 0xdae   :  { %v5631_v44 = vcvt.f32.s32 %v5630_v0 }
 0xdb0   :  { %v5634_v48 = vadd.s32 %v5633_v35, %v5631_v44 }
 0xdb2   :  { %v5845_v33 = vcvt.s32.f32 %v5634_v48 }
 0xdcc   :  { %v5841_v17 = vpop.f32.mrf.mxu2 }
 0xdcd   :  { %v5844_v57 = vmul.f32 10.0, %v5841_v17 }
 0xdcf   :  { %v5846_v62 = vsel %vm5614_vm14, %v5844_v57, %v5845_v33 }
 0xdd0   :  { %v5848_v41 = vsel %vm5847_vm9, %v5846_v62, 0.0 }
 0xdd1   :  { %5850 = vst [vmem:[%s11419_s13] sm:$0xff] %v5848_v41 }

</bundles_post_ra>
